<compile_context>
chip_gen: v7x
topology: tpu7x:2x2x1
jax: 0.10.0
libtpu: 0.0.40
codegen_flags: <defaults>
</compile_context>

<pallas_src>
import functools

import jax
import jax.numpy as jnp
from jax import lax
from jax.experimental import pallas as pl
from jax.experimental.pallas import tpu as pltpu

CONV_CHANNELS = 64

_VMEM = pl.BlockSpec(memory_space=pltpu.MemorySpace.VMEM)


# ------------------------------ fused kernel ------------------------------- #

def _fused_forward_kernel(x_ref, mask_ref,
                          w1_ref, b1_ref, w2_ref, b2_ref,
                          w3_ref, b3_ref, w4_ref, b4_ref,
                          wh_ref, bh_ref, wac_ref, bac_ref, u_ref,
                          out_ref, buf_a, buf_b,
                          *, hp, cc, num_actions, margin):
    pp = hp * hp  # padded positions for this sample

    # Zero only the margin rows: the interior is fully overwritten each layer
    # and board-border rows are re-zeroed by the mask.  Done every grid step so
    # each TensorCore's private scratch is valid under megacore sharding.
    zpad = jnp.zeros((margin, cc), jnp.float32)
    for buf in (buf_a, buf_b):
        buf[pl.ds(0, margin), :] = zpad
        buf[pl.ds(margin + pp, margin), :] = zpad

    # Hoist the (pp,1)->(pp,cc) mask broadcast out of the 4 conv layers.
    maskb = jnp.broadcast_to(mask_ref[...], (pp, cc))

    def conv3x3_relu(in_ref, w_ref, b_ref, dst_ref):
        # SAME 3x3 / stride-1 conv: concatenate the 9 shifted row-slices along
        # the K axis and issue ONE bf16 MXU matmul with f32 accumulation.
        slices = []
        for kh in range(3):
            for kw in range(3):
                shift = (kh - 1) * hp + (kw - 1)
                slices.append(
                    in_ref[pl.ds(margin + shift, pp), :].astype(jnp.bfloat16))
        slab = jnp.concatenate(slices, axis=1)                 # (pp, 9*cin) bf16
        acc = jnp.dot(slab, w_ref[...], preferred_element_type=jnp.float32)
        # ReLU + re-zero the board border so it acts as SAME padding next layer.
        dst_ref[pl.ds(margin, pp), :] = jnp.maximum(acc + b_ref[...], 0.0) * maskb

    conv3x3_relu(x_ref, w1_ref, b1_ref, buf_a)
    conv3x3_relu(buf_a, w2_ref, b2_ref, buf_b)
    conv3x3_relu(buf_b, w3_ref, b3_ref, buf_a)
    conv3x3_relu(buf_a, w4_ref, b4_ref, buf_b)

    # Actor & critic 1x1 convs fused into one (cc, 2) bf16 matmul + ReLU.
    feat = buf_b[pl.ds(margin, pp), :].astype(jnp.bfloat16)    # (pp, cc)
    head = jnp.dot(feat, wh_ref[...],
                   preferred_element_type=jnp.float32) + bh_ref[...]
    head = jnp.maximum(head, 0.0)                              # (pp, 2)

    # Fused actor/critic Linear heads: flatten-order is pre-folded into the
    # position-scattered weights wac (pp, A+1) (zero on padding rows); one
    # elementwise multiply + per-sample reduction replaces both selector dots.
    lane = lax.broadcasted_iota(jnp.int32, (pp, num_actions + 1), 1)
    hsel = jnp.where(lane < num_actions, head[:, 0:1], head[:, 1:2])   # (pp, A+1)
    red = jnp.sum(hsel * wac_ref[...], axis=0, keepdims=True) + bac_ref[...]
    logits = red[:, 0:num_actions]                             # (1, A)
    value = jnp.tanh(red[:, num_actions:num_actions + 1])      # (1, 1)

    # Softmax / log-softmax (f32, numerically stable).
    mx = jnp.max(logits, axis=-1, keepdims=True)
    ex = jnp.exp(logits - mx)
    z = jnp.sum(ex, axis=-1, keepdims=True)
    probs = ex / z
    logp_all = (logits - mx) - jnp.log(z)

    # Categorical sample via inverse CDF; unrolled VPU prefix sums (A is tiny).
    # Counting only the first A-1 prefix values clamps the sample to A-1.
    u = u_ref[...]                                             # (1, 1)
    running = jnp.zeros((1, 1), jnp.float32)
    action_f = jnp.zeros((1, 1), jnp.float32)
    for a in range(num_actions - 1):
        running = running + probs[:, a:a + 1]
        action_f = action_f + (running < u).astype(jnp.float32)
    action_i = action_f.astype(jnp.int32)

    # log_prob(action) gathered from log-softmax (stable; never -inf).
    lane_a = lax.broadcasted_iota(jnp.int32, (1, num_actions), 1)
    logp = jnp.sum(jnp.where(lane_a == action_i, logp_all, 0.0),
                   axis=-1, keepdims=True)                     # (1, 1)

    # Pack [value | action | logp] into one lane-dense (1, 128) slab.
    lanes = lax.broadcasted_iota(jnp.int32, out_ref.shape, 1)
    out_ref[...] = (jnp.where(lanes == 0, value, 0.0)
                    + jnp.where(lanes == 1, action_f, 0.0)
                    + jnp.where(lanes == 2, logp, 0.0))


# -------------------------------- wrapper ----------------------------------- #

def make_forward(board_size, num_boards, num_actions, batch):
    hp = board_size + 2
    pp = hp * hp
    margin = ((hp + 1 + 7) // 8) * 8     # >= hp+1, sublane aligned
    rt = pp + 2 * margin
    cc = CONV_CHANNELS

    kernel = functools.partial(
        _fused_forward_kernel, hp=hp, cc=cc,
        num_actions=num_actions, margin=margin)

    grid_spec = pltpu.PrefetchScalarGridSpec(
        num_scalar_prefetch=0,
        grid=(batch,),
        in_specs=[
            pl.BlockSpec((None, rt, num_boards), lambda b: (b, 0, 0)),    # x
            _VMEM,                                                         # mask
            _VMEM, _VMEM, _VMEM, _VMEM, _VMEM, _VMEM, _VMEM, _VMEM,        # convs
            _VMEM, _VMEM, _VMEM, _VMEM,                                    # heads
            pl.BlockSpec((None, 1, 1), lambda b: (b, 0, 0)),               # u
        ],
        out_specs=pl.BlockSpec((None, 1, 128), lambda b: (b, 0, 0)),
        scratch_shapes=[pltpu.VMEM((rt, cc), jnp.float32),
                        pltpu.VMEM((rt, cc), jnp.float32)],
    )

    call = pl.pallas_call(
        kernel,
        out_shape=jax.ShapeDtypeStruct((batch, 1, 128), jnp.float32),
        grid_spec=grid_spec,
        compiler_params=pltpu.CompilerParams(
            dimension_semantics=("parallel",)),
    )

    def forward(packed, x_nchw, u):
        # NCHW -> per-sample padded-flat layout: rows = (padded_y, padded_x),
        # lanes = channels, with `margin` zero rows above/below each sample.
        x = jnp.transpose(x_nchw, (0, 2, 3, 1)).astype(jnp.float32)
        xp = jnp.pad(x, ((0, 0), (1, 1), (1, 1), (0, 0)))
        x_flat = jnp.pad(xp.reshape(batch, pp, num_boards),
                         ((0, 0), (margin, margin), (0, 0)))

        out = call(x_flat, packed["mask"],
                   packed["w1"], packed["b1"], packed["w2"], packed["b2"],
                   packed["w3"], packed["b3"], packed["w4"], packed["b4"],
                   packed["wh"], packed["bh"], packed["wac"], packed["bac"],
                   u.reshape(batch, 1, 1)).reshape(batch, 128)

        value = out[:, 0:1]
        action = out[:, 1].astype(jnp.int32)
        logp = out[:, 2]
        return value, action, logp

    return forward


# --------------------------- parameter handling ----------------------------- #

def init_params(key, board_size, num_boards, num_actions):
    cc = CONV_CHANNELS
    flat = board_size * board_size
    ks = jax.random.split(key, 16)

    def conv_w(k, cin, cout):      # rows grouped by tap (kh, kw): (9*cin, cout)
        return jax.random.normal(k, (9 * cin, cout), jnp.float32) * (2.0 / (9 * cin)) ** 0.5

    def lin_w(k, fan_in, fan_out, gain=1.0):
        return jax.random.normal(k, (fan_in, fan_out), jnp.float32) * (gain / fan_in) ** 0.5

    def bias(k, n):
        return jax.random.uniform(k, (1, n), jnp.float32, -0.05, 0.05)

    return dict(
        w1=conv_w(ks[0], num_boards, cc), b1=bias(ks[1], cc),
        w2=conv_w(ks[2], cc, cc),         b2=bias(ks[3], cc),
        w3=conv_w(ks[4], cc, cc),         b3=bias(ks[5], cc),
        w4=conv_w(ks[6], cc, cc),         b4=bias(ks[7], cc),
        w_actor_1x1=lin_w(ks[8], cc, 1, 2.0),   b_actor_1x1=bias(ks[9], 1),
        w_critic_1x1=lin_w(ks[10], cc, 1, 2.0), b_critic_1x1=bias(ks[11], 1),
        w_actor_lin=lin_w(ks[12], flat, num_actions), b_actor_lin=bias(ks[13], num_actions),
        w_critic_lin=lin_w(ks[14], flat, 1),          b_critic_lin=bias(ks[15], 1),
    )


def pack_for_kernel(params, board_size):
    """Fold all layout changes (flatten order, head fusion, bf16) into weights."""
    hp = board_size + 2
    pp = hp * hp

    pos = jnp.arange(pp)
    y, x = pos // hp, pos % hp
    interior = (y >= 1) & (y <= board_size) & (x >= 1) & (x <= board_size)
    inner_idx = jnp.where(interior, (y - 1) * board_size + (x - 1), 0)

    def scatter(w_lin):
        # (board*board, F) flatten-order weights -> (pp, F) padded-position layout.
        return jnp.where(interior[:, None], w_lin[inner_idx], 0.0)

    def bf(w):
        return w.astype(jnp.bfloat16)

    return dict(
        mask=interior.astype(jnp.float32)[:, None],                         # (pp, 1)
        w1=bf(params["w1"]), b1=params["b1"],
        w2=bf(params["w2"]), b2=params["b2"],
        w3=bf(params["w3"]), b3=params["b3"],
        w4=bf(params["w4"]), b4=params["b4"],
        wh=bf(jnp.concatenate([params["w_actor_1x1"],
                               params["w_critic_1x1"]], axis=1)),           # (cc, 2)
        bh=jnp.concatenate([params["b_actor_1x1"],
                            params["b_critic_1x1"]], axis=1),               # (1, 2)
        wac=jnp.concatenate([scatter(params["w_actor_lin"]),
                             scatter(params["w_critic_lin"])], axis=1),     # (pp, A+1)
        bac=jnp.concatenate([params["b_actor_lin"],
                             params["b_critic_lin"]], axis=1),              # (1, A+1)
    )


# ------------------------- plain-JAX reference check ------------------------ #

def reference_logits_value(params, x_nchw, num_boards):
    cc = CONV_CHANNELS
    hi = lax.Precision.HIGHEST
    h = jnp.transpose(x_nchw, (0, 2, 3, 1)).astype(jnp.float32)    # NHWC
    cins = [num_boards, cc, cc, cc]
    for i, cin in enumerate(cins, start=1):
        w = params[f"w{i}"].reshape(3, 3, cin, cc)                 # HWIO
        h = lax.conv_general_dilated(h, w, (1, 1), "SAME",
                                     dimension_numbers=("NHWC", "HWIO", "NHWC"),
                                     precision=hi)
        h = jnp.maximum(h + params[f"b{i}"].reshape(1, 1, 1, cc), 0.0)
    a = jnp.maximum(jnp.einsum("nhwc,cf->nhwf", h, params["w_actor_1x1"],
                               precision=hi) + params["b_actor_1x1"], 0.0)
    c = jnp.maximum(jnp.einsum("nhwc,cf->nhwf", h, params["w_critic_1x1"],
                               precision=hi) + params["b_critic_1x1"], 0.0)
    n = x_nchw.shape[0]
    logits = jnp.dot(a.reshape(n, -1), params["w_actor_lin"],
                     precision=hi) + params["b_actor_lin"]
    value = jnp.tanh(jnp.dot(c.reshape(n, -1), params["w_critic_lin"],
                             precision=hi) + params["b_critic_lin"])
    return logits, value


# ---------------------------------- main ------------------------------------ #

if __name__ == "__main__":
    board_size, num_boards, num_actions, batch = 11, 4, 6, 2

    key = jax.random.PRNGKey(0)
    k_x, k_u, k_p = jax.random.split(key, 3)

    x = jax.random.normal(k_x, (batch, num_boards, board_size, board_size), jnp.float32)
    # TODO(synk): torch.distributions.Categorical.sample() uses PyTorch's RNG
    # stream; here the uniform draw is supplied externally and inverted in-kernel.
    u = jax.random.uniform(k_u, (batch, 1), jnp.float32)

    params = init_params(k_p, board_size, num_boards, num_actions)
    packed = pack_for_kernel(params, board_size)

    fwd = jax.jit(make_forward(board_size, num_boards, num_actions, batch))
    value, action, logp = fwd(packed, x, u)
    jax.block_until_ready((value, action, logp))

    # shape / range checks (match the PyTorch module's outputs)
    assert value.shape == (batch, 1) and value.dtype == jnp.float32
    assert action.shape == (batch,) and action.dtype == jnp.int32
    assert logp.shape == (batch,) and logp.dtype == jnp.float32
    assert bool(jnp.all(action >= 0)) and bool(jnp.all(action < num_actions))
    assert bool(jnp.all(logp <= 0.0)) and bool(jnp.all(jnp.abs(value) <= 1.0))

    # numeric cross-check against a plain-JAX/XLA reference of the same module
    # (loose tolerance: kernel uses bf16 MXU inputs with f32 accumulation)
    ref_logits, ref_value = reference_logits_value(params, x, num_boards)
    ref_logp_at = jax.nn.log_softmax(ref_logits, axis=-1)[jnp.arange(batch), action]
    assert float(jnp.max(jnp.abs(value - ref_value))) < 0.1
    assert float(jnp.max(jnp.abs(logp - ref_logp_at))) < 0.1

    print("KERNEL_OK")
</pallas_src>

<mosaic_0001>
module attributes {stable_mosaic.version = 11 : i64} {
  func.func @_fused_forward_kernel(%arg0: i32, %arg1: memref<1x201x4xf32, #tpu.memory_space<vmem>>, %arg2: memref<169x1xf32, #tpu.memory_space<vmem>>, %arg3: memref<36x64xbf16, #tpu.memory_space<vmem>>, %arg4: memref<1x64xf32, #tpu.memory_space<vmem>>, %arg5: memref<576x64xbf16, #tpu.memory_space<vmem>>, %arg6: memref<1x64xf32, #tpu.memory_space<vmem>>, %arg7: memref<576x64xbf16, #tpu.memory_space<vmem>>, %arg8: memref<1x64xf32, #tpu.memory_space<vmem>>, %arg9: memref<576x64xbf16, #tpu.memory_space<vmem>>, %arg10: memref<1x64xf32, #tpu.memory_space<vmem>>, %arg11: memref<64x2xbf16, #tpu.memory_space<vmem>>, %arg12: memref<1x2xf32, #tpu.memory_space<vmem>>, %arg13: memref<169x7xf32, #tpu.memory_space<vmem>>, %arg14: memref<1x7xf32, #tpu.memory_space<vmem>>, %arg15: memref<1x1x1xf32, #tpu.memory_space<vmem>>, %arg16: memref<1x1x128xf32, #tpu.memory_space<vmem>>, %arg17: memref<201x64xf32, #tpu.memory_space<vmem>>, %arg18: memref<201x64xf32, #tpu.memory_space<vmem>>) attributes {dimension_semantics = [#tpu.dimension_semantics<parallel>], iteration_bounds = array<i64: 2>, scalar_prefetch = 0 : i64, scratch_operands = 2 : i64, tpu.core_type = #tpu.core_type<tc>, window_params = [{transform_indices = @transform_0, window_bounds = array<i64: 1, 201, 4>}, {pipeline_mode = #tpu.pipeline_mode<synchronous>, transform_indices = @transform_1, window_bounds = array<i64: 169, 1>}, {pipeline_mode = #tpu.pipeline_mode<synchronous>, transform_indices = @transform_2, window_bounds = array<i64: 36, 64>}, {pipeline_mode = #tpu.pipeline_mode<synchronous>, transform_indices = @transform_3, window_bounds = array<i64: 1, 64>}, {pipeline_mode = #tpu.pipeline_mode<synchronous>, transform_indices = @transform_4, window_bounds = array<i64: 576, 64>}, {pipeline_mode = #tpu.pipeline_mode<synchronous>, transform_indices = @transform_5, window_bounds = array<i64: 1, 64>}, {pipeline_mode = #tpu.pipeline_mode<synchronous>, transform_indices = @transform_6, window_bounds = array<i64: 576, 64>}, {pipeline_mode = #tpu.pipeline_mode<synchronous>, transform_indices = @transform_7, window_bounds = array<i64: 1, 64>}, {pipeline_mode = #tpu.pipeline_mode<synchronous>, transform_indices = @transform_8, window_bounds = array<i64: 576, 64>}, {pipeline_mode = #tpu.pipeline_mode<synchronous>, transform_indices = @transform_9, window_bounds = array<i64: 1, 64>}, {pipeline_mode = #tpu.pipeline_mode<synchronous>, transform_indices = @transform_10, window_bounds = array<i64: 64, 2>}, {pipeline_mode = #tpu.pipeline_mode<synchronous>, transform_indices = @transform_11, window_bounds = array<i64: 1, 2>}, {pipeline_mode = #tpu.pipeline_mode<synchronous>, transform_indices = @transform_12, window_bounds = array<i64: 169, 7>}, {pipeline_mode = #tpu.pipeline_mode<synchronous>, transform_indices = @transform_13, window_bounds = array<i64: 1, 7>}, {transform_indices = @transform_14, window_bounds = array<i64: 1, 1, 1>}, {transform_indices = @transform_15, window_bounds = array<i64: 1, 1, 128>}]} {
    %cst = arith.constant 0.000000e+00 : f32
    %0 = vector.broadcast %cst : f32 to vector<16x64xf32>
    %c0 = arith.constant 0 : index
    %c0_0 = arith.constant 0 : index
    %1 = vector.load %arg17[%c0, %c0_0] : memref<201x64xf32, #tpu.memory_space<vmem>>, vector<16x64xf32>
    tpu.vector_store %arg17[%c0, %c0_0], %0 {strides = array<i32>} : memref<201x64xf32, #tpu.memory_space<vmem>>, vector<16x64xf32>,
    %c185 = arith.constant 185 : index
    %c0_1 = arith.constant 0 : index
    %2 = vector.load %arg17[%c185, %c0_1] : memref<201x64xf32, #tpu.memory_space<vmem>>, vector<16x64xf32>
    tpu.vector_store %arg17[%c185, %c0_1], %0 {strides = array<i32>} : memref<201x64xf32, #tpu.memory_space<vmem>>, vector<16x64xf32>,
    %c0_2 = arith.constant 0 : index
    %c0_3 = arith.constant 0 : index
    %3 = vector.load %arg18[%c0_2, %c0_3] : memref<201x64xf32, #tpu.memory_space<vmem>>, vector<16x64xf32>
    tpu.vector_store %arg18[%c0_2, %c0_3], %0 {strides = array<i32>} : memref<201x64xf32, #tpu.memory_space<vmem>>, vector<16x64xf32>,
    %c185_4 = arith.constant 185 : index
    %c0_5 = arith.constant 0 : index
    %4 = vector.load %arg18[%c185_4, %c0_5] : memref<201x64xf32, #tpu.memory_space<vmem>>, vector<16x64xf32>
    tpu.vector_store %arg18[%c185_4, %c0_5], %0 {strides = array<i32>} : memref<201x64xf32, #tpu.memory_space<vmem>>, vector<16x64xf32>,
    %c0_6 = arith.constant 0 : index
    %c0_7 = arith.constant 0 : index
    %5 = vector.load %arg2[%c0_6, %c0_7] : memref<169x1xf32, #tpu.memory_space<vmem>>, vector<169x1xf32>
    %6 = vector.shape_cast %5 : vector<169x1xf32> to vector<169x1xf32>
    %7 = vector.broadcast %6 : vector<169x1xf32> to vector<169x64xf32>
    %c0_8 = arith.constant 0 : index
    %c2 = arith.constant 2 : index
    %c0_9 = arith.constant 0 : index
    %8 = vector.load %arg1[%c0_8, %c2, %c0_9] : memref<1x201x4xf32, #tpu.memory_space<vmem>>, vector<1x169x4xf32>
    %9 = vector.shape_cast %8 : vector<1x169x4xf32> to vector<169x4xf32>
    %10 = arith.truncf %9 : vector<169x4xf32> to vector<169x4xbf16>
    %c0_10 = arith.constant 0 : index
    %c3 = arith.constant 3 : index
    %c0_11 = arith.constant 0 : index
    %11 = vector.load %arg1[%c0_10, %c3, %c0_11] : memref<1x201x4xf32, #tpu.memory_space<vmem>>, vector<1x169x4xf32>
    %12 = vector.shape_cast %11 : vector<1x169x4xf32> to vector<169x4xf32>
    %13 = arith.truncf %12 : vector<169x4xf32> to vector<169x4xbf16>
    %c0_12 = arith.constant 0 : index
    %c4 = arith.constant 4 : index
    %c0_13 = arith.constant 0 : index
    %14 = vector.load %arg1[%c0_12, %c4, %c0_13] : memref<1x201x4xf32, #tpu.memory_space<vmem>>, vector<1x169x4xf32>
    %15 = vector.shape_cast %14 : vector<1x169x4xf32> to vector<169x4xf32>
    %16 = arith.truncf %15 : vector<169x4xf32> to vector<169x4xbf16>
    %c0_14 = arith.constant 0 : index
    %c15 = arith.constant 15 : index
    %c0_15 = arith.constant 0 : index
    %17 = vector.load %arg1[%c0_14, %c15, %c0_15] : memref<1x201x4xf32, #tpu.memory_space<vmem>>, vector<1x169x4xf32>
    %18 = vector.shape_cast %17 : vector<1x169x4xf32> to vector<169x4xf32>
    %19 = arith.truncf %18 : vector<169x4xf32> to vector<169x4xbf16>
    %c0_16 = arith.constant 0 : index
    %c16 = arith.constant 16 : index
    %c0_17 = arith.constant 0 : index
    %20 = vector.load %arg1[%c0_16, %c16, %c0_17] : memref<1x201x4xf32, #tpu.memory_space<vmem>>, vector<1x169x4xf32>
    %21 = vector.shape_cast %20 : vector<1x169x4xf32> to vector<169x4xf32>
    %22 = arith.truncf %21 : vector<169x4xf32> to vector<169x4xbf16>
    %c0_18 = arith.constant 0 : index
    %c17 = arith.constant 17 : index
    %c0_19 = arith.constant 0 : index
    %23 = vector.load %arg1[%c0_18, %c17, %c0_19] : memref<1x201x4xf32, #tpu.memory_space<vmem>>, vector<1x169x4xf32>
    %24 = vector.shape_cast %23 : vector<1x169x4xf32> to vector<169x4xf32>
    %25 = arith.truncf %24 : vector<169x4xf32> to vector<169x4xbf16>
    %c0_20 = arith.constant 0 : index
    %c28 = arith.constant 28 : index
    %c0_21 = arith.constant 0 : index
    %26 = vector.load %arg1[%c0_20, %c28, %c0_21] : memref<1x201x4xf32, #tpu.memory_space<vmem>>, vector<1x169x4xf32>
    %27 = vector.shape_cast %26 : vector<1x169x4xf32> to vector<169x4xf32>
    %28 = arith.truncf %27 : vector<169x4xf32> to vector<169x4xbf16>
    %c0_22 = arith.constant 0 : index
    %c29 = arith.constant 29 : index
    %c0_23 = arith.constant 0 : index
    %29 = vector.load %arg1[%c0_22, %c29, %c0_23] : memref<1x201x4xf32, #tpu.memory_space<vmem>>, vector<1x169x4xf32>
    %30 = vector.shape_cast %29 : vector<1x169x4xf32> to vector<169x4xf32>
    %31 = arith.truncf %30 : vector<169x4xf32> to vector<169x4xbf16>
    %c0_24 = arith.constant 0 : index
    %c30 = arith.constant 30 : index
    %c0_25 = arith.constant 0 : index
    %32 = vector.load %arg1[%c0_24, %c30, %c0_25] : memref<1x201x4xf32, #tpu.memory_space<vmem>>, vector<1x169x4xf32>
    %33 = vector.shape_cast %32 : vector<1x169x4xf32> to vector<169x4xf32>
    %34 = arith.truncf %33 : vector<169x4xf32> to vector<169x4xbf16>
    %35 = tpu.concatenate %10, %13, %16, %19, %22, %25, %28, %31, %34 in 1 : vector<169x4xbf16>, vector<169x4xbf16>, vector<169x4xbf16>, vector<169x4xbf16>, vector<169x4xbf16>, vector<169x4xbf16>, vector<169x4xbf16>, vector<169x4xbf16>, vector<169x4xbf16> -> vector<169x36xbf16>
    %c0_26 = arith.constant 0 : index
    %c0_27 = arith.constant 0 : index
    %36 = vector.load %arg3[%c0_26, %c0_27] : memref<36x64xbf16, #tpu.memory_space<vmem>>, vector<36x64xbf16>
    %cst_28 = arith.constant dense<0.000000e+00> : vector<169x64xf32>
    %37 = tpu.matmul %35, %36, %cst_28 {dimension_numbers = #tpu.dot_dimension_numbers<[1], [0], [0], [1], [0, 0, 1, 1], [], []>} : vector<169x36xbf16>, vector<36x64xbf16>, vector<169x64xf32> -> vector<169x64xf32>
    %c0_29 = arith.constant 0 : index
    %c0_30 = arith.constant 0 : index
    %38 = vector.load %arg4[%c0_29, %c0_30] : memref<1x64xf32, #tpu.memory_space<vmem>>, vector<1x64xf32>
    %39 = vector.broadcast %38 : vector<1x64xf32> to vector<169x64xf32>
    %40 = arith.addf %37, %39 : vector<169x64xf32>
    %cst_31 = arith.constant 0.000000e+00 : f32
    %41 = vector.broadcast %cst_31 : f32 to vector<169x64xf32>
    %42 = arith.maximumf %40, %41 : vector<169x64xf32>
    %43 = arith.mulf %42, %7 : vector<169x64xf32>
    %c16_32 = arith.constant 16 : index
    %c0_33 = arith.constant 0 : index
    %44 = vector.load %arg17[%c16_32, %c0_33] : memref<201x64xf32, #tpu.memory_space<vmem>>, vector<169x64xf32>
    tpu.vector_store %arg17[%c16_32, %c0_33], %43 {strides = array<i32>} : memref<201x64xf32, #tpu.memory_space<vmem>>, vector<169x64xf32>,
    %c2_34 = arith.constant 2 : index
    %c0_35 = arith.constant 0 : index
    %45 = vector.load %arg17[%c2_34, %c0_35] : memref<201x64xf32, #tpu.memory_space<vmem>>, vector<169x64xf32>
    %46 = arith.truncf %45 : vector<169x64xf32> to vector<169x64xbf16>
    %c3_36 = arith.constant 3 : index
    %c0_37 = arith.constant 0 : index
    %47 = vector.load %arg17[%c3_36, %c0_37] : memref<201x64xf32, #tpu.memory_space<vmem>>, vector<169x64xf32>
    %48 = arith.truncf %47 : vector<169x64xf32> to vector<169x64xbf16>
    %c4_38 = arith.constant 4 : index
    %c0_39 = arith.constant 0 : index
    %49 = vector.load %arg17[%c4_38, %c0_39] : memref<201x64xf32, #tpu.memory_space<vmem>>, vector<169x64xf32>
    %50 = arith.truncf %49 : vector<169x64xf32> to vector<169x64xbf16>
    %c15_40 = arith.constant 15 : index
    %c0_41 = arith.constant 0 : index
    %51 = vector.load %arg17[%c15_40, %c0_41] : memref<201x64xf32, #tpu.memory_space<vmem>>, vector<169x64xf32>
    %52 = arith.truncf %51 : vector<169x64xf32> to vector<169x64xbf16>
    %c16_42 = arith.constant 16 : index
    %c0_43 = arith.constant 0 : index
    %53 = vector.load %arg17[%c16_42, %c0_43] : memref<201x64xf32, #tpu.memory_space<vmem>>, vector<169x64xf32>
    %54 = arith.truncf %53 : vector<169x64xf32> to vector<169x64xbf16>
    %c17_44 = arith.constant 17 : index
    %c0_45 = arith.constant 0 : index
    %55 = vector.load %arg17[%c17_44, %c0_45] : memref<201x64xf32, #tpu.memory_space<vmem>>, vector<169x64xf32>
    %56 = arith.truncf %55 : vector<169x64xf32> to vector<169x64xbf16>
    %c28_46 = arith.constant 28 : index
    %c0_47 = arith.constant 0 : index
    %57 = vector.load %arg17[%c28_46, %c0_47] : memref<201x64xf32, #tpu.memory_space<vmem>>, vector<169x64xf32>
    %58 = arith.truncf %57 : vector<169x64xf32> to vector<169x64xbf16>
    %c29_48 = arith.constant 29 : index
    %c0_49 = arith.constant 0 : index
    %59 = vector.load %arg17[%c29_48, %c0_49] : memref<201x64xf32, #tpu.memory_space<vmem>>, vector<169x64xf32>
    %60 = arith.truncf %59 : vector<169x64xf32> to vector<169x64xbf16>
    %c30_50 = arith.constant 30 : index
    %c0_51 = arith.constant 0 : index
    %61 = vector.load %arg17[%c30_50, %c0_51] : memref<201x64xf32, #tpu.memory_space<vmem>>, vector<169x64xf32>
    %62 = arith.truncf %61 : vector<169x64xf32> to vector<169x64xbf16>
    %63 = tpu.concatenate %46, %48, %50, %52, %54, %56, %58, %60, %62 in 1 : vector<169x64xbf16>, vector<169x64xbf16>, vector<169x64xbf16>, vector<169x64xbf16>, vector<169x64xbf16>, vector<169x64xbf16>, vector<169x64xbf16>, vector<169x64xbf16>, vector<169x64xbf16> -> vector<169x576xbf16>
    %c0_52 = arith.constant 0 : index
    %c0_53 = arith.constant 0 : index
    %64 = vector.load %arg5[%c0_52, %c0_53] : memref<576x64xbf16, #tpu.memory_space<vmem>>, vector<576x64xbf16>
    %cst_54 = arith.constant dense<0.000000e+00> : vector<169x64xf32>
    %65 = tpu.matmul %63, %64, %cst_54 {dimension_numbers = #tpu.dot_dimension_numbers<[1], [0], [0], [1], [0, 0, 1, 1], [], []>} : vector<169x576xbf16>, vector<576x64xbf16>, vector<169x64xf32> -> vector<169x64xf32>
    %c0_55 = arith.constant 0 : index
    %c0_56 = arith.constant 0 : index
    %66 = vector.load %arg6[%c0_55, %c0_56] : memref<1x64xf32, #tpu.memory_space<vmem>>, vector<1x64xf32>
    %67 = vector.broadcast %66 : vector<1x64xf32> to vector<169x64xf32>
    %68 = arith.addf %65, %67 : vector<169x64xf32>
    %cst_57 = arith.constant 0.000000e+00 : f32
    %69 = vector.broadcast %cst_57 : f32 to vector<169x64xf32>
    %70 = arith.maximumf %68, %69 : vector<169x64xf32>
    %71 = arith.mulf %70, %7 : vector<169x64xf32>
    %c16_58 = arith.constant 16 : index
    %c0_59 = arith.constant 0 : index
    %72 = vector.load %arg18[%c16_58, %c0_59] : memref<201x64xf32, #tpu.memory_space<vmem>>, vector<169x64xf32>
    tpu.vector_store %arg18[%c16_58, %c0_59], %71 {strides = array<i32>} : memref<201x64xf32, #tpu.memory_space<vmem>>, vector<169x64xf32>,
    %c2_60 = arith.constant 2 : index
    %c0_61 = arith.constant 0 : index
    %73 = vector.load %arg18[%c2_60, %c0_61] : memref<201x64xf32, #tpu.memory_space<vmem>>, vector<169x64xf32>
    %74 = arith.truncf %73 : vector<169x64xf32> to vector<169x64xbf16>
    %c3_62 = arith.constant 3 : index
    %c0_63 = arith.constant 0 : index
    %75 = vector.load %arg18[%c3_62, %c0_63] : memref<201x64xf32, #tpu.memory_space<vmem>>, vector<169x64xf32>
    %76 = arith.truncf %75 : vector<169x64xf32> to vector<169x64xbf16>
    %c4_64 = arith.constant 4 : index
    %c0_65 = arith.constant 0 : index
    %77 = vector.load %arg18[%c4_64, %c0_65] : memref<201x64xf32, #tpu.memory_space<vmem>>, vector<169x64xf32>
    %78 = arith.truncf %77 : vector<169x64xf32> to vector<169x64xbf16>
    %c15_66 = arith.constant 15 : index
    %c0_67 = arith.constant 0 : index
    %79 = vector.load %arg18[%c15_66, %c0_67] : memref<201x64xf32, #tpu.memory_space<vmem>>, vector<169x64xf32>
    %80 = arith.truncf %79 : vector<169x64xf32> to vector<169x64xbf16>
    %c16_68 = arith.constant 16 : index
    %c0_69 = arith.constant 0 : index
    %81 = vector.load %arg18[%c16_68, %c0_69] : memref<201x64xf32, #tpu.memory_space<vmem>>, vector<169x64xf32>
    %82 = arith.truncf %81 : vector<169x64xf32> to vector<169x64xbf16>
    %c17_70 = arith.constant 17 : index
    %c0_71 = arith.constant 0 : index
    %83 = vector.load %arg18[%c17_70, %c0_71] : memref<201x64xf32, #tpu.memory_space<vmem>>, vector<169x64xf32>
    %84 = arith.truncf %83 : vector<169x64xf32> to vector<169x64xbf16>
    %c28_72 = arith.constant 28 : index
    %c0_73 = arith.constant 0 : index
    %85 = vector.load %arg18[%c28_72, %c0_73] : memref<201x64xf32, #tpu.memory_space<vmem>>, vector<169x64xf32>
    %86 = arith.truncf %85 : vector<169x64xf32> to vector<169x64xbf16>
    %c29_74 = arith.constant 29 : index
    %c0_75 = arith.constant 0 : index
    %87 = vector.load %arg18[%c29_74, %c0_75] : memref<201x64xf32, #tpu.memory_space<vmem>>, vector<169x64xf32>
    %88 = arith.truncf %87 : vector<169x64xf32> to vector<169x64xbf16>
    %c30_76 = arith.constant 30 : index
    %c0_77 = arith.constant 0 : index
    %89 = vector.load %arg18[%c30_76, %c0_77] : memref<201x64xf32, #tpu.memory_space<vmem>>, vector<169x64xf32>
    %90 = arith.truncf %89 : vector<169x64xf32> to vector<169x64xbf16>
    %91 = tpu.concatenate %74, %76, %78, %80, %82, %84, %86, %88, %90 in 1 : vector<169x64xbf16>, vector<169x64xbf16>, vector<169x64xbf16>, vector<169x64xbf16>, vector<169x64xbf16>, vector<169x64xbf16>, vector<169x64xbf16>, vector<169x64xbf16>, vector<169x64xbf16> -> vector<169x576xbf16>
    %c0_78 = arith.constant 0 : index
    %c0_79 = arith.constant 0 : index
    %92 = vector.load %arg7[%c0_78, %c0_79] : memref<576x64xbf16, #tpu.memory_space<vmem>>, vector<576x64xbf16>
    %cst_80 = arith.constant dense<0.000000e+00> : vector<169x64xf32>
    %93 = tpu.matmul %91, %92, %cst_80 {dimension_numbers = #tpu.dot_dimension_numbers<[1], [0], [0], [1], [0, 0, 1, 1], [], []>} : vector<169x576xbf16>, vector<576x64xbf16>, vector<169x64xf32> -> vector<169x64xf32>
    %c0_81 = arith.constant 0 : index
    %c0_82 = arith.constant 0 : index
    %94 = vector.load %arg8[%c0_81, %c0_82] : memref<1x64xf32, #tpu.memory_space<vmem>>, vector<1x64xf32>
    %95 = vector.broadcast %94 : vector<1x64xf32> to vector<169x64xf32>
    %96 = arith.addf %93, %95 : vector<169x64xf32>
    %cst_83 = arith.constant 0.000000e+00 : f32
    %97 = vector.broadcast %cst_83 : f32 to vector<169x64xf32>
    %98 = arith.maximumf %96, %97 : vector<169x64xf32>
    %99 = arith.mulf %98, %7 : vector<169x64xf32>
    %c16_84 = arith.constant 16 : index
    %c0_85 = arith.constant 0 : index
    %100 = vector.load %arg17[%c16_84, %c0_85] : memref<201x64xf32, #tpu.memory_space<vmem>>, vector<169x64xf32>
    tpu.vector_store %arg17[%c16_84, %c0_85], %99 {strides = array<i32>} : memref<201x64xf32, #tpu.memory_space<vmem>>, vector<169x64xf32>,
    %c2_86 = arith.constant 2 : index
    %c0_87 = arith.constant 0 : index
    %101 = vector.load %arg17[%c2_86, %c0_87] : memref<201x64xf32, #tpu.memory_space<vmem>>, vector<169x64xf32>
    %102 = arith.truncf %101 : vector<169x64xf32> to vector<169x64xbf16>
    %c3_88 = arith.constant 3 : index
    %c0_89 = arith.constant 0 : index
    %103 = vector.load %arg17[%c3_88, %c0_89] : memref<201x64xf32, #tpu.memory_space<vmem>>, vector<169x64xf32>
    %104 = arith.truncf %103 : vector<169x64xf32> to vector<169x64xbf16>
    %c4_90 = arith.constant 4 : index
    %c0_91 = arith.constant 0 : index
    %105 = vector.load %arg17[%c4_90, %c0_91] : memref<201x64xf32, #tpu.memory_space<vmem>>, vector<169x64xf32>
    %106 = arith.truncf %105 : vector<169x64xf32> to vector<169x64xbf16>
    %c15_92 = arith.constant 15 : index
    %c0_93 = arith.constant 0 : index
    %107 = vector.load %arg17[%c15_92, %c0_93] : memref<201x64xf32, #tpu.memory_space<vmem>>, vector<169x64xf32>
    %108 = arith.truncf %107 : vector<169x64xf32> to vector<169x64xbf16>
    %c16_94 = arith.constant 16 : index
    %c0_95 = arith.constant 0 : index
    %109 = vector.load %arg17[%c16_94, %c0_95] : memref<201x64xf32, #tpu.memory_space<vmem>>, vector<169x64xf32>
    %110 = arith.truncf %109 : vector<169x64xf32> to vector<169x64xbf16>
    %c17_96 = arith.constant 17 : index
    %c0_97 = arith.constant 0 : index
    %111 = vector.load %arg17[%c17_96, %c0_97] : memref<201x64xf32, #tpu.memory_space<vmem>>, vector<169x64xf32>
    %112 = arith.truncf %111 : vector<169x64xf32> to vector<169x64xbf16>
    %c28_98 = arith.constant 28 : index
    %c0_99 = arith.constant 0 : index
    %113 = vector.load %arg17[%c28_98, %c0_99] : memref<201x64xf32, #tpu.memory_space<vmem>>, vector<169x64xf32>
    %114 = arith.truncf %113 : vector<169x64xf32> to vector<169x64xbf16>
    %c29_100 = arith.constant 29 : index
    %c0_101 = arith.constant 0 : index
    %115 = vector.load %arg17[%c29_100, %c0_101] : memref<201x64xf32, #tpu.memory_space<vmem>>, vector<169x64xf32>
    %116 = arith.truncf %115 : vector<169x64xf32> to vector<169x64xbf16>
    %c30_102 = arith.constant 30 : index
    %c0_103 = arith.constant 0 : index
    %117 = vector.load %arg17[%c30_102, %c0_103] : memref<201x64xf32, #tpu.memory_space<vmem>>, vector<169x64xf32>
    %118 = arith.truncf %117 : vector<169x64xf32> to vector<169x64xbf16>
    %119 = tpu.concatenate %102, %104, %106, %108, %110, %112, %114, %116, %118 in 1 : vector<169x64xbf16>, vector<169x64xbf16>, vector<169x64xbf16>, vector<169x64xbf16>, vector<169x64xbf16>, vector<169x64xbf16>, vector<169x64xbf16>, vector<169x64xbf16>, vector<169x64xbf16> -> vector<169x576xbf16>
    %c0_104 = arith.constant 0 : index
    %c0_105 = arith.constant 0 : index
    %120 = vector.load %arg9[%c0_104, %c0_105] : memref<576x64xbf16, #tpu.memory_space<vmem>>, vector<576x64xbf16>
    %cst_106 = arith.constant dense<0.000000e+00> : vector<169x64xf32>
    %121 = tpu.matmul %119, %120, %cst_106 {dimension_numbers = #tpu.dot_dimension_numbers<[1], [0], [0], [1], [0, 0, 1, 1], [], []>} : vector<169x576xbf16>, vector<576x64xbf16>, vector<169x64xf32> -> vector<169x64xf32>
    %c0_107 = arith.constant 0 : index
    %c0_108 = arith.constant 0 : index
    %122 = vector.load %arg10[%c0_107, %c0_108] : memref<1x64xf32, #tpu.memory_space<vmem>>, vector<1x64xf32>
    %123 = vector.broadcast %122 : vector<1x64xf32> to vector<169x64xf32>
    %124 = arith.addf %121, %123 : vector<169x64xf32>
    %cst_109 = arith.constant 0.000000e+00 : f32
    %125 = vector.broadcast %cst_109 : f32 to vector<169x64xf32>
    %126 = arith.maximumf %124, %125 : vector<169x64xf32>
    %127 = arith.mulf %126, %7 : vector<169x64xf32>
    %c16_110 = arith.constant 16 : index
    %c0_111 = arith.constant 0 : index
    %128 = vector.load %arg18[%c16_110, %c0_111] : memref<201x64xf32, #tpu.memory_space<vmem>>, vector<169x64xf32>
    tpu.vector_store %arg18[%c16_110, %c0_111], %127 {strides = array<i32>} : memref<201x64xf32, #tpu.memory_space<vmem>>, vector<169x64xf32>,
    %c16_112 = arith.constant 16 : index
    %c0_113 = arith.constant 0 : index
    %129 = vector.load %arg18[%c16_112, %c0_113] : memref<201x64xf32, #tpu.memory_space<vmem>>, vector<169x64xf32>
    %130 = arith.truncf %129 : vector<169x64xf32> to vector<169x64xbf16>
    %c0_114 = arith.constant 0 : index
    %c0_115 = arith.constant 0 : index
    %131 = vector.load %arg11[%c0_114, %c0_115] : memref<64x2xbf16, #tpu.memory_space<vmem>>, vector<64x2xbf16>
    %cst_116 = arith.constant dense<0.000000e+00> : vector<169x2xf32>
    %132 = tpu.matmul %130, %131, %cst_116 {dimension_numbers = #tpu.dot_dimension_numbers<[1], [0], [0], [1], [0, 0, 1, 1], [], []>} : vector<169x64xbf16>, vector<64x2xbf16>, vector<169x2xf32> -> vector<169x2xf32>
    %c0_117 = arith.constant 0 : index
    %c0_118 = arith.constant 0 : index
    %133 = vector.load %arg12[%c0_117, %c0_118] : memref<1x2xf32, #tpu.memory_space<vmem>>, vector<1x2xf32>
    %134 = vector.broadcast %133 : vector<1x2xf32> to vector<169x2xf32>
    %135 = arith.addf %132, %134 : vector<169x2xf32>
    %cst_119 = arith.constant 0.000000e+00 : f32
    %136 = vector.broadcast %cst_119 : f32 to vector<169x2xf32>
    %137 = arith.maximumf %135, %136 : vector<169x2xf32>
    %138 = tpu.iota {dimensions = array<i32: 1>} : vector<169x7xi32>
    %c6_i32 = arith.constant 6 : i32
    %139 = vector.broadcast %c6_i32 : i32 to vector<169x7xi32>
    %140 = arith.cmpi slt, %138, %139 : vector<169x7xi32>
    %141 = vector.extract_strided_slice %137 {offsets = [0, 0], sizes = [169, 1], strides = [1, 1]} : vector<169x2xf32> to vector<169x1xf32>
    %142 = vector.extract_strided_slice %137 {offsets = [0, 1], sizes = [169, 1], strides = [1, 1]} : vector<169x2xf32> to vector<169x1xf32>
    %143 = vector.shape_cast %141 : vector<169x1xf32> to vector<169x1xf32>
    %144 = vector.broadcast %143 : vector<169x1xf32> to vector<169x7xf32>
    %145 = vector.shape_cast %142 : vector<169x1xf32> to vector<169x1xf32>
    %146 = vector.broadcast %145 : vector<169x1xf32> to vector<169x7xf32>
    %147 = arith.select %140, %144, %146 : vector<169x7xi1>, vector<169x7xf32>
    %c0_120 = arith.constant 0 : index
    %c0_121 = arith.constant 0 : index
    %148 = vector.load %arg13[%c0_120, %c0_121] : memref<169x7xf32, #tpu.memory_space<vmem>>, vector<169x7xf32>
    %149 = arith.mulf %147, %148 : vector<169x7xf32>
    %cst_122 = arith.constant dense<0.000000e+00> : vector<7xf32>
    %150 = vector.multi_reduction <add>, %149, %cst_122 [0] : vector<169x7xf32> to vector<7xf32>
    %151 = vector.shape_cast %150 : vector<7xf32> to vector<1x7xf32>
    %c0_123 = arith.constant 0 : index
    %c0_124 = arith.constant 0 : index
    %152 = vector.load %arg14[%c0_123, %c0_124] : memref<1x7xf32, #tpu.memory_space<vmem>>, vector<1x7xf32>
    %153 = arith.addf %151, %152 : vector<1x7xf32>
    %154 = vector.extract_strided_slice %153 {offsets = [0, 0], sizes = [1, 6], strides = [1, 1]} : vector<1x7xf32> to vector<1x6xf32>
    %155 = vector.extract_strided_slice %153 {offsets = [0, 6], sizes = [1, 1], strides = [1, 1]} : vector<1x7xf32> to vector<1x1xf32>
    %156 = math.tanh %155 : vector<1x1xf32>
    %cst_125 = arith.constant dense<0xFF800000> : vector<1xf32>
    %157 = vector.multi_reduction <maximumf>, %154, %cst_125 [1] : vector<1x6xf32> to vector<1xf32>
    %158 = vector.shape_cast %157 : vector<1xf32> to vector<1x1xf32>
    %159 = vector.broadcast %158 : vector<1x1xf32> to vector<1x6xf32>
    %160 = arith.subf %154, %159 : vector<1x6xf32>
    %161 = math.exp %160 : vector<1x6xf32>
    %cst_126 = arith.constant dense<0.000000e+00> : vector<1xf32>
    %162 = vector.multi_reduction <add>, %161, %cst_126 [1] : vector<1x6xf32> to vector<1xf32>
    %163 = vector.shape_cast %162 : vector<1xf32> to vector<1x1xf32>
    %164 = vector.broadcast %163 : vector<1x1xf32> to vector<1x6xf32>
    %165 = arith.divf %161, %164 : vector<1x6xf32>
    %166 = vector.broadcast %158 : vector<1x1xf32> to vector<1x6xf32>
    %167 = arith.subf %154, %166 : vector<1x6xf32>
    %168 = math.log %163 : vector<1x1xf32>
    %169 = vector.broadcast %168 : vector<1x1xf32> to vector<1x6xf32>
    %170 = arith.subf %167, %169 : vector<1x6xf32>
    %c0_127 = arith.constant 0 : index
    %c0_128 = arith.constant 0 : index
    %c0_129 = arith.constant 0 : index
    %171 = vector.load %arg15[%c0_127, %c0_128, %c0_129] : memref<1x1x1xf32, #tpu.memory_space<vmem>>, vector<1x1x1xf32>
    %172 = vector.shape_cast %171 : vector<1x1x1xf32> to vector<1x1xf32>
    %cst_130 = arith.constant 0.000000e+00 : f32
    %173 = vector.broadcast %cst_130 : f32 to vector<1x1xf32>
    %cst_131 = arith.constant 0.000000e+00 : f32
    %174 = vector.broadcast %cst_131 : f32 to vector<1x1xf32>
    %175 = vector.extract_strided_slice %165 {offsets = [0, 0], sizes = [1, 1], strides = [1, 1]} : vector<1x6xf32> to vector<1x1xf32>
    %176 = arith.addf %173, %175 : vector<1x1xf32>
    %177 = arith.cmpf olt, %176, %172 : vector<1x1xf32>
    %178 = arith.extui %177 : vector<1x1xi1> to vector<1x1xi32>
    %179 = arith.sitofp %178 : vector<1x1xi32> to vector<1x1xf32>
    %180 = arith.addf %174, %179 : vector<1x1xf32>
    %181 = vector.extract_strided_slice %165 {offsets = [0, 1], sizes = [1, 1], strides = [1, 1]} : vector<1x6xf32> to vector<1x1xf32>
    %182 = arith.addf %176, %181 : vector<1x1xf32>
    %183 = arith.cmpf olt, %182, %172 : vector<1x1xf32>
    %184 = arith.extui %183 : vector<1x1xi1> to vector<1x1xi32>
    %185 = arith.sitofp %184 : vector<1x1xi32> to vector<1x1xf32>
    %186 = arith.addf %180, %185 : vector<1x1xf32>
    %187 = vector.extract_strided_slice %165 {offsets = [0, 2], sizes = [1, 1], strides = [1, 1]} : vector<1x6xf32> to vector<1x1xf32>
    %188 = arith.addf %182, %187 : vector<1x1xf32>
    %189 = arith.cmpf olt, %188, %172 : vector<1x1xf32>
    %190 = arith.extui %189 : vector<1x1xi1> to vector<1x1xi32>
    %191 = arith.sitofp %190 : vector<1x1xi32> to vector<1x1xf32>
    %192 = arith.addf %186, %191 : vector<1x1xf32>
    %193 = vector.extract_strided_slice %165 {offsets = [0, 3], sizes = [1, 1], strides = [1, 1]} : vector<1x6xf32> to vector<1x1xf32>
    %194 = arith.addf %188, %193 : vector<1x1xf32>
    %195 = arith.cmpf olt, %194, %172 : vector<1x1xf32>
    %196 = arith.extui %195 : vector<1x1xi1> to vector<1x1xi32>
    %197 = arith.sitofp %196 : vector<1x1xi32> to vector<1x1xf32>
    %198 = arith.addf %192, %197 : vector<1x1xf32>
    %199 = vector.extract_strided_slice %165 {offsets = [0, 4], sizes = [1, 1], strides = [1, 1]} : vector<1x6xf32> to vector<1x1xf32>
    %200 = arith.addf %194, %199 : vector<1x1xf32>
    %201 = arith.cmpf olt, %200, %172 : vector<1x1xf32>
    %202 = arith.extui %201 : vector<1x1xi1> to vector<1x1xi32>
    %203 = arith.sitofp %202 : vector<1x1xi32> to vector<1x1xf32>
    %204 = arith.addf %198, %203 : vector<1x1xf32>
    %205 = arith.fptosi %204 : vector<1x1xf32> to vector<1x1xi32>
    %206 = tpu.iota {dimensions = array<i32: 1>} : vector<1x6xi32>
    %207 = vector.broadcast %205 : vector<1x1xi32> to vector<1x6xi32>
    %208 = arith.cmpi eq, %206, %207 : vector<1x6xi32>
    %cst_132 = arith.constant 0.000000e+00 : f32
    %209 = vector.broadcast %cst_132 : f32 to vector<1x6xf32>
    %210 = arith.select %208, %170, %209 : vector<1x6xi1>, vector<1x6xf32>
    %cst_133 = arith.constant dense<0.000000e+00> : vector<1xf32>
    %211 = vector.multi_reduction <add>, %210, %cst_133 [1] : vector<1x6xf32> to vector<1xf32>
    %212 = vector.shape_cast %211 : vector<1xf32> to vector<1x1xf32>
    %213 = tpu.iota {dimensions = array<i32: 1>} : vector<1x128xi32>
    %c0_i32 = arith.constant 0 : i32
    %214 = vector.broadcast %c0_i32 : i32 to vector<1x128xi32>
    %215 = arith.cmpi eq, %213, %214 : vector<1x128xi32>
    %cst_134 = arith.constant 0.000000e+00 : f32
    %216 = vector.shape_cast %156 : vector<1x1xf32> to vector<1x1xf32>
    %217 = vector.broadcast %216 : vector<1x1xf32> to vector<1x128xf32>
    %218 = vector.broadcast %cst_134 : f32 to vector<1x128xf32>
    %219 = arith.select %215, %217, %218 : vector<1x128xi1>, vector<1x128xf32>
    %c1_i32 = arith.constant 1 : i32
    %220 = vector.broadcast %c1_i32 : i32 to vector<1x128xi32>
    %221 = arith.cmpi eq, %213, %220 : vector<1x128xi32>
    %cst_135 = arith.constant 0.000000e+00 : f32
    %222 = vector.shape_cast %204 : vector<1x1xf32> to vector<1x1xf32>
    %223 = vector.broadcast %222 : vector<1x1xf32> to vector<1x128xf32>
    %224 = vector.broadcast %cst_135 : f32 to vector<1x128xf32>
    %225 = arith.select %221, %223, %224 : vector<1x128xi1>, vector<1x128xf32>
    %226 = arith.addf %219, %225 : vector<1x128xf32>
    %c2_i32 = arith.constant 2 : i32
    %227 = vector.broadcast %c2_i32 : i32 to vector<1x128xi32>
    %228 = arith.cmpi eq, %213, %227 : vector<1x128xi32>
    %cst_136 = arith.constant 0.000000e+00 : f32
    %229 = vector.shape_cast %212 : vector<1x1xf32> to vector<1x1xf32>
    %230 = vector.broadcast %229 : vector<1x1xf32> to vector<1x128xf32>
    %231 = vector.broadcast %cst_136 : f32 to vector<1x128xf32>
    %232 = arith.select %228, %230, %231 : vector<1x128xi1>, vector<1x128xf32>
    %233 = arith.addf %226, %232 : vector<1x128xf32>
    %c0_137 = arith.constant 0 : index
    %c0_138 = arith.constant 0 : index
    %c0_139 = arith.constant 0 : index
    %234 = vector.load %arg16[%c0_137, %c0_138, %c0_139] : memref<1x1x128xf32, #tpu.memory_space<vmem>>, vector<1x1x128xf32>
    %235 = vector.shape_cast %234 : vector<1x1x128xf32> to vector<1x128xf32>
    %236 = vector.shape_cast %233 : vector<1x128xf32> to vector<1x1x128xf32>
    tpu.vector_store %arg16[%c0_137, %c0_138, %c0_139], %236 {strides = array<i32>} : memref<1x1x128xf32, #tpu.memory_space<vmem>>, vector<1x1x128xf32>,
    return
  }
  func.func @transform_0(%arg0: i32) -> (i32, i32, i32) {
    %c0_i32 = arith.constant 0 : i32
    %c0_i32_0 = arith.constant 0 : i32
    %c0_i32_1 = arith.constant 0 : i32
    return %arg0, %c0_i32, %c0_i32_0 : i32, i32, i32
  }
  func.func @transform_1(%arg0: i32) -> (i32, i32) {
    %c0_i32 = arith.constant 0 : i32
    %c0_i32_0 = arith.constant 0 : i32
    %c0_i32_1 = arith.constant 0 : i32
    return %c0_i32, %c0_i32_0 : i32, i32
  }
  func.func @transform_2(%arg0: i32) -> (i32, i32) {
    %c0_i32 = arith.constant 0 : i32
    %c0_i32_0 = arith.constant 0 : i32
    %c0_i32_1 = arith.constant 0 : i32
    return %c0_i32, %c0_i32_0 : i32, i32
  }
  func.func @transform_3(%arg0: i32) -> (i32, i32) {
    %c0_i32 = arith.constant 0 : i32
    %c0_i32_0 = arith.constant 0 : i32
    %c0_i32_1 = arith.constant 0 : i32
    return %c0_i32, %c0_i32_0 : i32, i32
  }
  func.func @transform_4(%arg0: i32) -> (i32, i32) {
    %c0_i32 = arith.constant 0 : i32
    %c0_i32_0 = arith.constant 0 : i32
    %c0_i32_1 = arith.constant 0 : i32
    return %c0_i32, %c0_i32_0 : i32, i32
  }
  func.func @transform_5(%arg0: i32) -> (i32, i32) {
    %c0_i32 = arith.constant 0 : i32
    %c0_i32_0 = arith.constant 0 : i32
    %c0_i32_1 = arith.constant 0 : i32
    return %c0_i32, %c0_i32_0 : i32, i32
  }
  func.func @transform_6(%arg0: i32) -> (i32, i32) {
    %c0_i32 = arith.constant 0 : i32
    %c0_i32_0 = arith.constant 0 : i32
    %c0_i32_1 = arith.constant 0 : i32
    return %c0_i32, %c0_i32_0 : i32, i32
  }
  func.func @transform_7(%arg0: i32) -> (i32, i32) {
    %c0_i32 = arith.constant 0 : i32
    %c0_i32_0 = arith.constant 0 : i32
    %c0_i32_1 = arith.constant 0 : i32
    return %c0_i32, %c0_i32_0 : i32, i32
  }
  func.func @transform_8(%arg0: i32) -> (i32, i32) {
    %c0_i32 = arith.constant 0 : i32
    %c0_i32_0 = arith.constant 0 : i32
    %c0_i32_1 = arith.constant 0 : i32
    return %c0_i32, %c0_i32_0 : i32, i32
  }
  func.func @transform_9(%arg0: i32) -> (i32, i32) {
    %c0_i32 = arith.constant 0 : i32
    %c0_i32_0 = arith.constant 0 : i32
    %c0_i32_1 = arith.constant 0 : i32
    return %c0_i32, %c0_i32_0 : i32, i32
  }
  func.func @transform_10(%arg0: i32) -> (i32, i32) {
    %c0_i32 = arith.constant 0 : i32
    %c0_i32_0 = arith.constant 0 : i32
    %c0_i32_1 = arith.constant 0 : i32
    return %c0_i32, %c0_i32_0 : i32, i32
  }
  func.func @transform_11(%arg0: i32) -> (i32, i32) {
    %c0_i32 = arith.constant 0 : i32
    %c0_i32_0 = arith.constant 0 : i32
    %c0_i32_1 = arith.constant 0 : i32
    return %c0_i32, %c0_i32_0 : i32, i32
  }
  func.func @transform_12(%arg0: i32) -> (i32, i32) {
    %c0_i32 = arith.constant 0 : i32
    %c0_i32_0 = arith.constant 0 : i32
    %c0_i32_1 = arith.constant 0 : i32
    return %c0_i32, %c0_i32_0 : i32, i32
  }
  func.func @transform_13(%arg0: i32) -> (i32, i32) {
    %c0_i32 = arith.constant 0 : i32
    %c0_i32_0 = arith.constant 0 : i32
    %c0_i32_1 = arith.constant 0 : i32
    return %c0_i32, %c0_i32_0 : i32, i32
  }
  func.func @transform_14(%arg0: i32) -> (i32, i32, i32) {
    %c0_i32 = arith.constant 0 : i32
    %c0_i32_0 = arith.constant 0 : i32
    %c0_i32_1 = arith.constant 0 : i32
    return %arg0, %c0_i32, %c0_i32_0 : i32, i32, i32
  }
  func.func @transform_15(%arg0: i32) -> (i32, i32, i32) {
    %c0_i32 = arith.constant 0 : i32
    %c0_i32_0 = arith.constant 0 : i32
    %c0_i32_1 = arith.constant 0 : i32
    return %arg0, %c0_i32, %c0_i32_0 : i32, i32, i32
  }
}

</mosaic_0001>

<bundles_post_ra>
// kernel: forward.1
= control target key start
LH: loop header
LB: loop body
LE: loop exit
PB: predicated region body
PF: predicated region fallthrough
CT: control target
= control target key end

     0   :  { %s7676_s18 = smov 0   ;;  %s9918_s0 = inlined_call_operand.vmem [shape: f32[2,201,4], index: 0, kind: input, shape index: {}]   ;;  %s9919_s1 = inlined_call_operand.vmem [shape: f32[169,1], index: 1, kind: input, shape index: {}]   ;;  %s9920_s2 = inlined_call_operand.vmem [shape: bf16[36,64], index: 2, kind: input, shape index: {}]   ;;  %s9921_s3 = inlined_call_operand.vmem [shape: f32[1,64], index: 3, kind: input, shape index: {}]   ;;  %s9922_s4 = inlined_call_operand.vmem [shape: bf16[576,64], index: 4, kind: input, shape index: {}]   ;;  %s9923_s5 = inlined_call_operand.vmem [shape: f32[1,64], index: 5, kind: input, shape index: {}]   ;;  %s9924_s6 = inlined_call_operand.vmem [shape: bf16[576,64], index: 6, kind: input, shape index: {}]   ;;  %s9925_s7 = inlined_call_operand.vmem [shape: f32[1,64], index: 7, kind: input, shape index: {}]   ;;  %s9926_s8 = inlined_call_operand.vmem [shape: bf16[576,64], index: 8, kind: input, shape index: {}]   ;;  %s9927_s9 = inlined_call_operand.vmem [shape: f32[1,64], index: 9, kind: input, shape index: {}]   ;;  %s9928_s10 = inlined_call_operand.vmem [shape: bf16[64,2], index: 10, kind: input, shape index: {}]   ;;  %s9929_s11 = inlined_call_operand.vmem [shape: f32[1,2], index: 11, kind: input, shape index: {}]   ;;  %s9930_s12 = inlined_call_operand.vmem [shape: f32[169,7], index: 12, kind: input, shape index: {}]   ;;  %s9931_s13 = inlined_call_operand.vmem [shape: f32[1,7], index: 13, kind: input, shape index: {}]   ;;  %s9932_s14 = inlined_call_operand.vmem [shape: f32[2,1,1], index: 14, kind: input, shape index: {}]   ;;  %s9933_s15 = inlined_call_operand.vmem [shape: f32[2,1,128], index: 15, kind: output, shape index: {}]  }
   0x1 LB: > { %s6366_s19 = sadd.s32 4294967295, %s7576_s18   ;;  %p6370_p0 = scmp.ge.s32.totalorder %s7576_s18, 1  ;;  %s7576_s18 = sphi %s7676_s18, %s25_s18  }
   0x2   : > { %p445_p1 = scmp.lt.s32.totalorder %s7576_s18, 3 }
   0x4   : > { %p446_p2 = pnand %p6370_p0, %p445_p1 }
   0x6   : > { %449 = sbr.rel (%p446_p2) target bundleno = 3033 (0xbd9), region = 80 }
   0xd   : > { %p494_p3 = scmp.lt.s32.totalorder %s6366_s19, 1  ;;  %v9936_v0 = vmov 0.0   ;;  %v7447_v1 = vld [vmem:[%s9920_s2] sm:$0xff]   ;;  %v7448_v2 = vld [vmem:[%s9920_s2 + $0x8] sm:$0xff]   ;;  %vm1435_vm0 = vcmask 1041408   ;;  %s7579_s30 = smov 4  }
   0xe   : > { %7120 = vmatprep.subr.bf16.mxu0 %v9936_v0  ;;  %7378 = vmatprep.subr.bf16.mxu1 %v9936_v0  ;;  %v7449_v3 = vld [vmem:[%s9920_s2 + $0x10] ss:$0 sps:$4 sm:$0x33]   ;;  %vm7580_vm1 = vmmov 0   ;;  %s7581_s16 = smov 12   ;;  %s7582_s17 = smov 8  }
   0xf   : > { %s9944_s19 = smov (!%p494_p3, %s6366_s19), 1  ;;  %7121 = vmatpush3.bf16.msra.mxu0 %v7447_v1  ;;  %7381 = vmatpush3.bf16.msra.mxu1 %v7447_v1  ;;  %v1437_v11 = vsel %vm1435_vm0, %v7449_v3, 0  ;;  %s7583_s20 = smov 16   ;;  %vm1190_vm2 = vcmask 31744   ;;  %vm1224_vm3 = vcmask 64512   ;;  %vm1247_vm4 = vcmask 97280  }
  0x10   : > { %s7384_s24 = smul.u32 208, %s9944_s19  ;;  %7122 = vmatprep.subr.bf16.mxu0 %v9936_v0  ;;  %7379 = vmatprep.subr.bf16.mxu1 %v9936_v0  ;;  %s7584_s21 = smov 20   ;;  %vm1270_vm5 = vcmask 130048   ;;  %vm1293_vm6 = vcmask 162816   ;;  %vm1316_vm7 = vcmask 195584   ;;  %vm1339_vm8 = vcmask 228352  }
  0x11   : > { %7126 = vmatprep.mubr.msk.bf16.mxu0 %vm7580_vm1, %v9936_v0  ;;  %7150 = vmatprep.mubr.msk.bf16.mxu1 %vm7580_vm1, %v9936_v0  ;;  %s7585_s22 = smov 24   ;;  %s7586_s23 = smov 28   ;;  %vm1362_vm9 = vcmask 261120   ;;  %vm1412_vm10 = vcmask 293888   ;;  %vm506_vm11 = vcmask 523264   ;;  %vm1625_vm12 = vcmask 516096  }
  0x12   : > { %s7703_s29 = scalar_lea.vmem %s9918_s0, %s7384_s24  ;;  %s7587_s24 = smov 32   ;;  %507 = vst.msk [vmem:[#allocation2] sm:$0xff] %vm506_vm11, %v9936_v0  ;;  %508 = vst.msk [vmem:[#allocation2 + $0x8] sm:$0xff] %vm506_vm11, %v9936_v0  ;;  %vm6174_vm14 = vcmask 56320   ;;  %vm6216_vm15 = vcmask 49152   ;;  %vm6228_vm0 = vcmask 40960  }
  0x13   : > { %v680_v4 = vld [vmem:[%s7703_s29 + $0x3] sm:$0xff]  ;;  %v681_v5 = vld [vmem:[%s7703_s29 + $0xb] sm:$0xff]  ;;  %7123 = vmatpush3.bf16.msra.mxu0 %v7448_v2  ;;  %7382 = vmatpush3.bf16.msra.mxu1 %v7448_v2  ;;  %v747_v8 = vld [vmem:[%s7703_s29 + $0x17] sm:$0xff]  ;;  %509 = vst.msk [vmem:[#allocation2 + $0xb9] sm:$0xff] %vm506_vm11, %v9936_v0  ;;  %s504_s26 = scalar_lea.vmem %s9933_s15, %s9944_s19 }
  0x14   : > { %v746_v6 = vld [vmem:[%s7703_s29 + $0xf] sm:$0xff]  ;;  %v702_v7 = vpack.c.bf16 %v681_v5, %v680_v4  ;;  %v713_v9 = vld [vmem:[%s7703_s29 + $0x4] sm:$0xff]  ;;  %7124 = vmatprep.subr.bf16.mxu0 %v9936_v0  ;;  %7380 = vmatprep.subr.bf16.mxu1 %v9936_v0  ;;  %v780_v14 = vld [vmem:[%s7703_s29 + $0x18] sm:$0xff]  ;;  %510 = vst.msk [vmem:[#allocation2 + $0xc1] sm:$0xff] %vm506_vm11, %v9936_v0 }
  0x15   : > { %v714_v10 = vld [vmem:[%s7703_s29 + $0xc] sm:$0xff]  ;;  %v768_v12 = vpack.c.bf16 %v747_v8, %v746_v6  ;;  %v813_v18 = vld [vmem:[%s7703_s29 + $0x19] sm:$0xff]  ;;  %v7723_v20 = vld [vmem:[%s7703_s29 + $0x24] sm:$0xff]  ;;  %511 = vst.msk [vmem:[#allocation3] sm:$0xff] %vm506_vm11, %v9936_v0 }
  0x16   : > { %v779_v13 = vld [vmem:[%s7703_s29 + $0x10] sm:$0xff]  ;;  %937 = vrot.lane.b32.xlu0 %v702_v7, %s7579_s30  ;;  %v735_v15 = vpack.c.bf16 %v714_v10, %v713_v9  ;;  %v716_v19 = vld [vmem:[%s7703_s29 + $0x1c] sm:$0xff]  ;;  %v861_v24 = vld [vmem:[%s7703_s29 + $0x25] sm:$0xff]  ;;  %512 = vst.msk [vmem:[#allocation3 + $0x8] sm:$0xff] %vm506_vm11, %v9936_v0 }
  0x17   : > { %1003 = vrot.lane.b32.xlu1 %v768_v12, %s7581_s16  ;;  %v801_v16 = vpack.c.bf16 %v780_v14, %v779_v13  ;;  %v812_v17 = vld [vmem:[%s7703_s29 + $0x11] sm:$0xff]  ;;  %7125 = vmatpush3.bf16.msra.mxu0 %v1437_v11  ;;  %v849_v22 = vpack.c.bf16 %v7723_v20, %v716_v19  ;;  %v860_v23 = vld [vmem:[%s7703_s29 + $0x1d] sm:$0xff]  ;;  %v894_v26 = vld [vmem:[%s7703_s29 + $0x26] sm:$0xff]  ;;  %513 = vst.msk [vmem:[#allocation3 + $0xb9] sm:$0xff] %vm506_vm11, %v9936_v0 }
  0x18   : > { %7383 = vmatpush3.bf16.msra.mxu1 %v1437_v11  ;;  %v834_v21 = vpack.c.bf16 %v813_v18, %v812_v17  ;;  %v893_v25 = vld [vmem:[%s7703_s29 + $0x1e] sm:$0xff]  ;;  %v882_v27 = vpack.c.bf16 %v861_v24, %v860_v23  ;;  %v682_v29 = vld [vmem:[%s7703_s29 + $0x13] sm:$0xff]  ;;  %v749_v35 = vld [vmem:[%s7703_s29 + $0x27] sm:$0xff]  ;;  %514 = vst.msk [vmem:[#allocation3 + $0xc1] sm:$0xff] %vm506_vm11, %v9936_v0 }
  0x19   : > { %v915_v28 = vpack.c.bf16 %v894_v26, %v893_v25  ;;  %v683_v30 = vld [vmem:[%s7703_s29 + $0x1b] sm:$0xff]  ;;  %v782_v37 = vld [vmem:[%s7703_s29 + $0x28] sm:$0xff]  ;;  %v783_v58 = vld [vmem:[%s7703_s29 + $0x30] sm:$0xff] }
  0x1a   : > { %970 = vrot.lane.b32.xlu0 %v735_v15, %s7582_s17  ;;  %v715_v31 = vld [vmem:[%s7703_s29 + $0x14] sm:$0xff]  ;;  %v703_v32 = vpack.c.bf16 %v683_v30, %v682_v29  ;;  %v748_v34 = vld [vmem:[%s7703_s29 + $0x1f] sm:$0xff]  ;;  %v815_v41 = vld [vmem:[%s7703_s29 + $0x29] sm:$0xff] }
  0x1b   : > { %1036 = vrot.lane.b32.xlu1 %v801_v16, %s7583_s20  ;;  %v736_v33 = vpack.c.bf16 %v716_v19, %v715_v31  ;;  %v781_v36 = vld [vmem:[%s7703_s29 + $0x20] sm:$0xff]  ;;  %v769_v38 = vpack.c.bf16 %v749_v35, %v748_v34  ;;  %v718_v42 = vld [vmem:[%s7703_s29 + $0x2c] sm:$0xff]  ;;  %v719_v43 = vld [vmem:[%s7703_s29 + $0x34] sm:$0xff] }
  0x1c   : > { %v802_v39 = vpack.c.bf16 %v782_v37, %v781_v36  ;;  %v814_v40 = vld [vmem:[%s7703_s29 + $0x21] sm:$0xff]  ;;  %v850_v45 = vpack.c.bf16 %v719_v43, %v718_v42  ;;  %v862_v46 = vld [vmem:[%s7703_s29 + $0x2d] sm:$0xff]  ;;  %v863_v47 = vld [vmem:[%s7703_s29 + $0x35] sm:$0xff]  ;;  %v737_v55 = vpack.c.bf16 %v718_v42, %v7723_v20 }
  0x1d   : > { %v835_v44 = vpack.c.bf16 %v815_v41, %v814_v40  ;;  %v895_v48 = vld [vmem:[%s7703_s29 + $0x2e] sm:$0xff]  ;;  %v896_v49 = vld [vmem:[%s7703_s29 + $0x36] sm:$0xff]  ;;  %v883_v50 = vpack.c.bf16 %v863_v47, %v862_v46  ;;  %v684_v52 = vld [vmem:[%s7703_s29 + $0x23] sm:$0xff] }
  0x1e   : > { %1069 = vrot.lane.b32.xlu0 %v834_v21, %s7584_s21  ;;  %v916_v51 = vpack.c.bf16 %v896_v49, %v895_v48  ;;  %v685_v53 = vld [vmem:[%s7703_s29 + $0x2b] sm:$0xff]  ;;  %v751_v57 = vld [vmem:[%s7703_s29 + $0x37] sm:$0xff]  ;;  %v752_v15 = vld [vmem:[%s7703_s29 + $0x3f] sm:$0xff] }
  0x1f   : > { %1102 = vrot.lane.b32.xlu1 %v849_v22, %s7585_s22  ;;  %v704_v54 = vpack.c.bf16 %v685_v53, %v684_v52  ;;  %v750_v56 = vld [vmem:[%s7703_s29 + $0x2f] sm:$0xff]  ;;  %v784_v59 = vld [vmem:[%s7703_s29 + $0x38] sm:$0xff]  ;;  %v721_v2 = vld [vmem:[%s7703_s29 + $0x44] sm:$0xff] }
  0x20   : > { %v770_v60 = vpack.c.bf16 %v751_v57, %v750_v56  ;;  %v803_v61 = vpack.c.bf16 %v784_v59, %v783_v58  ;;  %v816_v62 = vld [vmem:[%s7703_s29 + $0x31] sm:$0xff]  ;;  %v817_v63 = vld [vmem:[%s7703_s29 + $0x39] sm:$0xff]  ;;  %v865_v6 = vld [vmem:[%s7703_s29 + $0x45] sm:$0xff] }
  0x21   : > { %v720_v1 = vld [vmem:[%s7703_s29 + $0x3c] sm:$0xff]  ;;  %v836_v3 = vpack.c.bf16 %v817_v63, %v816_v62  ;;  %v898_v8 = vld [vmem:[%s7703_s29 + $0x46] sm:$0xff]  ;;  %v686_v11 = vld [vmem:[%s7703_s29 + $0x33] sm:$0xff] }
  0x22   : > { %1135 = vrot.lane.b32.xlu0 %v882_v27, %s7586_s23  ;;  %v851_v4 = vpack.c.bf16 %v721_v2, %v720_v1  ;;  %v864_v5 = vld [vmem:[%s7703_s29 + $0x3d] sm:$0xff]  ;;  %v738_v14 = vpack.c.bf16 %v720_v1, %v719_v43  ;;  %v753_v16 = vld [vmem:[%s7703_s29 + $0x47] sm:$0xff]  ;;  %v723_v24 = vld [vmem:[%s7703_s29 + $0x54] sm:$0xff] }
  0x23   : > { %1168 = vrot.lane.b32.xlu1 %v915_v28, %s7587_s24  ;;  %v897_v7 = vld [vmem:[%s7703_s29 + $0x3e] sm:$0xff]  ;;  %v884_v9 = vpack.c.bf16 %v865_v6, %v864_v5  ;;  %v786_v18 = vld [vmem:[%s7703_s29 + $0x48] sm:$0xff]  ;;  %v771_v19 = vpack.c.bf16 %v753_v16, %v752_v15  ;;  %v867_v27 = vld [vmem:[%s7703_s29 + $0x55] sm:$0xff]  ;;  %v9934_v15 = vmov 0  }
  0x24   : > { %v917_v10 = vpack.c.bf16 %v898_v8, %v897_v7  ;;  %v687_v12 = vld [vmem:[%s7703_s29 + $0x3b] sm:$0xff]  ;;  %v819_v22 = vld [vmem:[%s7703_s29 + $0x49] sm:$0xff]  ;;  %v820_v41 = vld [vmem:[%s7703_s29 + $0x51] sm:$0xff]  ;;  %7414 = vset.pattern.permute.xlu1 %v9934_v15  ;;  %7413 = vset.pattern.permute.xlu0 %v9934_v15 }
  0x25   : > { %v705_v13 = vpack.c.bf16 %v687_v12, %v686_v11  ;;  %v785_v17 = vld [vmem:[%s7703_s29 + $0x40] sm:$0xff]  ;;  %v722_v23 = vld [vmem:[%s7703_s29 + $0x4c] sm:$0xff]  ;;  %v900_v29 = vld [vmem:[%s7703_s29 + $0x56] sm:$0xff] }
  0x26   : > { %939 = vrot.lane.b32.xlu0 %v703_v32, %s7579_s30  ;;  %v804_v20 = vpack.c.bf16 %v786_v18, %v785_v17  ;;  %v818_v21 = vld [vmem:[%s7703_s29 + $0x41] sm:$0xff]  ;;  %v866_v25 = vld [vmem:[%s7703_s29 + $0x4d] sm:$0xff]  ;;  %v852_v30 = vpack.c.bf16 %v723_v24, %v722_v23  ;;  %v755_v36 = vld [vmem:[%s7703_s29 + $0x57] sm:$0xff]  ;;  %v739_v40 = vpack.c.bf16 %v722_v23, %v721_v2 }
  0x27   : > { %972 = vrot.lane.b32.xlu1 %v736_v33, %s7582_s17  ;;  %v837_v26 = vpack.c.bf16 %v819_v22, %v818_v21  ;;  %v899_v28 = vld [vmem:[%s7703_s29 + $0x4e] sm:$0xff]  ;;  %v688_v31 = vld [vmem:[%s7703_s29 + $0x43] sm:$0xff]  ;;  %v885_v33 = vpack.c.bf16 %v867_v27, %v866_v25  ;;  %v821_v42 = vld [vmem:[%s7703_s29 + $0x59] sm:$0xff] }
  0x28   : > { %v689_v32 = vld [vmem:[%s7703_s29 + $0x4b] sm:$0xff]  ;;  %v918_v34 = vpack.c.bf16 %v900_v29, %v899_v28  ;;  %v868_v47 = vld [vmem:[%s7703_s29 + $0x5d] sm:$0xff]  ;;  %v838_v49 = vpack.c.bf16 %v821_v42, %v820_v41  ;;  %v690_v53 = vld [vmem:[%s7703_s29 + $0x53] sm:$0xff] }
  0x29   : > { %v754_v35 = vld [vmem:[%s7703_s29 + $0x4f] sm:$0xff]  ;;  %v706_v37 = vpack.c.bf16 %v689_v32, %v688_v31  ;;  %v869_v48 = vld [vmem:[%s7703_s29 + $0x65] sm:$0xff]  ;;  %v759_v18 = vld [vmem:[%s7703_s29 + $0x77] sm:$0xff] }
  0x2a   : > { %1005 = vrot.lane.b32.xlu0 %v769_v38, %s7581_s16  ;;  %v787_v38 = vld [vmem:[%s7703_s29 + $0x50] sm:$0xff]  ;;  %v772_v43 = vpack.c.bf16 %v755_v36, %v754_v35  ;;  %v756_v57 = vld [vmem:[%s7703_s29 + $0x5f] sm:$0xff]  ;;  %v757_v58 = vld [vmem:[%s7703_s29 + $0x67] sm:$0xff] }
  0x2b   : > { %1038 = vrot.lane.b32.xlu1 %v802_v39, %s7583_s20  ;;  %v788_v39 = vld [vmem:[%s7703_s29 + $0x58] sm:$0xff]  ;;  %v822_v63 = vld [vmem:[%s7703_s29 + $0x61] sm:$0xff]  ;;  %v823_v1 = vld [vmem:[%s7703_s29 + $0x69] sm:$0xff]  ;;  %v773_v2 = vpack.c.bf16 %v757_v58, %v756_v57 }
  0x2c   : > { %v805_v46 = vpack.c.bf16 %v788_v39, %v787_v38  ;;  %v870_v6 = vld [vmem:[%s7703_s29 + $0x6d] sm:$0xff]  ;;  %v871_v7 = vld [vmem:[%s7703_s29 + $0x75] sm:$0xff]  ;;  %v839_v8 = vpack.c.bf16 %v823_v1, %v822_v63  ;;  %v692_v12 = vld [vmem:[%s7703_s29 + $0x63] sm:$0xff] }
  0x2d   : > { %v758_v17 = vld [vmem:[%s7703_s29 + $0x6f] sm:$0xff]  ;;  %v792_v21 = vld [vmem:[%s7703_s29 + $0x78] sm:$0xff]  ;;  %v7870_v27 = vld [vmem:[%s7703_s29 + $0x84] sm:$0xff] }
  0x2e   : > { %1071 = vrot.lane.b32.xlu0 %v835_v44, %s7584_s21  ;;  %v724_v44 = vld [vmem:[%s7703_s29 + $0x5c] sm:$0xff]  ;;  %v824_v23 = vld [vmem:[%s7703_s29 + $0x71] sm:$0xff]  ;;  %v774_v25 = vpack.c.bf16 %v759_v18, %v758_v17 }
  0x2f   : > { %1104 = vrot.lane.b32.xlu1 %v850_v45, %s7585_s22  ;;  %v7817_v45 = vld [vmem:[%s7703_s29 + $0x64] sm:$0xff]  ;;  %v740_v62 = vpack.c.bf16 %v724_v44, %v723_v24  ;;  %v825_v24 = vld [vmem:[%s7703_s29 + $0x79] sm:$0xff]  ;;  %v795_v18 = vld [vmem:[%s7703_s29 + $0x90] sm:$0xff] }
  0x30   : > { %v853_v52 = vpack.c.bf16 %v7817_v45, %v724_v44  ;;  %v872_v29 = vld [vmem:[%s7703_s29 + $0x7d] sm:$0xff]  ;;  %v840_v31 = vpack.c.bf16 %v825_v24, %v824_v23  ;;  %v694_v35 = vld [vmem:[%s7703_s29 + $0x73] sm:$0xff] }
  0x31   : > { %v905_v32 = vld [vmem:[%s7703_s29 + $0x7e] sm:$0xff]  ;;  %v875_v57 = vld [vmem:[%s7703_s29 + $0x95] sm:$0xff] }
  0x32   : > { %1137 = vrot.lane.b32.xlu0 %v883_v50, %s7586_s23  ;;  %v901_v50 = vld [vmem:[%s7703_s29 + $0x5e] sm:$0xff] }
  0x33   : > { %1170 = vrot.lane.b32.xlu1 %v916_v51, %s7587_s24  ;;  %v902_v51 = vld [vmem:[%s7703_s29 + $0x66] sm:$0xff] }
  0x34   : > { %v919_v56 = vpack.c.bf16 %v902_v51, %v901_v50  ;;  %v760_v39 = vld [vmem:[%s7703_s29 + $0x7f] sm:$0xff]  ;;  %v730_v50 = vld [vmem:[%s7703_s29 + $0x8c] sm:$0xff]  ;;  %v7898_v51 = vld [vmem:[%s7703_s29 + $0x94] sm:$0xff] }
  0x35   : > { %v793_v42 = vld [vmem:[%s7703_s29 + $0x80] sm:$0xff] }
  0x36   : > { %941 = vrot.lane.b32.xlu0 %v704_v54, %s7579_s30  ;;  %v691_v54 = vld [vmem:[%s7703_s29 + $0x5b] sm:$0xff] }
  0x37   : > { %974 = vrot.lane.b32.xlu1 %v737_v55, %s7582_s17  ;;  %v886_v55 = vpack.c.bf16 %v869_v48, %v868_v47  ;;  %v707_v59 = vpack.c.bf16 %v691_v54, %v690_v53  ;;  %v826_v47 = vld [vmem:[%s7703_s29 + $0x81] sm:$0xff]  ;;  %v827_v48 = vld [vmem:[%s7703_s29 + $0x89] sm:$0xff] }
  0x38   : > { %v841_v58 = vpack.c.bf16 %v827_v48, %v826_v47  ;;  %v698_v48 = vld [vmem:[%s7703_s29 + $0x93] sm:$0xff] }
  0x3a   : > { %1007 = vrot.lane.b32.xlu0 %v770_v60, %s7581_s16  ;;  %v789_v60 = vld [vmem:[%s7703_s29 + $0x60] sm:$0xff] }
  0x3b   : > { %1040 = vrot.lane.b32.xlu1 %v803_v61, %s7583_s20  ;;  %v790_v61 = vld [vmem:[%s7703_s29 + $0x68] sm:$0xff] }
  0x3c   : > { %v806_v5 = vpack.c.bf16 %v790_v61, %v789_v60  ;;  %v908_v60 = vld [vmem:[%s7703_s29 + $0x96] sm:$0xff]  ;;  %v856_v61 = vpack.c.bf16 %v7898_v51, %v730_v50 }
  0x3e   : > { %1073 = vrot.lane.b32.xlu0 %v836_v3, %s7584_s21  ;;  %v726_v3 = vld [vmem:[%s7703_s29 + $0x6c] sm:$0xff] }
  0x3f   : > { %1106 = vrot.lane.b32.xlu1 %v851_v4, %s7585_s22  ;;  %v7842_v4 = vld [vmem:[%s7703_s29 + $0x74] sm:$0xff]  ;;  %v741_v22 = vpack.c.bf16 %v726_v3, %v7817_v45  ;;  %v647_v45 = vld [vmem:[%s7703_s29 + $0x2] sm:$0xff] }
  0x40   : > { %v854_v11 = vpack.c.bf16 %v7842_v4, %v726_v3  ;;  %v696_v3 = vld [vmem:[%s7703_s29 + $0x83] sm:$0xff] }
  0x42   : > { %1139 = vrot.lane.b32.xlu0 %v884_v9, %s7586_s23  ;;  %v903_v9 = vld [vmem:[%s7703_s29 + $0x6e] sm:$0xff] }
  0x43   : > { %1172 = vrot.lane.b32.xlu1 %v917_v10, %s7587_s24  ;;  %v904_v10 = vld [vmem:[%s7703_s29 + $0x76] sm:$0xff] }
  0x44   : > { %v920_v16 = vpack.c.bf16 %v904_v10, %v903_v9  ;;  %v649_v10 = vld [vmem:[%s7703_s29 + $0x12] sm:$0xff] }
  0x46   : > { %943 = vrot.lane.b32.xlu0 %v705_v13, %s7579_s30  ;;  %v887_v13 = vpack.c.bf16 %v871_v7, %v870_v6  ;;  %v697_v6 = vld [vmem:[%s7703_s29 + $0x8b] sm:$0xff] }
  0x47   : > { %976 = vrot.lane.b32.xlu1 %v738_v14, %s7582_s17  ;;  %v693_v14 = vld [vmem:[%s7703_s29 + $0x6b] sm:$0xff]  ;;  %v710_v17 = vpack.c.bf16 %v697_v6, %v696_v3 }
  0x4a   : > { %1009 = vrot.lane.b32.xlu0 %v771_v19, %s7581_s16  ;;  %v708_v19 = vpack.c.bf16 %v693_v14, %v692_v12  ;;  %v762_v14 = vld [vmem:[%s7703_s29 + $0x8f] sm:$0xff] }
  0x4b   : > { %1042 = vrot.lane.b32.xlu1 %v804_v20, %s7583_s20  ;;  %v791_v20 = vld [vmem:[%s7703_s29 + $0x70] sm:$0xff] }
  0x4c   : > { %v807_v28 = vpack.c.bf16 %v792_v21, %v791_v20  ;;  %v743_v20 = vpack.c.bf16 %v730_v50, %v7870_v27 }
  0x4e   : > { %1075 = vrot.lane.b32.xlu0 %v837_v26, %s7584_s21  ;;  %v728_v26 = vld [vmem:[%s7703_s29 + $0x7c] sm:$0xff] }
  0x4f   : > { %1108 = vrot.lane.b32.xlu1 %v852_v30, %s7585_s22  ;;  %v873_v30 = vld [vmem:[%s7703_s29 + $0x85] sm:$0xff]  ;;  %v742_v44 = vpack.c.bf16 %v728_v26, %v7842_v4 }
  0x50   : > { %v888_v36 = vpack.c.bf16 %v873_v30, %v872_v29 }
  0x52   : > { %1141 = vrot.lane.b32.xlu0 %v885_v33, %s7586_s23  ;;  %v906_v33 = vld [vmem:[%s7703_s29 + $0x86] sm:$0xff] }
  0x53   : > { %1174 = vrot.lane.b32.xlu1 %v918_v34, %s7587_s24  ;;  %v855_v34 = vpack.c.bf16 %v7870_v27, %v728_v26  ;;  %v921_v38 = vpack.c.bf16 %v906_v33, %v905_v32  ;;  %v828_v26 = vld [vmem:[%s7703_s29 + $0x91] sm:$0xff]  ;;  %v7934_v32 = vld [vmem:[%s7703_s29 + $0xa4] sm:$0xff] }
  0x56   : > { %945 = vrot.lane.b32.xlu0 %v706_v37, %s7579_s30  ;;  %v695_v37 = vld [vmem:[%s7703_s29 + $0x7b] sm:$0xff] }
  0x57   : > { %978 = vrot.lane.b32.xlu1 %v739_v40, %s7582_s17  ;;  %v761_v40 = vld [vmem:[%s7703_s29 + $0x87] sm:$0xff]  ;;  %v709_v41 = vpack.c.bf16 %v695_v37, %v694_v35 }
  0x5a   : > { %1011 = vrot.lane.b32.xlu0 %v772_v43, %s7581_s16  ;;  %v794_v43 = vld [vmem:[%s7703_s29 + $0x88] sm:$0xff] }
  0x5b   : > { %1044 = vrot.lane.b32.xlu1 %v805_v46, %s7583_s20  ;;  %v648_v46 = vld [vmem:[%s7703_s29 + $0xa] sm:$0xff] }
  0x5c   : > { %v669_v54 = vpack.c.bf16 %v648_v46, %v647_v45 }
  0x5e   : > { %1077 = vrot.lane.b32.xlu0 %v838_v49, %s7584_s21  ;;  %v775_v49 = vpack.c.bf16 %v761_v40, %v760_v39  ;;  %v877_v39 = vld [vmem:[%s7703_s29 + $0xa5] sm:$0xff] }
  0x5f   : > { %1110 = vrot.lane.b32.xlu1 %v853_v52, %s7585_s22  ;;  %v808_v52 = vpack.c.bf16 %v794_v43, %v793_v42  ;;  %v909_v42 = vld [vmem:[%s7703_s29 + $0x9e] sm:$0xff]  ;;  %v910_v43 = vld [vmem:[%s7703_s29 + $0xa6] sm:$0xff] }
  0x60   : > { %v923_v47 = vpack.c.bf16 %v910_v43, %v909_v42  ;;  %v799_v43 = vld [vmem:[%s7703_s29 + $0xb0] sm:$0xff] }
  0x62   : > { %1143 = vrot.lane.b32.xlu0 %v886_v55, %s7586_s23 }
  0x63   : > { %1176 = vrot.lane.b32.xlu1 %v919_v56, %s7587_s24  ;;  %v874_v56 = vld [vmem:[%s7703_s29 + $0x8d] sm:$0xff] }
  0x66   : > { %947 = vrot.lane.b32.xlu0 %v707_v59, %s7579_s30  ;;  %v907_v59 = vld [vmem:[%s7703_s29 + $0x8e] sm:$0xff] }
  0x67   : > { %980 = vrot.lane.b32.xlu1 %v740_v62, %s7582_s17 }
  0x6a   : > { %1013 = vrot.lane.b32.xlu0 %v773_v2, %s7581_s16 }
  0x6b   : > { %1046 = vrot.lane.b32.xlu1 %v806_v5, %s7583_s20  ;;  %v889_v5 = vpack.c.bf16 %v875_v57, %v874_v56  ;;  %v651_v56 = vld [vmem:[%s7703_s29 + $0x22] sm:$0xff]  ;;  %v652_v57 = vld [vmem:[%s7703_s29 + $0x2a] sm:$0xff] }
  0x6e   : > { %1079 = vrot.lane.b32.xlu0 %v839_v8, %s7584_s21  ;;  %v922_v8 = vpack.c.bf16 %v908_v60, %v907_v59  ;;  %v764_v59 = vld [vmem:[%s7703_s29 + $0x9f] sm:$0xff]  ;;  %v765_v60 = vld [vmem:[%s7703_s29 + $0xa7] sm:$0xff] }
  0x6f   : > { %1112 = vrot.lane.b32.xlu1 %v854_v11, %s7585_s22  ;;  %v650_v11 = vld [vmem:[%s7703_s29 + $0x1a] sm:$0xff] }
  0x72   : > { %1145 = vrot.lane.b32.xlu0 %v887_v13, %s7586_s23 }
  0x73   : > { %1178 = vrot.lane.b32.xlu1 %v920_v16, %s7587_s24  ;;  %v763_v16 = vld [vmem:[%s7703_s29 + $0x97] sm:$0xff] }
  0x74   : > { %v776_v30 = vpack.c.bf16 %v763_v16, %v762_v14 }
  0x76   : > { %949 = vrot.lane.b32.xlu0 %v708_v19, %s7579_s30  ;;  %v796_v19 = vld [vmem:[%s7703_s29 + $0x98] sm:$0xff] }
  0x77   : > { %982 = vrot.lane.b32.xlu1 %v741_v22, %s7582_s17  ;;  %v809_v27 = vpack.c.bf16 %v796_v19, %v795_v18  ;;  %v879_v18 = vld [vmem:[%s7703_s29 + $0xb5] sm:$0xff] }
  0x7a   : > { %1015 = vrot.lane.b32.xlu0 %v774_v25, %s7581_s16  ;;  %v670_v25 = vpack.c.bf16 %v650_v11, %v649_v10  ;;  %v845_v10 = vld [vmem:[%s7703_s29 + $0xac] sm:$0xff]  ;;  %v846_v11 = vld [vmem:[%s7703_s29 + $0xb4] sm:$0xff] }
  0x7b   : > { %1048 = vrot.lane.b32.xlu1 %v807_v28, %s7583_s20  ;;  %v829_v28 = vld [vmem:[%s7703_s29 + $0x99] sm:$0xff]  ;;  %v858_v16 = vpack.c.bf16 %v846_v11, %v845_v10  ;;  %v655_v10 = vld [vmem:[%s7703_s29 + $0x42] sm:$0xff]  ;;  %v656_v11 = vld [vmem:[%s7703_s29 + $0x4a] sm:$0xff] }
  0x7e   : > { %1081 = vrot.lane.b32.xlu0 %v840_v31, %s7584_s21  ;;  %v732_v31 = vld [vmem:[%s7703_s29 + $0x9c] sm:$0xff] }
  0x7f   : > { %1114 = vrot.lane.b32.xlu1 %v855_v34, %s7585_s22  ;;  %v857_v37 = vpack.c.bf16 %v7934_v32, %v732_v31 }
  0x82   : > { %1147 = vrot.lane.b32.xlu0 %v888_v36, %s7586_s23  ;;  %v842_v36 = vpack.c.bf16 %v829_v28, %v828_v26  ;;  %v700_v28 = vld [vmem:[%s7703_s29 + $0xa3] sm:$0xff] }
  0x83   : > { %1180 = vrot.lane.b32.xlu1 %v921_v38, %s7587_s24  ;;  %v876_v38 = vld [vmem:[%s7703_s29 + $0x9d] sm:$0xff] }
  0x84   : > { %v890_v46 = vpack.c.bf16 %v877_v39, %v876_v38  ;;  %v766_v39 = vld [vmem:[%s7703_s29 + $0xaf] sm:$0xff] }
  0x86   : > { %951 = vrot.lane.b32.xlu0 %v709_v41, %s7579_s30 }
  0x87   : > { %984 = vrot.lane.b32.xlu1 %v742_v44, %s7582_s17 }
  0x88   : > { %v938_v53 = vpop.permute.xlu0 %937 }
  0x89   : > { %v1004_v55 = vpop.permute.xlu1 %1003  ;;  %v1193_v62 = vsel %vm1190_vm2, %v669_v54, %v938_v53 }
  0x8a   : > { %1017 = vrot.lane.b32.xlu0 %v775_v49, %s7581_s16  ;;  %v699_v49 = vld [vmem:[%s7703_s29 + $0x9b] sm:$0xff] }
  0x8b   : > { %1050 = vrot.lane.b32.xlu1 %v808_v52, %s7583_s20 }
  0x8c   : > { %v971_v63 = vpop.permute.xlu0 %970 }
  0x8d   : > { %v1226_v1 = vsel %vm1224_vm3, %v1193_v62, %v971_v63  ;;  %v1037_v2 = vpop.permute.xlu1 %1036  ;;  %v797_v63 = vld [vmem:[%s7703_s29 + $0xa0] sm:$0xff] }
  0x8e   : > { %v1249_v4 = vsel %vm1247_vm4, %v1226_v1, %v1004_v55  ;;  %1083 = vrot.lane.b32.xlu0 %v841_v58, %s7584_s21  ;;  %v711_v55 = vpack.c.bf16 %v699_v49, %v698_v48  ;;  %v744_v58 = vpack.c.bf16 %v732_v31, %v7898_v51  ;;  %v798_v1 = vld [vmem:[%s7703_s29 + $0xa8] sm:$0xff]  ;;  %v777_v51 = vpack.c.bf16 %v765_v60, %v764_v59  ;;  %v880_v60 = vld [vmem:[%s7703_s29 + $0xbd] sm:$0xff] }
  0x8f   : > { %v1272_v7 = vsel %vm1270_vm5, %v1249_v4, %v1037_v2  ;;  %1116 = vrot.lane.b32.xlu1 %v856_v61, %s7585_s22  ;;  %v671_v4 = vpack.c.bf16 %v652_v57, %v651_v56  ;;  %v810_v6 = vpack.c.bf16 %v798_v1, %v797_v63  ;;  %v913_v1 = vld [vmem:[%s7703_s29 + $0xbe] sm:$0xff] }
  0x90   : > { %v1070_v9 = vpop.permute.xlu0 %1069 }
  0x91   : > { %v1295_v12 = vsel %vm1293_vm6, %v1272_v7, %v1070_v9  ;;  %v1103_v13 = vpop.permute.xlu1 %1102  ;;  %v830_v7 = vld [vmem:[%s7703_s29 + $0xa1] sm:$0xff] }
  0x92   : > { %1149 = vrot.lane.b32.xlu0 %v889_v5, %s7586_s23  ;;  %v1318_v21 = vsel %vm1316_vm7, %v1295_v12, %v1103_v13 }
  0x93   : > { %1182 = vrot.lane.b32.xlu1 %v922_v8, %s7587_s24  ;;  %v831_v8 = vld [vmem:[%s7703_s29 + $0xa9] sm:$0xff] }
  0x94   : > { %v1136_v22 = vpop.permute.xlu0 %1135  ;;  %v843_v14 = vpack.c.bf16 %v831_v8, %v830_v7 }
  0x95   : > { %v1341_v23 = vsel %vm1339_vm8, %v1318_v21, %v1136_v22  ;;  %v1169_v24 = vpop.permute.xlu1 %1168  ;;  %v911_v21 = vld [vmem:[%s7703_s29 + $0xae] sm:$0xff]  ;;  %v912_v22 = vld [vmem:[%s7703_s29 + $0xb6] sm:$0xff] }
  0x96   : > { %v1364_v29 = vsel %vm1362_vm9, %v1341_v23, %v1169_v24  ;;  %953 = vrot.lane.b32.xlu0 %v710_v17, %s7579_s30  ;;  %v878_v17 = vld [vmem:[%s7703_s29 + $0xad] sm:$0xff]  ;;  %v924_v26 = vpack.c.bf16 %v912_v22, %v911_v21  ;;  %v518_v21 = vld [vmem:[%s9919_s1 + $0x18] sm:$0xff] }
  0x97   : > { %986 = vrot.lane.b32.xlu1 %v743_v20, %s7582_s17  ;;  %7127 = vmatmul.mubr.msk.bf16.vlgmr.msra.gmra.mrb[0].mxu0 %vm1412_vm10, %v1364_v29  ;;  %v701_v29 = vld [vmem:[%s7703_s29 + $0xab] sm:$0x1] }
  0x98   : > { %v940_v33 = vpop.permute.xlu0 %939  ;;  %7130 = vmatprep.mubr.msk.bf16.mxu0 %vm7580_vm1, %v9936_v0 }
  0x99   : > { %v1196_v34 = vsel %vm1190_vm2, %v670_v25, %v940_v33  ;;  %v973_v35 = vpop.permute.xlu1 %972  ;;  %v891_v25 = vpack.c.bf16 %v879_v18, %v878_v17 }
  0x9a   : > { %1019 = vrot.lane.b32.xlu0 %v776_v30, %s7581_s16  ;;  %v1228_v40 = vsel %vm1224_vm3, %v1196_v34, %v973_v35  ;;  %v712_v35 = vpack.c.bf16 %v701_v29, %v700_v28 }
  0x9b   : > { %1052 = vrot.lane.b32.xlu1 %v809_v27, %s7583_s20  ;;  %v734_v27 = vld [vmem:[%s7703_s29 + $0xac] sm:$0x1] }
  0x9c   : > { %v1006_v41 = vpop.permute.xlu0 %1005  ;;  %v745_v38 = vpack.c.bf16 %v734_v27, %v7934_v32 }
  0x9d   : > { %v1251_v44 = vsel %vm1247_vm4, %v1228_v40, %v1006_v41  ;;  %v1039_v45 = vpop.permute.xlu1 %1038  ;;  %v767_v40 = vld [vmem:[%s7703_s29 + $0xb7] sm:$0x1] }
  0x9e   : > { %1085 = vrot.lane.b32.xlu0 %v842_v36, %s7584_s21  ;;  %v1274_v50 = vsel %vm1270_vm5, %v1251_v44, %v1039_v45  ;;  %v653_v36 = vld [vmem:[%s7703_s29 + $0x32] sm:$0xff]  ;;  %v778_v32 = vpack.c.bf16 %v767_v40, %v766_v39  ;;  %v658_v40 = vld [vmem:[%s7703_s29 + $0x5a] sm:$0xff] }
  0x9f   : > { %1118 = vrot.lane.b32.xlu1 %v857_v37, %s7585_s22  ;;  %v654_v37 = vld [vmem:[%s7703_s29 + $0x3a] sm:$0xff]  ;;  %v800_v44 = vld [vmem:[%s7703_s29 + $0xb8] sm:$0x1] }
  0xa0   : > { %v1072_v52 = vpop.permute.xlu0 %1071  ;;  %v811_v49 = vpack.c.bf16 %v800_v44, %v799_v43  ;;  %v657_v39 = vld [vmem:[%s7703_s29 + $0x52] sm:$0xff]  ;;  %v523_v44 = vld [vmem:[%s9919_s1 + $0x40] sm:$0xff] }
  0xa1   : > { %v1297_v53 = vsel %vm1293_vm6, %v1274_v50, %v1072_v52  ;;  %v1105_v54 = vpop.permute.xlu1 %1104  ;;  %v832_v50 = vld [vmem:[%s7703_s29 + $0xb1] sm:$0xff]  ;;  %v833_v52 = vld [vmem:[%s7703_s29 + $0xb9] sm:$0x1] }
  0xa2   : > { %1151 = vrot.lane.b32.xlu0 %v890_v46, %s7586_s23  ;;  %v1320_v61 = vsel %vm1316_vm7, %v1297_v53, %v1105_v54  ;;  %v847_v54 = vld [vmem:[%s7703_s29 + $0xbc] sm:$0xff] }
  0xa3   : > { %1184 = vrot.lane.b32.xlu1 %v923_v47, %s7587_s24  ;;  %v672_v47 = vpack.c.bf16 %v654_v37, %v653_v36  ;;  %v521_v36 = vld [vmem:[%s9919_s1 + $0x30] sm:$0xff] }
  0xa4   : > { %v1138_v62 = vpop.permute.xlu0 %1137 }
  0xa5   : > { %v1343_v2 = vsel %vm1339_vm8, %v1320_v61, %v1138_v62  ;;  %v1171_v3 = vpop.permute.xlu1 %1170  ;;  %v881_v61 = vld [vmem:[%s7703_s29 + $0xc5] sm:$0x1] }
  0xa6   : > { %v1366_v5 = vsel %vm1362_vm9, %v1343_v2, %v1171_v3  ;;  %955 = vrot.lane.b32.xlu0 %v711_v55, %s7579_s30  ;;  %v848_v55 = vld [vmem:[%s7703_s29 + $0xc4] sm:$0x1]  ;;  %v914_v2 = vld [vmem:[%s7703_s29 + $0xc6] sm:$0x1] }
  0xa7   : > { %988 = vrot.lane.b32.xlu1 %v744_v58, %s7582_s17  ;;  %7131 = vmatmul.mubr.msk.bf16.gmra.mrb[4].mxu0 %vm1412_vm10, %v1366_v5  ;;  %v844_v58 = vpack.c.bf16 %v833_v52, %v832_v50  ;;  %v859_v59 = vpack.c.bf16 %v848_v55, %v847_v54  ;;  %v892_v5 = vpack.c.bf16 %v881_v61, %v880_v60  ;;  %v525_v50 = vld [vmem:[%s9919_s1 + $0x50] sm:$0xff]  ;;  %v528_v54 = vld [vmem:[%s9919_s1 + $0x68] sm:$0xff]  ;;  %v530_v60 = vld [vmem:[%s9919_s1 + $0x78] sm:$0xff] }
  0xa8   : > { %v942_v9 = vpop.permute.xlu0 %941  ;;  %7134 = vmatprep.mubr.msk.bf16.mxu0 %vm7580_vm1, %v9936_v0 }
  0xa9   : > { %v1199_v12 = vsel %vm1190_vm2, %v671_v4, %v942_v9  ;;  %v975_v13 = vpop.permute.xlu1 %974 }
  0xaa   : > { %1021 = vrot.lane.b32.xlu0 %v777_v51, %s7581_s16  ;;  %v1230_v19 = vsel %vm1224_vm3, %v1199_v12, %v975_v13  ;;  %v925_v51 = vpack.c.bf16 %v914_v2, %v913_v1  ;;  %v515_v12 = vld [vmem:[%s9919_s1] sm:$0xff] }
  0xab   : > { %1054 = vrot.lane.b32.xlu1 %v810_v6, %s7583_s20 }
  0xac   : > { %v1008_v20 = vpop.permute.xlu0 %1007 }
  0xad   : > { %v1253_v23 = vsel %vm1247_vm4, %v1230_v19, %v1008_v20  ;;  %v1041_v24 = vpop.permute.xlu1 %1040  ;;  %v673_v19 = vpack.c.bf16 %v656_v11, %v655_v10 }
  0xae   : > { %1087 = vrot.lane.b32.xlu0 %v843_v14, %s7584_s21  ;;  %v1276_v30 = vsel %vm1270_vm5, %v1253_v23, %v1041_v24  ;;  %v517_v23 = vld [vmem:[%s9919_s1 + $0x10] sm:$0xff] }
  0xaf   : > { %1120 = vrot.lane.b32.xlu1 %v858_v16, %s7585_s22  ;;  %v516_v16 = vld [vmem:[%s9919_s1 + $0x8] sm:$0xff] }
  0xb0   : > { %v1074_v31 = vpop.permute.xlu0 %1073 }
  0xb1   : > { %v1299_v33 = vsel %vm1293_vm6, %v1276_v30, %v1074_v31  ;;  %v1107_v34 = vpop.permute.xlu1 %1106  ;;  %v519_v30 = vld [vmem:[%s9919_s1 + $0x20] sm:$0xff] }
  0xb2   : > { %1153 = vrot.lane.b32.xlu0 %v891_v25, %s7586_s23  ;;  %v1322_v41 = vsel %vm1316_vm7, %v1299_v33, %v1107_v34  ;;  %v522_v33 = vld [vmem:[%s9919_s1 + $0x38] sm:$0xff] }
  0xb3   : > { %1186 = vrot.lane.b32.xlu1 %v924_v26, %s7587_s24  ;;  %v520_v26 = vld [vmem:[%s9919_s1 + $0x28] sm:$0xff] }
  0xb4   : > { %v1140_v42 = vpop.permute.xlu0 %1139 }
  0xb5   : > { %v1345_v45 = vsel %vm1339_vm8, %v1322_v41, %v1140_v42  ;;  %v1173_v46 = vpop.permute.xlu1 %1172  ;;  %v524_v41 = vld [vmem:[%s9919_s1 + $0x48] sm:$0xff] }
  0xb6   : > { %v1368_v48 = vsel %vm1362_vm9, %v1345_v45, %v1173_v46  ;;  %957 = vrot.lane.b32.xlu0 %v712_v35, %s7579_s30  ;;  %s7591_s30 = smov 126  }
  0xb7   : > { %990 = vrot.lane.b32.xlu1 %v745_v38, %s7582_s17  ;;  %7135 = vmatmul.mubr.msk.bf16.gmra.mrb[8].mxu0 %vm1412_vm10, %v1368_v48  ;;  %s7593_s17 = smov 125  }
  0xb8   : > { %v944_v53 = vpop.permute.xlu0 %943  ;;  %7138 = vmatprep.mubr.msk.bf16.mxu0 %vm7580_vm1, %v9936_v0 }
  0xb9   : > { %v1202_v56 = vsel %vm1190_vm2, %v672_v47, %v944_v53  ;;  %v977_v57 = vpop.permute.xlu1 %976  ;;  %v674_v47 = vpack.c.bf16 %v658_v40, %v657_v39 }
  0xba   : > { %1023 = vrot.lane.b32.xlu0 %v778_v32, %s7581_s16  ;;  %v1232_v62 = vsel %vm1224_vm3, %v1202_v56, %v977_v57  ;;  %v526_v32 = vld [vmem:[%s9919_s1 + $0x58] sm:$0xff]  ;;  %v527_v57 = vld [vmem:[%s9919_s1 + $0x60] sm:$0xff]  ;;  %s7592_s16 = smov 127  }
  0xbb   : > { %1056 = vrot.lane.b32.xlu1 %v811_v49, %s7583_s20  ;;  %s7594_s20 = smov 124  }
  0xbc   : > { %v1010_v63 = vpop.permute.xlu0 %1009 }
  0xbd   : > { %v1255_v3 = vsel %vm1247_vm4, %v1232_v62, %v1010_v63  ;;  %v1043_v4 = vpop.permute.xlu1 %1042  ;;  %v529_v63 = vld [vmem:[%s9919_s1 + $0x70] sm:$0xff] }
  0xbe   : > { %1089 = vrot.lane.b32.xlu0 %v844_v58, %s7584_s21  ;;  %v1278_v6 = vsel %vm1270_vm5, %v1255_v3, %v1043_v4  ;;  %v659_v3 = vld [vmem:[%s7703_s29 + $0x62] sm:$0xff]  ;;  %v660_v4 = vld [vmem:[%s7703_s29 + $0x6a] sm:$0xff] }
  0xbf   : > { %1122 = vrot.lane.b32.xlu1 %v859_v59, %s7585_s22  ;;  %v675_v10 = vpack.c.bf16 %v660_v4, %v659_v3  ;;  %v666_v3 = vld [vmem:[%s7703_s29 + $0x9a] sm:$0xff] }
  0xc0   : > { %v1076_v7 = vpop.permute.xlu0 %1075 }
  0xc1   : > { %v1301_v8 = vsel %vm1293_vm6, %v1278_v6, %v1076_v7  ;;  %v1109_v9 = vpop.permute.xlu1 %1108  ;;  %v531_v7 = vld [vmem:[%s9919_s1 + $0x80] sm:$0xff] }
  0xc2   : > { %1155 = vrot.lane.b32.xlu0 %v892_v5, %s7586_s23  ;;  %v1324_v13 = vsel %vm1316_vm7, %v1301_v8, %v1109_v9  ;;  %v532_v5 = vld [vmem:[%s9919_s1 + $0x88] sm:$0xff]  ;;  %s501_s23 = scalar_lea.vmem %s9932_s14, %s9944_s19 }
  0xc3   : > { %1188 = vrot.lane.b32.xlu1 %v925_v51, %s7587_s24  ;;  %s7589_s24 = smov 64  }
  0xc4   : > { %v1142_v14 = vpop.permute.xlu0 %1141 }
  0xc5   : > { %v1347_v17 = vsel %vm1339_vm8, %v1324_v13, %v1142_v14  ;;  %v1175_v18 = vpop.permute.xlu1 %1174  ;;  %v533_v14 = vld [vmem:[%s9919_s1 + $0x90] sm:$0xff] }
  0xc6   : > { %v1370_v20 = vsel %vm1362_vm9, %v1347_v17, %v1175_v18  ;;  %539 = vperm.xlu0 %7413, %v515_v12   ;;  %v534_v12 = vld [vmem:[%s9919_s1 + $0x98] sm:$0xff] }
  0xc7   : > { %7139 = vmatmul.mubr.msk.bf16.gmra.mrb[12].mxu0 %vm1412_vm10, %v1370_v20  ;;  %544 = vperm.xlu1 %7414, %v516_v16  }
  0xc8   : > { %v946_v22 = vpop.permute.xlu0 %945  ;;  %7142 = vmatprep.mubr.msk.bf16.mxu0 %vm7580_vm1, %v9936_v0 }
  0xc9   : > { %v1205_v24 = vsel %vm1190_vm2, %v673_v19, %v946_v22  ;;  %v979_v25 = vpop.permute.xlu1 %978 }
  0xca   : > { %554 = vperm.xlu0 %7413, %v518_v21   ;;  %v1234_v28 = vsel %vm1224_vm3, %v1205_v24, %v979_v25 }
  0xcb   : > { %549 = vperm.xlu1 %7414, %v517_v23  }
  0xcc   : > { %v1012_v29 = vpop.permute.xlu0 %1011 }
  0xcd   : > { %v1257_v31 = vsel %vm1247_vm4, %v1234_v28, %v1012_v29  ;;  %v1045_v27 = vpop.permute.xlu1 %1044  ;;  %v662_v28 = vld [vmem:[%s7703_s29 + $0x7a] sm:$0xff] }
  0xce   : > { %564 = vperm.xlu0 %7413, %v520_v26   ;;  %v1280_v34 = vsel %vm1270_vm5, %v1257_v31, %v1045_v27  ;;  %v661_v26 = vld [vmem:[%s7703_s29 + $0x72] sm:$0xff] }
  0xcf   : > { %559 = vperm.xlu1 %7414, %v519_v30  }
  0xd0   : > { %v1078_v35 = vpop.permute.xlu0 %1077 }
  0xd1   : > { %v1303_v37 = vsel %vm1293_vm6, %v1280_v34, %v1078_v35  ;;  %v1111_v38 = vpop.permute.xlu1 %1110 }
  0xd2   : > { %574 = vperm.xlu0 %7413, %v522_v33   ;;  %v1326_v42 = vsel %vm1316_vm7, %v1303_v37, %v1111_v38  ;;  %v676_v33 = vpack.c.bf16 %v662_v28, %v661_v26 }
  0xd3   : > { %569 = vperm.xlu1 %7414, %v521_v36  }
  0xd4   : > { %v1144_v43 = vpop.permute.xlu0 %1143 }
  0xd5   : > { %v1349_v45 = vsel %vm1339_vm8, %v1326_v42, %v1144_v43  ;;  %v1177_v46 = vpop.permute.xlu1 %1176 }
  0xd6   : > { %v1372_v48 = vsel %vm1362_vm9, %v1349_v45, %v1177_v46  ;;  %584 = vperm.xlu0 %7413, %v524_v41   ;;  %v663_v46 = vld [vmem:[%s7703_s29 + $0x82] sm:$0xff] }
  0xd7   : > { %7143 = vmatmul.mubr.msk.bf16.gmra.mrb[16].mxu0 %vm1412_vm10, %v1372_v48  ;;  %579 = vperm.xlu1 %7414, %v523_v44  }
  0xd8   : > { %v948_v49 = vpop.permute.xlu0 %947  ;;  %7146 = vmatprep.mubr.msk.bf16.mxu0 %vm7580_vm1, %v9936_v0 }
  0xd9   : > { %v1208_v52 = vsel %vm1190_vm2, %v674_v47, %v948_v49  ;;  %v981_v53 = vpop.permute.xlu1 %980  ;;  %v664_v47 = vld [vmem:[%s7703_s29 + $0x8a] sm:$0xff] }
  0xda   : > { %594 = vperm.xlu0 %7413, %v526_v32   ;;  %v1236_v55 = vsel %vm1224_vm3, %v1208_v52, %v981_v53  ;;  %v677_v52 = vpack.c.bf16 %v664_v47, %v663_v46  ;;  %v7450_v46 = vld [vmem:[%s9922_s4 + $0x40] sm:$0xff]  }
  0xdb   : > { %589 = vperm.xlu1 %7414, %v525_v50   ;;  %v7451_v47 = vld [vmem:[%s9922_s4] sm:$0xff]   ;;  %6568 = vmatprep.subr.bf16.mxu1 %v7450_v46 }
  0xdc   : > { %v1014_v56 = vpop.permute.xlu0 %1013 }
  0xdd   : > { %v1259_v58 = vsel %vm1247_vm4, %v1236_v55, %v1014_v56  ;;  %v1047_v59 = vpop.permute.xlu1 %1046 }
  0xde   : > { %604 = vperm.xlu0 %7413, %v528_v54   ;;  %v1282_v61 = vsel %vm1270_vm5, %v1259_v58, %v1047_v59 }
  0xdf   : > { %599 = vperm.xlu1 %7414, %v527_v57  }
  0xe0   : > { %v1080_v62 = vpop.permute.xlu0 %1079 }
  0xe1   : > { %v1305_v1 = vsel %vm1293_vm6, %v1282_v61, %v1080_v62  ;;  %v1113_v2 = vpop.permute.xlu1 %1112 }
  0xe2   : > { %614 = vperm.xlu0 %7413, %v530_v60   ;;  %v1328_v51 = vsel %vm1316_vm7, %v1305_v1, %v1113_v2  ;;  %v665_v2 = vld [vmem:[%s7703_s29 + $0x92] sm:$0xff] }
  0xe3   : > { %609 = vperm.xlu1 %7414, %v529_v63  }
  0xe4   : > { %v1146_v6 = vpop.permute.xlu0 %1145 }
  0xe5   : > { %v1351_v8 = vsel %vm1339_vm8, %v1328_v51, %v1146_v6  ;;  %v1179_v9 = vpop.permute.xlu1 %1178 }
  0xe6   : > { %v1374_v11 = vsel %vm1362_vm9, %v1351_v8, %v1179_v9  ;;  %624 = vperm.xlu0 %7413, %v532_v5  }
  0xe7   : > { %7147 = vmatmul.mubr.msk.bf16.gmra.mrb[20].mxu0 %vm1412_vm10, %v1374_v11  ;;  %619 = vperm.xlu1 %7414, %v531_v7   ;;  %v678_v7 = vpack.c.bf16 %v666_v3, %v665_v2  ;;  %v7464_v3 = vld [vmem:[%s9922_s4 + $0x78] sm:$0xff]  }
  0xe8   : > { %v950_v13 = vpop.permute.xlu0 %949 }
  0xe9   : > { %v1211_v16 = vsel %vm1190_vm2, %v675_v10, %v950_v13  ;;  %v983_v17 = vpop.permute.xlu1 %982 }
  0xea   : > { %634 = vperm.xlu0 %7413, %v534_v12   ;;  %v1238_v18 = vsel %vm1224_vm3, %v1211_v16, %v983_v17 }
  0xeb   : > { %629 = vperm.xlu1 %7414, %v533_v14  }
  0xec   : > { %v1016_v19 = vpop.permute.xlu0 %1015 }
  0xed   : > { %v1261_v20 = vsel %vm1247_vm4, %v1238_v18, %v1016_v19  ;;  %v1049_v21 = vpop.permute.xlu1 %1048 }
  0xee   : > { %v1284_v22 = vsel %vm1270_vm5, %v1261_v20, %v1049_v21  ;;  %v667_v21 = vld [vmem:[%s7703_s29 + $0xa2] sm:$0xff] }
  0xf0   : > { %v1082_v23 = vpop.permute.xlu0 %1081 }
  0xf1   : > { %v1307_v24 = vsel %vm1293_vm6, %v1284_v22, %v1082_v23  ;;  %v1115_v25 = vpop.permute.xlu1 %1114  ;;  %v668_v22 = vld [vmem:[%s7703_s29 + $0xaa] sm:$0x1] }
  0xf2   : > { %v1330_v29 = vsel %vm1316_vm7, %v1307_v24, %v1115_v25  ;;  %v679_v28 = vpack.c.bf16 %v668_v22, %v667_v21 }
  0xf4   : > { %v1148_v30 = vpop.permute.xlu0 %1147 }
  0xf5   : > { %v1353_v31 = vsel %vm1339_vm8, %v1330_v29, %v1148_v30  ;;  %v1181_v27 = vpop.permute.xlu1 %1180 }
  0xf6   : > { %v1376_v34 = vsel %vm1362_vm9, %v1353_v31, %v1181_v27 }
  0xf7   : > { %7151 = vmatmul.mubr.msk.bf16.vlgmr.msra.gmra.mrb[0].mxu1 %vm1412_vm10, %v1376_v34 }
  0xf8   : > { %v952_v35 = vpop.permute.xlu0 %951  ;;  %7154 = vmatprep.mubr.msk.bf16.mxu1 %vm7580_vm1, %v9936_v0  ;;  %6569 = vmatpush3.bf16.msra.mxu1 %v7451_v47 }
  0xf9   : > { %v1214_v36 = vsel %vm1190_vm2, %v676_v33, %v952_v35  ;;  %v985_v37 = vpop.permute.xlu1 %984 }
  0xfa   : > { %v1240_v38 = vsel %vm1224_vm3, %v1214_v36, %v985_v37 }
  0xfc   : > { %v1018_v39 = vpop.permute.xlu0 %1017 }
  0xfd   : > { %v1263_v40 = vsel %vm1247_vm4, %v1240_v38, %v1018_v39  ;;  %v1051_v41 = vpop.permute.xlu1 %1050 }
  0xfe   : > { %v1286_v42 = vsel %vm1270_vm5, %v1263_v40, %v1051_v41 }
 0x100   : > { %v1084_v43 = vpop.permute.xlu0 %1083 }
 0x101   : > { %v1309_v44 = vsel %vm1293_vm6, %v1286_v42, %v1084_v43  ;;  %v1117_v45 = vpop.permute.xlu1 %1116 }
 0x102   : > { %v1332_v48 = vsel %vm1316_vm7, %v1309_v44, %v1117_v45 }
 0x104   : > { %v1150_v32 = vpop.permute.xlu0 %1149 }
 0x105   : > { %v1355_v49 = vsel %vm1339_vm8, %v1332_v48, %v1150_v32  ;;  %v1183_v50 = vpop.permute.xlu1 %1182  ;;  %v7452_v48 = vld [vmem:[%s9922_s4 + $0x48] sm:$0xff]  }
 0x106   : > { %v1378_v53 = vsel %vm1362_vm9, %v1355_v49, %v1183_v50  ;;  %v7453_v32 = vld [vmem:[%s9922_s4 + $0x8] sm:$0xff]   ;;  %6570 = vmatprep.subr.bf16.mxu1 %v7452_v48  ;;  %v7454_v49 = vld [vmem:[%s9922_s4 + $0x50] sm:$0xff]  }
 0x107   : > { %7155 = vmatmul.mubr.msk.bf16.gmra.mrb[4].mxu1 %vm1412_vm10, %v1378_v53  ;;  %v7455_v50 = vld [vmem:[%s9922_s4 + $0x10] sm:$0xff]   ;;  %v7457_v53 = vld [vmem:[%s9922_s4 + $0x18] sm:$0xff]  }
 0x108   : > { %v954_v54 = vpop.permute.xlu0 %953  ;;  %7158 = vmatprep.mubr.msk.bf16.mxu1 %vm7580_vm1, %v9936_v0  ;;  %6571 = vmatpush3.bf16.msra.mxu1 %v7453_v32 }
 0x109   : > { %v1217_v55 = vsel %vm1190_vm2, %v677_v52, %v954_v54  ;;  %v987_v56 = vpop.permute.xlu1 %986  ;;  %6572 = vmatprep.subr.bf16.mxu1 %v7454_v49  ;;  %v7456_v52 = vld [vmem:[%s9922_s4 + $0x58] sm:$0xff]   ;;  %v7458_v54 = vld [vmem:[%s9922_s4 + $0x60] sm:$0xff]  }
 0x10a   : > { %v1242_v57 = vsel %vm1224_vm3, %v1217_v55, %v987_v56  ;;  %v7459_v55 = vld [vmem:[%s9922_s4 + $0x20] sm:$0xff]   ;;  %v7460_v56 = vld [vmem:[%s9922_s4 + $0x68] sm:$0xff]  }
 0x10c   : > { %v1020_v58 = vpop.permute.xlu0 %1019  ;;  %6573 = vmatpush3.bf16.msra.mxu1 %v7455_v50 }
 0x10d   : > { %v1265_v59 = vsel %vm1247_vm4, %v1242_v57, %v1020_v58  ;;  %v1053_v60 = vpop.permute.xlu1 %1052  ;;  %6574 = vmatprep.subr.bf16.mxu1 %v7456_v52  ;;  %v7461_v57 = vld [vmem:[%s9922_s4 + $0x28] sm:$0xff]   ;;  %v8237_v58 = vld [vmem:[%s9921_s3] ss:$0 sm:$0xff] }
 0x10e   : > { %v1288_v61 = vsel %vm1270_vm5, %v1265_v59, %v1053_v60  ;;  %v7462_v59 = vld [vmem:[%s9922_s4 + $0x70] sm:$0xff]  }
 0x10f   : > { %v7463_v60 = vld [vmem:[%s9922_s4 + $0x30] sm:$0xff]  }
 0x110   : > { %v1086_v62 = vpop.permute.xlu0 %1085  ;;  %6575 = vmatpush3.bf16.msra.mxu1 %v7457_v53 }
 0x111   : > { %v1311_v63 = vsel %vm1293_vm6, %v1288_v61, %v1086_v62  ;;  %v1119_v1 = vpop.permute.xlu1 %1118  ;;  %6576 = vmatprep.subr.bf16.mxu1 %v7458_v54 }
 0x112   : > { %v1334_v4 = vsel %vm1316_vm7, %v1311_v63, %v1119_v1 }
 0x114   : > { %v1152_v5 = vpop.permute.xlu0 %1151  ;;  %6577 = vmatpush3.bf16.msra.mxu1 %v7459_v55 }
 0x115   : > { %v1357_v51 = vsel %vm1339_vm8, %v1334_v4, %v1152_v5  ;;  %v1185_v6 = vpop.permute.xlu1 %1184  ;;  %6578 = vmatprep.subr.bf16.mxu1 %v7460_v56 }
 0x116   : > { %v1380_v8 = vsel %vm1362_vm9, %v1357_v51, %v1185_v6  ;;  %v7465_v6 = vld [vmem:[%s9922_s4 + $0x38] sm:$0xff]  }
 0x117   : > { %7159 = vmatmul.mubr.msk.bf16.gmra.mrb[8].mxu1 %vm1412_vm10, %v1380_v8 }
 0x118   : > { %v956_v9 = vpop.permute.xlu0 %955  ;;  %7162 = vmatprep.mubr.msk.bf16.mxu1 %vm7580_vm1, %v9936_v0  ;;  %6579 = vmatpush3.bf16.msra.mxu1 %v7461_v57 }
 0x119   : > { %v1220_v10 = vsel %vm1190_vm2, %v678_v7, %v956_v9  ;;  %v989_v11 = vpop.permute.xlu1 %988  ;;  %6580 = vmatprep.subr.bf16.mxu1 %v7462_v59 }
 0x11a   : > { %v1244_v12 = vsel %vm1224_vm3, %v1220_v10, %v989_v11  ;;  %v1660_v11 = vld [vmem:[#allocation2 + $0x3] sm:$0xff] }
 0x11c   : > { %v1022_v13 = vpop.permute.xlu0 %1021  ;;  %6581 = vmatpush3.bf16.msra.mxu1 %v7463_v60 }
 0x11d   : > { %v1267_v14 = vsel %vm1247_vm4, %v1244_v12, %v1022_v13  ;;  %v1055_v16 = vpop.permute.xlu1 %1054  ;;  %6582 = vmatprep.subr.bf16.mxu1 %v7464_v3 }
 0x11e   : > { %v1290_v17 = vsel %vm1270_vm5, %v1267_v14, %v1055_v16 }
 0x120   : > { %v1088_v18 = vpop.permute.xlu0 %1087  ;;  %6583 = vmatpush3.bf16.msra.mxu1 %v7465_v6 }
 0x121   : > { %v1313_v19 = vsel %vm1293_vm6, %v1290_v17, %v1088_v18  ;;  %v1121_v20 = vpop.permute.xlu1 %1120  ;;  %7170 = vmatprep.subr.bf16.mxu1 %v9936_v0 }
 0x122   : > { %v1336_v23 = vsel %vm1316_vm7, %v1313_v19, %v1121_v20 }
 0x124   : > { %v1154_v24 = vpop.permute.xlu0 %1153 }
 0x125   : > { %v1359_v25 = vsel %vm1339_vm8, %v1336_v23, %v1154_v24  ;;  %v1187_v26 = vpop.permute.xlu1 %1186 }
 0x126   : > { %v1382_v29 = vsel %vm1362_vm9, %v1359_v25, %v1187_v26 }
 0x127   : > { %7163 = vmatmul.mubr.msk.bf16.gmra.mrb[12].mxu1 %vm1412_vm10, %v1382_v29 }
 0x128   : > { %v958_v30 = vpop.permute.xlu0 %957  ;;  %7166 = vmatprep.mubr.msk.bf16.mxu1 %vm7580_vm1, %v9936_v0 }
 0x129   : > { %v1223_v31 = vsel %vm1190_vm2, %v679_v28, %v958_v30  ;;  %v991_v27 = vpop.permute.xlu1 %990  ;;  %v535_v28 = vld [vmem:[%s9919_s1 + $0xa0] sm:$0xff] }
 0x12a   : > { %v1246_v33 = vsel %vm1224_vm3, %v1223_v31, %v991_v27 }
 0x12c   : > { %v1024_v34 = vpop.permute.xlu0 %1023 }
 0x12d   : > { %v1269_v35 = vsel %vm1247_vm4, %v1246_v33, %v1024_v34  ;;  %v1057_v36 = vpop.permute.xlu1 %1056 }
 0x12e   : > { %v1292_v37 = vsel %vm1270_vm5, %v1269_v35, %v1057_v36 }
 0x130   : > { %v1090_v38 = vpop.permute.xlu0 %1089 }
 0x131   : > { %v1315_v39 = vsel %vm1293_vm6, %v1292_v37, %v1090_v38  ;;  %v1123_v40 = vpop.permute.xlu1 %1122 }
 0x132   : > { %v1338_v41 = vsel %vm1316_vm7, %v1315_v39, %v1123_v40 }
 0x134   : > { %v1156_v42 = vpop.permute.xlu0 %1155 }
 0x135   : > { %v1361_v43 = vsel %vm1339_vm8, %v1338_v41, %v1156_v42  ;;  %v1189_v44 = vpop.permute.xlu1 %1188 }
 0x136   : > { %v1384_v45 = vsel %vm1362_vm9, %v1361_v43, %v1189_v44 }
 0x137   : > { %7167 = vmatmul.mubr.msk.bf16.gmra.mrb[16].mxu1 %vm1412_vm10, %v1384_v45 }
 0x145   : > { %v8246_v2 = vpop.permute.xlu0 %539 }
 0x146   : > { %v8255_v7 = vpop.permute.xlu1 %544 }
 0x149   : > { %v8268_v26 = vpop.permute.xlu0 %554 }
 0x14a   : > { %v8264_v22 = vpop.permute.xlu1 %549 }
 0x14d   : > { %v8283_v46 = vpop.permute.xlu0 %564 }
 0x14e   : > { %v8279_v42 = vpop.permute.xlu1 %559 }
 0x16a   : > { %v1473_v61 = vpop.f32.mrb[0].mxu0 }
 0x16b   : > { %v1474_v62 = vadd.f32 %v8237_v58, %v1473_v61  ;;  %v7128_v63 = vpop.f32.mrb[1].mxu0 }
 0x16c   : > { %v1476_v1 = vpop.f32.mrb[2].mxu0 }
 0x16d   : > { %v1560_v4 = vmax.f32 %v1474_v62, 0.0  ;;  %v1477_v5 = vadd.f32 %v8237_v58, %v1476_v1  ;;  %v7129_v51 = vpop.f32.mrb[3].mxu0  ;;  %v8293_v1 = vpop.permute.xlu1 %569 }
 0x16f   : > { %v1561_v8 = vmax.f32 %v1477_v5, 0.0  ;;  %v1582_v9 = vmul.f32 %v1560_v4, %v8246_v2  ;;  %v8296_v5 = vpop.permute.xlu0 %574 }
 0x171   : > { %1604 = vst.msk [vmem:[#allocation2 + $0x10] sm:$0xff] %vm506_vm11, %v1582_v9  ;;  %v1583_v10 = vmul.f32 %v1561_v8, %v8255_v7 }
 0x173   : > { %1605 = vst.msk [vmem:[#allocation2 + $0x18] sm:$0xff] %vm506_vm11, %v1583_v10 }
 0x178   : > { %v1661_v12 = vld [vmem:[#allocation2 + $0xb] sm:$0xff] }
 0x179   : > { %v1682_v13 = vpack.c.bf16 %v1661_v12, %v1660_v11  ;;  %v1726_v16 = vld [vmem:[#allocation2 + $0xf] sm:$0xff] }
 0x17a   : > { %v1481_v14 = vpop.f32.mrb[4].mxu0  ;;  %v1727_v17 = vld [vmem:[#allocation2 + $0x17] sm:$0xff] }
 0x17b   : > { %v1482_v18 = vadd.f32 %v8237_v58, %v1481_v14  ;;  %1917 = vrot.lane.b32.xlu0 %v1682_v13, %s7589_s24  ;;  %v7132_v19 = vpop.f32.mrb[5].mxu0  ;;  %v1748_v20 = vpack.c.bf16 %v1727_v17, %v1726_v16  ;;  %v1662_v27 = vld [vmem:[#allocation2 + $0x13] sm:$0xff] }
 0x17c   : > { %v1484_v21 = vpop.f32.mrb[6].mxu0 }
 0x17d   : > { %v1562_v23 = vmax.f32 %v1482_v18, 0.0  ;;  %v1485_v24 = vadd.f32 %v8237_v58, %v1484_v21  ;;  %1950 = vrot.lane.b32.xlu1 %v1748_v20, %s7589_s24  ;;  %v7133_v25 = vpop.f32.mrb[7].mxu0  ;;  %v8305_v21 = vpop.permute.xlu1 %579 }
 0x17e   : > { %v8308_v25 = vpop.permute.xlu0 %584 }
 0x17f   : > { %v1563_v29 = vmax.f32 %v1485_v24, 0.0  ;;  %v1584_v30 = vmul.f32 %v1562_v23, %v8264_v22 }
 0x181   : > { %1606 = vst.msk [vmem:[#allocation2 + $0x20] sm:$0xff] %vm506_vm11, %v1584_v30  ;;  %v1585_v31 = vmul.f32 %v1563_v29, %v8268_v26  ;;  %639 = vperm.xlu1 %7414, %v535_v28  }
 0x183   : > { %1607 = vst.msk [vmem:[#allocation2 + $0x28] sm:$0xff] %vm506_vm11, %v1585_v31 }
 0x188   : > { %v1663_v33 = vld [vmem:[#allocation2 + $0x1b] sm:$0xff] }
 0x189   : > { %v1683_v34 = vpack.c.bf16 %v1663_v33, %v1662_v27  ;;  %v1728_v36 = vld [vmem:[#allocation2 + $0x1f] sm:$0xff] }
 0x18a   : > { %v1489_v35 = vpop.f32.mrb[8].mxu0  ;;  %v1729_v37 = vld [vmem:[#allocation2 + $0x27] sm:$0xff] }
 0x18b   : > { %v1490_v38 = vadd.f32 %v8237_v58, %v1489_v35  ;;  %1919 = vrot.lane.b32.xlu1 %v1683_v34, %s7589_s24  ;;  %v7136_v39 = vpop.f32.mrb[9].mxu0  ;;  %v1749_v40 = vpack.c.bf16 %v1729_v37, %v1728_v36  ;;  %v1664_v49 = vld [vmem:[#allocation2 + $0x23] sm:$0xff] }
 0x18c   : > { %v1492_v41 = vpop.f32.mrb[10].mxu0 }
 0x18d   : > { %v1564_v43 = vmax.f32 %v1490_v38, 0.0  ;;  %v1493_v44 = vadd.f32 %v8237_v58, %v1492_v41  ;;  %1952 = vrot.lane.b32.xlu0 %v1749_v40, %s7589_s24  ;;  %v7137_v45 = vpop.f32.mrb[11].mxu0 }
 0x18f   : > { %v1565_v47 = vmax.f32 %v1493_v44, 0.0  ;;  %v1586_v48 = vmul.f32 %v1564_v43, %v8279_v42  ;;  %v8317_v43 = vpop.permute.xlu1 %589 }
 0x191   : > { %1608 = vst.msk [vmem:[#allocation2 + $0x30] sm:$0xff] %vm506_vm11, %v1586_v48  ;;  %v1587_v32 = vmul.f32 %v1565_v47, %v8283_v46  ;;  %v8320_v47 = vpop.permute.xlu0 %594 }
 0x193   : > { %1609 = vst.msk [vmem:[#allocation2 + $0x38] sm:$0xff] %vm506_vm11, %v1587_v32 }
 0x198   : > { %v1665_v50 = vld [vmem:[#allocation2 + $0x2b] sm:$0xff] }
 0x199   : > { %v1684_v52 = vpack.c.bf16 %v1665_v50, %v1664_v49  ;;  %v1730_v54 = vld [vmem:[#allocation2 + $0x2f] sm:$0xff] }
 0x19a   : > { %v1497_v53 = vpop.f32.mrb[12].mxu0  ;;  %v1731_v55 = vld [vmem:[#allocation2 + $0x37] sm:$0xff] }
 0x19b   : > { %v1498_v56 = vadd.f32 %v8237_v58, %v1497_v53  ;;  %1921 = vrot.lane.b32.xlu1 %v1684_v52, %s7589_s24  ;;  %v7140_v57 = vpop.f32.mrb[13].mxu0  ;;  %v1750_v59 = vpack.c.bf16 %v1731_v55, %v1730_v54  ;;  %v1666_v6 = vld [vmem:[#allocation2 + $0x33] sm:$0xff] }
 0x19c   : > { %v1500_v60 = vpop.f32.mrb[14].mxu0 }
 0x19d   : > { %v1566_v61 = vmax.f32 %v1498_v56, 0.0  ;;  %v1501_v62 = vadd.f32 %v8237_v58, %v1500_v60  ;;  %1954 = vrot.lane.b32.xlu0 %v1750_v59, %s7589_s24  ;;  %v7141_v63 = vpop.f32.mrb[15].mxu0 }
 0x19e   : > { %v8329_v63 = vpop.permute.xlu1 %599 }
 0x19f   : > { %v1588_v3 = vmul.f32 %v1566_v61, %v8293_v1  ;;  %v1567_v4 = vmax.f32 %v1501_v62, 0.0 }
 0x1a1   : > { %1610 = vst.msk [vmem:[#allocation2 + $0x40] sm:$0xff] %vm506_vm11, %v1588_v3  ;;  %v1589_v51 = vmul.f32 %v1567_v4, %v8296_v5 }
 0x1a3   : > { %1611 = vst.msk [vmem:[#allocation2 + $0x48] sm:$0xff] %vm506_vm11, %v1589_v51  ;;  %v8332_v51 = vpop.permute.xlu0 %604 }
 0x1a8   : > { %v1667_v8 = vld [vmem:[#allocation2 + $0x3b] sm:$0xff] }
 0x1a9   : > { %v1685_v9 = vpack.c.bf16 %v1667_v8, %v1666_v6  ;;  %v1732_v11 = vld [vmem:[#allocation2 + $0x3f] sm:$0xff] }
 0x1aa   : > { %v1505_v10 = vpop.f32.mrb[16].mxu0  ;;  %v1733_v12 = vld [vmem:[#allocation2 + $0x47] sm:$0xff] }
 0x1ab   : > { %v1506_v13 = vadd.f32 %v8237_v58, %v1505_v10  ;;  %1923 = vrot.lane.b32.xlu1 %v1685_v9, %s7589_s24  ;;  %v7144_v14 = vpop.f32.mrb[17].mxu0  ;;  %v1751_v16 = vpack.c.bf16 %v1733_v12, %v1732_v11  ;;  %v1668_v29 = vld [vmem:[#allocation2 + $0x43] sm:$0xff] }
 0x1ac   : > { %v1508_v17 = vpop.f32.mrb[18].mxu0 }
 0x1ad   : > { %v1568_v18 = vmax.f32 %v1506_v13, 0.0  ;;  %v1509_v19 = vadd.f32 %v8237_v58, %v1508_v17  ;;  %1956 = vrot.lane.b32.xlu0 %v1751_v16, %s7589_s24  ;;  %v7145_v20 = vpop.f32.mrb[19].mxu0 }
 0x1af   : > { %v1590_v23 = vmul.f32 %v1568_v18, %v8305_v21  ;;  %v1569_v24 = vmax.f32 %v1509_v19, 0.0 }
 0x1b1   : > { %1612 = vst.msk [vmem:[#allocation2 + $0x50] sm:$0xff] %vm506_vm11, %v1590_v23  ;;  %v1591_v28 = vmul.f32 %v1569_v24, %v8308_v25  ;;  %v8341_v24 = vpop.permute.xlu1 %609 }
 0x1b3   : > { %1613 = vst.msk [vmem:[#allocation2 + $0x58] sm:$0xff] %vm506_vm11, %v1591_v28  ;;  %v8343_v28 = vpop.permute.xlu0 %614 }
 0x1b8   : > { %v1669_v30 = vld [vmem:[#allocation2 + $0x4b] sm:$0xff] }
 0x1b9   : > { %v1686_v31 = vpack.c.bf16 %v1669_v30, %v1668_v29  ;;  %v1734_v33 = vld [vmem:[#allocation2 + $0x4f] sm:$0xff] }
 0x1ba   : > { %v1513_v27 = vpop.f32.mrb[20].mxu0  ;;  %v1735_v34 = vld [vmem:[#allocation2 + $0x57] sm:$0xff] }
 0x1bb   : > { %v1514_v35 = vadd.f32 %v8237_v58, %v1513_v27  ;;  %1925 = vrot.lane.b32.xlu1 %v1686_v31, %s7589_s24  ;;  %v7148_v36 = vpop.f32.mrb[21].mxu0  ;;  %v1752_v37 = vpack.c.bf16 %v1735_v34, %v1734_v33  ;;  %v1670_v32 = vld [vmem:[#allocation2 + $0x53] sm:$0xff]  ;;  %v8349_v27 = vpop.permute.xlu0 %624 }
 0x1bc   : > { %v1516_v38 = vpop.f32.mrb[22].mxu0  ;;  %v8351_v33 = vpop.permute.xlu1 %619 }
 0x1bd   : > { %v1570_v39 = vmax.f32 %v1514_v35, 0.0  ;;  %v1517_v40 = vadd.f32 %v8237_v58, %v1516_v38  ;;  %1958 = vrot.lane.b32.xlu0 %v1752_v37, %s7589_s24  ;;  %v7149_v41 = vpop.f32.mrb[23].mxu0 }
 0x1bf   : > { %v1592_v44 = vmul.f32 %v1570_v39, %v8317_v43  ;;  %v1571_v45 = vmax.f32 %v1517_v40, 0.0  ;;  %v8353_v37 = vpop.permute.xlu0 %634 }
 0x1c0   : > { %v8355_v41 = vpop.permute.xlu1 %629 }
 0x1c1   : > { %1614 = vst.msk [vmem:[#allocation2 + $0x60] sm:$0xff] %vm506_vm11, %v1592_v44  ;;  %v1593_v48 = vmul.f32 %v1571_v45, %v8320_v47 }
 0x1c3   : > { %1615 = vst.msk [vmem:[#allocation2 + $0x68] sm:$0xff] %vm506_vm11, %v1593_v48 }
 0x1c8   : > { %v1671_v49 = vld [vmem:[#allocation2 + $0x5b] sm:$0xff] }
 0x1c9   : > { %v1687_v50 = vpack.c.bf16 %v1671_v49, %v1670_v32  ;;  %v1736_v53 = vld [vmem:[#allocation2 + $0x5f] sm:$0xff]  ;;  %v1694_v49 = vld [vmem:[#allocation2 + $0xc] sm:$0xff] }
 0x1ca   : > { %v1521_v52 = vpop.f32.mrb[0].mxu1  ;;  %v1737_v54 = vld [vmem:[#allocation2 + $0x67] sm:$0xff] }
 0x1cb   : > { %v1522_v55 = vadd.f32 %v8237_v58, %v1521_v52  ;;  %v7152_v56 = vpop.f32.mrb[1].mxu1  ;;  %1927 = vrot.lane.b32.xlu1 %v1687_v50, %s7589_s24  ;;  %v1753_v57 = vpack.c.bf16 %v1737_v54, %v1736_v53  ;;  %v1672_v8 = vld [vmem:[#allocation2 + $0x63] sm:$0xff] }
 0x1cc   : > { %v1524_v59 = vpop.f32.mrb[2].mxu1  ;;  %v1693_v32 = vld [vmem:[#allocation2 + $0x4] sm:$0xff] }
 0x1cd   : > { %v1572_v60 = vmax.f32 %v1522_v55, 0.0  ;;  %v1525_v61 = vadd.f32 %v8237_v58, %v1524_v59  ;;  %v7153_v62 = vpop.f32.mrb[3].mxu1  ;;  %1960 = vrot.lane.b32.xlu0 %v1753_v57, %s7589_s24  ;;  %v1627_v52 = vld [vmem:[#allocation2 + $0x2] sm:$0xff]  ;;  %v1628_v53 = vld [vmem:[#allocation2 + $0xa] sm:$0xff]  ;;  %v1715_v59 = vpack.c.bf16 %v1694_v49, %v1693_v32 }
 0x1ce   : > { %v1649_v62 = vpack.c.bf16 %v1628_v53, %v1627_v52  ;;  %v7471_v53 = vld [vmem:[%s9922_s4 + $0xd0] sm:$0xff]  }
 0x1cf   : > { %v1594_v3 = vmul.f32 %v1572_v60, %v8329_v63  ;;  %v1573_v4 = vmax.f32 %v1525_v61, 0.0 }
 0x1d1   : > { %1616 = vst.msk [vmem:[#allocation2 + $0x70] sm:$0xff] %vm506_vm11, %v1594_v3  ;;  %v1595_v6 = vmul.f32 %v1573_v4, %v8332_v51 }
 0x1d3   : > { %1617 = vst.msk [vmem:[#allocation2 + $0x78] sm:$0xff] %vm506_vm11, %v1595_v6 }
 0x1d8   : > { %v1673_v9 = vld [vmem:[#allocation2 + $0x6b] sm:$0xff] }
 0x1d9   : > { %v1688_v10 = vpack.c.bf16 %v1673_v9, %v1672_v8  ;;  %v1738_v12 = vld [vmem:[#allocation2 + $0x6f] sm:$0xff]  ;;  %v7466_v9 = vld [vmem:[%s9922_s4 + $0x100] sm:$0xff]  }
 0x1da   : > { %v1529_v11 = vpop.f32.mrb[4].mxu1  ;;  %v1739_v13 = vld [vmem:[#allocation2 + $0x77] sm:$0xff] }
 0x1db   : > { %v1530_v14 = vadd.f32 %v8237_v58, %v1529_v11  ;;  %v7156_v16 = vpop.f32.mrb[5].mxu1  ;;  %1929 = vrot.lane.b32.xlu1 %v1688_v10, %s7589_s24  ;;  %v1754_v17 = vpack.c.bf16 %v1739_v13, %v1738_v12  ;;  %v1674_v34 = vld [vmem:[#allocation2 + $0x73] sm:$0xff]  ;;  %v7467_v10 = vld [vmem:[%s9922_s4 + $0xc0] sm:$0xff]  }
 0x1dc   : > { %v1532_v18 = vpop.f32.mrb[6].mxu1  ;;  %v7468_v11 = vld [vmem:[%s9922_s4 + $0x80] sm:$0xff]   ;;  %6650 = vmatprep.subr.bf16.mxu0 %v7467_v10 }
 0x1dd   : > { %v1574_v19 = vmax.f32 %v1530_v14, 0.0  ;;  %v1533_v20 = vadd.f32 %v8237_v58, %v1532_v18  ;;  %v7157_v23 = vpop.f32.mrb[7].mxu1  ;;  %1962 = vrot.lane.b32.xlu0 %v1754_v17, %s7589_s24  ;;  %6651 = vmatpush3.bf16.msra.mxu0 %v7468_v11 }
 0x1df   : > { %v1596_v29 = vmul.f32 %v1574_v19, %v8341_v24  ;;  %v1575_v30 = vmax.f32 %v1533_v20, 0.0 }
 0x1e1   : > { %1618 = vst.msk [vmem:[#allocation2 + $0x80] sm:$0xff] %vm506_vm11, %v1596_v29  ;;  %v1597_v31 = vmul.f32 %v1575_v30, %v8343_v28  ;;  %v8379_v29 = vld [vmem:[#allocation2 + $0x1c] sm:$0xff] }
 0x1e3   : > { %1619 = vst.msk [vmem:[#allocation2 + $0x88] sm:$0xff] %vm506_vm11, %v1597_v31 }
 0x1e8   : > { %v1675_v35 = vld [vmem:[#allocation2 + $0x7b] sm:$0xff] }
 0x1e9   : > { %v1689_v36 = vpack.c.bf16 %v1675_v35, %v1674_v34  ;;  %v1740_v39 = vld [vmem:[#allocation2 + $0x7f] sm:$0xff] }
 0x1ea   : > { %v1537_v38 = vpop.f32.mrb[8].mxu1  ;;  %v1741_v40 = vld [vmem:[#allocation2 + $0x87] sm:$0xff] }
 0x1eb   : > { %v1538_v44 = vadd.f32 %v8237_v58, %v1537_v38  ;;  %v7160_v45 = vpop.f32.mrb[9].mxu1  ;;  %1931 = vrot.lane.b32.xlu1 %v1689_v36, %s7589_s24  ;;  %v1755_v48 = vpack.c.bf16 %v1741_v40, %v1740_v39  ;;  %v1676_v12 = vld [vmem:[#allocation2 + $0x83] sm:$0xff]  ;;  %v1695_v36 = vld [vmem:[#allocation2 + $0x14] sm:$0xff] }
 0x1ec   : > { %v1540_v50 = vpop.f32.mrb[10].mxu1  ;;  %v7469_v38 = vld [vmem:[%s9922_s4 + $0xc8] sm:$0xff]   ;;  %v1716_v40 = vpack.c.bf16 %v8379_v29, %v1695_v36 }
 0x1ed   : > { %v1576_v54 = vmax.f32 %v1538_v44, 0.0  ;;  %v1541_v55 = vadd.f32 %v8237_v58, %v1540_v50  ;;  %v7161_v56 = vpop.f32.mrb[11].mxu1  ;;  %1964 = vrot.lane.b32.xlu0 %v1755_v48, %s7589_s24  ;;  %v1918_v57 = vpop.permute.xlu0 %1917  ;;  %v7470_v39 = vld [vmem:[%s9922_s4 + $0x88] sm:$0xff]   ;;  %6652 = vmatprep.subr.bf16.mxu0 %v7469_v38  ;;  %v1630_v50 = vld [vmem:[#allocation2 + $0x1a] sm:$0xff] }
 0x1ee   : > { %v2040_v8 = vsel %vm506_vm11, %v1649_v62, %v1918_v57  ;;  %6653 = vmatpush3.bf16.msra.mxu0 %v7470_v39  ;;  %v7473_v56 = vld [vmem:[%s9922_s4 + $0xd8] sm:$0xff]   ;;  %v536_v36 = vld [vmem:[%s9919_s1 + $0xa8] sm:$0x1] }
 0x1ef   : > { %v1598_v60 = vmul.f32 %v1576_v54, %v8351_v33  ;;  %v1577_v61 = vmax.f32 %v1541_v55, 0.0  ;;  %v1951_v3 = vpop.permute.xlu1 %1950  ;;  %v1629_v54 = vld [vmem:[#allocation2 + $0x12] sm:$0xff]  ;;  %6654 = vmatprep.subr.bf16.mxu0 %v7471_v53  ;;  %v1631_v38 = vld [vmem:[#allocation2 + $0x22] sm:$0xff] }
 0x1f0   : > { %v2084_v4 = vsel %vm506_vm11, %v1715_v59, %v1951_v3  ;;  %v7472_v55 = vld [vmem:[%s9922_s4 + $0x90] sm:$0xff]   ;;  %v1650_v57 = vpack.c.bf16 %v1630_v50, %v1629_v54  ;;  %v7477_v59 = vld [vmem:[%s9922_s4 + $0x108] sm:$0xff]   ;;  %v7475_v3 = vld [vmem:[%s9922_s4 + $0xe0] sm:$0xff]  }
 0x1f1   : > { %1620 = vst.msk [vmem:[#allocation2 + $0x90] sm:$0xff] %vm506_vm11, %v1598_v60  ;;  %v1599_v6 = vmul.f32 %v1577_v61, %v8349_v27  ;;  %2574 = vmatprep.mubr.bf16.mxu1 %v2084_v4  ;;  %v7474_v61 = vld [vmem:[%s9922_s4 + $0x98] sm:$0xff]   ;;  %v7480_v53 = vld [vmem:[%s9922_s4 + $0xf0] sm:$0xff]  }
 0x1f2   : > { %2575 = vmatmul.mubr.bf16.vlgmr.msra.gmra.mrb[20].mxu1 %v2040_v8  ;;  %6655 = vmatpush3.bf16.msra.mxu0 %v7472_v55  ;;  %v7476_v8 = vld [vmem:[%s9922_s4 + $0xa0] sm:$0xff]   ;;  %v7481_v55 = vld [vmem:[%s9922_s4 + $0xb0] sm:$0xff]  }
 0x1f3   : > { %1621 = vst.msk [vmem:[#allocation2 + $0x98] sm:$0xff] %vm506_vm11, %v1599_v6  ;;  %7171 = vmatpush3.bf16.msra.mxu1 %v7466_v9  ;;  %6656 = vmatprep.subr.bf16.mxu0 %v7473_v56  ;;  %v1793_v56 = vld [vmem:[#allocation2 + $0x19] sm:$0xff] }
 0x1f4   : > { %7172 = vmatprep.subr.bf16.mxu1 %v9936_v0 }
 0x1f6   : > { %6657 = vmatpush3.bf16.msra.mxu0 %v7474_v61  ;;  %v7484_v61 = vld [vmem:[%s9922_s4 + $0x110] sm:$0xff]  }
 0x1f7   : > { %7173 = vmatpush3.bf16.msra.mxu1 %v7477_v59  ;;  %6658 = vmatprep.subr.bf16.mxu0 %v7475_v3  ;;  %v7482_v59 = vld [vmem:[%s9922_s4 + $0xf8] sm:$0xff]  }
 0x1f8   : > { %v1677_v13 = vld [vmem:[#allocation2 + $0x8b] sm:$0xff]  ;;  %7174 = vmatprep.subr.bf16.mxu1 %v9936_v0 }
 0x1f9   : > { %v1690_v14 = vpack.c.bf16 %v1677_v13, %v1676_v12  ;;  %v1742_v17 = vld [vmem:[#allocation2 + $0x8f] sm:$0xff] }
 0x1fa   : > { %v1545_v16 = vpop.f32.mrb[12].mxu1  ;;  %v1743_v18 = vld [vmem:[#allocation2 + $0x97] sm:$0xff]  ;;  %6659 = vmatpush3.bf16.msra.mxu0 %v7476_v8 }
 0x1fb   : > { %v1546_v19 = vadd.f32 %v8237_v58, %v1545_v16  ;;  %v7164_v20 = vpop.f32.mrb[13].mxu1  ;;  %1933 = vrot.lane.b32.xlu1 %v1690_v14, %s7589_s24  ;;  %v1756_v23 = vpack.c.bf16 %v1743_v18, %v1742_v17  ;;  %v1678_v4 = vld [vmem:[#allocation2 + $0x93] sm:$0xff]  ;;  %v1632_v18 = vld [vmem:[#allocation2 + $0x2a] sm:$0xff]  ;;  %7175 = vmatpush3.bf16.msra.mxu1 %v7484_v61 }
 0x1fc   : > { %v1548_v30 = vpop.f32.mrb[14].mxu1  ;;  %v8422_v16 = vld [vmem:[#allocation2 + $0x2c] sm:$0xff]  ;;  %7176 = vmatprep.subr.bf16.mxu1 %v9936_v0  ;;  %v1847_v61 = vld [vmem:[#allocation2 + $0x55] sm:$0xff] }
 0x1fd   : > { %v1578_v31 = vmax.f32 %v1546_v19, 0.0  ;;  %v1549_v34 = vadd.f32 %v8237_v58, %v1548_v30  ;;  %v7165_v35 = vpop.f32.mrb[15].mxu1  ;;  %1966 = vrot.lane.b32.xlu0 %v1756_v23, %s7589_s24  ;;  %v8427_v23 = vld [vmem:[#allocation2 + $0x24] sm:$0xff] }
 0x1fe   : > { %v1717_v35 = vpack.c.bf16 %v8422_v16, %v8427_v23 }
 0x1ff   : > { %v1600_v44 = vmul.f32 %v1578_v31, %v8355_v41  ;;  %v1579_v45 = vmax.f32 %v1549_v34, 0.0  ;;  %v1953_v48 = vpop.permute.xlu0 %1952  ;;  %v7478_v31 = vld [vmem:[%s9922_s4 + $0xe8] sm:$0xff]  }
 0x200   : > { %v8391_v32 = vpop.permute.xlu1 %639  ;;  %v2088_v49 = vsel %vm506_vm11, %v1716_v40, %v1953_v48  ;;  %6660 = vmatprep.subr.bf16.mxu0 %v7478_v31 }
 0x201   : > { %1622 = vst.msk [vmem:[#allocation2 + $0xa0] sm:$0xff] %vm506_vm11, %v1600_v44  ;;  %v1601_v52 = vmul.f32 %v1579_v45, %v8353_v37  ;;  %2582 = vmatprep.mubr.bf16.mxu1 %v2088_v49  ;;  %v1651_v44 = vpack.c.bf16 %v1632_v18, %v1631_v38  ;;  %v7479_v45 = vld [vmem:[%s9922_s4 + $0xa8] sm:$0xff]   ;;  %v1634_v18 = vld [vmem:[#allocation2 + $0x3a] sm:$0xff] }
 0x202   : > { %6661 = vmatpush3.bf16.msra.mxu0 %v7479_v45  ;;  %v1843_v38 = vld [vmem:[#allocation2 + $0x35] sm:$0xff] }
 0x203   : > { %1623 = vst.msk [vmem:[#allocation2 + $0xa8] sm:$0xff] %vm506_vm11, %v1601_v52  ;;  %6662 = vmatprep.subr.bf16.mxu0 %v7480_v53  ;;  %v1798_v53 = vld [vmem:[#allocation2 + $0x41] sm:$0xff] }
 0x204   : > { %v1920_v60 = vpop.permute.xlu1 %1919 }
 0x205   : > { %v2044_v62 = vsel %vm506_vm11, %v1650_v57, %v1920_v60  ;;  %v1792_v57 = vld [vmem:[#allocation2 + $0x11] sm:$0xff] }
 0x206   : > { %2583 = vmatmul.mubr.bf16.gmra.mrb[24].mxu1 %v2044_v62  ;;  %6663 = vmatpush3.bf16.msra.mxu0 %v7481_v55  ;;  %v7483_v60 = vld [vmem:[%s9922_s4 + $0xb8] sm:$0xff]   ;;  %v1814_v62 = vpack.c.bf16 %v1793_v56, %v1792_v57 }
 0x207   : > { %6664 = vmatprep.subr.bf16.mxu0 %v7482_v59  ;;  %v1844_v56 = vld [vmem:[#allocation2 + $0x3d] sm:$0xff] }
 0x208   : > { %v1679_v6 = vld [vmem:[#allocation2 + $0x9b] sm:$0xff] }
 0x209   : > { %v1691_v9 = vpack.c.bf16 %v1679_v6, %v1678_v4  ;;  %v1744_v11 = vld [vmem:[#allocation2 + $0x9f] sm:$0xff]  ;;  %v1795_v6 = vld [vmem:[#allocation2 + $0x29] sm:$0xff] }
 0x20a   : > { %v1553_v10 = vpop.f32.mrb[16].mxu1  ;;  %v1745_v12 = vld [vmem:[#allocation2 + $0xa7] sm:$0xff]  ;;  %6665 = vmatpush3.bf16.msra.mxu0 %v7483_v60  ;;  %v1801_v57 = vld [vmem:[#allocation2 + $0x59] sm:$0xff]  ;;  %v1800_v60 = vld [vmem:[#allocation2 + $0x51] sm:$0xff] }
 0x20b   : > { %v1554_v13 = vadd.f32 %v8237_v58, %v1553_v10  ;;  %1935 = vrot.lane.b32.xlu1 %v1691_v9, %s7589_s24  ;;  %v1757_v14 = vpack.c.bf16 %v1745_v12, %v1744_v11  ;;  %v7168_v17 = vpop.f32.mrb[17].mxu1  ;;  %v1680_v49 = vld [vmem:[#allocation2 + $0xa3] sm:$0xff]  ;;  %v1681_v50 = vld [vmem:[#allocation2 + $0xab] sm:$0x1] }
 0x20c   : > { %v8424_v19 = vpop.f32.mrb[18].mxu1  ;;  %v1692_v54 = vpack.c.bf16 %v1681_v50, %v1680_v49  ;;  %v1794_v9 = vld [vmem:[#allocation2 + $0x21] sm:$0xff]  ;;  %v1797_v17 = vld [vmem:[#allocation2 + $0x39] sm:$0xff]  ;;  %v1799_v49 = vld [vmem:[#allocation2 + $0x49] sm:$0xff] }
 0x20d   : > { %v1580_v20 = vmax.f32 %v1554_v13, 0.0  ;;  %1968 = vrot.lane.b32.xlu0 %v1757_v14, %s7589_s24  ;;  %v7169_v30 = vpop.f32.mrb[19].mxu1  ;;  %v1922_v34 = vpop.permute.xlu1 %1921  ;;  %v1841_v10 = vld [vmem:[#allocation2 + $0x25] sm:$0xff]  ;;  %v1815_v11 = vpack.c.bf16 %v1795_v6, %v1794_v9  ;;  %v8463_v12 = vld [vmem:[#allocation2 + $0x3c] sm:$0xff]  ;;  %v1817_v55 = vpack.c.bf16 %v1799_v49, %v1798_v53 }
 0x20e   : > { %v2048_v52 = vsel %vm506_vm11, %v1651_v44, %v1922_v34  ;;  %v7485_v13 = vld [vmem:[%s9922_s4 + $0x118] sm:$0xff]   ;;  %v1849_v9 = vld [vmem:[#allocation2 + $0x65] sm:$0xff] }
 0x20f   : > { %v1602_v39 = vmul.f32 %v1580_v20, %v8391_v32  ;;  %v1955_v40 = vpop.permute.xlu0 %1954  ;;  %v1840_v14 = vld [vmem:[#allocation2 + $0x1d] sm:$0xff]  ;;  %v8469_v30 = vld [vmem:[#allocation2 + $0x34] sm:$0xff]  ;;  %7177 = vmatpush3.bf16.msra.mxu1 %v7485_v13  ;;  %v1807_v49 = vld [vmem:[#allocation2 + $0x89] sm:$0xff] }
 0x210   : > { %v2092_v48 = vsel %vm506_vm11, %v1717_v35, %v1955_v40  ;;  %v1862_v20 = vpack.c.bf16 %v1841_v10, %v1840_v14  ;;  %v1718_v34 = vpack.c.bf16 %v8463_v12, %v8469_v30  ;;  %v1796_v35 = vld [vmem:[#allocation2 + $0x31] sm:$0xff]  ;;  %v1848_v13 = vld [vmem:[#allocation2 + $0x5d] sm:$0xff] }
 0x211   : > { %1624 = vst.msk [vmem:[#allocation2 + $0xb0] sm:$0xff] %vm506_vm11, %v1602_v39  ;;  %2590 = vmatprep.mubr.bf16.mxu1 %v2092_v48  ;;  %644 = vperm.xlu0 %7413, %v536_v36   ;;  %v1633_v36 = vld [vmem:[#allocation2 + $0x32] sm:$0xff]  ;;  %v1816_v40 = vpack.c.bf16 %v1797_v17, %v1796_v35  ;;  %v1636_v17 = vld [vmem:[#allocation2 + $0x4a] sm:$0xff]  ;;  %v1806_v53 = vld [vmem:[#allocation2 + $0x81] sm:$0xff] }
 0x212   : > { %2591 = vmatmul.mubr.bf16.gmra.mrb[28].mxu1 %v2048_v52  ;;  %v1652_v44 = vpack.c.bf16 %v1634_v18, %v1633_v36  ;;  %v1842_v48 = vld [vmem:[#allocation2 + $0x2d] sm:$0xff]  ;;  %v1805_v14 = vld [vmem:[#allocation2 + $0x79] sm:$0xff]  ;;  %v1866_v18 = vpack.c.bf16 %v1849_v9, %v1848_v13  ;;  %v1635_v36 = vld [vmem:[#allocation2 + $0x42] sm:$0xff] }
 0x213   : > { %v1863_v52 = vpack.c.bf16 %v1843_v38, %v1842_v48  ;;  %v1804_v35 = vld [vmem:[#allocation2 + $0x71] sm:$0xff]  ;;  %v1857_v9 = vld [vmem:[#allocation2 + $0xa5] sm:$0xff]  ;;  %v8498_v13 = vld [vmem:[#allocation2 + $0x5c] sm:$0xff] }
 0x214   : > { %v1851_v38 = vld [vmem:[#allocation2 + $0x75] sm:$0xff]  ;;  %v1850_v48 = vld [vmem:[#allocation2 + $0x6d] sm:$0xff] }
 0x215   : > { %1937 = vrot.lane.b32.xlu0 %v1692_v54, %s7589_s24  ;;  %v1845_v54 = vld [vmem:[#allocation2 + $0x45] sm:$0xff] }
 0x216   : > { %v1864_v59 = vpack.c.bf16 %v1845_v54, %v1844_v56  ;;  %v1853_v54 = vld [vmem:[#allocation2 + $0x85] sm:$0xff]  ;;  %v1852_v56 = vld [vmem:[#allocation2 + $0x7d] sm:$0xff] }
 0x218   : > { %v1746_v3 = vld [vmem:[#allocation2 + $0xaf] sm:$0xff]  ;;  %v1747_v4 = vld [vmem:[#allocation2 + $0xb7] sm:$0x1] }
 0x219   : > { %1983 = vrot.lane.b32.xlu0 %v1814_v62, %s7589_s24  ;;  %v1758_v8 = vpack.c.bf16 %v1747_v4, %v1746_v3  ;;  %v1818_v62 = vpack.c.bf16 %v1801_v57, %v1800_v60  ;;  %v1846_v3 = vld [vmem:[#allocation2 + $0x4d] sm:$0xff]  ;;  %v1809_v57 = vld [vmem:[#allocation2 + $0x99] sm:$0xff] }
 0x21a   : > { %v1803_v4 = vld [vmem:[#allocation2 + $0x69] sm:$0xff]  ;;  %v1865_v6 = vpack.c.bf16 %v1847_v61, %v1846_v3  ;;  %v1808_v60 = vld [vmem:[#allocation2 + $0x91] sm:$0xff] }
 0x21b   : > { %1970 = vrot.lane.b32.xlu1 %v1758_v8, %s7589_s24  ;;  %v1802_v8 = vld [vmem:[#allocation2 + $0x61] sm:$0xff]  ;;  %v1855_v61 = vld [vmem:[#allocation2 + $0x95] sm:$0xff]  ;;  %v1854_v3 = vld [vmem:[#allocation2 + $0x8d] sm:$0xff] }
 0x21c   : > { %v1819_v10 = vpack.c.bf16 %v1803_v4, %v1802_v8  ;;  %v1811_v4 = vld [vmem:[#allocation2 + $0xa9] sm:$0xff]  ;;  %v1810_v8 = vld [vmem:[#allocation2 + $0xa1] sm:$0xff] }
 0x21d   : > { %1985 = vrot.lane.b32.xlu0 %v1815_v11, %s7589_s24  ;;  %v1924_v31 = vpop.permute.xlu1 %1923  ;;  %v8482_v11 = vld [vmem:[#allocation2 + $0x4c] sm:$0xff] }
 0x21e   : > { %v2052_v50 = vsel %vm506_vm11, %v1652_v44, %v1924_v31  ;;  %v1653_v44 = vpack.c.bf16 %v1636_v17, %v1635_v36  ;;  %v1638_v17 = vld [vmem:[#allocation2 + $0x5a] sm:$0xff]  ;;  %v1637_v36 = vld [vmem:[#allocation2 + $0x52] sm:$0xff] }
 0x21f   : > { %v1957_v39 = vpop.permute.xlu0 %1956  ;;  %2016 = vrot.lane.b32.xlu1 %v1862_v20, %s7589_s24  ;;  %v8485_v20 = vld [vmem:[#allocation2 + $0x44] sm:$0xff] }
 0x220   : > { %v2096_v45 = vsel %vm506_vm11, %v1718_v34, %v1957_v39  ;;  %v1719_v34 = vpack.c.bf16 %v8482_v11, %v8485_v20 }
 0x221   : > { %2598 = vmatprep.mubr.bf16.mxu1 %v2096_v45  ;;  %1987 = vrot.lane.b32.xlu0 %v1816_v40, %s7589_s24  ;;  %v1820_v40 = vpack.c.bf16 %v1805_v14, %v1804_v35  ;;  %v1856_v14 = vld [vmem:[#allocation2 + $0x9d] sm:$0xff] }
 0x222   : > { %2599 = vmatmul.mubr.bf16.gmra.mrb[32].mxu1 %v2052_v50 }
 0x223   : > { %2018 = vrot.lane.b32.xlu1 %v1863_v52, %s7589_s24  ;;  %v1867_v52 = vpack.c.bf16 %v1851_v38, %v1850_v48  ;;  %v1640_v48 = vld [vmem:[#allocation2 + $0x6a] sm:$0xff] }
 0x225   : > { %1989 = vrot.lane.b32.xlu0 %v1817_v55, %s7589_s24  ;;  %v1821_v55 = vpack.c.bf16 %v1807_v49, %v1806_v53  ;;  %v8510_v49 = vld [vmem:[#allocation2 + $0x64] sm:$0xff] }
 0x226   : > { %v1639_v53 = vld [vmem:[#allocation2 + $0x62] sm:$0xff] }
 0x227   : > { %2020 = vrot.lane.b32.xlu1 %v1864_v59, %s7589_s24  ;;  %v1868_v59 = vpack.c.bf16 %v1853_v54, %v1852_v56 }
 0x229   : > { %1991 = vrot.lane.b32.xlu0 %v1818_v62, %s7589_s24  ;;  %v1822_v62 = vpack.c.bf16 %v1809_v57, %v1808_v60  ;;  %v1642_v60 = vld [vmem:[#allocation2 + $0x7a] sm:$0xff] }
 0x22b   : > { %2022 = vrot.lane.b32.xlu1 %v1865_v6, %s7589_s24  ;;  %v1869_v6 = vpack.c.bf16 %v1855_v61, %v1854_v3  ;;  %v8518_v61 = vld [vmem:[#allocation2 + $0x74] sm:$0xff] }
 0x22d   : > { %1993 = vrot.lane.b32.xlu0 %v1819_v10, %s7589_s24  ;;  %v1926_v31 = vpop.permute.xlu1 %1925  ;;  %v1823_v10 = vpack.c.bf16 %v1811_v4, %v1810_v8  ;;  %v1641_v4 = vld [vmem:[#allocation2 + $0x72] sm:$0xff] }
 0x22e   : > { %v2056_v50 = vsel %vm506_vm11, %v1653_v44, %v1926_v31  ;;  %v8501_v31 = vld [vmem:[#allocation2 + $0x54] sm:$0xff]  ;;  %v1656_v8 = vpack.c.bf16 %v1642_v60, %v1641_v4  ;;  %v1714_v4 = vld [vmem:[#allocation2 + $0xac] sm:$0x1] }
 0x22f   : > { %v1959_v39 = vpop.permute.xlu0 %1958  ;;  %2024 = vrot.lane.b32.xlu1 %v1866_v18, %s7589_s24  ;;  %v1870_v18 = vpack.c.bf16 %v1857_v9, %v1856_v14  ;;  %v1720_v35 = vpack.c.bf16 %v8498_v13, %v8501_v31  ;;  %v8524_v14 = vld [vmem:[#allocation2 + $0x8c] sm:$0xff] }
 0x230   : > { %v2100_v45 = vsel %vm506_vm11, %v1719_v34, %v1959_v39  ;;  %v1654_v39 = vpack.c.bf16 %v1638_v17, %v1637_v36  ;;  %v1644_v17 = vld [vmem:[#allocation2 + $0x8a] sm:$0xff]  ;;  %v1643_v36 = vld [vmem:[#allocation2 + $0x82] sm:$0xff] }
 0x231   : > { %2606 = vmatprep.mubr.bf16.mxu1 %v2100_v45  ;;  %1995 = vrot.lane.b32.xlu0 %v1820_v40, %s7589_s24  ;;  %v8508_v45 = vld [vmem:[#allocation2 + $0x6c] sm:$0xff] }
 0x232   : > { %2607 = vmatmul.mubr.bf16.gmra.mrb[36].mxu1 %v2056_v50 }
 0x233   : > { %2026 = vrot.lane.b32.xlu1 %v1867_v52, %s7589_s24  ;;  %v1721_v52 = vpack.c.bf16 %v8508_v45, %v8510_v49 }
 0x235   : > { %1997 = vrot.lane.b32.xlu0 %v1821_v55, %s7589_s24  ;;  %v1655_v55 = vpack.c.bf16 %v1640_v48, %v1639_v53  ;;  %v8532_v48 = vld [vmem:[#allocation2 + $0x9c] sm:$0xff] }
 0x237   : > { %2028 = vrot.lane.b32.xlu1 %v1868_v59, %s7589_s24  ;;  %v8516_v59 = vld [vmem:[#allocation2 + $0x7c] sm:$0xff] }
 0x238   : > { %v1722_v3 = vpack.c.bf16 %v8516_v59, %v8518_v61 }
 0x239   : > { %1999 = vrot.lane.b32.xlu0 %v1822_v62, %s7589_s24 }
 0x23b   : > { %2030 = vrot.lane.b32.xlu1 %v1869_v6, %s7589_s24 }
 0x23d   : > { %2001 = vrot.lane.b32.xlu0 %v1823_v10, %s7589_s24  ;;  %v1928_v34 = vpop.permute.xlu1 %1927 }
 0x23e   : > { %v2060_v44 = vsel %vm506_vm11, %v1654_v39, %v1928_v34  ;;  %v1657_v39 = vpack.c.bf16 %v1644_v17, %v1643_v36  ;;  %v1647_v36 = vld [vmem:[#allocation2 + $0xa2] sm:$0xff] }
 0x23f   : > { %v1961_v38 = vpop.permute.xlu0 %1960  ;;  %2032 = vrot.lane.b32.xlu1 %v1870_v18, %s7589_s24  ;;  %v8526_v18 = vld [vmem:[#allocation2 + $0x84] sm:$0xff] }
 0x240   : > { %v2104_v40 = vsel %vm506_vm11, %v1720_v35, %v1961_v38  ;;  %v1723_v35 = vpack.c.bf16 %v8524_v14, %v8526_v18 }
 0x241   : > { %2614 = vmatprep.mubr.bf16.mxu1 %v2104_v40 }
 0x242   : > { %2615 = vmatmul.mubr.bf16.gmra.mrb[40].mxu1 %v2060_v44 }
 0x24d   : > { %v1930_v50 = vpop.permute.xlu1 %1929 }
 0x24e   : > { %v2064_v57 = vsel %vm506_vm11, %v1655_v55, %v1930_v50  ;;  %v1646_v50 = vld [vmem:[#allocation2 + $0x9a] sm:$0xff]  ;;  %v1645_v55 = vld [vmem:[#allocation2 + $0x92] sm:$0xff] }
 0x24f   : > { %v1963_v54 = vpop.permute.xlu0 %1962 }
 0x250   : > { %v2108_v56 = vsel %vm506_vm11, %v1721_v52, %v1963_v54  ;;  %v8534_v52 = vld [vmem:[#allocation2 + $0x94] sm:$0xff] }
 0x251   : > { %2622 = vmatprep.mubr.bf16.mxu1 %v2108_v56  ;;  %v1724_v54 = vpack.c.bf16 %v8532_v48, %v8534_v52 }
 0x252   : > { %2623 = vmatmul.mubr.bf16.gmra.mrb[44].mxu1 %v2064_v57  ;;  %v1658_v57 = vpack.c.bf16 %v1646_v50, %v1645_v55  ;;  %v1760_v50 = vld [vmem:[#allocation2 + $0x18] sm:$0xff] }
 0x25d   : > { %v1932_v62 = vpop.permute.xlu1 %1931 }
 0x25e   : > { %v2068_v10 = vsel %vm506_vm11, %v1656_v8, %v1932_v62 }
 0x25f   : > { %v1965_v6 = vpop.permute.xlu0 %1964 }
 0x260   : > { %v2112_v9 = vsel %vm506_vm11, %v1722_v3, %v1965_v6  ;;  %v8540_v3 = vld [vmem:[#allocation2 + $0xa4] sm:$0xff]  ;;  %v1557_v6 = vadd.f32 %v8237_v58, %v8424_v19 }
 0x261   : > { %2630 = vmatprep.mubr.bf16.mxu1 %v2112_v9  ;;  %v1725_v8 = vpack.c.bf16 %v1714_v4, %v8540_v3  ;;  %v1874_v4 = vld [vmem:[#allocation2 + $0x26] sm:$0xff] }
 0x262   : > { %2631 = vmatmul.mubr.bf16.gmra.mrb[48].mxu1 %v2068_v10  ;;  %v1581_v17 = vmax.f32 %v1557_v6, 0.0  ;;  %v1860_v6 = vld [vmem:[#allocation2 + $0xbd] sm:$0xff] }
 0x26d   : > { %v1934_v34 = vpop.permute.xlu1 %1933 }
 0x26e   : > { %v2072_v44 = vsel %vm506_vm11, %v1657_v39, %v1934_v34 }
 0x26f   : > { %v1967_v38 = vpop.permute.xlu0 %1966 }
 0x270   : > { %v2116_v40 = vsel %vm506_vm11, %v1723_v35, %v1967_v38  ;;  %v1829_v35 = vpack.c.bf16 %v8427_v23, %v8379_v29  ;;  %v1648_v38 = vld [vmem:[#allocation2 + $0xaa] sm:$0x1]  ;;  %v1830_v23 = vpack.c.bf16 %v8469_v30, %v8422_v16 }
 0x271   : > { %2638 = vmatprep.mubr.bf16.mxu1 %v2116_v40  ;;  %v1659_v19 = vpack.c.bf16 %v1648_v38, %v1647_v36  ;;  %v1873_v38 = vld [vmem:[#allocation2 + $0x1e] sm:$0xff] }
 0x272   : > { %2639 = vmatmul.mubr.bf16.gmra.mrb[52].mxu1 %v2072_v44 }
 0x27d   : > { %v1936_v53 = vpop.permute.xlu1 %1935 }
 0x27e   : > { %v2076_v62 = vsel %vm506_vm11, %v1658_v57, %v1936_v53  ;;  %v1813_v57 = vld [vmem:[#allocation2 + $0xb9] sm:$0x1] }
 0x27f   : > { %v1969_v56 = vpop.permute.xlu0 %1968 }
 0x280   : > { %v2120_v60 = vsel %vm506_vm11, %v1724_v54, %v1969_v56  ;;  %v1759_v54 = vld [vmem:[#allocation2 + $0x10] sm:$0xff] }
 0x281   : > { %2646 = vmatprep.mubr.bf16.mxu1 %v2120_v60  ;;  %v1781_v56 = vpack.c.bf16 %v1760_v50, %v1759_v54  ;;  %v1831_v50 = vpack.c.bf16 %v8485_v20, %v8463_v12  ;;  %v1876_v54 = vld [vmem:[#allocation2 + $0x36] sm:$0xff]  ;;  %v1832_v12 = vpack.c.bf16 %v8501_v31, %v8482_v11  ;;  %v1833_v11 = vpack.c.bf16 %v8510_v49, %v8498_v13 }
 0x282   : > { %2647 = vmatmul.mubr.bf16.gmra.mrb[56].mxu1 %v2076_v62  ;;  %v1858_v62 = vld [vmem:[#allocation2 + $0xad] sm:$0xff]  ;;  %v1834_v13 = vpack.c.bf16 %v8518_v61, %v8508_v45  ;;  %v1835_v45 = vpack.c.bf16 %v8526_v18, %v8516_v59 }
 0x28d   : > { %v1971_v9 = vpop.permute.xlu1 %1970 }
 0x28e   : > { %v2124_v10 = vsel %vm506_vm11, %v1725_v8, %v1971_v9 }
 0x28f   : > { %2654 = vmatprep.mubr.bf16.mxu1 %v2124_v10 }
 0x290   : > { %v8546_v34 = vpop.permute.xlu0 %644 }
 0x291   : > { %9939 = vst [vmem:[#allocation4_spill] sm:$0xff] %v8546_v34  ;;  %v1603_v39 = vmul.f32 %v1581_v17, %v8546_v34  ;;  %v2017_v40 = vpop.permute.xlu1 %2016  ;;  %v1861_v17 = vld [vmem:[#allocation2 + $0xc5] sm:$0x1] }
 0x292   : > { %v2172_v58 = vsel %vm506_vm11, %v1829_v35, %v2017_v40  ;;  %v1762_v40 = vld [vmem:[#allocation2 + $0x28] sm:$0xff]  ;;  %v1872_v16 = vpack.c.bf16 %v1861_v17, %v1860_v6 }
 0x293   : > { %1626 = vst.msk [vmem:[#allocation2 + $0xb8] sm:$0x1] %vm1625_vm12, %v1603_v39  ;;  %2695 = vmatprep.mubr.bf16.mxu0 %v2172_v58  ;;  %v1895_v39 = vpack.c.bf16 %v1874_v4, %v1873_v38  ;;  %v1761_v58 = vld [vmem:[#allocation2 + $0x20] sm:$0xff]  ;;  %v1766_v17 = vld [vmem:[#allocation2 + $0x48] sm:$0xff] }
 0x294   : > { %v1938_v44 = vpop.permute.xlu0 %1937  ;;  %v1878_v6 = vld [vmem:[#allocation2 + $0x46] sm:$0xff] }
 0x295   : > { %v2080_v53 = vsel %vm506_vm11, %v1659_v19, %v1938_v44  ;;  %v2019_v55 = vpop.permute.xlu1 %2018  ;;  %v1782_v44 = vpack.c.bf16 %v1762_v40, %v1761_v58  ;;  %v1880_v40 = vld [vmem:[#allocation2 + $0x56] sm:$0xff] }
 0x296   : > { %2655 = vmatmul.mubr.bf16.gmra.mrb[60].mxu1 %v2080_v53  ;;  %v2176_v8 = vsel %vm506_vm11, %v1830_v23, %v2019_v55  ;;  %v1764_v23 = vld [vmem:[#allocation2 + $0x38] sm:$0xff] }
 0x297   : > { %7178 = vmatprep.mubr.msk.bf16.mxu1 %vm7580_vm1, %v9936_v0 }
 0x298   : > { %v1984_v29 = vpop.permute.xlu0 %1983 }
 0x299   : > { %v2128_v60 = vsel %vm506_vm11, %v1781_v56, %v1984_v29  ;;  %v2021_v19 = vpop.permute.xlu1 %2020  ;;  %v1875_v56 = vld [vmem:[#allocation2 + $0x2e] sm:$0xff] }
 0x29a   : > { %2696 = vmatmul.mubr.bf16.vlgmr.msra.gmra.mrb[24].mxu0 %v2128_v60  ;;  %v1812_v9 = vld [vmem:[#allocation2 + $0xb1] sm:$0xff]  ;;  %v2180_v55 = vsel %vm506_vm11, %v1831_v50, %v2021_v19  ;;  %v1896_v29 = vpack.c.bf16 %v1876_v54, %v1875_v56 }
 0x29b   : > { %v1859_v10 = vld [vmem:[#allocation2 + $0xb5] sm:$0xff]  ;;  %2703 = vmatprep.mubr.bf16.mxu0 %v2176_v8  ;;  %v1824_v35 = vpack.c.bf16 %v1813_v57, %v1812_v9  ;;  %v1877_v9 = vld [vmem:[#allocation2 + $0x3e] sm:$0xff] }
 0x29c   : > { %v1871_v36 = vpack.c.bf16 %v1859_v10, %v1858_v62  ;;  %v1986_v30 = vpop.permute.xlu0 %1985  ;;  %v1763_v60 = vld [vmem:[#allocation2 + $0x30] sm:$0xff]  ;;  %v1897_v10 = vpack.c.bf16 %v1878_v6, %v1877_v9  ;;  %v1768_v19 = vld [vmem:[#allocation2 + $0x58] sm:$0xff] }
 0x29d   : > { %2003 = vrot.lane.b32.xlu0 %v1824_v35, %s7589_s24  ;;  %v2132_v53 = vsel %vm506_vm11, %v1782_v44, %v1986_v30  ;;  %v2023_v62 = vpop.permute.xlu1 %2022  ;;  %v1783_v4 = vpack.c.bf16 %v1764_v23, %v1763_v60  ;;  %v1879_v30 = vld [vmem:[#allocation2 + $0x4e] sm:$0xff] }
 0x29e   : > { %2034 = vrot.lane.b32.xlu1 %v1871_v36, %s7589_s24  ;;  %7179 = vmatmul.mubr.msk.bf16.vlgmr.msra.gmra.mrb[64].mxu1 %vm506_vm11, %v1895_v39  ;;  %v2184_v8 = vsel %vm506_vm11, %v1832_v12, %v2023_v62  ;;  %v1765_v36 = vld [vmem:[#allocation2 + $0x40] sm:$0xff]  ;;  %v1898_v58 = vpack.c.bf16 %v1880_v40, %v1879_v30  ;;  %v1767_v50 = vld [vmem:[#allocation2 + $0x50] sm:$0xff]  ;;  %v1836_v40 = vpack.c.bf16 %v8534_v52, %v8524_v14 }
 0x29f   : > { %7182 = vmatprep.mubr.msk.bf16.mxu1 %vm7580_vm1, %v9936_v0  ;;  %v1784_v39 = vpack.c.bf16 %v1766_v17, %v1765_v36  ;;  %v1785_v54 = vpack.c.bf16 %v1768_v19, %v1767_v50  ;;  %v1769_v62 = vld [vmem:[#allocation2 + $0x60] sm:$0xff]  ;;  %v1837_v14 = vpack.c.bf16 %v8540_v3, %v8532_v48 }
 0x2a0   : > { %v1988_v57 = vpop.permute.xlu0 %1987  ;;  %v1890_v3 = vld [vmem:[#allocation2 + $0xa6] sm:$0xff] }
 0x2a1   : > { %v2136_v20 = vsel %vm506_vm11, %v1783_v4, %v1988_v57  ;;  %v2025_v38 = vpop.permute.xlu1 %2024  ;;  %v1770_v57 = vld [vmem:[#allocation2 + $0x68] sm:$0xff] }
 0x2a2   : > { %2036 = vrot.lane.b32.xlu1 %v1872_v16, %s7589_s24  ;;  %2704 = vmatmul.mubr.bf16.gmra.mrb[28].mxu0 %v2132_v53  ;;  %v2188_v16 = vsel %vm506_vm11, %v1833_v11, %v2025_v38  ;;  %v1786_v12 = vpack.c.bf16 %v1770_v57, %v1769_v62  ;;  %v1771_v38 = vld [vmem:[#allocation2 + $0x70] sm:$0xff] }
 0x2a3   : > { %2711 = vmatprep.mubr.bf16.mxu0 %v2180_v55  ;;  %v1882_v55 = vld [vmem:[#allocation2 + $0x66] sm:$0xff] }
 0x2a4   : > { %v1990_v35 = vpop.permute.xlu0 %1989 }
 0x2a5   : > { %v2140_v31 = vsel %vm506_vm11, %v1784_v39, %v1990_v35  ;;  %v2027_v53 = vpop.permute.xlu1 %2026 }
 0x2a6   : > { %7183 = vmatmul.mubr.msk.bf16.gmra.mrb[68].mxu1 %vm506_vm11, %v1896_v29  ;;  %v2192_v56 = vsel %vm506_vm11, %v1834_v13, %v2027_v53  ;;  %v1881_v29 = vld [vmem:[#allocation2 + $0x5e] sm:$0xff]  ;;  %v1774_v53 = vld [vmem:[#allocation2 + $0x88] sm:$0xff] }
 0x2a7   : > { %7186 = vmatprep.mubr.msk.bf16.mxu1 %vm7580_vm1, %v9936_v0  ;;  %v1899_v23 = vpack.c.bf16 %v1882_v55, %v1881_v29  ;;  %v1773_v13 = vld [vmem:[#allocation2 + $0x80] sm:$0xff] }
 0x2a8   : > { %v1992_v44 = vpop.permute.xlu0 %1991  ;;  %v1788_v55 = vpack.c.bf16 %v1774_v53, %v1773_v13 }
 0x2a9   : > { %v2144_v49 = vsel %vm506_vm11, %v1785_v54, %v1992_v44  ;;  %v2029_v4 = vpop.permute.xlu1 %2028  ;;  %v1885_v44 = vld [vmem:[#allocation2 + $0x7e] sm:$0xff] }
 0x2aa   : > { %2712 = vmatmul.mubr.bf16.gmra.mrb[32].mxu0 %v2136_v20  ;;  %v1884_v20 = vld [vmem:[#allocation2 + $0x76] sm:$0xff]  ;;  %v2196_v6 = vsel %vm506_vm11, %v1835_v45, %v2029_v4 }
 0x2ab   : > { %2719 = vmatprep.mubr.bf16.mxu0 %v2184_v8  ;;  %v1883_v8 = vld [vmem:[#allocation2 + $0x6e] sm:$0xff] }
 0x2ac   : > { %v1994_v60 = vpop.permute.xlu0 %1993  ;;  %v1900_v9 = vpack.c.bf16 %v1884_v20, %v1883_v8  ;;  %v1775_v4 = vld [vmem:[#allocation2 + $0x90] sm:$0xff]  ;;  %v1889_v8 = vld [vmem:[#allocation2 + $0x9e] sm:$0xff] }
 0x2ad   : > { %v2148_v61 = vsel %vm506_vm11, %v1786_v12, %v1994_v60  ;;  %v2031_v39 = vpop.permute.xlu1 %2030  ;;  %v1776_v60 = vld [vmem:[#allocation2 + $0x98] sm:$0xff] }
 0x2ae   : > { %7187 = vmatmul.mubr.msk.bf16.gmra.mrb[72].mxu1 %vm506_vm11, %v1897_v10  ;;  %v1772_v10 = vld [vmem:[#allocation2 + $0x78] sm:$0xff]  ;;  %v2200_v19 = vsel %vm506_vm11, %v1836_v40, %v2031_v39  ;;  %v1789_v12 = vpack.c.bf16 %v1776_v60, %v1775_v4  ;;  %v1825_v4 = vld [vmem:[#allocation2 + $0xac] sm:$0xff] }
 0x2af   : > { %7190 = vmatprep.mubr.msk.bf16.mxu1 %vm7580_vm1, %v9936_v0  ;;  %v1787_v18 = vpack.c.bf16 %v1772_v10, %v1771_v38  ;;  %v1903_v10 = vpack.c.bf16 %v1890_v3, %v1889_v8  ;;  %v1893_v40 = vld [vmem:[#allocation2 + $0xbe] sm:$0xff]  ;;  %v1826_v60 = vld [vmem:[#allocation2 + $0xb4] sm:$0xff] }
 0x2b0   : > { %v1996_v35 = vpop.permute.xlu0 %1995  ;;  %v1838_v3 = vpack.c.bf16 %v1826_v60, %v1825_v4 }
 0x2b1   : > { %v2152_v30 = vsel %vm506_vm11, %v1787_v18, %v1996_v35  ;;  %v1892_v35 = vld [vmem:[#allocation2 + $0xb6] sm:$0xff] }
 0x2b2   : > { %2720 = vmatmul.mubr.bf16.gmra.mrb[36].mxu0 %v2140_v31 }
 0x2b3   : > { %2727 = vmatprep.mubr.bf16.mxu0 %v2188_v16 }
 0x2b4   : > { %v1998_v54 = vpop.permute.xlu0 %1997 }
 0x2b5   : > { %v2156_v52 = vsel %vm506_vm11, %v1788_v55, %v1998_v54 }
 0x2b6   : > { %7191 = vmatmul.mubr.msk.bf16.gmra.mrb[76].mxu1 %vm506_vm11, %v1898_v58  ;;  %v1886_v58 = vld [vmem:[#allocation2 + $0x86] sm:$0xff] }
 0x2b7   : > { %7194 = vmatprep.mubr.msk.bf16.mxu1 %vm7580_vm1, %v9936_v0  ;;  %v1901_v50 = vpack.c.bf16 %v1886_v58, %v1885_v44 }
 0x2b8   : > { %v2000_v62 = vpop.permute.xlu0 %1999 }
 0x2b9   : > { %v2160_v48 = vsel %vm506_vm11, %v1789_v12, %v2000_v62  ;;  %v1778_v62 = vld [vmem:[#allocation2 + $0xa8] sm:$0xff]  ;;  %v1827_v12 = vld [vmem:[#allocation2 + $0xbc] sm:$0xff] }
 0x2ba   : > { %2728 = vmatmul.mubr.bf16.gmra.mrb[40].mxu0 %v2144_v49  ;;  %v2033_v49 = vpop.permute.xlu1 %2032 }
 0x2bb   : > { %2735 = vmatprep.mubr.bf16.mxu0 %v2192_v56  ;;  %v1888_v56 = vld [vmem:[#allocation2 + $0x96] sm:$0xff]  ;;  %v2204_v29 = vsel %vm506_vm11, %v1837_v14, %v2033_v49 }
 0x2be   : > { %7195 = vmatmul.mubr.msk.bf16.gmra.mrb[80].mxu1 %vm506_vm11, %v1899_v23  ;;  %v1887_v23 = vld [vmem:[#allocation2 + $0x8e] sm:$0xff] }
 0x2bf   : > { %7198 = vmatprep.mubr.msk.bf16.mxu1 %vm7580_vm1, %v9936_v0  ;;  %v1902_v57 = vpack.c.bf16 %v1888_v56, %v1887_v23 }
 0x2c2   : > { %2736 = vmatmul.mubr.bf16.gmra.mrb[44].mxu0 %v2148_v61 }
 0x2c3   : > { %2743 = vmatprep.mubr.bf16.mxu0 %v2196_v6 }
 0x2c5   : > { %v6584_v17 = vpop.f32.mrb[20].mxu1 }
 0x2c6   : > { %v6585_v36 = vpop.f32.mrb[21].mxu1  ;;  %7199 = vmatmul.mubr.msk.bf16.gmra.mrb[84].mxu1 %vm506_vm11, %v1900_v9 }
 0x2c7   : > { %v8599_v11 = vadd.f32 %v6585_v36, %v6584_v17  ;;  %v6587_v59 = vpop.f32.mrb[22].mxu1  ;;  %7202 = vmatprep.mubr.msk.bf16.mxu1 %vm7580_vm1, %v9936_v0  ;;  %v1891_v36 = vld [vmem:[#allocation2 + $0xae] sm:$0xff] }
 0x2c8   : > { %v6588_v31 = vpop.f32.mrb[23].mxu1  ;;  %v1904_v38 = vpack.c.bf16 %v1892_v35, %v1891_v36 }
 0x2c9   : > { %v8605_v16 = vadd.f32 %v6588_v31, %v6587_v59 }
 0x2ca   : > { %2744 = vmatmul.mubr.bf16.gmra.mrb[48].mxu0 %v2152_v30  ;;  %v1894_v30 = vld [vmem:[#allocation2 + $0xc6] sm:$0x1] }
 0x2cb   : > { %2751 = vmatprep.mubr.bf16.mxu0 %v2200_v19  ;;  %v1905_v44 = vpack.c.bf16 %v1894_v30, %v1893_v40  ;;  %v1779_v30 = vld [vmem:[#allocation2 + $0xb0] sm:$0xff] }
 0x2ce   : > { %7203 = vmatmul.mubr.msk.bf16.gmra.mrb[88].mxu1 %vm506_vm11, %v1901_v50 }
 0x2cf   : > { %7206 = vmatprep.mubr.msk.bf16.mxu1 %vm7580_vm1, %v9936_v0 }
 0x2d2   : > { %2752 = vmatmul.mubr.bf16.gmra.mrb[52].mxu0 %v2156_v52 }
 0x2d3   : > { %2759 = vmatprep.mubr.bf16.mxu0 %v2204_v29 }
 0x2d6   : > { %7207 = vmatmul.mubr.msk.bf16.gmra.mrb[92].mxu1 %vm506_vm11, %v1902_v57 }
 0x2d7   : > { %7210 = vmatprep.mubr.msk.bf16.mxu1 %vm7580_vm1, %v9936_v0 }
 0x2d9   : > { %v6590_v45 = vpop.f32.mrb[24].mxu1 }
 0x2da   : > { %v6591_v61 = vpop.f32.mrb[25].mxu1  ;;  %2760 = vmatmul.mubr.bf16.gmra.mrb[56].mxu0 %v2160_v48  ;;  %v2002_v48 = vpop.permute.xlu0 %2001 }
 0x2db   : > { %v8620_v20 = vadd.f32 %v6591_v61, %v6590_v45  ;;  %v6593_v6 = vpop.f32.mrb[26].mxu1  ;;  %v1828_v45 = vld [vmem:[#allocation2 + $0xc4] sm:$0x1] }
 0x2dc   : > { %v6594_v9 = vpop.f32.mrb[27].mxu1  ;;  %v1777_v61 = vld [vmem:[#allocation2 + $0xa0] sm:$0xff] }
 0x2dd   : > { %v8622_v17 = vadd.f32 %v6594_v9, %v6593_v6  ;;  %v1790_v8 = vpack.c.bf16 %v1778_v62, %v1777_v61 }
 0x2de   : > { %7211 = vmatmul.mubr.msk.bf16.gmra.mrb[96].mxu1 %vm506_vm11, %v1903_v10  ;;  %v1839_v10 = vpack.c.bf16 %v1828_v45, %v1827_v12 }
 0x2df   : > { %7214 = vmatprep.mubr.msk.bf16.mxu1 %vm7580_vm1, %v9936_v0  ;;  %v2164_v35 = vsel %vm506_vm11, %v1790_v8, %v2002_v48  ;;  %v7486_v8 = vld [vmem:[%s9924_s6 + $0x40] sm:$0xff]  }
 0x2e0   : > { %6747 = vmatprep.subr.bf16.mxu0 %v7486_v8 }
 0x2e5   : > { %v6596_v39 = vpop.f32.mrb[28].mxu1 }
 0x2e6   : > { %v6597_v59 = vpop.f32.mrb[29].mxu1  ;;  %7215 = vmatmul.mubr.msk.bf16.gmra.mrb[100].mxu1 %vm506_vm11, %v1904_v38 }
 0x2e7   : > { %v8628_v18 = vadd.f32 %v6597_v59, %v6596_v39  ;;  %v6599_v31 = vpop.f32.mrb[30].mxu1  ;;  %7218 = vmatprep.mubr.msk.bf16.mxu1 %vm7580_vm1, %v9936_v0  ;;  %v1780_v39 = vld [vmem:[#allocation2 + $0xb8] sm:$0x1] }
 0x2e8   : > { %v6600_v58 = vpop.f32.mrb[31].mxu1 }
 0x2e9   : > { %v8632_v19 = vadd.f32 %v6600_v58, %v6599_v31 }
 0x2ee   : > { %7219 = vmatmul.mubr.msk.bf16.gmra.mrb[104].mxu1 %vm506_vm11, %v1905_v44 }
 0x2f5   : > { %v6602_v50 = vpop.f32.mrb[32].mxu1 }
 0x2f6   : > { %v6603_v53 = vpop.f32.mrb[33].mxu1 }
 0x2f7   : > { %v8635_v54 = vadd.f32 %v6603_v53, %v6602_v50  ;;  %v6605_v13 = vpop.f32.mrb[34].mxu1  ;;  %v1791_v50 = vpack.c.bf16 %v1780_v39, %v1779_v30  ;;  %v7491_v30 = vld [vmem:[%s9924_s6 + $0x10] sm:$0xff]  }
 0x2f8   : > { %v6606_v49 = vpop.f32.mrb[35].mxu1 }
 0x2f9   : > { %v8637_v55 = vadd.f32 %v6606_v49, %v6605_v13 }
 0x305   : > { %v6608_v14 = vpop.f32.mrb[36].mxu1 }
 0x306   : > { %v6609_v52 = vpop.f32.mrb[37].mxu1 }
 0x307   : > { %v8639_v56 = vadd.f32 %v6609_v52, %v6608_v14  ;;  %v6611_v29 = vpop.f32.mrb[38].mxu1 }
 0x308   : > { %v6612_v23 = vpop.f32.mrb[39].mxu1 }
 0x309   : > { %v8641_v57 = vadd.f32 %v6612_v23, %v6611_v29 }
 0x30f   : > { %v2004_v31 = vpop.permute.xlu0 %2003 }
 0x310   : > { %v2035_v6 = vpop.permute.xlu1 %2034  ;;  %v2168_v49 = vsel %vm506_vm11, %v1791_v50, %v2004_v31 }
 0x311   : > { %v2208_v9 = vsel %vm506_vm11, %v1838_v3, %v2035_v6 }
 0x312   : > { %2767 = vmatprep.mubr.bf16.mxu0 %v2208_v9  ;;  %v7487_v9 = vld [vmem:[%s9924_s6] sm:$0xff]  }
 0x313   : > { %2768 = vmatmul.mubr.bf16.gmra.mrb[60].mxu0 %v2164_v35 }
 0x314   : > { %v2037_v36 = vpop.permute.xlu1 %2036  ;;  %6748 = vmatpush3.bf16.msra.mxu0 %v7487_v9 }
 0x315   : > { %v2212_v38 = vsel %vm506_vm11, %v1839_v10, %v2037_v36  ;;  %v6614_v59 = vpop.f32.mrb[40].mxu1  ;;  %v7488_v10 = vld [vmem:[%s9924_s6 + $0x48] sm:$0xff]  }
 0x316   : > { %2775 = vmatprep.mubr.bf16.mxu0 %v2212_v38  ;;  %v6615_v40 = vpop.f32.mrb[41].mxu1  ;;  %6749 = vmatprep.subr.bf16.mxu0 %v7488_v10 }
 0x317   : > { %v8646_v58 = vadd.f32 %v6615_v40, %v6614_v59  ;;  %v6617_v44 = vpop.f32.mrb[42].mxu1  ;;  %v7489_v59 = vld [vmem:[%s9924_s6 + $0x8] sm:$0xff]   ;;  %v7490_v40 = vld [vmem:[%s9924_s6 + $0x50] sm:$0xff]  }
 0x318   : > { %v6618_v53 = vpop.f32.mrb[43].mxu1  ;;  %6750 = vmatpush3.bf16.msra.mxu0 %v7489_v59 }
 0x319   : > { %v8648_v13 = vadd.f32 %v6618_v53, %v6617_v44  ;;  %6751 = vmatprep.subr.bf16.mxu0 %v7490_v40 }
 0x31b   : > { %2776 = vmatmul.mubr.bf16.gmra.mrb[64].mxu0 %v2168_v49 }
 0x31c   : > { %6752 = vmatpush3.bf16.msra.mxu0 %v7491_v30  ;;  %v7495_v30 = vld [vmem:[%s9924_s6 + $0x20] sm:$0xff]  }
 0x325   : > { %v6620_v14 = vpop.f32.mrb[44].mxu1 }
 0x326   : > { %v6621_v52 = vpop.f32.mrb[45].mxu1 }
 0x327   : > { %v8651_v29 = vadd.f32 %v6621_v52, %v6620_v14  ;;  %v6623_v23 = vpop.f32.mrb[46].mxu1 }
 0x328   : > { %v6624_v60 = vpop.f32.mrb[47].mxu1 }
 0x329   : > { %v8653_v62 = vadd.f32 %v6624_v60, %v6623_v23 }
 0x335   : > { %v6626_v4 = vpop.f32.mrb[48].mxu1 }
 0x336   : > { %v6627_v12 = vpop.f32.mrb[49].mxu1 }
 0x337   : > { %v8655_v45 = vadd.f32 %v6627_v12, %v6626_v4  ;;  %v6629_v48 = vpop.f32.mrb[50].mxu1  ;;  %v7492_v4 = vld [vmem:[%s9924_s6 + $0x58] sm:$0xff]  }
 0x338   : > { %v6630_v3 = vpop.f32.mrb[51].mxu1  ;;  %6753 = vmatprep.subr.bf16.mxu0 %v7492_v4 }
 0x339   : > { %v8657_v61 = vadd.f32 %v6630_v3, %v6629_v48  ;;  %v7493_v3 = vld [vmem:[%s9924_s6 + $0x18] sm:$0xff]  }
 0x33a   : > { %6754 = vmatpush3.bf16.msra.mxu0 %v7493_v3 }
 0x345   : > { %v6632_v6 = vpop.f32.mrb[52].mxu1 }
 0x346   : > { %v6633_v35 = vpop.f32.mrb[53].mxu1 }
 0x347   : > { %v8668_v36 = vadd.f32 %v6633_v35, %v6632_v6  ;;  %v6635_v38 = vpop.f32.mrb[54].mxu1  ;;  %v8696_v6 = vld [vmem:[%s9923_s5] ss:$0 sm:$0xff] }
 0x348   : > { %v6636_v39 = vpop.f32.mrb[55].mxu1 }
 0x349   : > { %v8673_v31 = vadd.f32 %v6636_v39, %v6635_v38  ;;  %v7494_v38 = vld [vmem:[%s9924_s6 + $0x60] sm:$0xff]   ;;  %v2577_v39 = vadd.f32 %v8599_v11, %v8696_v6  ;;  %v7496_v11 = vld [vmem:[%s9924_s6 + $0x68] sm:$0xff]  }
 0x34a   : > { %6755 = vmatprep.subr.bf16.mxu0 %v7494_v38 }
 0x34b   : > { %6756 = vmatpush3.bf16.msra.mxu0 %v7495_v30 }
 0x34c   : > { %6757 = vmatprep.subr.bf16.mxu0 %v7496_v11 }
 0x355   : > { %v6638_v44 = vpop.f32.mrb[56].mxu1 }
 0x356   : > { %v6639_v50 = vpop.f32.mrb[57].mxu1 }
 0x357   : > { %v8681_v53 = vadd.f32 %v6639_v50, %v6638_v44  ;;  %v6641_v49 = vpop.f32.mrb[58].mxu1  ;;  %v2580_v50 = vadd.f32 %v8605_v16, %v8696_v6 }
 0x358   : > { %v6642_v14 = vpop.f32.mrb[59].mxu1 }
 0x359   : > { %v8683_v52 = vadd.f32 %v6642_v14, %v6641_v49 }
 0x369   : > { %v6644_v23 = vpop.f32.mrb[60].mxu1 }
 0x36a   : > { %v6645_v60 = vpop.f32.mrb[61].mxu1 }
 0x36b   : > { %v8688_v12 = vadd.f32 %v6645_v60, %v6644_v23  ;;  %v6647_v48 = vpop.f32.mrb[62].mxu1 }
 0x36c   : > { %v6648_v8 = vpop.f32.mrb[63].mxu1 }
 0x36d   : > { %v8698_v9 = vadd.f32 %v6648_v8, %v6647_v48  ;;  %v6666_v10 = vpop.f32.mrb[24].mxu0  ;;  %v7497_v8 = vld [vmem:[%s9924_s6 + $0x28] sm:$0xff]  }
 0x36e   : > { %v6667_v35 = vpop.f32.mrb[25].mxu0  ;;  %6758 = vmatpush3.bf16.msra.mxu0 %v7497_v8  ;;  %v7500_v8 = vld [vmem:[%s9924_s6 + $0x78] sm:$0xff]  }
 0x36f   : > { %v6668_v59 = vadd.f32 %v6667_v35, %v6666_v10  ;;  %v6669_v40 = vpop.f32.mrb[26].mxu0 }
 0x370   : > { %v6670_v44 = vpop.f32.mrb[27].mxu0 }
 0x371   : > { %v6671_v49 = vadd.f32 %v6670_v44, %v6669_v40  ;;  %v2698_v14 = vadd.f32 %v6668_v59, %v2577_v39  ;;  %v2818_v23 = vpop.f32.mrb[64].mxu1  ;;  %v7498_v59 = vld [vmem:[%s9924_s6 + $0x70] sm:$0xff]   ;;  %v2585_v40 = vadd.f32 %v8620_v20, %v8696_v6 }
 0x372   : > { %v7180_v60 = vpop.f32.mrb[65].mxu1  ;;  %6759 = vmatprep.subr.bf16.mxu0 %v7498_v59 }
 0x373   : > { %v2819_v4 = vadd.f32 %v2818_v23, %v2698_v14  ;;  %v2701_v48 = vadd.f32 %v6671_v49, %v2580_v50  ;;  %v2821_v3 = vpop.f32.mrb[66].mxu1  ;;  %v7499_v14 = vld [vmem:[%s9924_s6 + $0x30] sm:$0xff]   ;;  %v2588_v60 = vadd.f32 %v8622_v17, %v8696_v6  ;;  %v7501_v17 = vld [vmem:[%s9924_s6 + $0x38] sm:$0xff]  }
 0x374   : > { %v7181_v10 = vpop.f32.mrb[67].mxu1  ;;  %6760 = vmatpush3.bf16.msra.mxu0 %v7499_v14 }
 0x375   : > { %v2905_v35 = vmax.f32 %v2819_v4, 0.0  ;;  %v2822_v16 = vadd.f32 %v2821_v3, %v2701_v48  ;;  %v6672_v38 = vpop.f32.mrb[28].mxu0  ;;  %6761 = vmatprep.subr.bf16.mxu0 %v7500_v8 }
 0x376   : > { %v6673_v39 = vpop.f32.mrb[29].mxu0 }
 0x377   : > { %v2927_v30 = vmul.f32 %v2905_v35, %v8246_v2  ;;  %v2906_v44 = vmax.f32 %v2822_v16, 0.0  ;;  %v6674_v50 = vadd.f32 %v6673_v39, %v6672_v38  ;;  %v6675_v49 = vpop.f32.mrb[30].mxu0 }
 0x378   : > { %v6676_v23 = vpop.f32.mrb[31].mxu0  ;;  %6762 = vmatpush3.bf16.msra.mxu0 %v7501_v17 }
 0x379   : > { %2949 = vst.msk [vmem:[#allocation3 + $0x10] sm:$0xff] %vm506_vm11, %v2927_v30  ;;  %v2928_v11 = vmul.f32 %v2906_v44, %v8255_v7  ;;  %v6677_v4 = vadd.f32 %v6676_v23, %v6675_v49  ;;  %v2706_v20 = vadd.f32 %v6674_v50, %v2585_v40  ;;  %v2826_v48 = vpop.f32.mrb[68].mxu1  ;;  %v3004_v44 = vld [vmem:[#allocation3 + $0x3] sm:$0xff]  ;;  %7222 = vmatprep.subr.bf16.mxu0 %v9936_v0 }
 0x37a   : > { %v7184_v3 = vpop.f32.mrb[69].mxu1  ;;  %v2593_v50 = vadd.f32 %v8628_v18, %v8696_v6 }
 0x37b   : > { %2950 = vst.msk [vmem:[#allocation3 + $0x18] sm:$0xff] %vm506_vm11, %v2928_v11  ;;  %v2827_v10 = vadd.f32 %v2826_v48, %v2706_v20  ;;  %v2709_v35 = vadd.f32 %v6677_v4, %v2588_v60  ;;  %v2829_v16 = vpop.f32.mrb[70].mxu1  ;;  %v2596_v11 = vadd.f32 %v8632_v19, %v8696_v6 }
 0x37c   : > { %v7185_v38 = vpop.f32.mrb[71].mxu1 }
 0x37d   : > { %v2907_v39 = vmax.f32 %v2827_v10, 0.0  ;;  %v2830_v59 = vadd.f32 %v2829_v16, %v2709_v35  ;;  %v6678_v40 = vpop.f32.mrb[32].mxu0 }
 0x37e   : > { %v6679_v30 = vpop.f32.mrb[33].mxu0 }
 0x37f   : > { %v2929_v49 = vmul.f32 %v2907_v39, %v8264_v22  ;;  %v2908_v14 = vmax.f32 %v2830_v59, 0.0  ;;  %v6680_v23 = vadd.f32 %v6679_v30, %v6678_v40  ;;  %v6681_v60 = vpop.f32.mrb[34].mxu0 }
 0x380   : > { %v6682_v4 = vpop.f32.mrb[35].mxu0  ;;  %v3005_v20 = vld [vmem:[#allocation3 + $0xb] sm:$0xff] }
 0x381   : > { %2951 = vst.msk [vmem:[#allocation3 + $0x20] sm:$0xff] %vm506_vm11, %v2929_v49  ;;  %v2930_v48 = vmul.f32 %v2908_v14, %v8268_v26  ;;  %v6683_v3 = vadd.f32 %v6682_v4, %v6681_v60  ;;  %v2714_v8 = vadd.f32 %v6680_v23, %v2593_v50  ;;  %v2834_v10 = vpop.f32.mrb[72].mxu1  ;;  %v3026_v35 = vpack.c.bf16 %v3005_v20, %v3004_v44  ;;  %v3070_v18 = vld [vmem:[#allocation3 + $0xf] sm:$0xff] }
 0x382   : > { %v7188_v16 = vpop.f32.mrb[73].mxu1  ;;  %v3071_v17 = vld [vmem:[#allocation3 + $0x17] sm:$0xff]  ;;  %v2601_v44 = vadd.f32 %v8635_v54, %v8696_v6 }
 0x383   : > { %2952 = vst.msk [vmem:[#allocation3 + $0x28] sm:$0xff] %vm506_vm11, %v2930_v48  ;;  %v2835_v38 = vadd.f32 %v2834_v10, %v2714_v8  ;;  %v2717_v39 = vadd.f32 %v6683_v3, %v2596_v11  ;;  %v2837_v59 = vpop.f32.mrb[74].mxu1  ;;  %3261 = vrot.lane.b32.xlu0 %v3026_v35, %s7589_s24  ;;  %v3092_v19 = vpack.c.bf16 %v3071_v17, %v3070_v18  ;;  %v3006_v48 = vld [vmem:[#allocation3 + $0x13] sm:$0xff] }
 0x384   : > { %v7189_v40 = vpop.f32.mrb[75].mxu1  ;;  %v2604_v11 = vadd.f32 %v8637_v55, %v8696_v6 }
 0x385   : > { %v2909_v30 = vmax.f32 %v2835_v38, 0.0  ;;  %v2838_v49 = vadd.f32 %v2837_v59, %v2717_v39  ;;  %v6684_v15 = vpop.f32.mrb[36].mxu0  ;;  %3294 = vrot.lane.b32.xlu1 %v3092_v19, %s7589_s24 }
 0x386   : > { %v6685_v50 = vpop.f32.mrb[37].mxu0 }
 0x387   : > { %v2931_v14 = vmul.f32 %v2909_v30, %v8279_v42  ;;  %v2910_v23 = vmax.f32 %v2838_v49, 0.0  ;;  %v6686_v60 = vadd.f32 %v6685_v50, %v6684_v15  ;;  %v6687_v4 = vpop.f32.mrb[38].mxu0 }
 0x388   : > { %v6688_v20 = vpop.f32.mrb[39].mxu0  ;;  %v3007_v3 = vld [vmem:[#allocation3 + $0x1b] sm:$0xff] }
 0x389   : > { %2953 = vst.msk [vmem:[#allocation3 + $0x30] sm:$0xff] %vm506_vm11, %v2931_v14  ;;  %v2932_v8 = vmul.f32 %v2910_v23, %v8283_v46  ;;  %v6689_v10 = vadd.f32 %v6688_v20, %v6687_v4  ;;  %v2722_v35 = vadd.f32 %v6686_v60, %v2601_v44  ;;  %v2842_v16 = vpop.f32.mrb[76].mxu1  ;;  %v3027_v18 = vpack.c.bf16 %v3007_v3, %v3006_v48  ;;  %v3072_v17 = vld [vmem:[#allocation3 + $0x1f] sm:$0xff] }
 0x38a   : > { %v7192_v54 = vpop.f32.mrb[77].mxu1  ;;  %v3073_v38 = vld [vmem:[#allocation3 + $0x27] sm:$0xff]  ;;  %v2609_v44 = vadd.f32 %v8639_v56, %v8696_v6 }
 0x38b   : > { %2954 = vst.msk [vmem:[#allocation3 + $0x38] sm:$0xff] %vm506_vm11, %v2932_v8  ;;  %v2843_v15 = vadd.f32 %v2842_v16, %v2722_v35  ;;  %v2725_v39 = vadd.f32 %v6689_v10, %v2604_v11  ;;  %v2845_v59 = vpop.f32.mrb[78].mxu1  ;;  %3263 = vrot.lane.b32.xlu0 %v3027_v18, %s7589_s24  ;;  %v3093_v55 = vpack.c.bf16 %v3073_v38, %v3072_v17  ;;  %v3008_v48 = vld [vmem:[#allocation3 + $0x23] sm:$0xff] }
 0x38c   : > { %v7193_v19 = vpop.f32.mrb[79].mxu1  ;;  %v2612_v11 = vadd.f32 %v8641_v57, %v8696_v6 }
 0x38d   : > { %v2911_v40 = vmax.f32 %v2843_v15, 0.0  ;;  %v2846_v30 = vadd.f32 %v2845_v59, %v2725_v39  ;;  %v6690_v49 = vpop.f32.mrb[40].mxu0  ;;  %3296 = vrot.lane.b32.xlu1 %v3093_v55, %s7589_s24 }
 0x38e   : > { %v6691_v50 = vpop.f32.mrb[41].mxu0 }
 0x38f   : > { %v2933_v14 = vmul.f32 %v2911_v40, %v8293_v1  ;;  %v2912_v23 = vmax.f32 %v2846_v30, 0.0  ;;  %v6692_v60 = vadd.f32 %v6691_v50, %v6690_v49  ;;  %v6693_v4 = vpop.f32.mrb[42].mxu0  ;;  %v2617_v49 = vadd.f32 %v8646_v58, %v8696_v6 }
 0x390   : > { %v6694_v20 = vpop.f32.mrb[43].mxu0  ;;  %v3009_v3 = vld [vmem:[#allocation3 + $0x2b] sm:$0xff] }
 0x391   : > { %2955 = vst.msk [vmem:[#allocation3 + $0x40] sm:$0xff] %vm506_vm11, %v2933_v14  ;;  %v2934_v8 = vmul.f32 %v2912_v23, %v8296_v5  ;;  %v6695_v10 = vadd.f32 %v6694_v20, %v6693_v4  ;;  %v2730_v35 = vadd.f32 %v6692_v60, %v2609_v44  ;;  %v2850_v16 = vpop.f32.mrb[80].mxu1  ;;  %v3028_v18 = vpack.c.bf16 %v3009_v3, %v3008_v48  ;;  %v3074_v54 = vld [vmem:[#allocation3 + $0x2f] sm:$0xff] }
 0x392   : > { %v7196_v56 = vpop.f32.mrb[81].mxu1  ;;  %v3075_v17 = vld [vmem:[#allocation3 + $0x37] sm:$0xff]  ;;  %v2620_v60 = vadd.f32 %v8648_v13, %v8696_v6 }
 0x393   : > { %2956 = vst.msk [vmem:[#allocation3 + $0x48] sm:$0xff] %vm506_vm11, %v2934_v8  ;;  %v2851_v38 = vadd.f32 %v2850_v16, %v2730_v35  ;;  %v2733_v15 = vadd.f32 %v6695_v10, %v2612_v11  ;;  %v2853_v39 = vpop.f32.mrb[82].mxu1  ;;  %3265 = vrot.lane.b32.xlu0 %v3028_v18, %s7589_s24  ;;  %v3094_v57 = vpack.c.bf16 %v3075_v17, %v3074_v54  ;;  %v3010_v11 = vld [vmem:[#allocation3 + $0x33] sm:$0xff] }
 0x394   : > { %v7197_v59 = vpop.f32.mrb[83].mxu1 }
 0x395   : > { %v2913_v55 = vmax.f32 %v2851_v38, 0.0  ;;  %v2854_v19 = vadd.f32 %v2853_v39, %v2733_v15  ;;  %v6696_v40 = vpop.f32.mrb[44].mxu0  ;;  %3298 = vrot.lane.b32.xlu1 %v3094_v57, %s7589_s24 }
 0x396   : > { %v6697_v30 = vpop.f32.mrb[45].mxu0 }
 0x397   : > { %v2935_v50 = vmul.f32 %v2913_v55, %v8305_v21  ;;  %v2914_v44 = vmax.f32 %v2854_v19, 0.0  ;;  %v6698_v14 = vadd.f32 %v6697_v30, %v6696_v40  ;;  %v6699_v23 = vpop.f32.mrb[46].mxu0  ;;  %v2625_v55 = vadd.f32 %v8651_v29, %v8696_v6 }
 0x398   : > { %v6700_v4 = vpop.f32.mrb[47].mxu0  ;;  %v3011_v20 = vld [vmem:[#allocation3 + $0x3b] sm:$0xff] }
 0x399   : > { %2957 = vst.msk [vmem:[#allocation3 + $0x50] sm:$0xff] %vm506_vm11, %v2935_v50  ;;  %v2936_v48 = vmul.f32 %v2914_v44, %v8308_v25  ;;  %v6701_v3 = vadd.f32 %v6700_v4, %v6699_v23  ;;  %v2738_v8 = vadd.f32 %v6698_v14, %v2617_v49  ;;  %v2858_v10 = vpop.f32.mrb[84].mxu1  ;;  %v3029_v35 = vpack.c.bf16 %v3011_v20, %v3010_v11  ;;  %v3076_v16 = vld [vmem:[#allocation3 + $0x3f] sm:$0xff] }
 0x39a   : > { %v7200_v58 = vpop.f32.mrb[85].mxu1  ;;  %v3077_v18 = vld [vmem:[#allocation3 + $0x47] sm:$0xff]  ;;  %v2628_v50 = vadd.f32 %v8653_v62, %v8696_v6 }
 0x39b   : > { %2958 = vst.msk [vmem:[#allocation3 + $0x58] sm:$0xff] %vm506_vm11, %v2936_v48  ;;  %v2859_v56 = vadd.f32 %v2858_v10, %v2738_v8  ;;  %v2741_v54 = vadd.f32 %v6701_v3, %v2620_v60  ;;  %v2861_v17 = vpop.f32.mrb[86].mxu1  ;;  %3267 = vrot.lane.b32.xlu0 %v3029_v35, %s7589_s24  ;;  %v3095_v13 = vpack.c.bf16 %v3077_v18, %v3076_v16  ;;  %v3012_v14 = vld [vmem:[#allocation3 + $0x43] sm:$0xff]  ;;  %v7502_v18 = vld [vmem:[%s9924_s6 + $0xc0] sm:$0xff]  }
 0x39c   : > { %v7201_v38 = vpop.f32.mrb[87].mxu1  ;;  %6829 = vmatprep.subr.bf16.mxu1 %v7502_v18 }
 0x39d   : > { %v2915_v15 = vmax.f32 %v2859_v56, 0.0  ;;  %v2862_v39 = vadd.f32 %v2861_v17, %v2741_v54  ;;  %v6702_v57 = vpop.f32.mrb[48].mxu0  ;;  %3300 = vrot.lane.b32.xlu1 %v3095_v13, %s7589_s24  ;;  %v7503_v56 = vld [vmem:[%s9924_s6 + $0x80] sm:$0xff]  }
 0x39e   : > { %v6703_v59 = vpop.f32.mrb[49].mxu0  ;;  %6830 = vmatpush3.bf16.msra.mxu1 %v7503_v56 }
 0x39f   : > { %v2937_v19 = vmul.f32 %v2915_v15, %v8317_v43  ;;  %v2916_v40 = vmax.f32 %v2862_v39, 0.0  ;;  %v6704_v30 = vadd.f32 %v6703_v59, %v6702_v57  ;;  %v6705_v49 = vpop.f32.mrb[50].mxu0  ;;  %v2633_v15 = vadd.f32 %v8655_v45, %v8696_v6 }
 0x3a0   : > { %v6706_v44 = vpop.f32.mrb[51].mxu0  ;;  %v3013_v23 = vld [vmem:[#allocation3 + $0x4b] sm:$0xff] }
 0x3a1   : > { %2959 = vst.msk [vmem:[#allocation3 + $0x60] sm:$0xff] %vm506_vm11, %v2937_v19  ;;  %v2938_v60 = vmul.f32 %v2916_v40, %v8320_v47  ;;  %v6707_v4 = vadd.f32 %v6706_v44, %v6705_v49  ;;  %v2746_v11 = vadd.f32 %v6704_v30, %v2625_v55  ;;  %v2866_v20 = vpop.f32.mrb[88].mxu1  ;;  %v3030_v48 = vpack.c.bf16 %v3013_v23, %v3012_v14  ;;  %v3078_v3 = vld [vmem:[#allocation3 + $0x4f] sm:$0xff] }
 0x3a2   : > { %v7204_v29 = vpop.f32.mrb[89].mxu1  ;;  %v3079_v8 = vld [vmem:[#allocation3 + $0x57] sm:$0xff]  ;;  %v2636_v19 = vadd.f32 %v8657_v61, %v8696_v6 }
 0x3a3   : > { %2960 = vst.msk [vmem:[#allocation3 + $0x68] sm:$0xff] %vm506_vm11, %v2938_v60  ;;  %v2867_v10 = vadd.f32 %v2866_v20, %v2746_v11  ;;  %v2749_v35 = vadd.f32 %v6707_v4, %v2628_v50  ;;  %v2869_v58 = vpop.f32.mrb[90].mxu1  ;;  %3269 = vrot.lane.b32.xlu0 %v3030_v48, %s7589_s24  ;;  %v3096_v62 = vpack.c.bf16 %v3079_v8, %v3078_v3  ;;  %v3014_v30 = vld [vmem:[#allocation3 + $0x53] sm:$0xff] }
 0x3a4   : > { %v7205_v16 = vpop.f32.mrb[91].mxu1 }
 0x3a5   : > { %v2917_v54 = vmax.f32 %v2867_v10, 0.0  ;;  %v2870_v17 = vadd.f32 %v2869_v58, %v2749_v35  ;;  %v6708_v13 = vpop.f32.mrb[52].mxu0  ;;  %3302 = vrot.lane.b32.xlu1 %v3096_v62, %s7589_s24  ;;  %v7505_v58 = vld [vmem:[%s9924_s6 + $0xc8] sm:$0xff]   ;;  %v2641_v16 = vadd.f32 %v8668_v36, %v8696_v6 }
 0x3a6   : > { %v6709_v38 = vpop.f32.mrb[53].mxu0  ;;  %6831 = vmatprep.subr.bf16.mxu1 %v7505_v58 }
 0x3a7   : > { %v2939_v39 = vmul.f32 %v2917_v54, %v8329_v63  ;;  %v2918_v57 = vmax.f32 %v2870_v17, 0.0  ;;  %v6710_v59 = vadd.f32 %v6709_v38, %v6708_v13  ;;  %v6711_v55 = vpop.f32.mrb[54].mxu0  ;;  %v7506_v13 = vld [vmem:[%s9924_s6 + $0x88] sm:$0xff]   ;;  %v2644_v38 = vadd.f32 %v8673_v31, %v8696_v6 }
 0x3a8   : > { %v6712_v40 = vpop.f32.mrb[55].mxu0  ;;  %v3015_v49 = vld [vmem:[#allocation3 + $0x5b] sm:$0xff]  ;;  %6832 = vmatpush3.bf16.msra.mxu1 %v7506_v13  ;;  %v7511_v13 = vld [vmem:[%s9924_s6 + $0x98] sm:$0xff]  }
 0x3a9   : > { %2961 = vst.msk [vmem:[#allocation3 + $0x70] sm:$0xff] %vm506_vm11, %v2939_v39  ;;  %v2940_v50 = vmul.f32 %v2918_v57, %v8332_v51  ;;  %v6713_v44 = vadd.f32 %v6712_v40, %v6711_v55  ;;  %v2754_v14 = vadd.f32 %v6710_v59, %v2633_v15  ;;  %v2874_v23 = vpop.f32.mrb[92].mxu1  ;;  %v3031_v45 = vpack.c.bf16 %v3015_v49, %v3014_v30  ;;  %v3080_v4 = vld [vmem:[#allocation3 + $0x5f] sm:$0xff] }
 0x3aa   : > { %v7208_v60 = vpop.f32.mrb[93].mxu1  ;;  %v3081_v11 = vld [vmem:[#allocation3 + $0x67] sm:$0xff] }
 0x3ab   : > { %2962 = vst.msk [vmem:[#allocation3 + $0x78] sm:$0xff] %vm506_vm11, %v2940_v50  ;;  %v2875_v20 = vadd.f32 %v2874_v23, %v2754_v14  ;;  %v2757_v48 = vadd.f32 %v6713_v44, %v2636_v19  ;;  %v2877_v29 = vpop.f32.mrb[94].mxu1  ;;  %3271 = vrot.lane.b32.xlu0 %v3031_v45, %s7589_s24  ;;  %v3097_v61 = vpack.c.bf16 %v3081_v11, %v3080_v4  ;;  %v3016_v39 = vld [vmem:[#allocation3 + $0x63] sm:$0xff] }
 0x3ac   : > { %v7209_v3 = vpop.f32.mrb[95].mxu1 }
 0x3ad   : > { %v2919_v8 = vmax.f32 %v2875_v20, 0.0  ;;  %v2878_v10 = vadd.f32 %v2877_v29, %v2757_v48  ;;  %v6714_v35 = vpop.f32.mrb[56].mxu0  ;;  %3304 = vrot.lane.b32.xlu1 %v3097_v61, %s7589_s24 }
 0x3ae   : > { %v6715_v62 = vpop.f32.mrb[57].mxu0 }
 0x3af   : > { %v2941_v18 = vmul.f32 %v2919_v8, %v8341_v24  ;;  %v2920_v56 = vmax.f32 %v2878_v10, 0.0  ;;  %v6716_v54 = vadd.f32 %v6715_v62, %v6714_v35  ;;  %v6717_v17 = vpop.f32.mrb[58].mxu0 }
 0x3b0   : > { %v6718_v15 = vpop.f32.mrb[59].mxu0  ;;  %v3017_v57 = vld [vmem:[#allocation3 + $0x6b] sm:$0xff] }
 0x3b1   : > { %2963 = vst.msk [vmem:[#allocation3 + $0x80] sm:$0xff] %vm506_vm11, %v2941_v18  ;;  %v2942_v36 = vmul.f32 %v2920_v56, %v8343_v28  ;;  %v6719_v59 = vadd.f32 %v6718_v15, %v6717_v17  ;;  %v2762_v55 = vadd.f32 %v6716_v54, %v2641_v16  ;;  %v2882_v19 = vpop.f32.mrb[96].mxu1  ;;  %v3032_v40 = vpack.c.bf16 %v3017_v57, %v3016_v39  ;;  %v3082_v49 = vld [vmem:[#allocation3 + $0x6f] sm:$0xff]  ;;  %v7507_v56 = vld [vmem:[%s9924_s6 + $0xd0] sm:$0xff]  }
 0x3b2   : > { %v7212_v30 = vpop.f32.mrb[97].mxu1  ;;  %v3083_v50 = vld [vmem:[#allocation3 + $0x77] sm:$0xff]  ;;  %v7508_v54 = vld [vmem:[%s9924_s6 + $0x90] sm:$0xff]   ;;  %v7510_v17 = vld [vmem:[%s9924_s6 + $0xd8] sm:$0xff]   ;;  %6833 = vmatprep.subr.bf16.mxu1 %v7507_v56 }
 0x3b3   : > { %2964 = vst.msk [vmem:[#allocation3 + $0x88] sm:$0xff] %vm506_vm11, %v2942_v36  ;;  %v2883_v44 = vadd.f32 %v2882_v19, %v2762_v55  ;;  %v2765_v14 = vadd.f32 %v6719_v59, %v2644_v38  ;;  %v2885_v31 = vpop.f32.mrb[98].mxu1  ;;  %3273 = vrot.lane.b32.xlu0 %v3032_v40, %s7589_s24  ;;  %v3098_v23 = vpack.c.bf16 %v3083_v50, %v3082_v49  ;;  %v3018_v48 = vld [vmem:[#allocation3 + $0x73] sm:$0xff] }
 0x3b4   : > { %v7213_v45 = vpop.f32.mrb[99].mxu1  ;;  %6834 = vmatpush3.bf16.msra.mxu1 %v7508_v54  ;;  %v7512_v39 = vld [vmem:[%s9924_s6 + $0xe0] sm:$0xff]   ;;  %v2657_v54 = vadd.f32 %v8688_v12, %v8696_v6  ;;  %v7521_v12 = vld [vmem:[%s9924_s6 + $0xb8] sm:$0xff]  }
 0x3b5   : > { %v2921_v60 = vmax.f32 %v2883_v44, 0.0  ;;  %v2886_v4 = vadd.f32 %v2885_v31, %v2765_v14  ;;  %3306 = vrot.lane.b32.xlu1 %v3098_v23, %s7589_s24  ;;  %6835 = vmatprep.subr.bf16.mxu1 %v7510_v17  ;;  %v7513_v49 = vld [vmem:[%s9924_s6 + $0xa0] sm:$0xff]   ;;  %v7515_v44 = vld [vmem:[%s9924_s6 + $0xe8] sm:$0xff]   ;;  %v7517_v31 = vld [vmem:[%s9924_s6 + $0xf0] sm:$0xff]  }
 0x3b6   : > { %v7516_v14 = vld [vmem:[%s9924_s6 + $0xa8] sm:$0xff]   ;;  %v7518_v23 = vld [vmem:[%s9924_s6 + $0xb0] sm:$0xff]  }
 0x3b7   : > { %v2943_v11 = vmul.f32 %v2921_v60, %v8351_v33  ;;  %v2922_v20 = vmax.f32 %v2886_v4, 0.0  ;;  %v2649_v4 = vadd.f32 %v8681_v53, %v8696_v6 }
 0x3b8   : > { %v3019_v29 = vld [vmem:[#allocation3 + $0x7b] sm:$0xff]  ;;  %6836 = vmatpush3.bf16.msra.mxu1 %v7511_v13 }
 0x3b9   : > { %2965 = vst.msk [vmem:[#allocation3 + $0x90] sm:$0xff] %vm506_vm11, %v2943_v11  ;;  %v2944_v61 = vmul.f32 %v2922_v20, %v8349_v27  ;;  %v2890_v3 = vpop.f32.mrb[100].mxu1  ;;  %v3033_v8 = vpack.c.bf16 %v3019_v29, %v3018_v48  ;;  %v3084_v35 = vld [vmem:[#allocation3 + $0x7f] sm:$0xff]  ;;  %6837 = vmatprep.subr.bf16.mxu1 %v7512_v39  ;;  %v2652_v29 = vadd.f32 %v8683_v52, %v8696_v6  ;;  %v7520_v52 = vld [vmem:[%s9924_s6 + $0xf8] sm:$0xff]  }
 0x3ba   : > { %v7216_v10 = vpop.f32.mrb[101].mxu1  ;;  %v3085_v58 = vld [vmem:[#allocation3 + $0x87] sm:$0xff] }
 0x3bb   : > { %2966 = vst.msk [vmem:[#allocation3 + $0x98] sm:$0xff] %vm506_vm11, %v2944_v61  ;;  %v2893_v62 = vpop.f32.mrb[102].mxu1  ;;  %3275 = vrot.lane.b32.xlu0 %v3033_v8, %s7589_s24  ;;  %v3099_v16 = vpack.c.bf16 %v3085_v58, %v3084_v35  ;;  %v3020_v38 = vld [vmem:[#allocation3 + $0x83] sm:$0xff] }
 0x3bc   : > { %v7217_v18 = vpop.f32.mrb[103].mxu1  ;;  %6838 = vmatpush3.bf16.msra.mxu1 %v7513_v49  ;;  %v2971_v49 = vld [vmem:[#allocation3 + $0x2] sm:$0xff] }
 0x3bd   : > { %3308 = vrot.lane.b32.xlu1 %v3099_v16, %s7589_s24  ;;  %6839 = vmatprep.subr.bf16.mxu1 %v7515_v44 }
 0x3c0   : > { %v3021_v15 = vld [vmem:[#allocation3 + $0x8b] sm:$0xff]  ;;  %6840 = vmatpush3.bf16.msra.mxu1 %v7516_v14 }
 0x3c1   : > { %v3034_v57 = vpack.c.bf16 %v3021_v15, %v3020_v38  ;;  %v2898_v36 = vpop.f32.mrb[104].mxu1  ;;  %v3086_v59 = vld [vmem:[#allocation3 + $0x8f] sm:$0xff]  ;;  %6841 = vmatprep.subr.bf16.mxu1 %v7517_v31 }
 0x3c2   : > { %v3087_v55 = vld [vmem:[#allocation3 + $0x97] sm:$0xff]  ;;  %v7220_v19 = vpop.f32.mrb[105].mxu1 }
 0x3c3   : > { %3277 = vrot.lane.b32.xlu0 %v3034_v57, %s7589_s24  ;;  %v3100_v40 = vpack.c.bf16 %v3087_v55, %v3086_v59  ;;  %v2901_v30 = vpop.f32.mrb[106].mxu1  ;;  %v3037_v19 = vld [vmem:[#allocation3 + $0x4] sm:$0xff] }
 0x3c4   : > { %v7221_v50 = vpop.f32.mrb[107].mxu1  ;;  %6842 = vmatpush3.bf16.msra.mxu1 %v7518_v23 }
 0x3c5   : > { %3310 = vrot.lane.b32.xlu1 %v3100_v40, %s7589_s24  ;;  %6843 = vmatprep.subr.bf16.mxu1 %v7520_v52  ;;  %v3038_v40 = vld [vmem:[#allocation3 + $0xc] sm:$0xff]  ;;  %v3137_v52 = vld [vmem:[#allocation3 + $0x19] sm:$0xff] }
 0x3c6   : > { %v2972_v50 = vld [vmem:[#allocation3 + $0xa] sm:$0xff]  ;;  %v3059_v14 = vpack.c.bf16 %v3038_v40, %v3037_v19 }
 0x3c8   : > { %6844 = vmatpush3.bf16.msra.mxu1 %v7521_v12 }
 0x3e6   : > { %v6720_v45 = vpop.f32.mrb[60].mxu0 }
 0x3e7   : > { %v6721_v60 = vpop.f32.mrb[61].mxu0 }
 0x3e8   : > { %v6722_v11 = vadd.f32 %v6721_v60, %v6720_v45  ;;  %v6723_v20 = vpop.f32.mrb[62].mxu0  ;;  %v2993_v45 = vpack.c.bf16 %v2972_v50, %v2971_v49  ;;  %v3185_v49 = vld [vmem:[#allocation3 + $0x25] sm:$0xff] }
 0x3e9   : > { %v6724_v48 = vpop.f32.mrb[63].mxu0  ;;  %v3139_v50 = vld [vmem:[#allocation3 + $0x29] sm:$0xff] }
 0x3ea   : > { %v2770_v61 = vadd.f32 %v6722_v11, %v2649_v4  ;;  %v6725_v8 = vadd.f32 %v6724_v48, %v6723_v20  ;;  %v7504_v4 = vld [vmem:[%s9924_s6 + $0x100] sm:$0xff]  }
 0x3eb   : > { %v3022_v11 = vld [vmem:[#allocation3 + $0x93] sm:$0xff] }
 0x3ec   : > { %v2891_v10 = vadd.f32 %v2890_v3, %v2770_v61  ;;  %v2773_v35 = vadd.f32 %v6725_v8, %v2652_v29  ;;  %v2660_v3 = vadd.f32 %v8698_v9, %v8696_v6 }
 0x3ee   : > { %v2923_v58 = vmax.f32 %v2891_v10, 0.0  ;;  %v2894_v16 = vadd.f32 %v2893_v62, %v2773_v35  ;;  %v6726_v18 = vpop.f32.mrb[64].mxu0 }
 0x3ef   : > { %v6727_v56 = vpop.f32.mrb[65].mxu0 }
 0x3f0   : > { %v2945_v17 = vmul.f32 %v2923_v58, %v8355_v41  ;;  %v2924_v53 = vmax.f32 %v2894_v16, 0.0  ;;  %v6728_v13 = vadd.f32 %v6727_v56, %v6726_v18  ;;  %v6729_v38 = vpop.f32.mrb[66].mxu0  ;;  %v8885_v16 = vld [vmem:[#allocation3 + $0x1c] sm:$0xff] }
 0x3f1   : > { %v6730_v15 = vpop.f32.mrb[67].mxu0  ;;  %v7509_v18 = vld [vmem:[%s9924_s6 + $0x108] sm:$0xff]  }
 0x3f2   : > { %2967 = vst.msk [vmem:[#allocation3 + $0xa0] sm:$0xff] %vm506_vm11, %v2945_v17  ;;  %v2946_v62 = vmul.f32 %v2924_v53, %v8353_v37  ;;  %v6731_v39 = vadd.f32 %v6730_v15, %v6729_v38  ;;  %v2778_v57 = vadd.f32 %v6728_v13, %v2657_v54  ;;  %v2974_v56 = vld [vmem:[#allocation3 + $0x1a] sm:$0xff]  ;;  %v2973_v38 = vld [vmem:[#allocation3 + $0x12] sm:$0xff] }
 0x3f3   : > { %v3039_v17 = vld [vmem:[#allocation3 + $0x14] sm:$0xff] }
 0x3f4   : > { %2968 = vst.msk [vmem:[#allocation3 + $0xa8] sm:$0xff] %vm506_vm11, %v2946_v62  ;;  %v2899_v59 = vadd.f32 %v2898_v36, %v2778_v57  ;;  %v2781_v55 = vadd.f32 %v6731_v39, %v2660_v3  ;;  %v3060_v13 = vpack.c.bf16 %v8885_v16, %v3039_v17  ;;  %v2994_v3 = vpack.c.bf16 %v2974_v56, %v2973_v38  ;;  %v3136_v62 = vld [vmem:[#allocation3 + $0x11] sm:$0xff]  ;;  %v3189_v56 = vld [vmem:[#allocation3 + $0x45] sm:$0xff]  ;;  %v8918_v17 = vld [vmem:[#allocation3 + $0x3c] sm:$0xff] }
 0x3f5   : > { %v3262_v44 = vpop.permute.xlu0 %3261  ;;  %v3158_v40 = vpack.c.bf16 %v3137_v52, %v3136_v62  ;;  %v2978_v38 = vld [vmem:[#allocation3 + $0x3a] sm:$0xff] }
 0x3f6   : > { %v2925_v6 = vmax.f32 %v2899_v59, 0.0  ;;  %v2902_v9 = vadd.f32 %v2901_v30, %v2781_v55  ;;  %v3384_v30 = vsel %vm506_vm11, %v2993_v45, %v3262_v44  ;;  %v7514_v59 = vld [vmem:[%s9924_s6 + $0x110] sm:$0xff]  }
 0x3f7   : > { %v3295_v60 = vpop.permute.xlu1 %3294  ;;  %v3138_v44 = vld [vmem:[#allocation3 + $0x21] sm:$0xff] }
 0x3f8   : > { %v2947_v31 = vmul.f32 %v2925_v6, %v8391_v32  ;;  %v2926_v23 = vmax.f32 %v2902_v9, 0.0  ;;  %v3428_v36 = vsel %vm506_vm11, %v3059_v14, %v3295_v60  ;;  %v3184_v6 = vld [vmem:[#allocation3 + $0x1d] sm:$0xff]  ;;  %v8902_v9 = vld [vmem:[#allocation3 + $0x2c] sm:$0xff]  ;;  %v3159_v45 = vpack.c.bf16 %v3139_v50, %v3138_v44 }
 0x3f9   : > { %v3023_v20 = vld [vmem:[#allocation3 + $0x9b] sm:$0xff]  ;;  %3918 = vmatprep.mubr.bf16.mxu0 %v3428_v36  ;;  %v2976_v14 = vld [vmem:[#allocation3 + $0x2a] sm:$0xff] }
 0x3fa   : > { %2969 = vst.msk [vmem:[#allocation3 + $0xb0] sm:$0xff] %vm506_vm11, %v2947_v31  ;;  %v2948_v48 = vmul.f32 %v2926_v23, %v8546_v34  ;;  %v3035_v29 = vpack.c.bf16 %v3023_v20, %v3022_v11  ;;  %v3088_v61 = vld [vmem:[#allocation3 + $0x9f] sm:$0xff]  ;;  %3919 = vmatmul.mubr.bf16.vlgmr.msra.gmra.mrb[68].mxu0 %v3384_v30  ;;  %v7519_v31 = vld [vmem:[%s9924_s6 + $0x118] sm:$0xff]   ;;  %v3206_v23 = vpack.c.bf16 %v3185_v49, %v3184_v6  ;;  %v3187_v20 = vld [vmem:[#allocation3 + $0x35] sm:$0xff] }
 0x3fb   : > { %v3089_v8 = vld [vmem:[#allocation3 + $0xa7] sm:$0xff]  ;;  %7223 = vmatpush3.bf16.msra.mxu0 %v7504_v4  ;;  %v3144_v50 = vld [vmem:[#allocation3 + $0x51] sm:$0xff] }
 0x3fc   : > { %v3024_v10 = vld [vmem:[#allocation3 + $0xa3] sm:$0xff]  ;;  %v3025_v35 = vld [vmem:[#allocation3 + $0xab] sm:$0x1]  ;;  %2970 = vst.msk [vmem:[#allocation3 + $0xb8] sm:$0x1] %vm1625_vm12, %v2948_v48  ;;  %3279 = vrot.lane.b32.xlu0 %v3035_v29, %s7589_s24  ;;  %v3101_v58 = vpack.c.bf16 %v3089_v8, %v3088_v61  ;;  %7224 = vmatprep.subr.bf16.mxu0 %v9936_v0  ;;  %v3141_v48 = vld [vmem:[#allocation3 + $0x39] sm:$0xff] }
 0x3fd   : > { %v3036_v54 = vpack.c.bf16 %v3025_v35, %v3024_v10  ;;  %v3264_v53 = vpop.permute.xlu0 %3263  ;;  %v8907_v60 = vld [vmem:[#allocation3 + $0x24] sm:$0xff]  ;;  %v3186_v8 = vld [vmem:[#allocation3 + $0x2d] sm:$0xff] }
 0x3fe   : > { %3312 = vrot.lane.b32.xlu1 %v3101_v58, %s7589_s24  ;;  %v3388_v55 = vsel %vm506_vm11, %v2994_v3, %v3264_v53  ;;  %v3061_v36 = vpack.c.bf16 %v8902_v9, %v8907_v60  ;;  %v2975_v11 = vld [vmem:[#allocation3 + $0x22] sm:$0xff]  ;;  %v3140_v10 = vld [vmem:[#allocation3 + $0x31] sm:$0xff]  ;;  %v3207_v58 = vpack.c.bf16 %v3187_v20, %v3186_v8 }
 0x3ff   : > { %v3297_v15 = vpop.permute.xlu1 %3296  ;;  %7225 = vmatpush3.bf16.msra.mxu0 %v7509_v18  ;;  %v2995_v29 = vpack.c.bf16 %v2976_v14, %v2975_v11  ;;  %v3160_v18 = vpack.c.bf16 %v3141_v48, %v3140_v10  ;;  %v3188_v53 = vld [vmem:[#allocation3 + $0x3d] sm:$0xff]  ;;  %v8920_v3 = vld [vmem:[#allocation3 + $0x34] sm:$0xff]  ;;  %v2980_v11 = vld [vmem:[#allocation3 + $0x4a] sm:$0xff] }
 0x400   : > { %3281 = vrot.lane.b32.xlu0 %v3036_v54, %s7589_s24  ;;  %v3432_v39 = vsel %vm506_vm11, %v3060_v13, %v3297_v15  ;;  %7226 = vmatprep.subr.bf16.mxu0 %v9936_v0  ;;  %v3143_v54 = vld [vmem:[#allocation3 + $0x49] sm:$0xff]  ;;  %v3142_v13 = vld [vmem:[#allocation3 + $0x41] sm:$0xff]  ;;  %v3208_v52 = vpack.c.bf16 %v3189_v56, %v3188_v53  ;;  %v3195_v10 = vld [vmem:[#allocation3 + $0x75] sm:$0xff] }
 0x401   : > { %v3090_v57 = vld [vmem:[#allocation3 + $0xaf] sm:$0xff]  ;;  %v3091_v12 = vld [vmem:[#allocation3 + $0xb7] sm:$0x1]  ;;  %3926 = vmatprep.mubr.bf16.mxu0 %v3432_v39  ;;  %v3161_v15 = vpack.c.bf16 %v3143_v54, %v3142_v13  ;;  %v3062_v39 = vpack.c.bf16 %v8918_v17, %v8920_v3  ;;  %v2979_v8 = vld [vmem:[#allocation3 + $0x42] sm:$0xff] }
 0x402   : > { %v3102_v19 = vpack.c.bf16 %v3091_v12, %v3090_v57  ;;  %3927 = vmatmul.mubr.bf16.gmra.mrb[72].mxu0 %v3388_v55  ;;  %v2977_v57 = vld [vmem:[#allocation3 + $0x32] sm:$0xff] }
 0x403   : > { %7227 = vmatpush3.bf16.msra.mxu0 %v7514_v59  ;;  %v3191_v12 = vld [vmem:[#allocation3 + $0x55] sm:$0xff]  ;;  %v3190_v49 = vld [vmem:[#allocation3 + $0x4d] sm:$0xff] }
 0x404   : > { %3314 = vrot.lane.b32.xlu1 %v3102_v19, %s7589_s24  ;;  %3327 = vrot.lane.b32.xlu0 %v3158_v40, %s7589_s24  ;;  %v3145_v59 = vld [vmem:[#allocation3 + $0x59] sm:$0xff]  ;;  %v2996_v19 = vpack.c.bf16 %v2978_v38, %v2977_v57  ;;  %v3209_v44 = vpack.c.bf16 %v3191_v12, %v3190_v49  ;;  %v3194_v54 = vld [vmem:[#allocation3 + $0x6d] sm:$0xff]  ;;  %v3150_v12 = vld [vmem:[#allocation3 + $0x81] sm:$0xff] }
 0x405   : > { %7228 = vmatprep.subr.bf16.mxu0 %v9936_v0  ;;  %v3266_v4 = vpop.permute.xlu0 %3265  ;;  %v3162_v14 = vpack.c.bf16 %v3145_v59, %v3144_v50  ;;  %v3148_v53 = vld [vmem:[#allocation3 + $0x71] sm:$0xff]  ;;  %v3211_v38 = vpack.c.bf16 %v3195_v10, %v3194_v54  ;;  %v3196_v57 = vld [vmem:[#allocation3 + $0x7d] sm:$0xff] }
 0x406   : > { %v3392_v35 = vsel %vm506_vm11, %v2995_v29, %v3266_v4  ;;  %v3192_v4 = vld [vmem:[#allocation3 + $0x5d] sm:$0xff]  ;;  %v8954_v10 = vld [vmem:[#allocation3 + $0x6c] sm:$0xff] }
 0x407   : > { %v3299_v30 = vpop.permute.xlu1 %3298  ;;  %7229 = vmatpush3.bf16.msra.mxu0 %v7519_v31  ;;  %v3193_v31 = vld [vmem:[#allocation3 + $0x65] sm:$0xff]  ;;  %v2982_v59 = vld [vmem:[#allocation3 + $0x5a] sm:$0xff] }
 0x408   : > { %3360 = vrot.lane.b32.xlu1 %v3206_v23, %s7589_s24  ;;  %3329 = vrot.lane.b32.xlu0 %v3159_v45, %s7589_s24  ;;  %v3436_v61 = vsel %vm506_vm11, %v3061_v36, %v3299_v30  ;;  %v3147_v23 = vld [vmem:[#allocation3 + $0x69] sm:$0xff]  ;;  %v3146_v36 = vld [vmem:[#allocation3 + $0x61] sm:$0xff]  ;;  %v3210_v20 = vpack.c.bf16 %v3193_v31, %v3192_v4 }
 0x409   : > { %3934 = vmatprep.mubr.bf16.mxu0 %v3436_v61  ;;  %v8930_v45 = vld [vmem:[#allocation3 + $0x4c] sm:$0xff]  ;;  %v3163_v48 = vpack.c.bf16 %v3147_v23, %v3146_v36  ;;  %v8932_v30 = vld [vmem:[#allocation3 + $0x44] sm:$0xff] }
 0x40a   : > { %3935 = vmatmul.mubr.bf16.gmra.mrb[76].mxu0 %v3392_v35  ;;  %v3063_v61 = vpack.c.bf16 %v8930_v45, %v8932_v30  ;;  %v3149_v35 = vld [vmem:[#allocation3 + $0x79] sm:$0xff]  ;;  %v3198_v36 = vld [vmem:[#allocation3 + $0x8d] sm:$0xff] }
 0x40c   : > { %3362 = vrot.lane.b32.xlu1 %v3207_v58, %s7589_s24  ;;  %3331 = vrot.lane.b32.xlu0 %v3160_v18, %s7589_s24  ;;  %v2997_v18 = vpack.c.bf16 %v2980_v11, %v2979_v8  ;;  %v3152_v11 = vld [vmem:[#allocation3 + $0x91] sm:$0xff]  ;;  %v3155_v8 = vld [vmem:[#allocation3 + $0xa9] sm:$0xff] }
 0x40d   : > { %v3268_v62 = vpop.permute.xlu0 %3267 }
 0x40e   : > { %v3396_v6 = vsel %vm506_vm11, %v2996_v19, %v3268_v62  ;;  %v3151_v62 = vld [vmem:[#allocation3 + $0x89] sm:$0xff] }
 0x40f   : > { %v3301_v55 = vpop.permute.xlu1 %3300  ;;  %v3165_v19 = vpack.c.bf16 %v3151_v62, %v3150_v12  ;;  %v3203_v62 = vld [vmem:[#allocation3 + $0xb5] sm:$0xff] }
 0x410   : > { %3364 = vrot.lane.b32.xlu1 %v3208_v52, %s7589_s24  ;;  %3333 = vrot.lane.b32.xlu0 %v3161_v15, %s7589_s24  ;;  %v3440_v40 = vsel %vm506_vm11, %v3062_v39, %v3301_v55  ;;  %v3164_v52 = vpack.c.bf16 %v3149_v35, %v3148_v53  ;;  %v3197_v15 = vld [vmem:[#allocation3 + $0x85] sm:$0xff]  ;;  %v8942_v39 = vld [vmem:[#allocation3 + $0x5c] sm:$0xff] }
 0x411   : > { %3942 = vmatprep.mubr.bf16.mxu0 %v3440_v40  ;;  %v3212_v55 = vpack.c.bf16 %v3197_v15, %v3196_v57  ;;  %v8944_v40 = vld [vmem:[#allocation3 + $0x54] sm:$0xff]  ;;  %v3200_v35 = vld [vmem:[#allocation3 + $0x9d] sm:$0xff] }
 0x412   : > { %3943 = vmatmul.mubr.bf16.gmra.mrb[80].mxu0 %v3396_v6  ;;  %v3064_v50 = vpack.c.bf16 %v8942_v39, %v8944_v40  ;;  %v2981_v6 = vld [vmem:[#allocation3 + $0x52] sm:$0xff]  ;;  %v8956_v53 = vld [vmem:[#allocation3 + $0x64] sm:$0xff] }
 0x413   : > { %v2998_v23 = vpack.c.bf16 %v2982_v59, %v2981_v6  ;;  %v2983_v15 = vld [vmem:[#allocation3 + $0x62] sm:$0xff]  ;;  %v3156_v57 = vld [vmem:[#allocation3 + $0xb1] sm:$0xff] }
 0x414   : > { %3366 = vrot.lane.b32.xlu1 %v3209_v44, %s7589_s24  ;;  %3335 = vrot.lane.b32.xlu0 %v3162_v14, %s7589_s24  ;;  %v3199_v44 = vld [vmem:[#allocation3 + $0x95] sm:$0xff] }
 0x415   : > { %v3270_v29 = vpop.permute.xlu0 %3269  ;;  %v3153_v14 = vld [vmem:[#allocation3 + $0x99] sm:$0xff] }
 0x416   : > { %v3400_v13 = vsel %vm506_vm11, %v2997_v18, %v3270_v29  ;;  %v3166_v29 = vpack.c.bf16 %v3153_v14, %v3152_v11  ;;  %v2984_v18 = vld [vmem:[#allocation3 + $0x6a] sm:$0xff] }
 0x417   : > { %v3303_v58 = vpop.permute.xlu1 %3302  ;;  %v2999_v59 = vpack.c.bf16 %v2984_v18, %v2983_v15  ;;  %v2988_v18 = vld [vmem:[#allocation3 + $0x8a] sm:$0xff] }
 0x418   : > { %3368 = vrot.lane.b32.xlu1 %v3210_v20, %s7589_s24  ;;  %3337 = vrot.lane.b32.xlu0 %v3163_v48, %s7589_s24  ;;  %v3444_v56 = vsel %vm506_vm11, %v3063_v61, %v3303_v58  ;;  %v3213_v48 = vpack.c.bf16 %v3199_v44, %v3198_v36  ;;  %v3201_v61 = vld [vmem:[#allocation3 + $0xa5] sm:$0xff]  ;;  %v8968_v36 = vld [vmem:[#allocation3 + $0x74] sm:$0xff] }
 0x419   : > { %3950 = vmatprep.mubr.bf16.mxu0 %v3444_v56  ;;  %v3154_v58 = vld [vmem:[#allocation3 + $0xa1] sm:$0xff]  ;;  %v3214_v56 = vpack.c.bf16 %v3201_v61, %v3200_v35 }
 0x41a   : > { %3951 = vmatmul.mubr.bf16.gmra.mrb[84].mxu0 %v3400_v13  ;;  %v3167_v54 = vpack.c.bf16 %v3155_v8, %v3154_v58  ;;  %v3157_v13 = vld [vmem:[#allocation3 + $0xb9] sm:$0x1]  ;;  %v8975_v58 = vld [vmem:[#allocation3 + $0x8c] sm:$0xff] }
 0x41b   : > { %v3168_v14 = vpack.c.bf16 %v3157_v13, %v3156_v57 }
 0x41c   : > { %3370 = vrot.lane.b32.xlu1 %v3211_v38, %s7589_s24  ;;  %3339 = vrot.lane.b32.xlu0 %v3164_v52, %s7589_s24  ;;  %v3065_v52 = vpack.c.bf16 %v8954_v10, %v8956_v53 }
 0x41d   : > { %v3272_v49 = vpop.permute.xlu0 %3271 }
 0x41e   : > { %v3404_v20 = vsel %vm506_vm11, %v2998_v23, %v3272_v49  ;;  %v3204_v49 = vld [vmem:[#allocation3 + $0xbd] sm:$0xff] }
 0x41f   : > { %v3305_v31 = vpop.permute.xlu1 %3304 }
 0x420   : > { %3372 = vrot.lane.b32.xlu1 %v3212_v55, %s7589_s24  ;;  %3341 = vrot.lane.b32.xlu0 %v3165_v19, %s7589_s24  ;;  %v3448_v4 = vsel %vm506_vm11, %v3064_v50, %v3305_v31  ;;  %v3202_v19 = vld [vmem:[#allocation3 + $0xad] sm:$0xff]  ;;  %v3205_v50 = vld [vmem:[#allocation3 + $0xc5] sm:$0x1]  ;;  %v8966_v31 = vld [vmem:[#allocation3 + $0x7c] sm:$0xff] }
 0x421   : > { %3958 = vmatprep.mubr.bf16.mxu0 %v3448_v4  ;;  %v3215_v44 = vpack.c.bf16 %v3203_v62, %v3202_v19  ;;  %v3216_v23 = vpack.c.bf16 %v3205_v50, %v3204_v49  ;;  %v2986_v4 = vld [vmem:[#allocation3 + $0x7a] sm:$0xff]  ;;  %v2989_v50 = vld [vmem:[#allocation3 + $0x92] sm:$0xff] }
 0x422   : > { %3959 = vmatmul.mubr.bf16.gmra.mrb[88].mxu0 %v3404_v20  ;;  %v3066_v20 = vpack.c.bf16 %v8966_v31, %v8968_v36  ;;  %v8985_v19 = vld [vmem:[#allocation3 + $0x94] sm:$0xff] }
 0x424   : > { %3374 = vrot.lane.b32.xlu1 %v3213_v48, %s7589_s24  ;;  %3343 = vrot.lane.b32.xlu0 %v3166_v29, %s7589_s24  ;;  %v2985_v48 = vld [vmem:[#allocation3 + $0x72] sm:$0xff] }
 0x425   : > { %v3274_v38 = vpop.permute.xlu0 %3273  ;;  %v3000_v61 = vpack.c.bf16 %v2986_v4, %v2985_v48  ;;  %v8991_v4 = vld [vmem:[#allocation3 + $0xa4] sm:$0xff] }
 0x426   : > { %v3408_v6 = vsel %vm506_vm11, %v2999_v59, %v3274_v38  ;;  %v2987_v38 = vld [vmem:[#allocation3 + $0x82] sm:$0xff]  ;;  %v2990_v59 = vld [vmem:[#allocation3 + $0x9a] sm:$0xff] }
 0x427   : > { %v3307_v12 = vpop.permute.xlu1 %3306  ;;  %v3001_v15 = vpack.c.bf16 %v2988_v18, %v2987_v38 }
 0x428   : > { %3376 = vrot.lane.b32.xlu1 %v3214_v56, %s7589_s24  ;;  %3345 = vrot.lane.b32.xlu0 %v3167_v54, %s7589_s24  ;;  %v3452_v55 = vsel %vm506_vm11, %v3065_v52, %v3307_v12  ;;  %v8977_v56 = vld [vmem:[#allocation3 + $0x84] sm:$0xff]  ;;  %v8983_v12 = vld [vmem:[#allocation3 + $0x9c] sm:$0xff] }
 0x429   : > { %3966 = vmatprep.mubr.bf16.mxu0 %v3452_v55  ;;  %v3067_v13 = vpack.c.bf16 %v8975_v58, %v8977_v56  ;;  %v3068_v49 = vpack.c.bf16 %v8983_v12, %v8985_v19 }
 0x42a   : > { %3967 = vmatmul.mubr.bf16.gmra.mrb[92].mxu0 %v3408_v6 }
 0x42c   : > { %3378 = vrot.lane.b32.xlu1 %v3215_v44, %s7589_s24  ;;  %3347 = vrot.lane.b32.xlu0 %v3168_v14, %s7589_s24  ;;  %v3002_v44 = vpack.c.bf16 %v2990_v59, %v2989_v50 }
 0x42d   : > { %v3276_v11 = vpop.permute.xlu0 %3275 }
 0x42e   : > { %v3412_v35 = vsel %vm506_vm11, %v3000_v61, %v3276_v11  ;;  %v3058_v11 = vld [vmem:[#allocation3 + $0xac] sm:$0x1]  ;;  %v2992_v61 = vld [vmem:[#allocation3 + $0xaa] sm:$0x1] }
 0x42f   : > { %v3309_v29 = vpop.permute.xlu1 %3308  ;;  %v3069_v48 = vpack.c.bf16 %v3058_v11, %v8991_v4  ;;  %v3105_v11 = vld [vmem:[#allocation3 + $0x20] sm:$0xff] }
 0x430   : > { %3380 = vrot.lane.b32.xlu1 %v3216_v23, %s7589_s24  ;;  %v3456_v8 = vsel %vm506_vm11, %v3066_v20, %v3309_v29  ;;  %v2991_v29 = vld [vmem:[#allocation3 + $0xa2] sm:$0xff] }
 0x431   : > { %3974 = vmatprep.mubr.bf16.mxu0 %v3456_v8 }
 0x432   : > { %3975 = vmatmul.mubr.bf16.gmra.mrb[96].mxu0 %v3412_v35  ;;  %v3104_v35 = vld [vmem:[#allocation3 + $0x18] sm:$0xff] }
 0x435   : > { %v3278_v54 = vpop.permute.xlu0 %3277 }
 0x436   : > { %v3416_v57 = vsel %vm506_vm11, %v3001_v15, %v3278_v54  ;;  %v3003_v54 = vpack.c.bf16 %v2992_v61, %v2991_v29  ;;  %v3175_v29 = vpack.c.bf16 %v8932_v30, %v8918_v17  ;;  %v3176_v17 = vpack.c.bf16 %v8944_v40, %v8930_v45 }
 0x437   : > { %v3311_v52 = vpop.permute.xlu1 %3310  ;;  %v3177_v45 = vpack.c.bf16 %v8956_v53, %v8942_v39  ;;  %v3178_v39 = vpack.c.bf16 %v8968_v36, %v8954_v10  ;;  %v3179_v10 = vpack.c.bf16 %v8977_v56, %v8966_v31  ;;  %v3180_v31 = vpack.c.bf16 %v8985_v19, %v8975_v58 }
 0x438   : > { %v3460_v62 = vsel %vm506_vm11, %v3067_v13, %v3311_v52  ;;  %v3103_v13 = vld [vmem:[#allocation3 + $0x10] sm:$0xff]  ;;  %v3173_v52 = vpack.c.bf16 %v8907_v60, %v8885_v16  ;;  %v3106_v60 = vld [vmem:[#allocation3 + $0x28] sm:$0xff]  ;;  %v3181_v58 = vpack.c.bf16 %v8991_v4, %v8983_v12 }
 0x439   : > { %3982 = vmatprep.mubr.bf16.mxu0 %v3460_v62  ;;  %v3125_v15 = vpack.c.bf16 %v3104_v35, %v3103_v13  ;;  %v3219_v35 = vld [vmem:[#allocation3 + $0x2e] sm:$0xff] }
 0x43a   : > { %3983 = vmatmul.mubr.bf16.gmra.mrb[100].mxu0 %v3416_v57  ;;  %v3107_v13 = vld [vmem:[#allocation3 + $0x30] sm:$0xff] }
 0x46e   : > { %v3280_v55 = vpop.permute.xlu0 %3279 }
 0x46f   : > { %v3420_v23 = vsel %vm506_vm11, %v3002_v44, %v3280_v55  ;;  %v3217_v44 = vld [vmem:[#allocation3 + $0x1e] sm:$0xff] }
 0x470   : > { %v3313_v6 = vpop.permute.xlu1 %3312 }
 0x471   : > { %v3464_v14 = vsel %vm506_vm11, %v3068_v49, %v3313_v6  ;;  %v3174_v49 = vpack.c.bf16 %v8920_v3, %v8902_v9  ;;  %v3218_v6 = vld [vmem:[#allocation3 + $0x26] sm:$0xff]  ;;  %v3220_v3 = vld [vmem:[#allocation3 + $0x36] sm:$0xff] }
 0x472   : > { %3990 = vmatprep.mubr.bf16.mxu0 %v3464_v14  ;;  %v3282_v20 = vpop.permute.xlu0 %3281 }
 0x473   : > { %3991 = vmatmul.mubr.bf16.gmra.mrb[104].mxu0 %v3420_v23  ;;  %v3424_v57 = vsel %vm506_vm11, %v3003_v54, %v3282_v20  ;;  %v3239_v23 = vpack.c.bf16 %v3218_v6, %v3217_v44  ;;  %v3240_v54 = vpack.c.bf16 %v3220_v3, %v3219_v35  ;;  %v3224_v44 = vld [vmem:[#allocation3 + $0x56] sm:$0xff]  ;;  %v3226_v3 = vld [vmem:[#allocation3 + $0x66] sm:$0xff]  ;;  %v3225_v35 = vld [vmem:[#allocation3 + $0x5e] sm:$0xff] }
 0x476   : > { %v3315_v8 = vpop.permute.xlu1 %3314  ;;  %v3328_v38 = vpop.permute.xlu0 %3327 }
 0x477   : > { %v3468_v18 = vsel %vm506_vm11, %v3069_v48, %v3315_v8  ;;  %v3472_v55 = vsel %vm506_vm11, %v3125_v15, %v3328_v38  ;;  %v3126_v48 = vpack.c.bf16 %v3106_v60, %v3105_v11  ;;  %v3108_v8 = vld [vmem:[#allocation3 + $0x38] sm:$0xff] }
 0x478   : > { %3998 = vmatprep.mubr.bf16.mxu0 %v3468_v18 }
 0x47a   : > { %v3361_v62 = vpop.permute.xlu1 %3360  ;;  %v3330_v14 = vpop.permute.xlu0 %3329 }
 0x47b   : > { %3999 = vmatmul.mubr.bf16.gmra.mrb[108].mxu0 %v3424_v57  ;;  %v3516_v59 = vsel %vm506_vm11, %v3173_v52, %v3361_v62  ;;  %v3476_v61 = vsel %vm506_vm11, %v3126_v48, %v3330_v14  ;;  %v3127_v52 = vpack.c.bf16 %v3108_v8, %v3107_v13  ;;  %v3222_v62 = vld [vmem:[#allocation3 + $0x46] sm:$0xff]  ;;  %v3112_v14 = vld [vmem:[#allocation3 + $0x58] sm:$0xff]  ;;  %v3111_v48 = vld [vmem:[#allocation3 + $0x50] sm:$0xff] }
 0x47c   : > { %4039 = vmatprep.mubr.bf16.mxu1 %v3516_v59  ;;  %7230 = vmatprep.mubr.msk.bf16.mxu0 %vm7580_vm1, %v9936_v0  ;;  %v3110_v57 = vld [vmem:[#allocation3 + $0x48] sm:$0xff]  ;;  %v3221_v59 = vld [vmem:[#allocation3 + $0x3e] sm:$0xff] }
 0x47d   : > { %4040 = vmatmul.mubr.bf16.vlgmr.msra.gmra.mrb[108].mxu1 %v3472_v55  ;;  %v3114_v8 = vld [vmem:[#allocation3 + $0x68] sm:$0xff]  ;;  %v3113_v13 = vld [vmem:[#allocation3 + $0x60] sm:$0xff] }
 0x47e   : > { %v3363_v50 = vpop.permute.xlu1 %3362  ;;  %v3332_v18 = vpop.permute.xlu0 %3331 }
 0x47f   : > { %v3520_v16 = vsel %vm506_vm11, %v3174_v49, %v3363_v50  ;;  %v3480_v30 = vsel %vm506_vm11, %v3127_v52, %v3332_v18  ;;  %v3241_v49 = vpack.c.bf16 %v3222_v62, %v3221_v59  ;;  %v3109_v50 = vld [vmem:[#allocation3 + $0x40] sm:$0xff]  ;;  %v3130_v52 = vpack.c.bf16 %v3114_v8, %v3113_v13  ;;  %v3227_v62 = vld [vmem:[#allocation3 + $0x6e] sm:$0xff] }
 0x480   : > { %4047 = vmatprep.mubr.bf16.mxu1 %v3520_v16  ;;  %v3128_v16 = vpack.c.bf16 %v3110_v57, %v3109_v50  ;;  %v3172_v13 = vld [vmem:[#allocation3 + $0xc4] sm:$0x1] }
 0x482   : > { %v3365_v20 = vpop.permute.xlu1 %3364  ;;  %v3334_v55 = vpop.permute.xlu0 %3333 }
 0x483   : > { %7231 = vmatmul.mubr.msk.bf16.vlgmr.msra.gmra.mrb[112].mxu0 %vm506_vm11, %v3239_v23  ;;  %v3524_v9 = vsel %vm506_vm11, %v3175_v29, %v3365_v20  ;;  %v3484_v40 = vsel %vm506_vm11, %v3128_v16, %v3334_v55  ;;  %v3223_v23 = vld [vmem:[#allocation3 + $0x4e] sm:$0xff]  ;;  %v3230_v16 = vld [vmem:[#allocation3 + $0x86] sm:$0xff] }
 0x484   : > { %7234 = vmatprep.mubr.msk.bf16.mxu0 %vm7580_vm1, %v9936_v0  ;;  %v3242_v20 = vpack.c.bf16 %v3224_v44, %v3223_v23  ;;  %v3115_v55 = vld [vmem:[#allocation3 + $0x70] sm:$0xff] }
 0x485   : > { %4048 = vmatmul.mubr.bf16.gmra.mrb[112].mxu1 %v3476_v61  ;;  %v3129_v61 = vpack.c.bf16 %v3112_v14, %v3111_v48  ;;  %v3117_v14 = vld [vmem:[#allocation3 + $0x80] sm:$0xff]  ;;  %v3232_v48 = vld [vmem:[#allocation3 + $0x96] sm:$0xff] }
 0x486   : > { %4055 = vmatprep.mubr.bf16.mxu1 %v3524_v9  ;;  %v3367_v38 = vpop.permute.xlu1 %3366  ;;  %v3336_v11 = vpop.permute.xlu0 %3335 }
 0x487   : > { %v3528_v15 = vsel %vm506_vm11, %v3176_v17, %v3367_v38  ;;  %v3488_v53 = vsel %vm506_vm11, %v3129_v61, %v3336_v11  ;;  %v3231_v61 = vld [vmem:[#allocation3 + $0x8e] sm:$0xff] }
 0x48a   : > { %v3369_v6 = vpop.permute.xlu1 %3368  ;;  %v3338_v18 = vpop.permute.xlu0 %3337 }
 0x48b   : > { %7235 = vmatmul.mubr.msk.bf16.gmra.mrb[116].mxu0 %vm506_vm11, %v3240_v54  ;;  %v3532_v60 = vsel %vm506_vm11, %v3177_v45, %v3369_v6  ;;  %v3243_v54 = vpack.c.bf16 %v3226_v3, %v3225_v35  ;;  %v3492_v36 = vsel %vm506_vm11, %v3130_v52, %v3338_v18  ;;  %v3118_v45 = vld [vmem:[#allocation3 + $0x88] sm:$0xff]  ;;  %v3119_v3 = vld [vmem:[#allocation3 + $0x90] sm:$0xff] }
 0x48c   : > { %7238 = vmatprep.mubr.msk.bf16.mxu0 %vm7580_vm1, %v9936_v0  ;;  %v3132_v11 = vpack.c.bf16 %v3118_v45, %v3117_v14  ;;  %v3169_v18 = vld [vmem:[#allocation3 + $0xac] sm:$0xff]  ;;  %v3238_v14 = vld [vmem:[#allocation3 + $0xc6] sm:$0x1] }
 0x48d   : > { %4056 = vmatmul.mubr.bf16.gmra.mrb[116].mxu1 %v3480_v30  ;;  %v3228_v30 = vld [vmem:[#allocation3 + $0x76] sm:$0xff]  ;;  %v3234_v52 = vld [vmem:[#allocation3 + $0xa6] sm:$0xff] }
 0x48e   : > { %4063 = vmatprep.mubr.bf16.mxu1 %v3528_v15  ;;  %v3371_v29 = vpop.permute.xlu1 %3370  ;;  %v3116_v15 = vld [vmem:[#allocation3 + $0x78] sm:$0xff]  ;;  %v3340_v57 = vpop.permute.xlu0 %3339  ;;  %v3244_v59 = vpack.c.bf16 %v3228_v30, %v3227_v62  ;;  %v3123_v45 = vld [vmem:[#allocation3 + $0xb0] sm:$0xff] }
 0x48f   : > { %v3536_v9 = vsel %vm506_vm11, %v3178_v39, %v3371_v29  ;;  %v3131_v50 = vpack.c.bf16 %v3116_v15, %v3115_v55  ;;  %v3120_v29 = vld [vmem:[#allocation3 + $0x98] sm:$0xff] }
 0x490   : > { %v3170_v39 = vld [vmem:[#allocation3 + $0xb4] sm:$0xff]  ;;  %v3133_v35 = vpack.c.bf16 %v3120_v29, %v3119_v3 }
 0x491   : > { %v3496_v56 = vsel %vm506_vm11, %v3131_v50, %v3340_v57  ;;  %v3182_v12 = vpack.c.bf16 %v3170_v39, %v3169_v18  ;;  %v3121_v57 = vld [vmem:[#allocation3 + $0xa0] sm:$0xff]  ;;  %v3236_v50 = vld [vmem:[#allocation3 + $0xb6] sm:$0xff] }
 0x492   : > { %v3373_v38 = vpop.permute.xlu1 %3372 }
 0x493   : > { %7239 = vmatmul.mubr.msk.bf16.gmra.mrb[120].mxu0 %vm506_vm11, %v3241_v49  ;;  %v3540_v17 = vsel %vm506_vm11, %v3179_v10, %v3373_v38  ;;  %v3122_v10 = vld [vmem:[#allocation3 + $0xa8] sm:$0xff] }
 0x494   : > { %7242 = vmatprep.mubr.msk.bf16.mxu0 %vm7580_vm1, %v9936_v0 }
 0x495   : > { %4064 = vmatmul.mubr.bf16.gmra.mrb[120].mxu1 %v3484_v40  ;;  %v3229_v40 = vld [vmem:[#allocation3 + $0x7e] sm:$0xff] }
 0x496   : > { %4071 = vmatprep.mubr.bf16.mxu1 %v3532_v60  ;;  %v3375_v49 = vpop.permute.xlu1 %3374  ;;  %v3342_v60 = vpop.permute.xlu0 %3341  ;;  %v3245_v44 = vpack.c.bf16 %v3230_v16, %v3229_v40 }
 0x497   : > { %v3544_v6 = vsel %vm506_vm11, %v3180_v31, %v3375_v49  ;;  %v3500_v19 = vsel %vm506_vm11, %v3132_v11, %v3342_v60  ;;  %v3124_v31 = vld [vmem:[#allocation3 + $0xb8] sm:$0x1] }
 0x498   : > { %v3135_v40 = vpack.c.bf16 %v3124_v31, %v3123_v45 }
 0x49a   : > { %v3377_v23 = vpop.permute.xlu1 %3376 }
 0x49b   : > { %7243 = vmatmul.mubr.msk.bf16.gmra.mrb[124].mxu0 %vm506_vm11, %v3242_v20  ;;  %v3548_v20 = vsel %vm506_vm11, %v3181_v58, %v3377_v23 }
 0x49c   : > { %7246 = vmatprep.mubr.msk.bf16.mxu0 %vm7580_vm1, %v9936_v0 }
 0x49d   : > { %4072 = vmatmul.mubr.bf16.gmra.mrb[124].mxu1 %v3488_v53  ;;  %v3344_v53 = vpop.permute.xlu0 %3343 }
 0x49e   : > { %4079 = vmatprep.mubr.bf16.mxu1 %v3536_v9  ;;  %v3246_v9 = vpack.c.bf16 %v3232_v48, %v3231_v61  ;;  %v3379_v8 = vpop.permute.xlu1 %3378  ;;  %v3504_v4 = vsel %vm506_vm11, %v3133_v35, %v3344_v53 }
 0x49f   : > { %v3552_v38 = vsel %vm506_vm11, %v3182_v12, %v3379_v8 }
 0x4a1   : > { %v3346_v15 = vpop.permute.xlu0 %3345 }
 0x4a2   : > { %v3381_v30 = vpop.permute.xlu1 %3380 }
 0x4a3   : > { %7247 = vmatmul.mubr.msk.bf16.gmra.mrb[128].mxu0 %vm506_vm11, %v3243_v54  ;;  %v3171_v54 = vld [vmem:[#allocation3 + $0xbc] sm:$0xff] }
 0x4a4   : > { %7250 = vmatprep.mubr.msk.bf16.mxu0 %vm7580_vm1, %v9936_v0 }
 0x4a5   : > { %4080 = vmatmul.mubr.bf16.gmra.mrb[128].mxu1 %v3492_v36  ;;  %v3183_v36 = vpack.c.bf16 %v3172_v13, %v3171_v54 }
 0x4a6   : > { %4087 = vmatprep.mubr.bf16.mxu1 %v3540_v17  ;;  %v3233_v17 = vld [vmem:[#allocation3 + $0x9e] sm:$0xff] }
 0x4a7   : > { %v3247_v62 = vpack.c.bf16 %v3234_v52, %v3233_v17  ;;  %v3556_v55 = vsel %vm506_vm11, %v3183_v36, %v3381_v30 }
 0x4ab   : > { %7251 = vmatmul.mubr.msk.bf16.gmra.mrb[132].mxu0 %vm506_vm11, %v3244_v59  ;;  %v3134_v59 = vpack.c.bf16 %v3122_v10, %v3121_v57 }
 0x4ac   : > { %7254 = vmatprep.mubr.msk.bf16.mxu0 %vm7580_vm1, %v9936_v0 }
 0x4ad   : > { %4088 = vmatmul.mubr.bf16.gmra.mrb[132].mxu1 %v3496_v56  ;;  %v3508_v49 = vsel %vm506_vm11, %v3134_v59, %v3346_v15  ;;  %v3235_v56 = vld [vmem:[#allocation3 + $0xae] sm:$0xff] }
 0x4ae   : > { %4095 = vmatprep.mubr.bf16.mxu1 %v3544_v6  ;;  %v3348_v6 = vpop.permute.xlu0 %3347  ;;  %v3248_v16 = vpack.c.bf16 %v3236_v50, %v3235_v56 }
 0x4af   : > { %v3512_v60 = vsel %vm506_vm11, %v3135_v40, %v3348_v6 }
 0x4b3   : > { %7255 = vmatmul.mubr.msk.bf16.gmra.mrb[136].mxu0 %vm506_vm11, %v3245_v44  ;;  %v3237_v44 = vld [vmem:[#allocation3 + $0xbe] sm:$0xff] }
 0x4b4   : > { %7258 = vmatprep.mubr.msk.bf16.mxu0 %vm7580_vm1, %v9936_v0  ;;  %v3249_v58 = vpack.c.bf16 %v3238_v14, %v3237_v44 }
 0x4b5   : > { %4096 = vmatmul.mubr.bf16.gmra.mrb[136].mxu1 %v3500_v19 }
 0x4b6   : > { %4103 = vmatprep.mubr.bf16.mxu1 %v3548_v20 }
 0x4bb   : > { %7259 = vmatmul.mubr.msk.bf16.gmra.mrb[140].mxu0 %vm506_vm11, %v3246_v9 }
 0x4bc   : > { %7262 = vmatprep.mubr.msk.bf16.mxu0 %vm7580_vm1, %v9936_v0 }
 0x4bd   : > { %4104 = vmatmul.mubr.bf16.gmra.mrb[140].mxu1 %v3504_v4 }
 0x4be   : > { %4111 = vmatprep.mubr.bf16.mxu1 %v3552_v38 }
 0x4c3   : > { %7263 = vmatmul.mubr.msk.bf16.gmra.mrb[144].mxu0 %vm506_vm11, %v3247_v62 }
 0x4c4   : > { %7266 = vmatprep.mubr.msk.bf16.mxu0 %vm7580_vm1, %v9936_v0 }
 0x4c5   : > { %4112 = vmatmul.mubr.bf16.gmra.mrb[144].mxu1 %v3508_v49 }
 0x4c6   : > { %4119 = vmatprep.mubr.bf16.mxu1 %v3556_v55 }
 0x4cb   : > { %7267 = vmatmul.mubr.msk.bf16.gmra.mrb[148].mxu0 %vm506_vm11, %v3248_v16 }
 0x4cc   : > { %7270 = vmatprep.mubr.msk.bf16.mxu0 %vm7580_vm1, %v9936_v0 }
 0x4cd   : > { %4120 = vmatmul.mubr.bf16.gmra.mrb[148].mxu1 %v3512_v60  ;;  %v6763_v23 = vpop.f32.mrb[68].mxu0 }
 0x4ce   : > { %v6764_v11 = vpop.f32.mrb[69].mxu0 }
 0x4cf   : > { %v9068_v19 = vadd.f32 %v6764_v11, %v6763_v23  ;;  %v6766_v20 = vpop.f32.mrb[70].mxu0 }
 0x4d0   : > { %v6767_v48 = vpop.f32.mrb[71].mxu0 }
 0x4d1   : > { %v9070_v29 = vadd.f32 %v6767_v48, %v6766_v20  ;;  %v7522_v48 = vld [vmem:[%s9926_s8 + $0x40] sm:$0xff]  }
 0x4d2   : > { %6926 = vmatprep.subr.bf16.mxu1 %v7522_v48 }
 0x4d3   : > { %7271 = vmatmul.mubr.msk.bf16.gmra.mrb[152].mxu0 %vm506_vm11, %v3249_v58 }
 0x4d5   : > { %v6769_v61 = vpop.f32.mrb[72].mxu0 }
 0x4d6   : > { %v6770_v39 = vpop.f32.mrb[73].mxu0 }
 0x4d7   : > { %v9073_v53 = vadd.f32 %v6770_v39, %v6769_v61  ;;  %v6772_v9 = vpop.f32.mrb[74].mxu0 }
 0x4d8   : > { %v6773_v3 = vpop.f32.mrb[75].mxu0 }
 0x4d9   : > { %v9075_v8 = vadd.f32 %v6773_v3, %v6772_v9 }
 0x4dd   : > { %v6775_v35 = vpop.f32.mrb[76].mxu0 }
 0x4de   : > { %v6776_v18 = vpop.f32.mrb[77].mxu0 }
 0x4df   : > { %v9077_v12 = vadd.f32 %v6776_v18, %v6775_v35  ;;  %v6778_v4 = vpop.f32.mrb[78].mxu0  ;;  %v7523_v35 = vld [vmem:[%s9926_s8] sm:$0xff]  }
 0x4e0   : > { %v6779_v54 = vpop.f32.mrb[79].mxu0  ;;  %6927 = vmatpush3.bf16.msra.mxu1 %v7523_v35 }
 0x4e1   : > { %v9079_v13 = vadd.f32 %v6779_v54, %v6778_v4 }
 0x4e5   : > { %v6781_v38 = vpop.f32.mrb[80].mxu0 }
 0x4e6   : > { %v6782_v52 = vpop.f32.mrb[81].mxu0 }
 0x4e7   : > { %v9081_v10 = vadd.f32 %v6782_v52, %v6781_v38  ;;  %v6784_v36 = vpop.f32.mrb[82].mxu0 }
 0x4e8   : > { %v6785_v17 = vpop.f32.mrb[83].mxu0 }
 0x4e9   : > { %v9083_v30 = vadd.f32 %v6785_v17, %v6784_v36  ;;  %v7524_v17 = vld [vmem:[%s9926_s8 + $0x48] sm:$0xff]  }
 0x4ea   : > { %6928 = vmatprep.subr.bf16.mxu1 %v7524_v17 }
 0x4ed   : > { %v6787_v15 = vpop.f32.mrb[84].mxu0 }
 0x4ee   : > { %v6788_v62 = vpop.f32.mrb[85].mxu0 }
 0x4ef   : > { %v9085_v57 = vadd.f32 %v6788_v62, %v6787_v15  ;;  %v6790_v59 = vpop.f32.mrb[86].mxu0  ;;  %v7525_v15 = vld [vmem:[%s9926_s8 + $0x8] sm:$0xff]   ;;  %v7526_v62 = vld [vmem:[%s9926_s8 + $0x50] sm:$0xff]  }
 0x4f0   : > { %v6791_v55 = vpop.f32.mrb[87].mxu0  ;;  %6929 = vmatpush3.bf16.msra.mxu1 %v7525_v15 }
 0x4f1   : > { %v9087_v49 = vadd.f32 %v6791_v55, %v6790_v59  ;;  %v7527_v59 = vld [vmem:[%s9926_s8 + $0x10] sm:$0xff]   ;;  %6930 = vmatprep.subr.bf16.mxu1 %v7526_v62  ;;  %v7528_v55 = vld [vmem:[%s9926_s8 + $0x58] sm:$0xff]  }
 0x4f4   : > { %6931 = vmatpush3.bf16.msra.mxu1 %v7527_v59 }
 0x4f5   : > { %v6793_v50 = vpop.f32.mrb[88].mxu0  ;;  %6932 = vmatprep.subr.bf16.mxu1 %v7528_v55 }
 0x4f6   : > { %v6794_v31 = vpop.f32.mrb[89].mxu0 }
 0x4f7   : > { %v9089_v56 = vadd.f32 %v6794_v31, %v6793_v50  ;;  %v6796_v6 = vpop.f32.mrb[90].mxu0  ;;  %v7529_v50 = vld [vmem:[%s9926_s8 + $0x18] sm:$0xff]   ;;  %v7530_v31 = vld [vmem:[%s9926_s8 + $0x60] sm:$0xff]  }
 0x4f8   : > { %v6797_v16 = vpop.f32.mrb[91].mxu0  ;;  %6933 = vmatpush3.bf16.msra.mxu1 %v7529_v50 }
 0x4f9   : > { %v9091_v45 = vadd.f32 %v6797_v16, %v6796_v6  ;;  %6934 = vmatprep.subr.bf16.mxu1 %v7530_v31  ;;  %v7531_v6 = vld [vmem:[%s9926_s8 + $0x20] sm:$0xff]   ;;  %v7532_v16 = vld [vmem:[%s9926_s8 + $0x68] sm:$0xff]  }
 0x4fc   : > { %6935 = vmatpush3.bf16.msra.mxu1 %v7531_v6 }
 0x4fd   : > { %v6799_v40 = vpop.f32.mrb[92].mxu0  ;;  %6936 = vmatprep.subr.bf16.mxu1 %v7532_v16 }
 0x4fe   : > { %v6800_v60 = vpop.f32.mrb[93].mxu0 }
 0x4ff   : > { %v9093_v44 = vadd.f32 %v6800_v60, %v6799_v40  ;;  %v6802_v14 = vpop.f32.mrb[94].mxu0  ;;  %v7533_v40 = vld [vmem:[%s9926_s8 + $0x28] sm:$0xff]   ;;  %v7534_v60 = vld [vmem:[%s9926_s8 + $0x70] sm:$0xff]  }
 0x500   : > { %v6803_v23 = vpop.f32.mrb[95].mxu0  ;;  %6937 = vmatpush3.bf16.msra.mxu1 %v7533_v40 }
 0x501   : > { %v9095_v11 = vadd.f32 %v6803_v23, %v6802_v14  ;;  %6938 = vmatprep.subr.bf16.mxu1 %v7534_v60 }
 0x505   : > { %v6805_v58 = vpop.f32.mrb[96].mxu0 }
 0x506   : > { %v6806_v20 = vpop.f32.mrb[97].mxu0 }
 0x507   : > { %v9100_v61 = vadd.f32 %v6806_v20, %v6805_v58  ;;  %v6808_v39 = vpop.f32.mrb[98].mxu0  ;;  %v7535_v58 = vld [vmem:[%s9926_s8 + $0x30] sm:$0xff]  }
 0x508   : > { %v6809_v9 = vpop.f32.mrb[99].mxu0  ;;  %6939 = vmatpush3.bf16.msra.mxu1 %v7535_v58 }
 0x509   : > { %v9102_v3 = vadd.f32 %v6809_v9, %v6808_v39 }
 0x50d   : > { %v6811_v18 = vpop.f32.mrb[100].mxu0 }
 0x50e   : > { %v6812_v4 = vpop.f32.mrb[101].mxu0 }
 0x50f   : > { %v9107_v54 = vadd.f32 %v6812_v4, %v6811_v18  ;;  %v6814_v38 = vpop.f32.mrb[102].mxu0  ;;  %v9154_v18 = vld [vmem:[%s9925_s7] ss:$0 sm:$0xff] }
 0x510   : > { %v6815_v52 = vpop.f32.mrb[103].mxu0  ;;  %v3921_v50 = vadd.f32 %v9068_v19, %v9154_v18  ;;  %v3924_v60 = vadd.f32 %v9070_v29, %v9154_v18  ;;  %v7538_v19 = vld [vmem:[%s9926_s8 + $0xc0] sm:$0xff]  }
 0x511   : > { %v9109_v36 = vadd.f32 %v6815_v52, %v6814_v38  ;;  %v7536_v38 = vld [vmem:[%s9926_s8 + $0x78] sm:$0xff]   ;;  %7008 = vmatprep.subr.bf16.mxu0 %v7538_v19 }
 0x512   : > { %v7537_v52 = vld [vmem:[%s9926_s8 + $0x38] sm:$0xff]   ;;  %6940 = vmatprep.subr.bf16.mxu1 %v7536_v38 }
 0x513   : > { %6941 = vmatpush3.bf16.msra.mxu1 %v7537_v52 }
 0x514   : > { %7274 = vmatprep.subr.bf16.mxu1 %v9936_v0 }
 0x546   : > { %v6817_v14 = vpop.f32.mrb[104].mxu0 }
 0x547   : > { %v6818_v23 = vpop.f32.mrb[105].mxu0 }
 0x548   : > { %v9147_v20 = vadd.f32 %v6818_v23, %v6817_v14  ;;  %v6820_v48 = vpop.f32.mrb[106].mxu0 }
 0x549   : > { %v6821_v39 = vpop.f32.mrb[107].mxu0 }
 0x54a   : > { %v9149_v9 = vadd.f32 %v6821_v39, %v6820_v48 }
 0x54e   : > { %v6823_v35 = vpop.f32.mrb[108].mxu0 }
 0x54f   : > { %v6824_v4 = vpop.f32.mrb[109].mxu0 }
 0x550   : > { %v9162_v17 = vadd.f32 %v6824_v4, %v6823_v35  ;;  %v6826_v15 = vpop.f32.mrb[110].mxu0  ;;  %v6845_v62 = vpop.f32.mrb[108].mxu1  ;;  %v7539_v4 = vld [vmem:[%s9926_s8 + $0x80] sm:$0xff]  }
 0x551   : > { %v6827_v59 = vpop.f32.mrb[111].mxu0  ;;  %v6846_v55 = vpop.f32.mrb[109].mxu1  ;;  %7009 = vmatpush3.bf16.msra.mxu0 %v7539_v4 }
 0x552   : > { %v9166_v31 = vadd.f32 %v6827_v59, %v6826_v15  ;;  %v6847_v6 = vadd.f32 %v6846_v55, %v6845_v62  ;;  %v6848_v16 = vpop.f32.mrb[110].mxu1  ;;  %v3929_v55 = vadd.f32 %v9073_v53, %v9154_v18 }
 0x553   : > { %v6849_v40 = vpop.f32.mrb[111].mxu1 }
 0x554   : > { %v6850_v14 = vadd.f32 %v6849_v40, %v6848_v16  ;;  %v4042_v23 = vadd.f32 %v6847_v6, %v3921_v50 }
 0x556   : > { %v4162_v58 = vpop.f32.mrb[112].mxu0  ;;  %v4045_v48 = vadd.f32 %v6850_v14, %v3924_v60  ;;  %v3932_v14 = vadd.f32 %v9075_v8, %v9154_v18  ;;  %v7541_v8 = vld [vmem:[%s9926_s8 + $0xc8] sm:$0xff]  }
 0x557   : > { %v4163_v39 = vadd.f32 %v4162_v58, %v4042_v23  ;;  %v7232_v35 = vpop.f32.mrb[113].mxu0  ;;  %7010 = vmatprep.subr.bf16.mxu0 %v7541_v8 }
 0x558   : > { %v6851_v38 = vpop.f32.mrb[112].mxu1  ;;  %v4165_v52 = vpop.f32.mrb[114].mxu0 }
 0x559   : > { %v4249_v15 = vmax.f32 %v4163_v39, 0.0  ;;  %v4166_v62 = vadd.f32 %v4165_v52, %v4045_v48  ;;  %v6852_v59 = vpop.f32.mrb[113].mxu1  ;;  %v7233_v29 = vpop.f32.mrb[115].mxu0 }
 0x55a   : > { %v6853_v50 = vadd.f32 %v6852_v59, %v6851_v38  ;;  %v6854_v6 = vpop.f32.mrb[114].mxu1  ;;  %v3937_v29 = vadd.f32 %v9077_v12, %v9154_v18 }
 0x55b   : > { %v4271_v16 = vmul.f32 %v4249_v15, %v8246_v2  ;;  %v4250_v40 = vmax.f32 %v4166_v62, 0.0  ;;  %v6855_v60 = vpop.f32.mrb[115].mxu1 }
 0x55c   : > { %v6856_v23 = vadd.f32 %v6855_v60, %v6854_v6  ;;  %v4050_v58 = vadd.f32 %v6853_v50, %v3929_v55  ;;  %v4348_v6 = vld [vmem:[#allocation2 + $0x3] sm:$0xff] }
 0x55d   : > { %4293 = vst.msk [vmem:[#allocation2 + $0x10] sm:$0xff] %vm506_vm11, %v4271_v16  ;;  %v4272_v48 = vmul.f32 %v4250_v40, %v8255_v7 }
 0x55e   : > { %v4170_v39 = vpop.f32.mrb[116].mxu0  ;;  %v4053_v35 = vadd.f32 %v6856_v23, %v3932_v14  ;;  %v7542_v14 = vld [vmem:[%s9926_s8 + $0x88] sm:$0xff]   ;;  %v3940_v23 = vadd.f32 %v9079_v13, %v9154_v18 }
 0x55f   : > { %4294 = vst.msk [vmem:[#allocation2 + $0x18] sm:$0xff] %vm506_vm11, %v4272_v48  ;;  %v4171_v53 = vadd.f32 %v4170_v39, %v4050_v58  ;;  %v7236_v19 = vpop.f32.mrb[117].mxu0  ;;  %7011 = vmatpush3.bf16.msra.mxu0 %v7542_v14 }
 0x560   : > { %v6857_v4 = vpop.f32.mrb[116].mxu1  ;;  %v4173_v38 = vpop.f32.mrb[118].mxu0 }
 0x561   : > { %v4251_v52 = vmax.f32 %v4171_v53, 0.0  ;;  %v4174_v15 = vadd.f32 %v4173_v38, %v4053_v35  ;;  %v6858_v62 = vpop.f32.mrb[117].mxu1  ;;  %v7237_v59 = vpop.f32.mrb[119].mxu0 }
 0x562   : > { %v6859_v55 = vadd.f32 %v6858_v62, %v6857_v4  ;;  %v6860_v50 = vpop.f32.mrb[118].mxu1 }
 0x563   : > { %v4273_v16 = vmul.f32 %v4251_v52, %v8264_v22  ;;  %v4252_v40 = vmax.f32 %v4174_v15, 0.0  ;;  %v6861_v60 = vpop.f32.mrb[119].mxu1 }
 0x564   : > { %v6862_v58 = vadd.f32 %v6861_v60, %v6860_v50  ;;  %v4058_v48 = vadd.f32 %v6859_v55, %v3937_v29  ;;  %v4349_v39 = vld [vmem:[#allocation2 + $0xb] sm:$0xff] }
 0x565   : > { %4295 = vst.msk [vmem:[#allocation2 + $0x20] sm:$0xff] %vm506_vm11, %v4273_v16  ;;  %v4274_v12 = vmul.f32 %v4252_v40, %v8268_v26  ;;  %v4370_v35 = vpack.c.bf16 %v4349_v39, %v4348_v6  ;;  %v4414_v4 = vld [vmem:[#allocation2 + $0xf] sm:$0xff]  ;;  %v3945_v6 = vadd.f32 %v9081_v10, %v9154_v18 }
 0x566   : > { %v4178_v53 = vpop.f32.mrb[120].mxu0  ;;  %v4061_v19 = vadd.f32 %v6862_v58, %v3940_v23  ;;  %v4415_v38 = vld [vmem:[#allocation2 + $0x17] sm:$0xff]  ;;  %v3948_v58 = vadd.f32 %v9083_v30, %v9154_v18 }
 0x567   : > { %4296 = vst.msk [vmem:[#allocation2 + $0x28] sm:$0xff] %vm506_vm11, %v4274_v12  ;;  %v4179_v52 = vadd.f32 %v4178_v53, %v4058_v48  ;;  %v7240_v15 = vpop.f32.mrb[121].mxu0  ;;  %4605 = vrot.lane.b32.xlu0 %v4370_v35, %s7589_s24  ;;  %v4436_v13 = vpack.c.bf16 %v4415_v38, %v4414_v4  ;;  %v4350_v12 = vld [vmem:[#allocation2 + $0x13] sm:$0xff] }
 0x568   : > { %v6863_v62 = vpop.f32.mrb[120].mxu1  ;;  %v4181_v59 = vpop.f32.mrb[122].mxu0 }
 0x569   : > { %v4253_v8 = vmax.f32 %v4179_v52, 0.0  ;;  %v4182_v29 = vadd.f32 %v4181_v59, %v4061_v19  ;;  %v6864_v55 = vpop.f32.mrb[121].mxu1  ;;  %v7241_v50 = vpop.f32.mrb[123].mxu0  ;;  %4638 = vrot.lane.b32.xlu1 %v4436_v13, %s7589_s24 }
 0x56a   : > { %v6865_v16 = vadd.f32 %v6864_v55, %v6863_v62  ;;  %v6866_v40 = vpop.f32.mrb[122].mxu1  ;;  %v7543_v55 = vld [vmem:[%s9926_s8 + $0xd0] sm:$0xff]  }
 0x56b   : > { %v4275_v60 = vmul.f32 %v4253_v8, %v8279_v42  ;;  %v4254_v14 = vmax.f32 %v4182_v29, 0.0  ;;  %v6867_v23 = vpop.f32.mrb[123].mxu1  ;;  %v7544_v50 = vld [vmem:[%s9926_s8 + $0x90] sm:$0xff]   ;;  %7012 = vmatprep.subr.bf16.mxu0 %v7543_v55 }
 0x56c   : > { %v6868_v48 = vadd.f32 %v6867_v23, %v6866_v40  ;;  %v4066_v39 = vadd.f32 %v6865_v16, %v3945_v6  ;;  %v4351_v35 = vld [vmem:[#allocation2 + $0x1b] sm:$0xff]  ;;  %v3953_v23 = vadd.f32 %v9085_v57, %v9154_v18  ;;  %7013 = vmatpush3.bf16.msra.mxu0 %v7544_v50 }
 0x56d   : > { %4297 = vst.msk [vmem:[#allocation2 + $0x30] sm:$0xff] %vm506_vm11, %v4275_v60  ;;  %v4276_v53 = vmul.f32 %v4254_v14, %v8283_v46  ;;  %v4371_v19 = vpack.c.bf16 %v4351_v35, %v4350_v12  ;;  %v4416_v38 = vld [vmem:[#allocation2 + $0x1f] sm:$0xff] }
 0x56e   : > { %v4186_v4 = vpop.f32.mrb[124].mxu0  ;;  %v4069_v10 = vadd.f32 %v6868_v48, %v3948_v58  ;;  %v4417_v52 = vld [vmem:[#allocation2 + $0x27] sm:$0xff]  ;;  %v9210_v62 = vld [vmem:[#allocation2 + $0x1c] sm:$0xff] }
 0x56f   : > { %4298 = vst.msk [vmem:[#allocation2 + $0x38] sm:$0xff] %vm506_vm11, %v4276_v53  ;;  %v4187_v15 = vadd.f32 %v4186_v4, %v4066_v39  ;;  %v7244_v13 = vpop.f32.mrb[125].mxu0  ;;  %4607 = vrot.lane.b32.xlu0 %v4371_v19, %s7589_s24  ;;  %v4437_v30 = vpack.c.bf16 %v4417_v52, %v4416_v38  ;;  %v9212_v59 = vld [vmem:[#allocation2 + $0x24] sm:$0xff]  ;;  %v3956_v53 = vadd.f32 %v9087_v49, %v9154_v18 }
 0x570   : > { %v6869_v8 = vpop.f32.mrb[124].mxu1  ;;  %v4189_v29 = vpop.f32.mrb[126].mxu0  ;;  %v4517_v6 = vpack.c.bf16 %v9212_v59, %v9210_v62 }
 0x571   : > { %v4255_v16 = vmax.f32 %v4187_v15, 0.0  ;;  %v4190_v40 = vadd.f32 %v4189_v29, %v4069_v10  ;;  %v6870_v60 = vpop.f32.mrb[125].mxu1  ;;  %v7245_v14 = vpop.f32.mrb[127].mxu0  ;;  %4640 = vrot.lane.b32.xlu1 %v4437_v30, %s7589_s24  ;;  %v4352_v10 = vld [vmem:[#allocation2 + $0x23] sm:$0xff] }
 0x572   : > { %v6871_v58 = vadd.f32 %v6870_v60, %v6869_v8  ;;  %v6872_v48 = vpop.f32.mrb[126].mxu1 }
 0x573   : > { %v4277_v39 = vmul.f32 %v4255_v16, %v8293_v1  ;;  %v4256_v12 = vmax.f32 %v4190_v40, 0.0  ;;  %v6873_v35 = vpop.f32.mrb[127].mxu1  ;;  %v7546_v40 = vld [vmem:[%s9926_s8 + $0xd8] sm:$0xff]  }
 0x574   : > { %v6874_v19 = vadd.f32 %v6873_v35, %v6872_v48  ;;  %v4074_v4 = vadd.f32 %v6871_v58, %v3953_v23  ;;  %v4353_v38 = vld [vmem:[#allocation2 + $0x2b] sm:$0xff]  ;;  %v7547_v48 = vld [vmem:[%s9926_s8 + $0x98] sm:$0xff]   ;;  %7014 = vmatprep.subr.bf16.mxu0 %v7546_v40 }
 0x575   : > { %4299 = vst.msk [vmem:[#allocation2 + $0x40] sm:$0xff] %vm506_vm11, %v4277_v39  ;;  %v4278_v52 = vmul.f32 %v4256_v12, %v8296_v5  ;;  %v4372_v57 = vpack.c.bf16 %v4353_v38, %v4352_v10  ;;  %v4418_v30 = vld [vmem:[#allocation2 + $0x2f] sm:$0xff]  ;;  %v3961_v39 = vadd.f32 %v9089_v56, %v9154_v18  ;;  %7015 = vmatpush3.bf16.msra.mxu0 %v7547_v48 }
 0x576   : > { %v4194_v15 = vpop.f32.mrb[128].mxu0  ;;  %v4077_v13 = vadd.f32 %v6874_v19, %v3956_v53  ;;  %v4419_v8 = vld [vmem:[#allocation2 + $0x37] sm:$0xff]  ;;  %v3964_v10 = vadd.f32 %v9091_v45, %v9154_v18  ;;  %v3969_v48 = vadd.f32 %v9093_v44, %v9154_v18 }
 0x577   : > { %4300 = vst.msk [vmem:[#allocation2 + $0x48] sm:$0xff] %vm506_vm11, %v4278_v52  ;;  %v4195_v29 = vadd.f32 %v4194_v15, %v4074_v4  ;;  %v7248_v55 = vpop.f32.mrb[129].mxu0  ;;  %4609 = vrot.lane.b32.xlu0 %v4372_v57, %s7589_s24  ;;  %v4438_v49 = vpack.c.bf16 %v4419_v8, %v4418_v30  ;;  %v4354_v57 = vld [vmem:[#allocation2 + $0x33] sm:$0xff] }
 0x578   : > { %v6875_v50 = vpop.f32.mrb[128].mxu1  ;;  %v4197_v16 = vpop.f32.mrb[130].mxu0 }
 0x579   : > { %v4257_v60 = vmax.f32 %v4195_v29, 0.0  ;;  %v4198_v14 = vadd.f32 %v4197_v16, %v4077_v13  ;;  %v6876_v23 = vpop.f32.mrb[129].mxu1  ;;  %v7249_v58 = vpop.f32.mrb[131].mxu0  ;;  %4642 = vrot.lane.b32.xlu1 %v4438_v49, %s7589_s24 }
 0x57a   : > { %v6877_v12 = vadd.f32 %v6876_v23, %v6875_v50  ;;  %v6878_v35 = vpop.f32.mrb[130].mxu1 }
 0x57b   : > { %v4279_v53 = vmul.f32 %v4257_v60, %v8305_v21  ;;  %v4258_v19 = vmax.f32 %v4198_v14, 0.0  ;;  %v6879_v4 = vpop.f32.mrb[131].mxu1 }
 0x57c   : > { %v6880_v38 = vadd.f32 %v6879_v4, %v6878_v35  ;;  %v4082_v52 = vadd.f32 %v6877_v12, %v3961_v39  ;;  %v4355_v15 = vld [vmem:[#allocation2 + $0x3b] sm:$0xff] }
 0x57d   : > { %4301 = vst.msk [vmem:[#allocation2 + $0x50] sm:$0xff] %vm506_vm11, %v4279_v53  ;;  %v4280_v13 = vmul.f32 %v4258_v19, %v8308_v25  ;;  %v4373_v56 = vpack.c.bf16 %v4355_v15, %v4354_v57  ;;  %v4420_v29 = vld [vmem:[#allocation2 + $0x3f] sm:$0xff] }
 0x57e   : > { %v4202_v30 = vpop.f32.mrb[132].mxu0  ;;  %v4085_v8 = vadd.f32 %v6880_v38, %v3964_v10  ;;  %v4421_v55 = vld [vmem:[#allocation2 + $0x47] sm:$0xff]  ;;  %v3972_v10 = vadd.f32 %v9095_v11, %v9154_v18 }
 0x57f   : > { %4302 = vst.msk [vmem:[#allocation2 + $0x58] sm:$0xff] %vm506_vm11, %v4280_v13  ;;  %v4203_v49 = vadd.f32 %v4202_v30, %v4082_v52  ;;  %v7252_v50 = vpop.f32.mrb[133].mxu0  ;;  %4611 = vrot.lane.b32.xlu0 %v4373_v56, %s7589_s24  ;;  %v4439_v45 = vpack.c.bf16 %v4421_v55, %v4420_v29  ;;  %v7548_v4 = vld [vmem:[%s9926_s8 + $0xe0] sm:$0xff]  }
 0x580   : > { %v6881_v16 = vpop.f32.mrb[132].mxu1  ;;  %v4205_v40 = vpop.f32.mrb[134].mxu0  ;;  %v4356_v57 = vld [vmem:[#allocation2 + $0x43] sm:$0xff]  ;;  %7016 = vmatprep.subr.bf16.mxu0 %v7548_v4 }
 0x581   : > { %v4259_v60 = vmax.f32 %v4203_v49, 0.0  ;;  %v4206_v14 = vadd.f32 %v4205_v40, %v4085_v8  ;;  %v6882_v23 = vpop.f32.mrb[133].mxu1  ;;  %v7253_v58 = vpop.f32.mrb[135].mxu0  ;;  %4644 = vrot.lane.b32.xlu1 %v4439_v45, %s7589_s24  ;;  %v7549_v50 = vld [vmem:[%s9926_s8 + $0xa0] sm:$0xff]  }
 0x582   : > { %v6883_v39 = vadd.f32 %v6882_v23, %v6881_v16  ;;  %v6884_v12 = vpop.f32.mrb[134].mxu1  ;;  %7017 = vmatpush3.bf16.msra.mxu0 %v7549_v50  ;;  %v3977_v58 = vadd.f32 %v9100_v61, %v9154_v18 }
 0x583   : > { %v4281_v35 = vmul.f32 %v4259_v60, %v8317_v43  ;;  %v4260_v53 = vmax.f32 %v4206_v14, 0.0  ;;  %v6885_v19 = vpop.f32.mrb[135].mxu1 }
 0x584   : > { %v6886_v38 = vadd.f32 %v6885_v19, %v6884_v12  ;;  %v4090_v52 = vadd.f32 %v6883_v39, %v3969_v48  ;;  %v4357_v15 = vld [vmem:[#allocation2 + $0x4b] sm:$0xff]  ;;  %v3980_v19 = vadd.f32 %v9102_v3, %v9154_v18 }
 0x585   : > { %4303 = vst.msk [vmem:[#allocation2 + $0x60] sm:$0xff] %vm506_vm11, %v4281_v35  ;;  %v4282_v44 = vmul.f32 %v4260_v53, %v8320_v47  ;;  %v4374_v13 = vpack.c.bf16 %v4357_v15, %v4356_v57  ;;  %v4422_v8 = vld [vmem:[#allocation2 + $0x4f] sm:$0xff] }
 0x586   : > { %v4210_v56 = vpop.f32.mrb[136].mxu0  ;;  %v4093_v30 = vadd.f32 %v6886_v38, %v3972_v10  ;;  %v4423_v29 = vld [vmem:[#allocation2 + $0x57] sm:$0xff] }
 0x587   : > { %4304 = vst.msk [vmem:[#allocation2 + $0x68] sm:$0xff] %vm506_vm11, %v4282_v44  ;;  %v4211_v55 = vadd.f32 %v4210_v56, %v4090_v52  ;;  %v7256_v49 = vpop.f32.mrb[137].mxu0  ;;  %4613 = vrot.lane.b32.xlu0 %v4374_v13, %s7589_s24  ;;  %v4440_v11 = vpack.c.bf16 %v4423_v29, %v4422_v8  ;;  %v4358_v38 = vld [vmem:[#allocation2 + $0x53] sm:$0xff] }
 0x588   : > { %v6887_v45 = vpop.f32.mrb[136].mxu1  ;;  %v4213_v16 = vpop.f32.mrb[138].mxu0  ;;  %v7551_v49 = vld [vmem:[%s9926_s8 + $0xe8] sm:$0xff]  }
 0x589   : > { %v4261_v40 = vmax.f32 %v4211_v55, 0.0  ;;  %v4214_v60 = vadd.f32 %v4213_v16, %v4093_v30  ;;  %v6888_v14 = vpop.f32.mrb[137].mxu1  ;;  %v7257_v23 = vpop.f32.mrb[139].mxu0  ;;  %4646 = vrot.lane.b32.xlu1 %v4440_v11, %s7589_s24  ;;  %v7552_v11 = vld [vmem:[%s9926_s8 + $0xa8] sm:$0xff]   ;;  %7018 = vmatprep.subr.bf16.mxu0 %v7551_v49  ;;  %v7554_v49 = vld [vmem:[%s9926_s8 + $0xb0] sm:$0xff]  }
 0x58a   : > { %v6889_v48 = vadd.f32 %v6888_v14, %v6887_v45  ;;  %v6890_v39 = vpop.f32.mrb[138].mxu1  ;;  %7019 = vmatpush3.bf16.msra.mxu0 %v7552_v11  ;;  %v3993_v11 = vadd.f32 %v9147_v20, %v9154_v18 }
 0x58b   : > { %v4283_v12 = vmul.f32 %v4261_v40, %v8329_v63  ;;  %v4262_v35 = vmax.f32 %v4214_v60, 0.0  ;;  %v6891_v53 = vpop.f32.mrb[139].mxu1  ;;  %v3985_v60 = vadd.f32 %v9107_v54, %v9154_v18 }
 0x58c   : > { %v6892_v4 = vadd.f32 %v6891_v53, %v6890_v39  ;;  %v4098_v10 = vadd.f32 %v6889_v48, %v3977_v58  ;;  %v4359_v52 = vld [vmem:[#allocation2 + $0x5b] sm:$0xff] }
 0x58d   : > { %4305 = vst.msk [vmem:[#allocation2 + $0x70] sm:$0xff] %vm506_vm11, %v4283_v12  ;;  %v4284_v57 = vmul.f32 %v4262_v35, %v8332_v51  ;;  %v4375_v15 = vpack.c.bf16 %v4359_v52, %v4358_v38  ;;  %v4424_v13 = vld [vmem:[#allocation2 + $0x5f] sm:$0xff]  ;;  %v3988_v12 = vadd.f32 %v9109_v36, %v9154_v18 }
 0x58e   : > { %v4218_v44 = vpop.f32.mrb[140].mxu0  ;;  %v4101_v61 = vadd.f32 %v6892_v4, %v3980_v19  ;;  %v4425_v56 = vld [vmem:[#allocation2 + $0x67] sm:$0xff] }
 0x58f   : > { %4306 = vst.msk [vmem:[#allocation2 + $0x78] sm:$0xff] %vm506_vm11, %v4284_v57  ;;  %v4219_v30 = vadd.f32 %v4218_v44, %v4098_v10  ;;  %v7260_v8 = vpop.f32.mrb[141].mxu0  ;;  %4615 = vrot.lane.b32.xlu0 %v4375_v15, %s7589_s24  ;;  %v4441_v3 = vpack.c.bf16 %v4425_v56, %v4424_v13  ;;  %v4360_v19 = vld [vmem:[#allocation2 + $0x63] sm:$0xff] }
 0x590   : > { %v6893_v29 = vpop.f32.mrb[140].mxu1  ;;  %v4221_v55 = vpop.f32.mrb[142].mxu0 }
 0x591   : > { %v4263_v50 = vmax.f32 %v4219_v30, 0.0  ;;  %v4222_v45 = vadd.f32 %v4221_v55, %v4101_v61  ;;  %v6894_v16 = vpop.f32.mrb[141].mxu1  ;;  %v7261_v40 = vpop.f32.mrb[143].mxu0  ;;  %4648 = vrot.lane.b32.xlu1 %v4441_v3, %s7589_s24  ;;  %v7553_v55 = vld [vmem:[%s9926_s8 + $0xf0] sm:$0xff]  }
 0x592   : > { %v6895_v14 = vadd.f32 %v6894_v16, %v6893_v29  ;;  %v6896_v23 = vpop.f32.mrb[142].mxu1  ;;  %7020 = vmatprep.subr.bf16.mxu0 %v7553_v55  ;;  %v4004_v55 = vadd.f32 %v9166_v31, %v9154_v18 }
 0x593   : > { %v4285_v58 = vmul.f32 %v4263_v50, %v8341_v24  ;;  %v4264_v48 = vmax.f32 %v4222_v45, 0.0  ;;  %v6897_v39 = vpop.f32.mrb[143].mxu1  ;;  %7021 = vmatpush3.bf16.msra.mxu0 %v7554_v49 }
 0x594   : > { %v6898_v35 = vadd.f32 %v6897_v39, %v6896_v23  ;;  %v4106_v53 = vadd.f32 %v6895_v14, %v3985_v60  ;;  %v4361_v4 = vld [vmem:[#allocation2 + $0x6b] sm:$0xff]  ;;  %v3996_v14 = vadd.f32 %v9149_v9, %v9154_v18 }
 0x595   : > { %4307 = vst.msk [vmem:[#allocation2 + $0x80] sm:$0xff] %vm506_vm11, %v4285_v58  ;;  %v4286_v10 = vmul.f32 %v4264_v48, %v8343_v28  ;;  %v4376_v54 = vpack.c.bf16 %v4361_v4, %v4360_v19  ;;  %v4426_v57 = vld [vmem:[#allocation2 + $0x6f] sm:$0xff] }
 0x596   : > { %v4226_v38 = vpop.f32.mrb[144].mxu0  ;;  %v4109_v52 = vadd.f32 %v6898_v35, %v3988_v12  ;;  %v4427_v15 = vld [vmem:[#allocation2 + $0x77] sm:$0xff] }
 0x597   : > { %4308 = vst.msk [vmem:[#allocation2 + $0x88] sm:$0xff] %vm506_vm11, %v4286_v10  ;;  %v4227_v44 = vadd.f32 %v4226_v38, %v4106_v53  ;;  %v7264_v61 = vpop.f32.mrb[145].mxu0  ;;  %4617 = vrot.lane.b32.xlu0 %v4376_v54, %s7589_s24  ;;  %v4442_v36 = vpack.c.bf16 %v4427_v15, %v4426_v57  ;;  %v4362_v48 = vld [vmem:[#allocation2 + $0x73] sm:$0xff] }
 0x598   : > { %v6899_v13 = vpop.f32.mrb[144].mxu1  ;;  %v4229_v56 = vpop.f32.mrb[146].mxu0 }
 0x599   : > { %v4265_v30 = vmax.f32 %v4227_v44, 0.0  ;;  %v4230_v8 = vadd.f32 %v4229_v56, %v4109_v52  ;;  %v6900_v3 = vpop.f32.mrb[145].mxu1  ;;  %v7265_v29 = vpop.f32.mrb[147].mxu0  ;;  %4650 = vrot.lane.b32.xlu1 %v4442_v36, %s7589_s24  ;;  %v4001_v36 = vadd.f32 %v9162_v17, %v9154_v18 }
 0x59a   : > { %v6901_v50 = vadd.f32 %v6900_v3, %v6899_v13  ;;  %v6902_v45 = vpop.f32.mrb[146].mxu1  ;;  %v7556_v29 = vld [vmem:[%s9926_s8 + $0xf8] sm:$0xff]  }
 0x59b   : > { %v4287_v16 = vmul.f32 %v4265_v30, %v8351_v33  ;;  %v4266_v40 = vmax.f32 %v4230_v8, 0.0  ;;  %v6903_v60 = vpop.f32.mrb[147].mxu1  ;;  %7022 = vmatprep.subr.bf16.mxu0 %v7556_v29  ;;  %v4529_v29 = vld [vmem:[#allocation2 + $0x25] sm:$0xff] }
 0x59c   : > { %v6904_v23 = vadd.f32 %v6903_v60, %v6902_v45  ;;  %v4114_v58 = vadd.f32 %v6901_v50, %v3993_v11  ;;  %v4363_v39 = vld [vmem:[#allocation2 + $0x7b] sm:$0xff] }
 0x59d   : > { %4309 = vst.msk [vmem:[#allocation2 + $0x90] sm:$0xff] %vm506_vm11, %v4287_v16  ;;  %v4288_v12 = vmul.f32 %v4266_v40, %v8349_v27  ;;  %v4377_v20 = vpack.c.bf16 %v4363_v39, %v4362_v48  ;;  %v4428_v19 = vld [vmem:[#allocation2 + $0x7f] sm:$0xff] }
 0x59e   : > { %v4234_v35 = vpop.f32.mrb[148].mxu0  ;;  %v4117_v53 = vadd.f32 %v6904_v23, %v3996_v14  ;;  %v4429_v4 = vld [vmem:[#allocation2 + $0x87] sm:$0xff]  ;;  %v7557_v39 = vld [vmem:[%s9926_s8 + $0xb8] sm:$0xff]  }
 0x59f   : > { %4310 = vst.msk [vmem:[#allocation2 + $0x98] sm:$0xff] %vm506_vm11, %v4288_v12  ;;  %v4235_v10 = vadd.f32 %v4234_v35, %v4114_v58  ;;  %v7268_v54 = vpop.f32.mrb[149].mxu0  ;;  %4619 = vrot.lane.b32.xlu0 %v4377_v20, %s7589_s24  ;;  %v4443_v9 = vpack.c.bf16 %v4429_v4, %v4428_v19  ;;  %v4364_v50 = vld [vmem:[#allocation2 + $0x83] sm:$0xff]  ;;  %7023 = vmatpush3.bf16.msra.mxu0 %v7557_v39 }
 0x5a0   : > { %v6905_v38 = vpop.f32.mrb[148].mxu1  ;;  %v4237_v52 = vpop.f32.mrb[150].mxu0  ;;  %7326 = vmatprep.subr.bf16.mxu0 %v9936_v0 }
 0x5a1   : > { %v4267_v57 = vmax.f32 %v4235_v10, 0.0  ;;  %v4238_v15 = vadd.f32 %v4237_v52, %v4117_v53  ;;  %v6906_v44 = vpop.f32.mrb[149].mxu1  ;;  %v7269_v61 = vpop.f32.mrb[151].mxu0  ;;  %4652 = vrot.lane.b32.xlu1 %v4443_v9, %s7589_s24 }
 0x5a2   : > { %v6907_v13 = vadd.f32 %v6906_v44, %v6905_v38  ;;  %v6908_v56 = vpop.f32.mrb[150].mxu1 }
 0x5a3   : > { %v4289_v30 = vmul.f32 %v4267_v57, %v8355_v41  ;;  %v4268_v8 = vmax.f32 %v4238_v15, 0.0  ;;  %v6909_v3 = vpop.f32.mrb[151].mxu1 }
 0x5a4   : > { %v6910_v49 = vadd.f32 %v6909_v3, %v6908_v56  ;;  %v4122_v11 = vadd.f32 %v6907_v13, %v4001_v36  ;;  %v4365_v45 = vld [vmem:[#allocation2 + $0x8b] sm:$0xff]  ;;  %v4481_v36 = vld [vmem:[#allocation2 + $0x19] sm:$0xff] }
 0x5a5   : > { %4311 = vst.msk [vmem:[#allocation2 + $0xa0] sm:$0xff] %vm506_vm11, %v4289_v30  ;;  %v4290_v17 = vmul.f32 %v4268_v8, %v8353_v37  ;;  %v4378_v16 = vpack.c.bf16 %v4365_v45, %v4364_v50  ;;  %v4430_v14 = vld [vmem:[#allocation2 + $0x8f] sm:$0xff] }
 0x5a6   : > { %v4242_v40 = vpop.f32.mrb[152].mxu0  ;;  %v4125_v60 = vadd.f32 %v6910_v49, %v4004_v55  ;;  %v4431_v23 = vld [vmem:[#allocation2 + $0x97] sm:$0xff]  ;;  %v4483_v55 = vld [vmem:[#allocation2 + $0x29] sm:$0xff] }
 0x5a7   : > { %4312 = vst.msk [vmem:[#allocation2 + $0xa8] sm:$0xff] %vm506_vm11, %v4290_v17  ;;  %v4243_v58 = vadd.f32 %v4242_v40, %v4122_v11  ;;  %v7272_v48 = vpop.f32.mrb[153].mxu0  ;;  %4621 = vrot.lane.b32.xlu0 %v4378_v16, %s7589_s24  ;;  %v4444_v18 = vpack.c.bf16 %v4431_v23, %v4430_v14  ;;  %v4366_v4 = vld [vmem:[#allocation2 + $0x93] sm:$0xff]  ;;  %v4528_v49 = vld [vmem:[#allocation2 + $0x1d] sm:$0xff] }
 0x5a8   : > { %v4245_v31 = vpop.f32.mrb[154].mxu0  ;;  %v4480_v30 = vld [vmem:[#allocation2 + $0x11] sm:$0xff]  ;;  %v4482_v11 = vld [vmem:[#allocation2 + $0x21] sm:$0xff]  ;;  %v4550_v50 = vpack.c.bf16 %v4529_v29, %v4528_v49  ;;  %v4485_v16 = vld [vmem:[#allocation2 + $0x39] sm:$0xff] }
 0x5a9   : > { %v4269_v12 = vmax.f32 %v4243_v58, 0.0  ;;  %v4246_v20 = vadd.f32 %v4245_v31, %v4125_v60  ;;  %v7273_v35 = vpop.f32.mrb[155].mxu0  ;;  %4654 = vrot.lane.b32.xlu1 %v4444_v18, %s7589_s24  ;;  %v4502_v3 = vpack.c.bf16 %v4481_v36, %v4480_v30  ;;  %v4503_v45 = vpack.c.bf16 %v4483_v55, %v4482_v11  ;;  %v4531_v17 = vld [vmem:[#allocation2 + $0x35] sm:$0xff]  ;;  %v4530_v40 = vld [vmem:[#allocation2 + $0x2d] sm:$0xff]  ;;  %v4533_v58 = vld [vmem:[#allocation2 + $0x45] sm:$0xff] }
 0x5aa   : > { %v4484_v60 = vld [vmem:[#allocation2 + $0x31] sm:$0xff]  ;;  %v4551_v14 = vpack.c.bf16 %v4531_v17, %v4530_v40  ;;  %v4487_v48 = vld [vmem:[#allocation2 + $0x49] sm:$0xff]  ;;  %v4532_v18 = vld [vmem:[#allocation2 + $0x3d] sm:$0xff] }
 0x5ab   : > { %v4291_v53 = vmul.f32 %v4269_v12, %v8391_v32  ;;  %v4270_v19 = vmax.f32 %v4246_v20, 0.0  ;;  %v4504_v23 = vpack.c.bf16 %v4485_v16, %v4484_v60  ;;  %v4486_v31 = vld [vmem:[#allocation2 + $0x41] sm:$0xff]  ;;  %v4552_v39 = vpack.c.bf16 %v4533_v58, %v4532_v18  ;;  %v4535_v20 = vld [vmem:[#allocation2 + $0x55] sm:$0xff]  ;;  %v4538_v36 = vld [vmem:[#allocation2 + $0x6d] sm:$0xff] }
 0x5ac   : > { %v4367_v10 = vld [vmem:[#allocation2 + $0x9b] sm:$0xff]  ;;  %v4505_v12 = vpack.c.bf16 %v4487_v48, %v4486_v31  ;;  %v4542_v17 = vld [vmem:[#allocation2 + $0x8d] sm:$0xff]  ;;  %v4381_v48 = vld [vmem:[#allocation2 + $0x4] sm:$0xff] }
 0x5ad   : > { %4313 = vst.msk [vmem:[#allocation2 + $0xb0] sm:$0xff] %vm506_vm11, %v4291_v53  ;;  %v4292_v54 = vmul.f32 %v4270_v19, %v8546_v34  ;;  %v4379_v9 = vpack.c.bf16 %v4367_v10, %v4366_v4  ;;  %v4432_v38 = vld [vmem:[#allocation2 + $0x9f] sm:$0xff]  ;;  %v4534_v53 = vld [vmem:[#allocation2 + $0x4d] sm:$0xff] }
 0x5ae   : > { %v4433_v52 = vld [vmem:[#allocation2 + $0xa7] sm:$0xff]  ;;  %v4489_v35 = vld [vmem:[#allocation2 + $0x59] sm:$0xff]  ;;  %v4488_v19 = vld [vmem:[#allocation2 + $0x51] sm:$0xff]  ;;  %v4553_v4 = vpack.c.bf16 %v4535_v20, %v4534_v53 }
 0x5af   : > { %v4368_v57 = vld [vmem:[#allocation2 + $0xa3] sm:$0xff]  ;;  %v4369_v15 = vld [vmem:[#allocation2 + $0xab] sm:$0x1]  ;;  %4314 = vst.msk [vmem:[#allocation2 + $0xb8] sm:$0x1] %vm1625_vm12, %v4292_v54  ;;  %4623 = vrot.lane.b32.xlu0 %v4379_v9, %s7589_s24  ;;  %v4445_v44 = vpack.c.bf16 %v4433_v52, %v4432_v38  ;;  %v4506_v10 = vpack.c.bf16 %v4489_v35, %v4488_v19  ;;  %v4496_v16 = vld [vmem:[#allocation2 + $0x91] sm:$0xff] }
 0x5b0   : > { %v4380_v61 = vpack.c.bf16 %v4369_v15, %v4368_v57  ;;  %v4537_v54 = vld [vmem:[#allocation2 + $0x65] sm:$0xff]  ;;  %v4536_v38 = vld [vmem:[#allocation2 + $0x5d] sm:$0xff] }
 0x5b1   : > { %4656 = vrot.lane.b32.xlu1 %v4445_v44, %s7589_s24  ;;  %v4491_v9 = vld [vmem:[#allocation2 + $0x69] sm:$0xff]  ;;  %v4490_v52 = vld [vmem:[#allocation2 + $0x61] sm:$0xff]  ;;  %v4554_v57 = vpack.c.bf16 %v4537_v54, %v4536_v38  ;;  %v4539_v44 = vld [vmem:[#allocation2 + $0x75] sm:$0xff] }
 0x5b2   : > { %v4507_v15 = vpack.c.bf16 %v4491_v9, %v4490_v52  ;;  %v4540_v29 = vld [vmem:[#allocation2 + $0x7d] sm:$0xff]  ;;  %v4382_v18 = vld [vmem:[#allocation2 + $0xc] sm:$0xff]  ;;  %v4501_v52 = vld [vmem:[#allocation2 + $0xb9] sm:$0x1] }
 0x5b3   : > { %4625 = vrot.lane.b32.xlu0 %v4380_v61, %s7589_s24  ;;  %v4493_v61 = vld [vmem:[#allocation2 + $0x79] sm:$0xff]  ;;  %v4494_v55 = vld [vmem:[#allocation2 + $0x81] sm:$0xff]  ;;  %v4316_v31 = vld [vmem:[#allocation2 + $0xa] sm:$0xff]  ;;  %v4403_v19 = vpack.c.bf16 %v4382_v18, %v4381_v48 }
 0x5b4   : > { %v4434_v13 = vld [vmem:[#allocation2 + $0xaf] sm:$0xff]  ;;  %v4435_v56 = vld [vmem:[#allocation2 + $0xb7] sm:$0x1]  ;;  %v4315_v58 = vld [vmem:[#allocation2 + $0x2] sm:$0xff] }
 0x5b5   : > { %v4446_v8 = vpack.c.bf16 %v4435_v56, %v4434_v13  ;;  %v4492_v13 = vld [vmem:[#allocation2 + $0x71] sm:$0xff]  ;;  %v4555_v56 = vpack.c.bf16 %v4539_v44, %v4538_v36  ;;  %v7540_v9 = vld [vmem:[%s9926_s8 + $0x100] sm:$0xff]  }
 0x5b6   : > { %v4508_v30 = vpack.c.bf16 %v4493_v61, %v4492_v13  ;;  %v4500_v38 = vld [vmem:[#allocation2 + $0xb1] sm:$0xff]  ;;  %v4548_v44 = vld [vmem:[#allocation2 + $0xbd] sm:$0xff]  ;;  %v4549_v61 = vld [vmem:[#allocation2 + $0xc5] sm:$0x1] }
 0x5b7   : > { %4658 = vrot.lane.b32.xlu1 %v4446_v8, %s7589_s24  ;;  %4671 = vrot.lane.b32.xlu0 %v4502_v3, %s7589_s24  ;;  %v4541_v8 = vld [vmem:[#allocation2 + $0x85] sm:$0xff] }
 0x5b8   : > { %v4495_v3 = vld [vmem:[#allocation2 + $0x89] sm:$0xff]  ;;  %v4556_v49 = vpack.c.bf16 %v4541_v8, %v4540_v29  ;;  %v4560_v8 = vpack.c.bf16 %v4549_v61, %v4548_v44  ;;  %v4383_v29 = vld [vmem:[#allocation2 + $0x14] sm:$0xff] }
 0x5b9   : > { %v4509_v11 = vpack.c.bf16 %v4495_v3, %v4494_v55  ;;  %v4318_v3 = vld [vmem:[#allocation2 + $0x1a] sm:$0xff]  ;;  %v4319_v18 = vld [vmem:[#allocation2 + $0x22] sm:$0xff]  ;;  %v4324_v44 = vld [vmem:[#allocation2 + $0x4a] sm:$0xff] }
 0x5ba   : > { %v9390_v61 = vld [vmem:[#allocation2 + $0x44] sm:$0xff] }
 0x5bb   : > { %4704 = vrot.lane.b32.xlu1 %v4550_v50, %s7589_s24  ;;  %4673 = vrot.lane.b32.xlu0 %v4503_v45, %s7589_s24  ;;  %v4543_v50 = vld [vmem:[#allocation2 + $0x95] sm:$0xff] }
 0x5bc   : > { %v4497_v45 = vld [vmem:[#allocation2 + $0x99] sm:$0xff]  ;;  %v4557_v40 = vpack.c.bf16 %v4543_v50, %v4542_v17  ;;  %v7550_v17 = vld [vmem:[%s9926_s8 + $0x110] sm:$0xff]  }
 0x5bd   : > { %v4510_v60 = vpack.c.bf16 %v4497_v45, %v4496_v16 }
 0x5bf   : > { %4706 = vrot.lane.b32.xlu1 %v4551_v14, %s7589_s24  ;;  %4675 = vrot.lane.b32.xlu0 %v4504_v23, %s7589_s24  ;;  %v4545_v14 = vld [vmem:[#allocation2 + $0xa5] sm:$0xff] }
 0x5c0   : > { %v4499_v23 = vld [vmem:[#allocation2 + $0xa9] sm:$0xff] }
 0x5c3   : > { %4708 = vrot.lane.b32.xlu1 %v4552_v39, %s7589_s24  ;;  %4677 = vrot.lane.b32.xlu0 %v4505_v12, %s7589_s24  ;;  %v4544_v39 = vld [vmem:[#allocation2 + $0x9d] sm:$0xff] }
 0x5c4   : > { %v4498_v12 = vld [vmem:[#allocation2 + $0xa1] sm:$0xff]  ;;  %v4558_v20 = vpack.c.bf16 %v4545_v14, %v4544_v39  ;;  %v7555_v14 = vld [vmem:[%s9926_s8 + $0x118] sm:$0xff]  }
 0x5c5   : > { %v4511_v35 = vpack.c.bf16 %v4499_v23, %v4498_v12  ;;  %v4320_v23 = vld [vmem:[#allocation2 + $0x2a] sm:$0xff] }
 0x5c6   : > { %v4339_v39 = vpack.c.bf16 %v4320_v23, %v4319_v18  ;;  %v9406_v18 = vld [vmem:[#allocation2 + $0x64] sm:$0xff] }
 0x5c7   : > { %4710 = vrot.lane.b32.xlu1 %v4553_v4, %s7589_s24  ;;  %4679 = vrot.lane.b32.xlu0 %v4506_v10, %s7589_s24  ;;  %v4547_v4 = vld [vmem:[#allocation2 + $0xb5] sm:$0xff]  ;;  %v4337_v10 = vpack.c.bf16 %v4316_v31, %v4315_v58 }
 0x5cb   : > { %4712 = vrot.lane.b32.xlu1 %v4554_v57, %s7589_s24  ;;  %4681 = vrot.lane.b32.xlu0 %v4507_v15, %s7589_s24  ;;  %v4546_v15 = vld [vmem:[#allocation2 + $0xad] sm:$0xff] }
 0x5cc   : > { %v4559_v13 = vpack.c.bf16 %v4547_v4, %v4546_v15  ;;  %v9388_v15 = vld [vmem:[#allocation2 + $0x4c] sm:$0xff] }
 0x5cf   : > { %4714 = vrot.lane.b32.xlu1 %v4555_v56, %s7589_s24  ;;  %4683 = vrot.lane.b32.xlu0 %v4508_v30, %s7589_s24  ;;  %v4512_v56 = vpack.c.bf16 %v4501_v52, %v4500_v38  ;;  %v7545_v30 = vld [vmem:[%s9926_s8 + $0x108] sm:$0xff]  }
 0x5d3   : > { %4716 = vrot.lane.b32.xlu1 %v4556_v49, %s7589_s24  ;;  %4685 = vrot.lane.b32.xlu0 %v4509_v11, %s7589_s24  ;;  %v4404_v49 = vpack.c.bf16 %v9210_v62, %v4383_v29  ;;  %v4317_v11 = vld [vmem:[#allocation2 + $0x12] sm:$0xff] }
 0x5d4   : > { %v4338_v45 = vpack.c.bf16 %v4318_v3, %v4317_v11  ;;  %v9398_v11 = vld [vmem:[#allocation2 + $0x54] sm:$0xff] }
 0x5d7   : > { %4718 = vrot.lane.b32.xlu1 %v4557_v40, %s7589_s24  ;;  %4687 = vrot.lane.b32.xlu0 %v4510_v60, %s7589_s24  ;;  %v9370_v60 = vld [vmem:[#allocation2 + $0x2c] sm:$0xff] }
 0x5d8   : > { %v4405_v48 = vpack.c.bf16 %v9370_v60, %v9212_v59 }
 0x5d9   : > { %v4606_v53 = vpop.permute.xlu0 %4605 }
 0x5da   : > { %v4728_v36 = vsel %vm506_vm11, %v4337_v10, %v4606_v53  ;;  %v4322_v53 = vld [vmem:[#allocation2 + $0x3a] sm:$0xff] }
 0x5db   : > { %4720 = vrot.lane.b32.xlu1 %v4558_v20, %s7589_s24  ;;  %v4639_v54 = vpop.permute.xlu1 %4638  ;;  %4689 = vrot.lane.b32.xlu0 %v4511_v35, %s7589_s24  ;;  %v9380_v35 = vld [vmem:[#allocation2 + $0x3c] sm:$0xff] }
 0x5dc   : > { %v4772_v57 = vsel %vm506_vm11, %v4403_v19, %v4639_v54  ;;  %v9382_v19 = vld [vmem:[#allocation2 + $0x34] sm:$0xff] }
 0x5dd   : > { %5262 = vmatprep.mubr.bf16.mxu1 %v4772_v57  ;;  %v4406_v10 = vpack.c.bf16 %v9380_v35, %v9382_v19  ;;  %v4321_v54 = vld [vmem:[#allocation2 + $0x32] sm:$0xff] }
 0x5de   : > { %5263 = vmatmul.mubr.bf16.vlgmr.msra.gmra.mrb[152].mxu1 %v4728_v36  ;;  %v4340_v38 = vpack.c.bf16 %v4322_v53, %v4321_v54  ;;  %v9412_v54 = vld [vmem:[#allocation2 + $0x7c] sm:$0xff] }
 0x5df   : > { %7275 = vmatpush3.bf16.msra.mxu1 %v7540_v9  ;;  %4722 = vrot.lane.b32.xlu1 %v4559_v13, %s7589_s24  ;;  %v4407_v13 = vpack.c.bf16 %v9388_v15, %v9390_v61 }
 0x5e0   : > { %4691 = vrot.lane.b32.xlu0 %v4512_v56, %s7589_s24  ;;  %7276 = vmatprep.subr.bf16.mxu1 %v9936_v0  ;;  %v4323_v56 = vld [vmem:[#allocation2 + $0x42] sm:$0xff] }
 0x5e1   : > { %v4608_v55 = vpop.permute.xlu0 %4607 }
 0x5e2   : > { %v4732_v40 = vsel %vm506_vm11, %v4338_v45, %v4608_v55  ;;  %v9396_v55 = vld [vmem:[#allocation2 + $0x5c] sm:$0xff] }
 0x5e3   : > { %v4641_v50 = vpop.permute.xlu1 %4640  ;;  %7277 = vmatpush3.bf16.msra.mxu1 %v7545_v30  ;;  %4724 = vrot.lane.b32.xlu1 %v4560_v8, %s7589_s24  ;;  %v4341_v8 = vpack.c.bf16 %v4324_v44, %v4323_v56  ;;  %v4408_v45 = vpack.c.bf16 %v9396_v55, %v9398_v11  ;;  %v4329_v44 = vld [vmem:[#allocation2 + $0x72] sm:$0xff] }
 0x5e4   : > { %v4776_v16 = vsel %vm506_vm11, %v4404_v49, %v4641_v50  ;;  %7278 = vmatprep.subr.bf16.mxu1 %v9936_v0  ;;  %v4326_v49 = vld [vmem:[#allocation2 + $0x5a] sm:$0xff] }
 0x5e5   : > { %5270 = vmatprep.mubr.bf16.mxu1 %v4776_v16 }
 0x5e6   : > { %5271 = vmatmul.mubr.bf16.gmra.mrb[156].mxu1 %v4732_v40 }
 0x5e7   : > { %7279 = vmatpush3.bf16.msra.mxu1 %v7550_v17  ;;  %v4325_v17 = vld [vmem:[#allocation2 + $0x52] sm:$0xff] }
 0x5e8   : > { %7280 = vmatprep.subr.bf16.mxu1 %v9936_v0  ;;  %v4342_v40 = vpack.c.bf16 %v4326_v49, %v4325_v17 }
 0x5e9   : > { %v4610_v58 = vpop.permute.xlu0 %4609 }
 0x5ea   : > { %v4736_v20 = vsel %vm506_vm11, %v4339_v39, %v4610_v58  ;;  %v9404_v58 = vld [vmem:[#allocation2 + $0x6c] sm:$0xff] }
 0x5eb   : > { %v4643_v31 = vpop.permute.xlu1 %4642  ;;  %7281 = vmatpush3.bf16.msra.mxu1 %v7555_v14  ;;  %v4409_v39 = vpack.c.bf16 %v9404_v58, %v9406_v18 }
 0x5ec   : > { %v4780_v12 = vsel %vm506_vm11, %v4405_v48, %v4643_v31  ;;  %v4328_v48 = vld [vmem:[#allocation2 + $0x6a] sm:$0xff] }
 0x5ed   : > { %5278 = vmatprep.mubr.bf16.mxu1 %v4780_v12  ;;  %v4327_v12 = vld [vmem:[#allocation2 + $0x62] sm:$0xff] }
 0x5ee   : > { %5279 = vmatmul.mubr.bf16.gmra.mrb[160].mxu1 %v4736_v20  ;;  %v4343_v53 = vpack.c.bf16 %v4328_v48, %v4327_v12  ;;  %v4334_v48 = vld [vmem:[#allocation2 + $0x9a] sm:$0xff] }
 0x5f1   : > { %v4612_v4 = vpop.permute.xlu0 %4611 }
 0x5f2   : > { %v4740_v57 = vsel %vm506_vm11, %v4340_v38, %v4612_v4  ;;  %v9414_v38 = vld [vmem:[#allocation2 + $0x74] sm:$0xff] }
 0x5f3   : > { %v4645_v9 = vpop.permute.xlu1 %4644 }
 0x5f4   : > { %v4784_v52 = vsel %vm506_vm11, %v4406_v10, %v4645_v9  ;;  %v4330_v9 = vld [vmem:[#allocation2 + $0x7a] sm:$0xff] }
 0x5f5   : > { %5286 = vmatprep.mubr.bf16.mxu1 %v4784_v52 }
 0x5f6   : > { %5287 = vmatmul.mubr.bf16.gmra.mrb[164].mxu1 %v4740_v57  ;;  %v4410_v57 = vpack.c.bf16 %v9412_v54, %v9414_v38 }
 0x5f9   : > { %v4614_v36 = vpop.permute.xlu0 %4613 }
 0x5fa   : > { %v4744_v29 = vsel %vm506_vm11, %v4341_v8, %v4614_v36  ;;  %v9420_v8 = vld [vmem:[#allocation2 + $0x8c] sm:$0xff] }
 0x5fb   : > { %v4647_v30 = vpop.permute.xlu1 %4646 }
 0x5fc   : > { %v4788_v3 = vsel %vm506_vm11, %v4407_v13, %v4647_v30  ;;  %v4344_v13 = vpack.c.bf16 %v4330_v9, %v4329_v44 }
 0x5fd   : > { %5294 = vmatprep.mubr.bf16.mxu1 %v4788_v3  ;;  %v4332_v3 = vld [vmem:[#allocation2 + $0x8a] sm:$0xff] }
 0x5fe   : > { %5295 = vmatmul.mubr.bf16.gmra.mrb[168].mxu1 %v4744_v29  ;;  %v9422_v29 = vld [vmem:[#allocation2 + $0x84] sm:$0xff] }
 0x601   : > { %v4616_v50 = vpop.permute.xlu0 %4615 }
 0x602   : > { %v4748_v23 = vsel %vm506_vm11, %v4342_v40, %v4616_v50  ;;  %v4411_v50 = vpack.c.bf16 %v9420_v8, %v9422_v29 }
 0x603   : > { %v4649_v16 = vpop.permute.xlu1 %4648 }
 0x604   : > { %v4792_v14 = vsel %vm506_vm11, %v4408_v45, %v4649_v16  ;;  %v4331_v45 = vld [vmem:[#allocation2 + $0x82] sm:$0xff] }
 0x605   : > { %5302 = vmatprep.mubr.bf16.mxu1 %v4792_v14  ;;  %v4345_v16 = vpack.c.bf16 %v4332_v3, %v4331_v45  ;;  %v4448_v3 = vld [vmem:[#allocation2 + $0x18] sm:$0xff]  ;;  %v4447_v45 = vld [vmem:[#allocation2 + $0x10] sm:$0xff] }
 0x606   : > { %5303 = vmatmul.mubr.bf16.gmra.mrb[172].mxu1 %v4748_v23  ;;  %v9428_v23 = vld [vmem:[#allocation2 + $0x9c] sm:$0xff] }
 0x609   : > { %v4618_v31 = vpop.permute.xlu0 %4617 }
 0x60a   : > { %v4752_v10 = vsel %vm506_vm11, %v4343_v53, %v4618_v31 }
 0x60b   : > { %v4651_v20 = vpop.permute.xlu1 %4650 }
 0x60c   : > { %v4796_v4 = vsel %vm506_vm11, %v4409_v39, %v4651_v20  ;;  %v9430_v39 = vld [vmem:[#allocation2 + $0x94] sm:$0xff] }
 0x60d   : > { %5310 = vmatprep.mubr.bf16.mxu1 %v4796_v4  ;;  %v4412_v12 = vpack.c.bf16 %v9428_v23, %v9430_v39  ;;  %v4333_v20 = vld [vmem:[#allocation2 + $0x92] sm:$0xff] }
 0x60e   : > { %5311 = vmatmul.mubr.bf16.gmra.mrb[176].mxu1 %v4752_v10  ;;  %v4346_v4 = vpack.c.bf16 %v4334_v48, %v4333_v20 }
 0x611   : > { %v4620_v52 = vpop.permute.xlu0 %4619 }
 0x612   : > { %v4756_v30 = vsel %vm506_vm11, %v4344_v13, %v4620_v52  ;;  %v9436_v52 = vld [vmem:[#allocation2 + $0xa4] sm:$0xff] }
 0x613   : > { %v4653_v36 = vpop.permute.xlu1 %4652  ;;  %v4335_v13 = vld [vmem:[#allocation2 + $0xa2] sm:$0xff] }
 0x614   : > { %v4800_v56 = vsel %vm506_vm11, %v4410_v57, %v4653_v36  ;;  %v4402_v57 = vld [vmem:[#allocation2 + $0xac] sm:$0x1] }
 0x615   : > { %5318 = vmatprep.mubr.bf16.mxu1 %v4800_v56  ;;  %v4413_v36 = vpack.c.bf16 %v4402_v57, %v9436_v52  ;;  %v4336_v56 = vld [vmem:[#allocation2 + $0xaa] sm:$0x1] }
 0x616   : > { %5319 = vmatmul.mubr.bf16.gmra.mrb[180].mxu1 %v4756_v30 }
 0x619   : > { %v4622_v49 = vpop.permute.xlu0 %4621 }
 0x61a   : > { %v4760_v14 = vsel %vm506_vm11, %v4345_v16, %v4622_v49  ;;  %v4469_v16 = vpack.c.bf16 %v4448_v3, %v4447_v45 }
 0x61b   : > { %v4655_v17 = vpop.permute.xlu1 %4654 }
 0x61c   : > { %v4804_v40 = vsel %vm506_vm11, %v4411_v50, %v4655_v17  ;;  %v4347_v50 = vpack.c.bf16 %v4336_v56, %v4335_v13  ;;  %v4452_v56 = vld [vmem:[#allocation2 + $0x38] sm:$0xff] }
 0x61d   : > { %5326 = vmatprep.mubr.bf16.mxu1 %v4804_v40 }
 0x61e   : > { %5327 = vmatmul.mubr.bf16.gmra.mrb[184].mxu1 %v4760_v14 }
 0x621   : > { %v4624_v31 = vpop.permute.xlu0 %4623 }
 0x622   : > { %v4764_v9 = vsel %vm506_vm11, %v4346_v4, %v4624_v31 }
 0x623   : > { %v4657_v53 = vpop.permute.xlu1 %4656 }
 0x624   : > { %v4808_v10 = vsel %vm506_vm11, %v4412_v12, %v4657_v53  ;;  %v4518_v12 = vpack.c.bf16 %v9382_v19, %v9370_v60  ;;  %v4562_v53 = vld [vmem:[#allocation2 + $0x26] sm:$0xff]  ;;  %v4564_v19 = vld [vmem:[#allocation2 + $0x36] sm:$0xff] }
 0x625   : > { %5334 = vmatprep.mubr.bf16.mxu1 %v4808_v10  ;;  %v4626_v44 = vpop.permute.xlu0 %4625  ;;  %v4450_v10 = vld [vmem:[#allocation2 + $0x28] sm:$0xff] }
 0x626   : > { %5335 = vmatmul.mubr.bf16.gmra.mrb[188].mxu1 %v4764_v9  ;;  %v4768_v14 = vsel %vm506_vm11, %v4347_v50, %v4626_v44  ;;  %v4561_v9 = vld [vmem:[#allocation2 + $0x1e] sm:$0xff]  ;;  %v4451_v50 = vld [vmem:[#allocation2 + $0x30] sm:$0xff] }
 0x627   : > { %v4583_v59 = vpack.c.bf16 %v4562_v53, %v4561_v9 }
 0x629   : > { %v4659_v30 = vpop.permute.xlu1 %4658  ;;  %v4672_v17 = vpop.permute.xlu0 %4671 }
 0x62a   : > { %v4812_v49 = vsel %vm506_vm11, %v4413_v36, %v4659_v30  ;;  %v4816_v31 = vsel %vm506_vm11, %v4469_v16, %v4672_v17  ;;  %v4519_v36 = vpack.c.bf16 %v9390_v61, %v9380_v35  ;;  %v4563_v30 = vld [vmem:[#allocation2 + $0x2e] sm:$0xff]  ;;  %v4471_v17 = vpack.c.bf16 %v4452_v56, %v4451_v50  ;;  %v4570_v56 = vld [vmem:[#allocation2 + $0x66] sm:$0xff] }
 0x62b   : > { %5342 = vmatprep.mubr.bf16.mxu1 %v4812_v49  ;;  %v4584_v49 = vpack.c.bf16 %v4564_v19, %v4563_v30  ;;  %v4520_v35 = vpack.c.bf16 %v9398_v11, %v9388_v15  ;;  %v4521_v15 = vpack.c.bf16 %v9406_v18, %v9396_v55  ;;  %v4458_v30 = vld [vmem:[#allocation2 + $0x68] sm:$0xff] }
 0x62d   : > { %v4705_v40 = vpop.permute.xlu1 %4704  ;;  %v4674_v62 = vpop.permute.xlu0 %4673 }
 0x62e   : > { %5343 = vmatmul.mubr.bf16.gmra.mrb[192].mxu1 %v4768_v14  ;;  %v4860_v48 = vsel %vm506_vm11, %v4517_v6, %v4705_v40  ;;  %v4449_v6 = vld [vmem:[#allocation2 + $0x20] sm:$0xff]  ;;  %v4454_v14 = vld [vmem:[#allocation2 + $0x48] sm:$0xff] }
 0x62f   : > { %5383 = vmatprep.mubr.bf16.mxu0 %v4860_v48  ;;  %7282 = vmatprep.mubr.msk.bf16.mxu1 %vm7580_vm1, %v9936_v0  ;;  %v4470_v44 = vpack.c.bf16 %v4450_v10, %v4449_v6  ;;  %v4566_v40 = vld [vmem:[#allocation2 + $0x46] sm:$0xff]  ;;  %v4565_v48 = vld [vmem:[#allocation2 + $0x3e] sm:$0xff]  ;;  %v4567_v6 = vld [vmem:[#allocation2 + $0x4e] sm:$0xff] }
 0x630   : > { %5384 = vmatmul.mubr.bf16.vlgmr.msra.gmra.mrb[156].mxu0 %v4816_v31  ;;  %v7558_v10 = vld [vmem:[%s9928_s10] sm:$0xff]  }
 0x631   : > { %v4707_v20 = vpop.permute.xlu1 %4706  ;;  %v4820_v13 = vsel %vm506_vm11, %v4470_v44, %v4674_v62  ;;  %v4676_v3 = vpop.permute.xlu0 %4675  ;;  %v4568_v62 = vld [vmem:[#allocation2 + $0x56] sm:$0xff]  ;;  %7327 = vmatpush3.bf16.msra.mxu0 %v7558_v10  ;;  %v4462_v10 = vld [vmem:[#allocation2 + $0x88] sm:$0xff] }
 0x632   : > { %v4864_v4 = vsel %vm506_vm11, %v4518_v12, %v4707_v20  ;;  %v4824_v61 = vsel %vm506_vm11, %v4471_v17, %v4676_v3  ;;  %v4585_v12 = vpack.c.bf16 %v4566_v40, %v4565_v48  ;;  %v4453_v20 = vld [vmem:[#allocation2 + $0x40] sm:$0xff]  ;;  %7328 = vmatprep.subr.bf16.mxu0 %v9936_v0  ;;  %v4586_v18 = vpack.c.bf16 %v4568_v62, %v4567_v6  ;;  %v4460_v40 = vld [vmem:[#allocation2 + $0x78] sm:$0xff] }
 0x633   : > { %5391 = vmatprep.mubr.bf16.mxu0 %v4864_v4  ;;  %v4472_v4 = vpack.c.bf16 %v4454_v14, %v4453_v20  ;;  %v4569_v3 = vld [vmem:[#allocation2 + $0x5e] sm:$0xff]  ;;  %v4571_v14 = vld [vmem:[#allocation2 + $0x6e] sm:$0xff] }
 0x634   : > { %v4587_v50 = vpack.c.bf16 %v4570_v56, %v4569_v3  ;;  %v4461_v6 = vld [vmem:[#allocation2 + $0x80] sm:$0xff] }
 0x635   : > { %v4709_v57 = vpop.permute.xlu1 %4708  ;;  %v4678_v31 = vpop.permute.xlu0 %4677 }
 0x636   : > { %7283 = vmatmul.mubr.msk.bf16.vlgmr.msra.gmra.mrb[196].mxu1 %vm506_vm11, %v4583_v59  ;;  %v4868_v60 = vsel %vm506_vm11, %v4519_v36, %v4709_v57  ;;  %v4828_v11 = vsel %vm506_vm11, %v4472_v4, %v4678_v31  ;;  %v4456_v59 = vld [vmem:[#allocation2 + $0x58] sm:$0xff]  ;;  %v4455_v57 = vld [vmem:[#allocation2 + $0x50] sm:$0xff] }
 0x637   : > { %7286 = vmatprep.mubr.msk.bf16.mxu1 %vm7580_vm1, %v9936_v0  ;;  %v4473_v36 = vpack.c.bf16 %v4456_v59, %v4455_v57 }
 0x638   : > { %5392 = vmatmul.mubr.bf16.gmra.mrb[160].mxu0 %v4820_v13  ;;  %v4522_v13 = vpack.c.bf16 %v9414_v38, %v9404_v58  ;;  %v4523_v58 = vpack.c.bf16 %v9422_v29, %v9412_v54  ;;  %v7559_v54 = vld [vmem:[%s9928_s10 + $0x8] sm:$0xff]   ;;  %v4524_v29 = vpack.c.bf16 %v9430_v39, %v9420_v8  ;;  %v4476_v8 = vpack.c.bf16 %v4462_v10, %v4461_v6  ;;  %v4581_v6 = vld [vmem:[#allocation2 + $0xbe] sm:$0xff] }
 0x639   : > { %5399 = vmatprep.mubr.bf16.mxu0 %v4868_v60  ;;  %v4711_v45 = vpop.permute.xlu1 %4710  ;;  %v4680_v55 = vpop.permute.xlu0 %4679  ;;  %7329 = vmatpush3.bf16.msra.mxu0 %v7559_v54  ;;  %v4525_v39 = vpack.c.bf16 %v9436_v52, %v9428_v23 }
 0x63a   : > { %v4872_v16 = vsel %vm506_vm11, %v4520_v35, %v4711_v45  ;;  %v4832_v60 = vsel %vm506_vm11, %v4473_v36, %v4680_v55  ;;  %v4457_v45 = vld [vmem:[#allocation2 + $0x60] sm:$0xff]  ;;  %7330 = vmatprep.subr.bf16.mxu0 %v9936_v0  ;;  %v4464_v36 = vld [vmem:[#allocation2 + $0x98] sm:$0xff] }
 0x63b   : > { %v4474_v35 = vpack.c.bf16 %v4458_v30, %v4457_v45  ;;  %v4463_v30 = vld [vmem:[#allocation2 + $0x90] sm:$0xff]  ;;  %v4515_v45 = vld [vmem:[#allocation2 + $0xbc] sm:$0xff] }
 0x63d   : > { %v4713_v53 = vpop.permute.xlu1 %4712 }
 0x63e   : > { %7287 = vmatmul.mubr.msk.bf16.gmra.mrb[200].mxu1 %vm506_vm11, %v4584_v49  ;;  %v4876_v9 = vsel %vm506_vm11, %v4521_v15, %v4713_v53  ;;  %v4682_v49 = vpop.permute.xlu0 %4681 }
 0x63f   : > { %7290 = vmatprep.mubr.msk.bf16.mxu1 %vm7580_vm1, %v9936_v0  ;;  %v4836_v38 = vsel %vm506_vm11, %v4474_v35, %v4682_v49  ;;  %v4477_v49 = vpack.c.bf16 %v4464_v36, %v4463_v30  ;;  %v7560_v35 = vld [vmem:[%s9928_s10 + $0x10] sm:$0xff]  }
 0x640   : > { %5400 = vmatmul.mubr.bf16.gmra.mrb[164].mxu0 %v4824_v61 }
 0x641   : > { %5407 = vmatprep.mubr.bf16.mxu0 %v4872_v16  ;;  %v4715_v44 = vpop.permute.xlu1 %4714  ;;  %v4572_v16 = vld [vmem:[#allocation2 + $0x76] sm:$0xff]  ;;  %7331 = vmatpush3.bf16.msra.mxu0 %v7560_v35 }
 0x642   : > { %v4880_v19 = vsel %vm506_vm11, %v4522_v13, %v4715_v44  ;;  %v4684_v48 = vpop.permute.xlu0 %4683  ;;  %v4588_v31 = vpack.c.bf16 %v4572_v16, %v4571_v14  ;;  %v4576_v44 = vld [vmem:[#allocation2 + $0x96] sm:$0xff]  ;;  %v4575_v13 = vld [vmem:[#allocation2 + $0x8e] sm:$0xff]  ;;  %7332 = vmatprep.subr.bf16.mxu0 %v9936_v0 }
 0x643   : > { %v4590_v56 = vpack.c.bf16 %v4576_v44, %v4575_v13 }
 0x645   : > { %v4717_v17 = vpop.permute.xlu1 %4716 }
 0x646   : > { %7291 = vmatmul.mubr.msk.bf16.gmra.mrb[204].mxu1 %vm506_vm11, %v4585_v12  ;;  %v4884_v61 = vsel %vm506_vm11, %v4523_v58, %v4717_v17  ;;  %v4459_v12 = vld [vmem:[#allocation2 + $0x70] sm:$0xff]  ;;  %v4686_v62 = vpop.permute.xlu0 %4685  ;;  %v4516_v17 = vld [vmem:[#allocation2 + $0xc4] sm:$0x1] }
 0x647   : > { %7294 = vmatprep.mubr.msk.bf16.mxu1 %vm7580_vm1, %v9936_v0  ;;  %v4475_v53 = vpack.c.bf16 %v4460_v40, %v4459_v12  ;;  %v4527_v16 = vpack.c.bf16 %v4516_v17, %v4515_v45  ;;  %v4577_v40 = vld [vmem:[#allocation2 + $0x9e] sm:$0xff] }
 0x648   : > { %5408 = vmatmul.mubr.bf16.gmra.mrb[168].mxu0 %v4828_v11  ;;  %v4574_v11 = vld [vmem:[#allocation2 + $0x86] sm:$0xff] }
 0x649   : > { %5415 = vmatprep.mubr.bf16.mxu0 %v4876_v9  ;;  %v4719_v20 = vpop.permute.xlu1 %4718  ;;  %v4840_v4 = vsel %vm506_vm11, %v4475_v53, %v4684_v48  ;;  %v4573_v9 = vld [vmem:[#allocation2 + $0x7e] sm:$0xff] }
 0x64a   : > { %v4888_v15 = vsel %vm506_vm11, %v4524_v29, %v4719_v20  ;;  %v4589_v59 = vpack.c.bf16 %v4574_v11, %v4573_v9  ;;  %v4465_v12 = vld [vmem:[#allocation2 + $0xa0] sm:$0xff]  ;;  %v4580_v29 = vld [vmem:[#allocation2 + $0xb6] sm:$0xff] }
 0x64b   : > { %v4467_v9 = vld [vmem:[#allocation2 + $0xb0] sm:$0xff] }
 0x64d   : > { %v4721_v55 = vpop.permute.xlu1 %4720 }
 0x64e   : > { %7295 = vmatmul.mubr.msk.bf16.gmra.mrb[208].mxu1 %vm506_vm11, %v4586_v18  ;;  %v4844_v18 = vsel %vm506_vm11, %v4476_v8, %v4686_v62  ;;  %v4892_v57 = vsel %vm506_vm11, %v4525_v39, %v4721_v55  ;;  %v4582_v55 = vld [vmem:[#allocation2 + $0xc6] sm:$0x1]  ;;  %v7561_v39 = vld [vmem:[%s9928_s10 + $0x18] sm:$0xff]  }
 0x64f   : > { %7298 = vmatprep.mubr.msk.bf16.mxu1 %vm7580_vm1, %v9936_v0  ;;  %v4593_v8 = vpack.c.bf16 %v4582_v55, %v4581_v6  ;;  %7333 = vmatpush3.bf16.msra.mxu0 %v7561_v39 }
 0x650   : > { %5416 = vmatmul.mubr.bf16.gmra.mrb[172].mxu0 %v4832_v60  ;;  %v4514_v60 = vld [vmem:[#allocation2 + $0xb4] sm:$0xff] }
 0x651   : > { %5423 = vmatprep.mubr.bf16.mxu0 %v4880_v19  ;;  %v4688_v19 = vpop.permute.xlu0 %4687  ;;  %v4723_v3 = vpop.permute.xlu1 %4722 }
 0x652   : > { %v4848_v52 = vsel %vm506_vm11, %v4477_v49, %v4688_v19 }
 0x655   : > { %v4725_v14 = vpop.permute.xlu1 %4724  ;;  %v4690_v48 = vpop.permute.xlu0 %4689 }
 0x656   : > { %7299 = vmatmul.mubr.msk.bf16.gmra.mrb[212].mxu1 %vm506_vm11, %v4587_v50  ;;  %v4513_v50 = vld [vmem:[#allocation2 + $0xac] sm:$0xff]  ;;  %v4900_v53 = vsel %vm506_vm11, %v4527_v16, %v4725_v14 }
 0x657   : > { %7302 = vmatprep.mubr.msk.bf16.mxu1 %vm7580_vm1, %v9936_v0  ;;  %v4526_v23 = vpack.c.bf16 %v4514_v60, %v4513_v50 }
 0x658   : > { %5424 = vmatmul.mubr.bf16.gmra.mrb[176].mxu0 %v4836_v38  ;;  %v4578_v38 = vld [vmem:[#allocation2 + $0xa6] sm:$0xff] }
 0x659   : > { %5431 = vmatprep.mubr.bf16.mxu0 %v4884_v61  ;;  %v4896_v58 = vsel %vm506_vm11, %v4526_v23, %v4723_v3  ;;  %v4466_v61 = vld [vmem:[#allocation2 + $0xa8] sm:$0xff]  ;;  %v4692_v11 = vpop.permute.xlu0 %4691 }
 0x65a   : > { %v4478_v20 = vpack.c.bf16 %v4466_v61, %v4465_v12 }
 0x65c   : > { %v4852_v54 = vsel %vm506_vm11, %v4478_v20, %v4690_v48 }
 0x65e   : > { %7303 = vmatmul.mubr.msk.bf16.gmra.mrb[216].mxu1 %vm506_vm11, %v4588_v31  ;;  %v4591_v31 = vpack.c.bf16 %v4578_v38, %v4577_v40 }
 0x65f   : > { %7306 = vmatprep.mubr.msk.bf16.mxu1 %vm7580_vm1, %v9936_v0 }
 0x660   : > { %5432 = vmatmul.mubr.bf16.gmra.mrb[180].mxu0 %v4840_v4  ;;  %v4468_v4 = vld [vmem:[#allocation2 + $0xb8] sm:$0x1] }
 0x661   : > { %5439 = vmatprep.mubr.bf16.mxu0 %v4888_v15  ;;  %v4579_v15 = vld [vmem:[#allocation2 + $0xae] sm:$0xff]  ;;  %v4479_v62 = vpack.c.bf16 %v4468_v4, %v4467_v9 }
 0x662   : > { %v4592_v10 = vpack.c.bf16 %v4580_v29, %v4579_v15 }
 0x666   : > { %7307 = vmatmul.mubr.msk.bf16.gmra.mrb[220].mxu1 %vm506_vm11, %v4589_v59  ;;  %v4856_v59 = vsel %vm506_vm11, %v4479_v62, %v4692_v11 }
 0x667   : > { %7310 = vmatprep.mubr.msk.bf16.mxu1 %vm7580_vm1, %v9936_v0 }
 0x668   : > { %5440 = vmatmul.mubr.bf16.gmra.mrb[184].mxu0 %v4844_v18 }
 0x669   : > { %5447 = vmatprep.mubr.bf16.mxu0 %v4892_v57 }
 0x66e   : > { %7311 = vmatmul.mubr.msk.bf16.gmra.mrb[224].mxu1 %vm506_vm11, %v4590_v56 }
 0x66f   : > { %7314 = vmatprep.mubr.msk.bf16.mxu1 %vm7580_vm1, %v9936_v0 }
 0x670   : > { %5448 = vmatmul.mubr.bf16.gmra.mrb[188].mxu0 %v4848_v52 }
 0x671   : > { %5455 = vmatprep.mubr.bf16.mxu0 %v4896_v58 }
 0x676   : > { %7315 = vmatmul.mubr.msk.bf16.gmra.mrb[228].mxu1 %vm506_vm11, %v4591_v31 }
 0x677   : > { %7318 = vmatprep.mubr.msk.bf16.mxu1 %vm7580_vm1, %v9936_v0 }
 0x678   : > { %5456 = vmatmul.mubr.bf16.gmra.mrb[192].mxu0 %v4852_v54 }
 0x679   : > { %5463 = vmatprep.mubr.bf16.mxu0 %v4900_v53 }
 0x67e   : > { %7319 = vmatmul.mubr.msk.bf16.gmra.mrb[232].mxu1 %vm506_vm11, %v4592_v10 }
 0x67f   : > { %7322 = vmatprep.mubr.msk.bf16.mxu1 %vm7580_vm1, %v9936_v0 }
 0x680   : > { %5464 = vmatmul.mubr.bf16.gmra.mrb[196].mxu0 %v4856_v59 }
 0x681   : > { %7334 = vmatprep.mubr.msk.bf16.mxu0 %vm7580_vm1, %v9936_v0 }
 0x686   : > { %7323 = vmatmul.mubr.msk.bf16.gmra.mrb[236].mxu1 %vm506_vm11, %v4593_v8 }
 0x6b1   : > { %v6942_v18 = vpop.f32.mrb[152].mxu1 }
 0x6b2   : > { %v6943_v57 = vpop.f32.mrb[153].mxu1 }
 0x6b3   : > { %v9532_v44 = vadd.f32 %v6943_v57, %v6942_v18  ;;  %v6945_v36 = vpop.f32.mrb[154].mxu1 }
 0x6b4   : > { %v6946_v13 = vpop.f32.mrb[155].mxu1 }
 0x6b5   : > { %v9534_v60 = vadd.f32 %v6946_v13, %v6945_v36 }
 0x6b9   : > { %v6948_v19 = vpop.f32.mrb[156].mxu1 }
 0x6ba   : > { %v6949_v56 = vpop.f32.mrb[157].mxu1 }
 0x6bb   : > { %v9536_v30 = vadd.f32 %v6949_v56, %v6948_v19  ;;  %v6951_v3 = vpop.f32.mrb[158].mxu1 }
 0x6bc   : > { %v6952_v49 = vpop.f32.mrb[159].mxu1 }
 0x6bd   : > { %v9538_v50 = vadd.f32 %v6952_v49, %v6951_v3 }
 0x6c1   : > { %v6954_v23 = vpop.f32.mrb[160].mxu1 }
 0x6c2   : > { %v6955_v52 = vpop.f32.mrb[161].mxu1 }
 0x6c3   : > { %v9540_v45 = vadd.f32 %v6955_v52, %v6954_v23  ;;  %v6957_v17 = vpop.f32.mrb[162].mxu1 }
 0x6c4   : > { %v6958_v35 = vpop.f32.mrb[163].mxu1 }
 0x6c5   : > { %v9542_v58 = vadd.f32 %v6958_v35, %v6957_v17 }
 0x6c9   : > { %v6960_v38 = vpop.f32.mrb[164].mxu1 }
 0x6ca   : > { %v6961_v61 = vpop.f32.mrb[165].mxu1 }
 0x6cb   : > { %v9544_v16 = vadd.f32 %v6961_v61, %v6960_v38  ;;  %v6963_v40 = vpop.f32.mrb[166].mxu1 }
 0x6cc   : > { %v6964_v14 = vpop.f32.mrb[167].mxu1 }
 0x6cd   : > { %v9546_v48 = vadd.f32 %v6964_v14, %v6963_v40 }
 0x6d1   : > { %v6966_v31 = vpop.f32.mrb[168].mxu1 }
 0x6d2   : > { %v6967_v12 = vpop.f32.mrb[169].mxu1 }
 0x6d3   : > { %v9548_v20 = vadd.f32 %v6967_v12, %v6966_v31  ;;  %v6969_v53 = vpop.f32.mrb[170].mxu1 }
 0x6d4   : > { %v6970_v54 = vpop.f32.mrb[171].mxu1 }
 0x6d5   : > { %v9550_v29 = vadd.f32 %v6970_v54, %v6969_v53 }
 0x6d9   : > { %v6972_v4 = vpop.f32.mrb[172].mxu1 }
 0x6da   : > { %v6973_v15 = vpop.f32.mrb[173].mxu1 }
 0x6db   : > { %v9552_v11 = vadd.f32 %v6973_v15, %v6972_v4  ;;  %v6975_v10 = vpop.f32.mrb[174].mxu1  ;;  %v9575_v4 = vld [vmem:[%s9927_s9] ss:$0 sm:$0xff] }
 0x6dc   : > { %v6976_v9 = vpop.f32.mrb[175].mxu1 }
 0x6dd   : > { %v9554_v62 = vadd.f32 %v6976_v9, %v6975_v10 }
 0x6e1   : > { %v6978_v59 = vpop.f32.mrb[176].mxu1 }
 0x6e2   : > { %v6979_v6 = vpop.f32.mrb[177].mxu1 }
 0x6e3   : > { %v9556_v55 = vadd.f32 %v6979_v6, %v6978_v59  ;;  %v6981_v8 = vpop.f32.mrb[178].mxu1 }
 0x6e4   : > { %v6982_v39 = vpop.f32.mrb[179].mxu1 }
 0x6e5   : > { %v9558_v18 = vadd.f32 %v6982_v39, %v6981_v8  ;;  %v5265_v39 = vadd.f32 %v9532_v44, %v9575_v4 }
 0x6e9   : > { %v6984_v57 = vpop.f32.mrb[180].mxu1 }
 0x6ea   : > { %v6985_v36 = vpop.f32.mrb[181].mxu1 }
 0x6eb   : > { %v9560_v13 = vadd.f32 %v6985_v36, %v6984_v57  ;;  %v6987_v19 = vpop.f32.mrb[182].mxu1 }
 0x6ec   : > { %v6988_v56 = vpop.f32.mrb[183].mxu1 }
 0x6ed   : > { %v9562_v3 = vadd.f32 %v6988_v56, %v6987_v19 }
 0x6f1   : > { %v6990_v49 = vpop.f32.mrb[184].mxu1 }
 0x6f2   : > { %v6991_v23 = vpop.f32.mrb[185].mxu1 }
 0x6f3   : > { %v9564_v52 = vadd.f32 %v6991_v23, %v6990_v49  ;;  %v6993_v17 = vpop.f32.mrb[186].mxu1  ;;  %v5268_v49 = vadd.f32 %v9534_v60, %v9575_v4 }
 0x6f4   : > { %v6994_v35 = vpop.f32.mrb[187].mxu1 }
 0x6f5   : > { %v9566_v38 = vadd.f32 %v6994_v35, %v6993_v17 }
 0x6f9   : > { %v6996_v61 = vpop.f32.mrb[188].mxu1 }
 0x6fa   : > { %v6997_v40 = vpop.f32.mrb[189].mxu1 }
 0x6fb   : > { %v9568_v14 = vadd.f32 %v6997_v40, %v6996_v61  ;;  %v6999_v31 = vpop.f32.mrb[190].mxu1 }
 0x6fc   : > { %v7000_v12 = vpop.f32.mrb[191].mxu1 }
 0x6fd   : > { %v9570_v53 = vadd.f32 %v7000_v12, %v6999_v31 }
 0x701   : > { %v7002_v54 = vpop.f32.mrb[192].mxu1 }
 0x702   : > { %v7003_v15 = vpop.f32.mrb[193].mxu1 }
 0x703   : > { %v9577_v10 = vadd.f32 %v7003_v15, %v7002_v54  ;;  %v7005_v9 = vpop.f32.mrb[194].mxu1  ;;  %v7024_v59 = vpop.f32.mrb[156].mxu0 }
 0x704   : > { %v7006_v6 = vpop.f32.mrb[195].mxu1  ;;  %v7025_v8 = vpop.f32.mrb[157].mxu0 }
 0x705   : > { %v9581_v57 = vadd.f32 %v7006_v6, %v7005_v9  ;;  %v7026_v36 = vadd.f32 %v7025_v8, %v7024_v59  ;;  %v7027_v19 = vpop.f32.mrb[158].mxu0  ;;  %v5273_v9 = vadd.f32 %v9536_v30, %v9575_v4 }
 0x706   : > { %v7028_v56 = vpop.f32.mrb[159].mxu0 }
 0x707   : > { %v7029_v23 = vadd.f32 %v7028_v56, %v7027_v19  ;;  %v5386_v17 = vadd.f32 %v7026_v36, %v5265_v39  ;;  %v5276_v39 = vadd.f32 %v9538_v50, %v9575_v4  ;;  %v5281_v50 = vadd.f32 %v9540_v45, %v9575_v4 }
 0x709   : > { %v5506_v35 = vpop.f32.mrb[196].mxu1  ;;  %v5389_v61 = vadd.f32 %v7029_v23, %v5268_v49 }
 0x70a   : > { %v5507_v40 = vadd.f32 %v5506_v35, %v5386_v17  ;;  %v7284_v31 = vpop.f32.mrb[197].mxu1 }
 0x70b   : > { %v7030_v12 = vpop.f32.mrb[160].mxu0  ;;  %v5509_v54 = vpop.f32.mrb[198].mxu1 }
 0x70c   : > { %v5593_v15 = vmax.f32 %v5507_v40, 0.0  ;;  %v5510_v0 = vadd.f32 %v5509_v54, %v5389_v61  ;;  %v7031_v34 = vpop.f32.mrb[161].mxu0  ;;  %v7285_v44 = vpop.f32.mrb[199].mxu1 }
 0x70d   : > { %v7032_v59 = vadd.f32 %v7031_v34, %v7030_v12  ;;  %v7033_v6 = vpop.f32.mrb[162].mxu0 }
 0x70e   : > { %v5615_v8 = vmul.f32 %v5593_v15, %v8246_v2  ;;  %v5594_v60 = vmax.f32 %v5510_v0, 0.0  ;;  %v7034_v19 = vpop.f32.mrb[163].mxu0 }
 0x70f   : > { %v7035_v36 = vadd.f32 %v7034_v19, %v7033_v6  ;;  %v5394_v56 = vadd.f32 %v7032_v59, %v5273_v9  ;;  %v5284_v9 = vadd.f32 %v9542_v58, %v9575_v4 }
 0x710   : > { %5637 = vst.msk [vmem:[#allocation3 + $0x10] sm:$0xff] %vm506_vm11, %v5615_v8  ;;  %v5616_v49 = vmul.f32 %v5594_v60, %v8255_v7 }
 0x711   : > { %v5514_v23 = vpop.f32.mrb[200].mxu1  ;;  %v5397_v17 = vadd.f32 %v7035_v36, %v5276_v39 }
 0x712   : > { %5638 = vst.msk [vmem:[#allocation3 + $0x18] sm:$0xff] %vm506_vm11, %v5616_v49  ;;  %v5515_v30 = vadd.f32 %v5514_v23, %v5394_v56  ;;  %v7288_v34 = vpop.f32.mrb[201].mxu1 }
 0x713   : > { %v7036_v35 = vpop.f32.mrb[164].mxu0  ;;  %v5517_v61 = vpop.f32.mrb[202].mxu1 }
 0x714   : > { %v5595_v2 = vmax.f32 %v5515_v30, 0.0  ;;  %v5518_v0 = vadd.f32 %v5517_v61, %v5397_v17  ;;  %v7037_v40 = vpop.f32.mrb[165].mxu0  ;;  %v7289_v31 = vpop.f32.mrb[203].mxu1 }
 0x715   : > { %v7038_v12 = vadd.f32 %v7037_v40, %v7036_v35  ;;  %v7039_v54 = vpop.f32.mrb[166].mxu0 }
 0x716   : > { %v5617_v15 = vmul.f32 %v5595_v2, %v8264_v22  ;;  %v5596_v7 = vmax.f32 %v5518_v0, 0.0  ;;  %v7040_v44 = vpop.f32.mrb[167].mxu0  ;;  %v9940_v2 = vmov 0.0  }
 0x717   : > { %v7041_v59 = vadd.f32 %v7040_v44, %v7039_v54  ;;  %v5402_v6 = vadd.f32 %v7038_v12, %v5281_v50  ;;  %v5659_v39 = vld [vmem:[#allocation3 + $0x10] sm:$0xff]  ;;  %v5292_v50 = vadd.f32 %v9546_v48, %v9575_v4 }
 0x718   : > { %5639 = vst.msk [vmem:[#allocation3 + $0x20] sm:$0xff] %vm506_vm11, %v5617_v15  ;;  %v5618_v8 = vmul.f32 %v5596_v7, %v8268_v26  ;;  %v5289_v26 = vadd.f32 %v9544_v16, %v9575_v4 }
 0x719   : > { %v5522_v60 = vpop.f32.mrb[204].mxu1  ;;  %v5405_v19 = vadd.f32 %v7041_v59, %v5284_v9  ;;  %v5660_v36 = vld [vmem:[#allocation3 + $0x18] sm:$0xff] }
 0x71a   : > { %5640 = vst.msk [vmem:[#allocation3 + $0x28] sm:$0xff] %vm506_vm11, %v5618_v8  ;;  %v5523_v45 = vadd.f32 %v5522_v60, %v5402_v6  ;;  %v7292_v56 = vpop.f32.mrb[205].mxu1  ;;  %v5681_v22 = vpack.c.bf16 %v5660_v36, %v5659_v39 }
 0x71b   : > { %v7042_v49 = vpop.f32.mrb[168].mxu0  ;;  %v5525_v23 = vpop.f32.mrb[206].mxu1 }
 0x71c   : > { %v5597_v17 = vmax.f32 %v5523_v45, 0.0  ;;  %v5526_v30 = vadd.f32 %v5525_v23, %v5405_v19  ;;  %v7043_v58 = vpop.f32.mrb[169].mxu0  ;;  %v7293_v34 = vpop.f32.mrb[207].mxu1  ;;  %7335 = vmatmul.mubr.msk.bf16.vlgmr.msra.gmra.mrb[200].mxu0 %vm506_vm11, %v5681_v22 }
 0x71d   : > { %v7044_v35 = vadd.f32 %v7043_v58, %v7042_v49  ;;  %v7045_v61 = vpop.f32.mrb[170].mxu0  ;;  %7338 = vmatprep.mubr.msk.bf16.mxu0 %vm7580_vm1, %v9940_v2 }
 0x71e   : > { %v5619_v0 = vmul.f32 %v5597_v17, %v8279_v42  ;;  %v5598_v40 = vmax.f32 %v5526_v30, 0.0  ;;  %v7046_v31 = vpop.f32.mrb[171].mxu0  ;;  %v5300_v17 = vadd.f32 %v9550_v29, %v9575_v4 }
 0x71f   : > { %v7047_v12 = vadd.f32 %v7046_v31, %v7045_v61  ;;  %v5410_v54 = vadd.f32 %v7044_v35, %v5289_v26  ;;  %v5661_v44 = vld [vmem:[#allocation3 + $0x20] sm:$0xff] }
 0x720   : > { %5641 = vst.msk [vmem:[#allocation3 + $0x30] sm:$0xff] %vm506_vm11, %v5619_v0  ;;  %v5620_v15 = vmul.f32 %v5598_v40, %v8283_v46  ;;  %v5297_v46 = vadd.f32 %v9548_v20, %v9575_v4 }
 0x721   : > { %v5530_v7 = vpop.f32.mrb[208].mxu1  ;;  %v5413_v16 = vadd.f32 %v7047_v12, %v5292_v50  ;;  %v5662_v9 = vld [vmem:[#allocation3 + $0x28] sm:$0xff] }
 0x722   : > { %5642 = vst.msk [vmem:[#allocation3 + $0x38] sm:$0xff] %vm506_vm11, %v5620_v15  ;;  %v5531_v59 = vadd.f32 %v5530_v7, %v5410_v54  ;;  %v7296_v6 = vpop.f32.mrb[209].mxu1  ;;  %v5682_v42 = vpack.c.bf16 %v5662_v9, %v5661_v44 }
 0x723   : > { %v7048_v8 = vpop.f32.mrb[172].mxu0  ;;  %v5533_v60 = vpop.f32.mrb[210].mxu1  ;;  %v5308_v6 = vadd.f32 %v9554_v62, %v9575_v4 }
 0x724   : > { %v5599_v19 = vmax.f32 %v5531_v59, 0.0  ;;  %v5534_v39 = vadd.f32 %v5533_v60, %v5413_v16  ;;  %v7049_v48 = vpop.f32.mrb[173].mxu0  ;;  %v7297_v36 = vpop.f32.mrb[211].mxu1  ;;  %7339 = vmatmul.mubr.msk.bf16.gmra.mrb[204].mxu0 %vm506_vm11, %v5682_v42 }
 0x725   : > { %v7050_v45 = vadd.f32 %v7049_v48, %v7048_v8  ;;  %v7051_v56 = vpop.f32.mrb[174].mxu0  ;;  %7342 = vmatprep.mubr.msk.bf16.mxu0 %vm7580_vm1, %v9940_v2 }
 0x726   : > { %v5621_v22 = vmul.f32 %v5599_v19, %v8293_v1  ;;  %v5600_v49 = vmax.f32 %v5534_v39, 0.0  ;;  %v7052_v23 = vpop.f32.mrb[175].mxu0 }
 0x727   : > { %v7053_v30 = vadd.f32 %v7052_v23, %v7051_v56  ;;  %v5418_v58 = vadd.f32 %v7050_v45, %v5297_v46  ;;  %v5663_v35 = vld [vmem:[#allocation3 + $0x30] sm:$0xff] }
 0x728   : > { %5643 = vst.msk [vmem:[#allocation3 + $0x40] sm:$0xff] %vm506_vm11, %v5621_v22  ;;  %v5622_v34 = vmul.f32 %v5600_v49, %v8296_v5  ;;  %v5305_v5 = vadd.f32 %v9552_v11, %v9575_v4 }
 0x729   : > { %v5538_v26 = vpop.f32.mrb[212].mxu1  ;;  %v5421_v20 = vadd.f32 %v7053_v30, %v5300_v17  ;;  %v5664_v61 = vld [vmem:[#allocation3 + $0x38] sm:$0xff] }
 0x72a   : > { %5644 = vst.msk [vmem:[#allocation3 + $0x48] sm:$0xff] %vm506_vm11, %v5622_v34  ;;  %v5539_v0 = vadd.f32 %v5538_v26, %v5418_v58  ;;  %v7300_v40 = vpop.f32.mrb[213].mxu1  ;;  %v5683_v1 = vpack.c.bf16 %v5664_v61, %v5663_v35 }
 0x72b   : > { %v7054_v31 = vpop.f32.mrb[176].mxu0  ;;  %v5541_v50 = vpop.f32.mrb[214].mxu1 }
 0x72c   : > { %v5601_v12 = vmax.f32 %v5539_v0, 0.0  ;;  %v5542_v54 = vadd.f32 %v5541_v50, %v5421_v20  ;;  %v7055_v29 = vpop.f32.mrb[177].mxu0  ;;  %v7301_v15 = vpop.f32.mrb[215].mxu1  ;;  %7343 = vmatmul.mubr.msk.bf16.gmra.mrb[208].mxu0 %vm506_vm11, %v5683_v1  ;;  %v5316_v20 = vadd.f32 %v9558_v18, %v9575_v4 }
 0x72d   : > { %v7056_v7 = vadd.f32 %v7055_v29, %v7054_v31  ;;  %v7057_v16 = vpop.f32.mrb[178].mxu0  ;;  %7346 = vmatprep.mubr.msk.bf16.mxu0 %vm7580_vm1, %v9940_v2 }
 0x72e   : > { %v5623_v44 = vmul.f32 %v5601_v12, %v8305_v21  ;;  %v5602_v9 = vmax.f32 %v5542_v54, 0.0  ;;  %v7058_v59 = vpop.f32.mrb[179].mxu0 }
 0x72f   : > { %v7059_v42 = vadd.f32 %v7058_v59, %v7057_v16  ;;  %v5426_v8 = vadd.f32 %v7056_v7, %v5305_v5  ;;  %v5665_v39 = vld [vmem:[#allocation3 + $0x40] sm:$0xff] }
 0x730   : > { %5645 = vst.msk [vmem:[#allocation3 + $0x50] sm:$0xff] %vm506_vm11, %v5623_v44  ;;  %v5624_v60 = vmul.f32 %v5602_v9, %v8308_v25  ;;  %v5313_v25 = vadd.f32 %v9556_v55, %v9575_v4 }
 0x731   : > { %v5546_v19 = vpop.f32.mrb[216].mxu1  ;;  %v5429_v11 = vadd.f32 %v7059_v42, %v5308_v6  ;;  %v5666_v48 = vld [vmem:[#allocation3 + $0x48] sm:$0xff]  ;;  %v5324_v42 = vadd.f32 %v9562_v3, %v9575_v4 }
 0x732   : > { %5646 = vst.msk [vmem:[#allocation3 + $0x58] sm:$0xff] %vm506_vm11, %v5624_v60  ;;  %v5547_v36 = vadd.f32 %v5546_v19, %v5426_v8  ;;  %v7304_v46 = vpop.f32.mrb[217].mxu1  ;;  %v5684_v21 = vpack.c.bf16 %v5666_v48, %v5665_v39 }
 0x733   : > { %v7060_v45 = vpop.f32.mrb[180].mxu0  ;;  %v5549_v56 = vpop.f32.mrb[218].mxu1 }
 0x734   : > { %v5603_v22 = vmax.f32 %v5547_v36, 0.0  ;;  %v5550_v49 = vadd.f32 %v5549_v56, %v5429_v11  ;;  %v7061_v62 = vpop.f32.mrb[181].mxu0  ;;  %v7305_v23 = vpop.f32.mrb[219].mxu1  ;;  %7347 = vmatmul.mubr.msk.bf16.gmra.mrb[212].mxu0 %vm506_vm11, %v5684_v21 }
 0x735   : > { %v7062_v17 = vadd.f32 %v7061_v62, %v7060_v45  ;;  %v7063_v30 = vpop.f32.mrb[182].mxu0  ;;  %7350 = vmatprep.mubr.msk.bf16.mxu0 %vm7580_vm1, %v9940_v2 }
 0x736   : > { %v5625_v58 = vmul.f32 %v5603_v22, %v8317_v43  ;;  %v5604_v34 = vmax.f32 %v5550_v49, 0.0  ;;  %v7064_v26 = vpop.f32.mrb[183].mxu0 }
 0x737   : > { %v7065_v35 = vadd.f32 %v7064_v26, %v7063_v30  ;;  %v5434_v61 = vadd.f32 %v7062_v17, %v5313_v25  ;;  %v5667_v1 = vld [vmem:[#allocation3 + $0x50] sm:$0xff] }
 0x738   : > { %5647 = vst.msk [vmem:[#allocation3 + $0x60] sm:$0xff] %vm506_vm11, %v5625_v58  ;;  %v5626_v0 = vmul.f32 %v5604_v34, %v8320_v47  ;;  %v5321_v47 = vadd.f32 %v9560_v13, %v9575_v4  ;;  %v5332_v58 = vadd.f32 %v9566_v38, %v9575_v4 }
 0x739   : > { %v5554_v40 = vpop.f32.mrb[220].mxu1  ;;  %v5437_v55 = vadd.f32 %v7065_v35, %v5316_v20  ;;  %v5668_v31 = vld [vmem:[#allocation3 + $0x58] sm:$0xff] }
 0x73a   : > { %5648 = vst.msk [vmem:[#allocation3 + $0x68] sm:$0xff] %vm506_vm11, %v5626_v0  ;;  %v5555_v50 = vadd.f32 %v5554_v40, %v5434_v61  ;;  %v7308_v12 = vpop.f32.mrb[221].mxu1  ;;  %v5685_v43 = vpack.c.bf16 %v5668_v31, %v5667_v1 }
 0x73b   : > { %v7066_v54 = vpop.f32.mrb[184].mxu0  ;;  %v5557_v29 = vpop.f32.mrb[222].mxu1 }
 0x73c   : > { %v5605_v15 = vmax.f32 %v5555_v50, 0.0  ;;  %v5558_v5 = vadd.f32 %v5557_v29, %v5437_v55  ;;  %v7067_v18 = vpop.f32.mrb[185].mxu0  ;;  %v7309_v7 = vpop.f32.mrb[223].mxu1  ;;  %7351 = vmatmul.mubr.msk.bf16.gmra.mrb[216].mxu0 %vm506_vm11, %v5685_v43 }
 0x73d   : > { %v7068_v16 = vadd.f32 %v7067_v18, %v7066_v54  ;;  %v7069_v44 = vpop.f32.mrb[186].mxu0  ;;  %7354 = vmatprep.mubr.msk.bf16.mxu0 %vm7580_vm1, %v9940_v2  ;;  %v5340_v7 = vadd.f32 %v9570_v53, %v9575_v4 }
 0x73e   : > { %v5627_v9 = vmul.f32 %v5605_v15, %v8329_v63  ;;  %v5606_v59 = vmax.f32 %v5558_v5, 0.0  ;;  %v7070_v6 = vpop.f32.mrb[187].mxu0 }
 0x73f   : > { %v7071_v8 = vadd.f32 %v7070_v6, %v7069_v44  ;;  %v5442_v60 = vadd.f32 %v7068_v16, %v5321_v47  ;;  %v5669_v39 = vld [vmem:[#allocation3 + $0x60] sm:$0xff] }
 0x740   : > { %5649 = vst.msk [vmem:[#allocation3 + $0x70] sm:$0xff] %vm506_vm11, %v5627_v9  ;;  %v5628_v19 = vmul.f32 %v5606_v59, %v8332_v51  ;;  %v5329_v51 = vadd.f32 %v9564_v52, %v9575_v4 }
 0x741   : > { %v5562_v11 = vpop.f32.mrb[224].mxu1  ;;  %v5445_v13 = vadd.f32 %v7071_v8, %v5324_v42  ;;  %v5670_v48 = vld [vmem:[#allocation3 + $0x68] sm:$0xff] }
 0x742   : > { %5650 = vst.msk [vmem:[#allocation3 + $0x78] sm:$0xff] %vm506_vm11, %v5628_v19  ;;  %v5563_v36 = vadd.f32 %v5562_v11, %v5442_v60  ;;  %v7312_v46 = vpop.f32.mrb[225].mxu1  ;;  %v5686_v63 = vpack.c.bf16 %v5670_v48, %v5669_v39 }
 0x743   : > { %v7072_v21 = vpop.f32.mrb[188].mxu0  ;;  %v5565_v45 = vpop.f32.mrb[226].mxu1 }
 0x744   : > { %v5607_v56 = vmax.f32 %v5563_v36, 0.0  ;;  %v5566_v22 = vadd.f32 %v5565_v45, %v5445_v13  ;;  %v7073_v3 = vpop.f32.mrb[189].mxu0  ;;  %v7313_v49 = vpop.f32.mrb[227].mxu1  ;;  %7355 = vmatmul.mubr.msk.bf16.gmra.mrb[220].mxu0 %vm506_vm11, %v5686_v63  ;;  %v5348_v45 = vadd.f32 %v9581_v57, %v9575_v4 }
 0x745   : > { %v7074_v62 = vadd.f32 %v7073_v3, %v7072_v21  ;;  %v7075_v23 = vpop.f32.mrb[190].mxu0  ;;  %7358 = vmatprep.mubr.msk.bf16.mxu0 %vm7580_vm1, %v9940_v2 }
 0x746   : > { %v5629_v25 = vmul.f32 %v5607_v56, %v8341_v24  ;;  %v5608_v17 = vmax.f32 %v5566_v22, 0.0  ;;  %v7076_v30 = vpop.f32.mrb[191].mxu0 }
 0x747   : > { %v7077_v34 = vadd.f32 %v7076_v30, %v7075_v23  ;;  %v5450_v26 = vadd.f32 %v7074_v62, %v5329_v51  ;;  %v5671_v61 = vld [vmem:[#allocation3 + $0x70] sm:$0xff] }
 0x748   : > { %5651 = vst.msk [vmem:[#allocation3 + $0x80] sm:$0xff] %vm506_vm11, %v5629_v25  ;;  %v5630_v20 = vmul.f32 %v5608_v17, %v8343_v28  ;;  %v5337_v28 = vadd.f32 %v9568_v14, %v9575_v4 }
 0x749   : > { %v5570_v35 = vpop.f32.mrb[228].mxu1  ;;  %v5453_v52 = vadd.f32 %v7077_v34, %v5332_v58  ;;  %v5672_v0 = vld [vmem:[#allocation3 + $0x78] sm:$0xff]  ;;  %v9941_v34 = vld [vmem:[#allocation4_spill] sm:$0xff] }
 0x74a   : > { %5652 = vst.msk [vmem:[#allocation3 + $0x88] sm:$0xff] %vm506_vm11, %v5630_v20  ;;  %v5571_v40 = vadd.f32 %v5570_v35, %v5450_v26  ;;  %v7316_v55 = vpop.f32.mrb[229].mxu1  ;;  %v5687_v24 = vpack.c.bf16 %v5672_v0, %v5671_v61 }
 0x74b   : > { %v7078_v1 = vpop.f32.mrb[192].mxu0  ;;  %v5573_v31 = vpop.f32.mrb[230].mxu1 }
 0x74c   : > { %v5609_v50 = vmax.f32 %v5571_v40, 0.0  ;;  %v5574_v12 = vadd.f32 %v5573_v31, %v5453_v52  ;;  %v7079_v38 = vpop.f32.mrb[193].mxu0  ;;  %v7317_v43 = vpop.f32.mrb[231].mxu1  ;;  %7359 = vmatmul.mubr.msk.bf16.gmra.mrb[224].mxu0 %vm506_vm11, %v5687_v24 }
 0x74d   : > { %v7080_v54 = vadd.f32 %v7079_v38, %v7078_v1  ;;  %v7081_v29 = vpop.f32.mrb[194].mxu0  ;;  %7362 = vmatprep.mubr.msk.bf16.mxu0 %vm7580_vm1, %v9940_v2 }
 0x74e   : > { %v5631_v15 = vmul.f32 %v5609_v50, %v8351_v33  ;;  %v5610_v5 = vmax.f32 %v5574_v12, 0.0  ;;  %v7082_v18 = vpop.f32.mrb[195].mxu0 }
 0x74f   : > { %v7083_v47 = vadd.f32 %v7082_v18, %v7081_v29  ;;  %v5458_v16 = vadd.f32 %v7080_v54, %v5337_v28  ;;  %v5673_v59 = vld [vmem:[#allocation3 + $0x80] sm:$0xff]  ;;  %v7590_v29 = vmov 1  }
 0x750   : > { %5653 = vst.msk [vmem:[#allocation3 + $0x90] sm:$0xff] %vm506_vm11, %v5631_v15  ;;  %v5632_v44 = vmul.f32 %v5610_v5, %v8349_v27  ;;  %v5345_v27 = vadd.f32 %v9577_v10, %v9575_v4 }
 0x751   : > { %v5578_v9 = vpop.f32.mrb[232].mxu1  ;;  %v5461_v14 = vadd.f32 %v7083_v47, %v5340_v7  ;;  %v5674_v6 = vld [vmem:[#allocation3 + $0x88] sm:$0xff] }
 0x752   : > { %5654 = vst.msk [vmem:[#allocation3 + $0x98] sm:$0xff] %vm506_vm11, %v5632_v44  ;;  %v5579_v42 = vadd.f32 %v5578_v9, %v5458_v16  ;;  %v7320_v8 = vpop.f32.mrb[233].mxu1  ;;  %v5688_v33 = vpack.c.bf16 %v5674_v6, %v5673_v59  ;;  %v9942_v16 = vmov 0  }
 0x753   : > { %v7084_v60 = vpop.f32.mrb[196].mxu0  ;;  %v5581_v19 = vpop.f32.mrb[234].mxu1 }
 0x754   : > { %v5611_v11 = vmax.f32 %v5579_v42, 0.0  ;;  %v5582_v13 = vadd.f32 %v5581_v19, %v5461_v14  ;;  %v7085_v53 = vpop.f32.mrb[197].mxu0  ;;  %v7321_v39 = vpop.f32.mrb[235].mxu1  ;;  %7363 = vmatmul.mubr.msk.bf16.gmra.mrb[228].mxu0 %vm506_vm11, %v5688_v33 }
 0x755   : > { %v7086_v48 = vadd.f32 %v7085_v53, %v7084_v60  ;;  %v7087_v36 = vpop.f32.mrb[198].mxu0  ;;  %7366 = vmatprep.mubr.msk.bf16.mxu0 %vm7580_vm1, %v9940_v2 }
 0x756   : > { %v5633_v46 = vmul.f32 %v5611_v11, %v8355_v41  ;;  %v5612_v63 = vmax.f32 %v5582_v13, 0.0  ;;  %v7088_v21 = vpop.f32.mrb[199].mxu0 }
 0x757   : > { %v7089_v56 = vadd.f32 %v7088_v21, %v7087_v36  ;;  %v5466_v22 = vadd.f32 %v7086_v48, %v5345_v27  ;;  %v5675_v51 = vld [vmem:[#allocation3 + $0x90] sm:$0xff] }
 0x758   : > { %5655 = vst.msk [vmem:[#allocation3 + $0xa0] sm:$0xff] %vm506_vm11, %v5633_v46  ;;  %v5634_v3 = vmul.f32 %v5612_v63, %v8353_v37 }
 0x759   : > { %v5586_v49 = vpop.f32.mrb[236].mxu1  ;;  %v5469_v10 = vadd.f32 %v7089_v56, %v5348_v45  ;;  %v5676_v62 = vld [vmem:[#allocation3 + $0x98] sm:$0xff] }
 0x75a   : > { %5656 = vst.msk [vmem:[#allocation3 + $0xa8] sm:$0xff] %vm506_vm11, %v5634_v3  ;;  %v5587_v23 = vadd.f32 %v5586_v49, %v5466_v22  ;;  %v7324_v25 = vpop.f32.mrb[237].mxu1  ;;  %v5689_v41 = vpack.c.bf16 %v5676_v62, %v5675_v51 }
 0x75b   : > { %v5589_v17 = vpop.f32.mrb[238].mxu1 }
 0x75c   : > { %v5613_v30 = vmax.f32 %v5587_v23, 0.0  ;;  %v5590_v58 = vadd.f32 %v5589_v17, %v5469_v10  ;;  %7367 = vmatmul.mubr.msk.bf16.gmra.mrb[232].mxu0 %vm506_vm11, %v5689_v41  ;;  %v7325_v4 = vpop.f32.mrb[239].mxu1 }
 0x75d   : > { %7370 = vmatprep.mubr.msk.bf16.mxu0 %vm7580_vm1, %v9940_v2 }
 0x75e   : > { %v5635_v37 = vmul.f32 %v5613_v30, %v8391_v32  ;;  %v5614_v57 = vmax.f32 %v5590_v58, 0.0  ;;  %v9703_v32 = vld [vmem:[%s9929_s11] ss:$0 sm:$0xff] }
 0x75f   : > { %v5677_v20 = vld [vmem:[#allocation3 + $0xa0] sm:$0xff] }
 0x760   : > { %5657 = vst.msk [vmem:[#allocation3 + $0xb0] sm:$0xff] %vm506_vm11, %v5635_v37  ;;  %v5636_v26 = vmul.f32 %v5614_v57, %v9941_v34 }
 0x761   : > { %v5678_v35 = vld [vmem:[#allocation3 + $0xa8] sm:$0xff] }
 0x762   : > { %5658 = vst.msk [vmem:[#allocation3 + $0xb8] sm:$0x1] %vm1625_vm12, %v5636_v26  ;;  %v5690_v52 = vpack.c.bf16 %v5678_v35, %v5677_v20 }
 0x764   : > { %7371 = vmatmul.mubr.msk.bf16.gmra.mrb[236].mxu0 %vm506_vm11, %v5690_v52 }
 0x765   : > { %7374 = vmatprep.mubr.msk.bf16.mxu0 %vm7580_vm1, %v9940_v2 }
 0x767   : > { %v5679_v61 = vld [vmem:[#allocation3 + $0xb0] sm:$0xff] }
 0x769   : > { %v5680_v0 = vld [vmem:[#allocation3 + $0xb8] sm:$0x1] }
 0x76a   : > { %v5691_v40 = vpack.c.bf16 %v5680_v0, %v5679_v61 }
 0x76c   : > { %7375 = vmatmul.mubr.msk.bf16.gmra.mrb[240].mxu0 %vm506_vm11, %v5691_v40 }
 0x7ef   : > { %v5798_v55 = vpop.f32.mrb[200].mxu0 }
 0x7f0   : > { %v5799_v24 = vadd.f32 %v9703_v32, %v5798_v55  ;;  %v7336_v1 = vpop.f32.mrb[201].mxu0 }
 0x7f1   : > { %v5801_v31 = vpop.f32.mrb[202].mxu0 }
 0x7f2   : > { %v5885_v50 = vmax.f32 %v5799_v24, 0.0  ;;  %v5802_v12 = vadd.f32 %v9703_v32, %v5801_v31  ;;  %v7337_v38 = vpop.f32.mrb[203].mxu0 }
 0x7f4   : > { %v5886_v43 = vmax.f32 %v5802_v12, 0.0  ;;  %5912 = vperm.xlu1 %7414, %v5885_v50  }
 0x7f6   : > { %5917 = vperm.xlu0 %7413, %v5886_v43  }
 0x7f7   : > { %v5806_v28 = vpop.f32.mrb[204].mxu0 }
 0x7f8   : > { %v5807_v54 = vadd.f32 %v9703_v32, %v5806_v28  ;;  %7415 = vset.pattern.permute.xlu1 %v7590_v29  ;;  %v7340_v15 = vpop.f32.mrb[205].mxu0 }
 0x7f9   : > { %6021 = vperm.xlu1 %7415, %v5885_v50   ;;  %v5809_v5 = vpop.f32.mrb[206].mxu0 }
 0x7fa   : > { %v5810_v18 = vadd.f32 %v9703_v32, %v5809_v5  ;;  %7416 = vset.pattern.permute.xlu0 %v7590_v29  ;;  %v7341_v7 = vpop.f32.mrb[207].mxu0  ;;  %v5887_v47 = vmax.f32 %v5807_v54, 0.0 }
 0x7fb   : > { %6025 = vperm.xlu0 %7416, %v5886_v43  }
 0x7fc   : > { %v5888_v44 = vmax.f32 %v5810_v18, 0.0 }
 0x7fd   : > { %7417 = vset.pattern.permute.xlu1 %v9942_v16 }
 0x7fe   : > { %5922 = vperm.xlu1 %7417, %v5887_v47  }
 0x7ff   : > { %7419 = vset.pattern.permute.xlu0 %v9942_v16  ;;  %v5814_v9 = vpop.f32.mrb[208].mxu0 }
 0x800   : > { %v5815_v14 = vadd.f32 %v9703_v32, %v5814_v9  ;;  %5927 = vperm.xlu0 %7419, %v5888_v44   ;;  %v7344_v59 = vpop.f32.mrb[209].mxu0 }
 0x801   : > { %v5817_v6 = vpop.f32.mrb[210].mxu0 }
 0x802   : > { %v5889_v42 = vmax.f32 %v5815_v14, 0.0  ;;  %7418 = vset.pattern.permute.xlu1 %v7590_v29  ;;  %v7345_v8 = vpop.f32.mrb[211].mxu0  ;;  %v5818_v13 = vadd.f32 %v9703_v32, %v5817_v6 }
 0x803   : > { %6029 = vperm.xlu1 %7418, %v5887_v47  }
 0x804   : > { %7421 = vset.pattern.permute.xlu0 %v7590_v29  ;;  %v5890_v48 = vmax.f32 %v5818_v13, 0.0 }
 0x805   : > { %6037 = vperm.xlu0 %7421, %v5889_v42  }
 0x807   : > { %6033 = vperm.xlu1 %7418, %v5888_v44   ;;  %v5822_v33 = vpop.f32.mrb[212].mxu0 }
 0x808   : > { %v5823_v60 = vadd.f32 %v9703_v32, %v5822_v33  ;;  %v7348_v19 = vpop.f32.mrb[213].mxu0 }
 0x809   : > { %v5825_v11 = vpop.f32.mrb[214].mxu0  ;;  %7423 = vset.pattern.permute.xlu0 %v9942_v16 }
 0x80a   : > { %v5891_v53 = vmax.f32 %v5823_v60, 0.0  ;;  %v7349_v39 = vpop.f32.mrb[215].mxu0  ;;  %v5826_v27 = vadd.f32 %v9703_v32, %v5825_v11 }
 0x80b   : > { %7420 = vset.pattern.permute.xlu1 %v9942_v16  ;;  %v5907_v39 = vlaneseq }
 0x80c   : > { %5932 = vperm.xlu1 %7420, %v5889_v42   ;;  %5942 = vperm.xlu0 %7423, %v5891_v53   ;;  %v5892_v36 = vmax.f32 %v5826_v27, 0.0 }
 0x80d   : > { %v9756_v27 = vand.u32 127, %v5907_v39 }
 0x80f   : > { %v5830_v46 = vpop.f32.mrb[216].mxu0  ;;  %vm5909_vm13 = vcmp.lt.s32.totalorder %v9756_v27, 6  ;;  %vm6298_vm7 = vcmp.eq.s32.totalorder %v9756_v27, 1  ;;  %vm6291_vm8 = vcmp.eq.s32.totalorder %v9756_v27, 0  ;;  %vm6306_vm9 = vcmp.eq.s32.totalorder %v9756_v27, 2 }
 0x810   : > { %5937 = vperm.xlu1 %7420, %v5890_v48   ;;  %7425 = vset.pattern.permute.xlu0 %v7590_v29  ;;  %v7352_v63 = vpop.f32.mrb[217].mxu0  ;;  %v5831_v25 = vadd.f32 %v9703_v32, %v5830_v46 }
 0x811   : > { %6049 = vperm.xlu0 %7425, %v5892_v36   ;;  %v5833_v21 = vpop.f32.mrb[218].mxu0 }
 0x812   : > { %v5834_v45 = vadd.f32 %v9703_v32, %v5833_v21  ;;  %v7353_v56 = vpop.f32.mrb[219].mxu0  ;;  %v5893_v17 = vmax.f32 %v5831_v25, 0.0 }
 0x814   : > { %v5894_v22 = vmax.f32 %v5834_v45, 0.0  ;;  %7422 = vset.pattern.permute.xlu1 %v7590_v29  ;;  %v6130_v45 = vld [vmem:[%s9930_s12] sm:$0xff] }
 0x815   : > { %6041 = vperm.xlu1 %7422, %v5890_v48   ;;  %7427 = vset.pattern.permute.xlu0 %v9942_v16 }
 0x816   : > { %5957 = vperm.xlu0 %7427, %v5894_v22  }
 0x817   : > { %v5838_v3 = vpop.f32.mrb[220].mxu0 }
 0x818   : > { %v5839_v49 = vadd.f32 %v9703_v32, %v5838_v3  ;;  %v7356_v10 = vpop.f32.mrb[221].mxu0 }
 0x819   : > { %6045 = vperm.xlu1 %7422, %v5891_v53   ;;  %v5841_v51 = vpop.f32.mrb[222].mxu0 }
 0x81a   : > { %v5895_v62 = vmax.f32 %v5839_v49, 0.0  ;;  %v7357_v23 = vpop.f32.mrb[223].mxu0  ;;  %7429 = vset.pattern.permute.xlu0 %v7590_v29  ;;  %v5842_v55 = vadd.f32 %v9703_v32, %v5841_v51  ;;  %v6132_v49 = vld [vmem:[%s9930_s12 + $0x10] sm:$0xff] }
 0x81c   : > { %6061 = vperm.xlu0 %7429, %v5895_v62   ;;  %v5896_v12 = vmax.f32 %v5842_v55, 0.0 }
 0x81d   : > { %7424 = vset.pattern.permute.xlu1 %v9942_v16 }
 0x81e   : > { %5947 = vperm.xlu1 %7424, %v5892_v36  }
 0x81f   : > { %v5846_v41 = vpop.f32.mrb[224].mxu0 }
 0x820   : > { %v5847_v30 = vadd.f32 %v9703_v32, %v5846_v41  ;;  %v7360_v58 = vpop.f32.mrb[225].mxu0  ;;  %7431 = vset.pattern.permute.xlu0 %v9942_v16 }
 0x821   : > { %v5849_v4 = vpop.f32.mrb[226].mxu0 }
 0x822   : > { %v5897_v37 = vmax.f32 %v5847_v30, 0.0  ;;  %5952 = vperm.xlu1 %7424, %v5893_v17   ;;  %v7361_v57 = vpop.f32.mrb[227].mxu0  ;;  %v5850_v34 = vadd.f32 %v9703_v32, %v5849_v4 }
 0x824   : > { %5972 = vperm.xlu0 %7431, %v5897_v37   ;;  %v5898_v26 = vmax.f32 %v5850_v34, 0.0 }
 0x826   : > { %7426 = vset.pattern.permute.xlu1 %v7590_v29 }
 0x827   : > { %6053 = vperm.xlu1 %7426, %v5893_v17   ;;  %v5854_v20 = vpop.f32.mrb[228].mxu0 }
 0x828   : > { %7433 = vset.pattern.permute.xlu0 %v7590_v29  ;;  %v7364_v35 = vpop.f32.mrb[229].mxu0  ;;  %v5855_v14 = vadd.f32 %v9703_v32, %v5854_v20 }
 0x829   : > { %6073 = vperm.xlu0 %7433, %v5898_v26   ;;  %v5857_v52 = vpop.f32.mrb[230].mxu0 }
 0x82a   : > { %v5858_v61 = vadd.f32 %v9703_v32, %v5857_v52  ;;  %v7365_v0 = vpop.f32.mrb[231].mxu0  ;;  %v5899_v33 = vmax.f32 %v5855_v14, 0.0 }
 0x82b   : > { %6057 = vperm.xlu1 %7426, %v5894_v22  }
 0x82c   : > { %v5900_v40 = vmax.f32 %v5858_v61, 0.0 }
 0x82d   : > { %7435 = vset.pattern.permute.xlu0 %v9942_v16 }
 0x82e   : > { %5987 = vperm.xlu0 %7435, %v5900_v40  }
 0x82f   : > { %7428 = vset.pattern.permute.xlu1 %v9942_v16  ;;  %v5862_v24 = vpop.f32.mrb[232].mxu0 }
 0x830   : > { %v5863_v1 = vadd.f32 %v9703_v32, %v5862_v24  ;;  %5962 = vperm.xlu1 %7428, %v5895_v62   ;;  %v7368_v31 = vpop.f32.mrb[233].mxu0 }
 0x831   : > { %v5865_v50 = vpop.f32.mrb[234].mxu0 }
 0x832   : > { %v5901_v38 = vmax.f32 %v5863_v1, 0.0  ;;  %v7369_v43 = vpop.f32.mrb[235].mxu0  ;;  %7437 = vset.pattern.permute.xlu0 %v7590_v29  ;;  %v5866_v19 = vadd.f32 %v9703_v32, %v5865_v50 }
 0x834   : > { %5967 = vperm.xlu1 %7428, %v5896_v12   ;;  %6085 = vperm.xlu0 %7437, %v5901_v38   ;;  %v5902_v11 = vmax.f32 %v5866_v19, 0.0  ;;  %v6137_v19 = vld [vmem:[%s9930_s12 + $0x38] sm:$0xff] }
 0x837   : > { %v5870_v28 = vpop.f32.mrb[236].mxu0 }
 0x838   : > { %v5871_v54 = vadd.f32 %v9703_v32, %v5870_v28  ;;  %7430 = vset.pattern.permute.xlu1 %v7590_v29  ;;  %v7372_v15 = vpop.f32.mrb[237].mxu0  ;;  %7439 = vset.pattern.permute.xlu0 %v9942_v16  ;;  %v6133_v28 = vld [vmem:[%s9930_s12 + $0x18] sm:$0xff] }
 0x839   : > { %6065 = vperm.xlu1 %7430, %v5896_v12   ;;  %v5873_v5 = vpop.f32.mrb[238].mxu0 }
 0x83a   : > { %v5903_v18 = vmax.f32 %v5871_v54, 0.0  ;;  %v7373_v7 = vpop.f32.mrb[239].mxu0  ;;  %v5874_v47 = vadd.f32 %v9703_v32, %v5873_v5 }
 0x83c   : > { %6002 = vperm.xlu0 %7439, %v5903_v18   ;;  %v5904_v44 = vmax.f32 %v5874_v47, 0.0 }
 0x83d   : > { %6069 = vperm.xlu1 %7430, %v5897_v37  }
 0x83f   : > { %v5878_v9 = vpop.f32.mrb[240].mxu0 }
 0x840   : > { %7441 = vset.pattern.permute.xlu0 %v7590_v29  ;;  %v7376_v59 = vpop.f32.mrb[241].mxu0  ;;  %v5879_v13 = vadd.f32 %v9703_v32, %v5878_v9 }
 0x841   : > { %7432 = vset.pattern.permute.xlu1 %v9942_v16  ;;  %6097 = vperm.xlu0 %7441, %v5904_v44   ;;  %v5881_v6 = vpop.f32.mrb[242].mxu0 }
 0x842   : > { %v5882_v42 = vadd.f32 %v9703_v32, %v5881_v6  ;;  %5977 = vperm.xlu1 %7432, %v5898_v26   ;;  %v7377_v8 = vpop.f32.mrb[243].mxu0  ;;  %v5905_v53 = vmax.f32 %v5879_v13, 0.0 }
 0x844   : > { %v5906_v60 = vmax.f32 %v5882_v42, 0.0  ;;  %v6136_v42 = vld [vmem:[%s9930_s12 + $0x30] sm:$0xff] }
 0x845   : > { %7443 = vset.pattern.permute.xlu0 %v9942_v16 }
 0x846   : > { %5982 = vperm.xlu1 %7432, %v5899_v33   ;;  %6017 = vperm.xlu0 %7443, %v5906_v60  }
 0x84a   : > { %7434 = vset.pattern.permute.xlu1 %v7590_v29 }
 0x84b   : > { %6077 = vperm.xlu1 %7434, %v5899_v33  }
 0x84f   : > { %6081 = vperm.xlu1 %7434, %v5900_v40  }
 0x853   : > { %7436 = vset.pattern.permute.xlu1 %v9942_v16 }
 0x854   : > { %5992 = vperm.xlu1 %7436, %v5901_v38  }
 0x858   : > { %5997 = vperm.xlu1 %7436, %v5902_v11  }
 0x85c   : > { %7438 = vset.pattern.permute.xlu1 %v7590_v29 }
 0x85d   : > { %6089 = vperm.xlu1 %7438, %v5902_v11  }
 0x861   : > { %6093 = vperm.xlu1 %7438, %v5903_v18   ;;  %v6134_v18 = vld [vmem:[%s9930_s12 + $0x20] sm:$0xff] }
 0x865   : > { %7440 = vset.pattern.permute.xlu1 %v9942_v16 }
 0x866   : > { %6007 = vperm.xlu1 %7440, %v5904_v44   ;;  %v6135_v44 = vld [vmem:[%s9930_s12 + $0x28] sm:$0xff] }
 0x86a   : > { %6012 = vperm.xlu1 %7440, %v5905_v53  }
 0x86e   : > { %7442 = vset.pattern.permute.xlu1 %v7590_v29  ;;  %v6131_v29 = vld [vmem:[%s9930_s12 + $0x8] sm:$0xff] }
 0x86f   : > { %6101 = vperm.xlu1 %7442, %v5905_v53  }
 0x873   : > { %v5913_v48 = vpop.permute.xlu1 %5912  ;;  %6105 = vperm.xlu1 %7442, %v5906_v60  }
 0x875   : > { %v5918_v36 = vpop.permute.xlu0 %5917 }
 0x877   : > { %7444 = vset.pattern.permute.xlu1 %v9942_v16 }
 0x878   : > { %v6022_v46 = vpop.permute.xlu1 %6021 }
 0x879   : > { %v6108_v32 = vsel %vm5909_vm13, %v5913_v48, %v6022_v46  ;;  %v6138_v48 = vld [vmem:[%s9930_s12 + $0x40] sm:$0xff] }
 0x87a   : > { %v6026_v63 = vpop.permute.xlu0 %6025  ;;  %v6152_v3 = vmul.f32 %v6130_v45, %v6108_v32  ;;  %v6139_v45 = vld [vmem:[%s9930_s12 + $0x48] sm:$0xff] }
 0x87b   : > { %v6109_v21 = vsel %vm5909_vm13, %v5918_v36, %v6026_v63 }
 0x87c   : > { %v6153_v22 = vmul.f32 %v6131_v29, %v6109_v21  ;;  %v6175_v23 = vsel %vm6174_vm14, %v6152_v3, 0.0 }
 0x87d   : > { %v5923_v56 = vpop.permute.xlu1 %5922 }
 0x87e   : > { %v6176_v10 = vsel %vm6174_vm14, %v6153_v22, 0.0 }
 0x87f   : > { %v6177_v41 = vadd.f32 %v6176_v10, %v6175_v23  ;;  %v5928_v0 = vpop.permute.xlu0 %5927  ;;  %v6140_v10 = vld [vmem:[%s9930_s12 + $0x50] sm:$0xff] }
 0x882   : > { %v6030_v51 = vpop.permute.xlu1 %6029 }
 0x883   : > { %v6110_v62 = vsel %vm5909_vm13, %v5923_v56, %v6030_v51 }
 0x884   : > { %v6154_v25 = vmul.f32 %v6132_v49, %v6110_v62  ;;  %v6038_v55 = vpop.permute.xlu0 %6037 }
 0x886   : > { %v6178_v17 = vsel %vm6174_vm14, %v6154_v25, 0.0  ;;  %v6034_v30 = vpop.permute.xlu1 %6033 }
 0x887   : > { %v6179_v58 = vadd.f32 %v6178_v17, %v6177_v41  ;;  %v6111_v54 = vsel %vm5909_vm13, %v5928_v0, %v6034_v30  ;;  %v6141_v17 = vld [vmem:[%s9930_s12 + $0x58] sm:$0xff]  ;;  %v6143_v0 = vld [vmem:[%s9930_s12 + $0x68] sm:$0xff] }
 0x888   : > { %v6155_v47 = vmul.f32 %v6133_v28, %v6111_v54 }
 0x88a   : > { %v6180_v33 = vsel %vm6174_vm14, %v6155_v47, 0.0 }
 0x88b   : > { %v5933_v4 = vpop.permute.xlu1 %5932  ;;  %v5943_v1 = vpop.permute.xlu0 %5942  ;;  %v6181_v39 = vadd.f32 %v6180_v33, %v6179_v58 }
 0x88c   : > { %v6112_v7 = vsel %vm5909_vm13, %v5933_v4, %v6038_v55 }
 0x88d   : > { %v6156_v14 = vmul.f32 %v6134_v18, %v6112_v7 }
 0x88f   : > { %v5938_v37 = vpop.permute.xlu1 %5937  ;;  %v6182_v13 = vsel %vm6174_vm14, %v6156_v14, 0.0 }
 0x890   : > { %v6050_v50 = vpop.permute.xlu0 %6049  ;;  %v6183_v21 = vadd.f32 %v6182_v13, %v6181_v39 }
 0x894   : > { %v6042_v57 = vpop.permute.xlu1 %6041 }
 0x895   : > { %v5958_v43 = vpop.permute.xlu0 %5957  ;;  %v6113_v9 = vsel %vm5909_vm13, %v5938_v37, %v6042_v57 }
 0x896   : > { %v6157_v60 = vmul.f32 %v6135_v44, %v6113_v9 }
 0x898   : > { %v6046_v34 = vpop.permute.xlu1 %6045  ;;  %v6184_v32 = vsel %vm6174_vm14, %v6157_v60, 0.0 }
 0x899   : > { %v6114_v8 = vsel %vm5909_vm13, %v5943_v1, %v6046_v34  ;;  %v6185_v49 = vadd.f32 %v6184_v32, %v6183_v21  ;;  %v6142_v34 = vld [vmem:[%s9930_s12 + $0x60] sm:$0xff] }
 0x89a   : > { %v6158_v53 = vmul.f32 %v6136_v42, %v6114_v8 }
 0x89b   : > { %v6062_v15 = vpop.permute.xlu0 %6061 }
 0x89c   : > { %v6186_v22 = vsel %vm6174_vm14, %v6158_v53, 0.0  ;;  %v6148_v53 = vld [vmem:[%s9930_s12 + $0x90] sm:$0xff] }
 0x89d   : > { %v5948_v26 = vpop.permute.xlu1 %5947  ;;  %v6187_v41 = vadd.f32 %v6186_v22, %v6185_v49 }
 0x89e   : > { %v6115_v11 = vsel %vm5909_vm13, %v5948_v26, %v6050_v50 }
 0x89f   : > { %v6159_v63 = vmul.f32 %v6137_v19, %v6115_v11 }
 0x8a1   : > { %v5953_v20 = vpop.permute.xlu1 %5952  ;;  %v6188_v23 = vsel %vm6174_vm14, %v6159_v63, 0.0  ;;  %v6149_v63 = vld [vmem:[%s9930_s12 + $0x98] sm:$0xff] }
 0x8a2   : > { %v6189_v57 = vadd.f32 %v6188_v23, %v6187_v41 }
 0x8a3   : > { %v5973_v59 = vpop.permute.xlu0 %5972 }
 0x8a6   : > { %v6054_v35 = vpop.permute.xlu1 %6053 }
 0x8a7   : > { %v6116_v36 = vsel %vm5909_vm13, %v5953_v20, %v6054_v35 }
 0x8a8   : > { %v6074_v29 = vpop.permute.xlu0 %6073  ;;  %v6160_v3 = vmul.f32 %v6138_v48, %v6116_v36 }
 0x8aa   : > { %v6058_v52 = vpop.permute.xlu1 %6057  ;;  %v6190_v58 = vsel %vm6174_vm14, %v6160_v3, 0.0 }
 0x8ab   : > { %v6117_v56 = vsel %vm5909_vm13, %v5958_v43, %v6058_v52 }
 0x8ac   : > { %v6161_v25 = vmul.f32 %v6139_v45, %v6117_v56 }
 0x8ad   : > { %v5988_v4 = vpop.permute.xlu0 %5987 }
 0x8ae   : > { %v6192_v20 = vsel %vm6174_vm14, %v6161_v25, 0.0 }
 0x8af   : > { %v5963_v61 = vpop.permute.xlu1 %5962 }
 0x8b0   : > { %v6118_v51 = vsel %vm5909_vm13, %v5963_v61, %v6062_v15  ;;  %v6191_v61 = vadd.f32 %v6190_v58, %v6189_v57 }
 0x8b1   : > { %v6162_v37 = vmul.f32 %v6140_v10, %v6118_v51  ;;  %v6150_v51 = vld [vmem:[%s9930_s12 + $0xa0] sm:$0xff] }
 0x8b2   : > { %v6193_v50 = vadd.f32 %v6192_v20, %v6191_v61 }
 0x8b3   : > { %v5968_v40 = vpop.permute.xlu1 %5967  ;;  %v6194_v55 = vsel %vm6174_vm14, %v6162_v37, 0.0 }
 0x8b4   : > { %v6195_v18 = vadd.f32 %v6194_v55, %v6193_v50 }
 0x8b8   : > { %v6066_v24 = vpop.permute.xlu1 %6065 }
 0x8b9   : > { %v6119_v30 = vsel %vm5909_vm13, %v5968_v40, %v6066_v24  ;;  %v6086_v24 = vpop.permute.xlu0 %6085 }
 0x8ba   : > { %v6163_v35 = vmul.f32 %v6141_v17, %v6119_v30 }
 0x8bc   : > { %v6070_v31 = vpop.permute.xlu1 %6069  ;;  %v6196_v28 = vsel %vm6174_vm14, %v6163_v35, 0.0 }
 0x8bd   : > { %v6120_v26 = vsel %vm5909_vm13, %v5973_v59, %v6070_v31  ;;  %v6144_v31 = vld [vmem:[%s9930_s12 + $0x70] sm:$0xff]  ;;  %v6003_v47 = vpop.permute.xlu0 %6002  ;;  %v6197_v14 = vadd.f32 %v6196_v28, %v6195_v18 }
 0x8be   : > { %v6164_v1 = vmul.f32 %v6142_v34, %v6120_v26 }
 0x8c0   : > { %v6198_v44 = vsel %vm6174_vm14, %v6164_v1, 0.0 }
 0x8c1   : > { %v5978_v12 = vpop.permute.xlu1 %5977  ;;  %v6199_v8 = vadd.f32 %v6198_v44, %v6197_v14  ;;  %v6098_v48 = vpop.permute.xlu0 %6097 }
 0x8c2   : > { %v6121_v40 = vsel %vm5909_vm13, %v5978_v12, %v6074_v29  ;;  %v6145_v12 = vld [vmem:[%s9930_s12 + $0x78] sm:$0xff] }
 0x8c3   : > { %v6165_v54 = vmul.f32 %v6143_v0, %v6121_v40 }
 0x8c5   : > { %v5983_v38 = vpop.permute.xlu1 %5982  ;;  %v6200_v59 = vsel %vm6174_vm14, %v6165_v54, 0.0  ;;  %v6018_v37 = vpop.permute.xlu0 %6017 }
 0x8c6   : > { %v6201_v13 = vadd.f32 %v6200_v59, %v6199_v8 }
 0x8ca   : > { %v6078_v5 = vpop.permute.xlu1 %6077 }
 0x8cb   : > { %v6122_v43 = vsel %vm5909_vm13, %v5983_v38, %v6078_v5  ;;  %v6146_v38 = vld [vmem:[%s9930_s12 + $0x80] sm:$0xff] }
 0x8cc   : > { %v6166_v9 = vmul.f32 %v6144_v31, %v6122_v43  ;;  %v6225_v31 = vld [vmem:[%s9931_s13] sm:$0x1] }
 0x8ce   : > { %v6082_v6 = vpop.permute.xlu1 %6081  ;;  %v6202_v19 = vsel %vm6174_vm14, %v6166_v9, 0.0 }
 0x8cf   : > { %v6123_v7 = vsel %vm5909_vm13, %v5988_v4, %v6082_v6  ;;  %v6147_v6 = vld [vmem:[%s9930_s12 + $0x88] sm:$0xff]  ;;  %v6203_v32 = vadd.f32 %v6202_v19, %v6201_v13 }
 0x8d0   : > { %v6167_v42 = vmul.f32 %v6145_v12, %v6123_v7  ;;  %v6151_v4 = vld [vmem:[%s9930_s12 + $0xa8] sm:$0x1] }
 0x8d2   : > { %v6204_v36 = vsel %vm6174_vm14, %v6167_v42, 0.0 }
 0x8d3   : > { %v5993_v46 = vpop.permute.xlu1 %5992  ;;  %v6205_v22 = vadd.f32 %v6204_v36, %v6203_v32 }
 0x8d4   : > { %v6124_v5 = vsel %vm5909_vm13, %v5993_v46, %v6086_v24 }
 0x8d5   : > { %v6168_v11 = vmul.f32 %v6146_v38, %v6124_v5  ;;  %v6243_v38 = vld [vmem:[%s501_s23] sm:$0x1] }
 0x8d7   : > { %v5998_v62 = vpop.permute.xlu1 %5997  ;;  %v6206_v45 = vsel %vm6174_vm14, %v6168_v11, 0.0 }
 0x8d8   : > { %v6207_v10 = vadd.f32 %v6206_v45, %v6205_v22 }
 0x8dc   : > { %v6090_v52 = vpop.permute.xlu1 %6089 }
 0x8dd   : > { %v6125_v33 = vsel %vm5909_vm13, %v5998_v62, %v6090_v52 }
 0x8de   : > { %v6169_v46 = vmul.f32 %v6147_v6, %v6125_v33 }
 0x8e0   : > { %v6094_v15 = vpop.permute.xlu1 %6093  ;;  %v6208_v3 = vsel %vm6174_vm14, %v6169_v46, 0.0 }
 0x8e1   : > { %v6126_v39 = vsel %vm5909_vm13, %v6003_v47, %v6094_v15  ;;  %v6209_v25 = vadd.f32 %v6208_v3, %v6207_v10 }
 0x8e2   : > { %v6170_v56 = vmul.f32 %v6148_v53, %v6126_v39 }
 0x8e4   : > { %v6210_v62 = vsel %vm6174_vm14, %v6170_v56, 0.0  ;;  %v7595_v56 = vmov 6  }
 0x8e5   : > { %v6008_v60 = vpop.permute.xlu1 %6007  ;;  %v6211_v58 = vadd.f32 %v6210_v62, %v6209_v25 }
 0x8e6   : > { %v6127_v29 = vsel %vm5909_vm13, %v6008_v60, %v6098_v48 }
 0x8e7   : > { %v6171_v49 = vmul.f32 %v6149_v63, %v6127_v29 }
 0x8e9   : > { %v6013_v21 = vpop.permute.xlu1 %6012  ;;  %v6212_v17 = vsel %vm6174_vm14, %v6171_v49, 0.0 }
 0x8ea   : > { %v6213_v26 = vadd.f32 %v6212_v17, %v6211_v58 }
 0x8ee   : > { %v6102_v23 = vpop.permute.xlu1 %6101 }
 0x8ef   : > { %v6128_v41 = vsel %vm5909_vm13, %v6013_v21, %v6102_v23 }
 0x8f0   : > { %v6172_v30 = vmul.f32 %v6150_v51, %v6128_v41 }
 0x8f2   : > { %v6214_v57 = vsel %vm6174_vm14, %v6172_v30, 0.0  ;;  %v6106_v34 = vpop.permute.xlu1 %6105 }
 0x8f3   : > { %v6129_v20 = vsel %vm5909_vm13, %v6018_v37, %v6106_v34  ;;  %v6215_v52 = vadd.f32 %v6214_v57, %v6213_v26 }
 0x8f4   : > { %v6173_v35 = vmul.f32 %v6151_v4, %v6129_v20 }
 0x8f6   : > { %v6217_v61 = vsel %vm6216_vm15, %v6173_v35, 0.0 }
 0x8f7   : > { %v6218_v0 = vadd.f32 %v6217_v61, %v6215_v52 }
 0x8f9   : > { %v6219_v40 = vrot.slane %v6218_v0, 4 }
 0x8fb   : > { %v6220_v55 = vadd.f32 %v6219_v40, %v6218_v0 }
 0x8fd   : > { %v6221_v24 = vrot.slane %v6220_v55, 2 }
 0x8ff   : > { %v6222_v1 = vadd.f32 %v6221_v24, %v6220_v55 }
 0x901   : > { %v6223_v50 = vrot.slane %v6222_v1, 1 }
 0x903   : > { %v6224_v43 = vadd.f32 %v6223_v50, %v6222_v1 }
 0x905   : > { %v6226_v28 = vadd.f32 %v6225_v31, %v6224_v43 }
 0x907   : > { %v6229_v54 = vsel %vm6228_vm0, %v6226_v28, -inf }
 0x908   : > { %6230 = vmax.xlane.f32.xlu1 %v6229_v54 }
 0x995   : > { %v6231_v15 = vpop.xlane.xlu1 %6230 }
 0x996   : > { %v6232_v18 = vsub.f32 %v6226_v28, %v6231_v15 }
 0x998   : > { %v6233_v12 = vmul.f32 1.442695, %v6232_v18 }
 0x99a   : > { %7562 = vpow2.f32 %v6233_v12 }
 0x9a4   : > { %v7563_v7 = vpop.eup %7562 }
 0x9a5   : > { %v6235_v47 = vsel %vm6228_vm0, %v7563_v7, 0.0 }
 0x9a6   : > { %6236 = vadd.xlane.f32.xlu0 %v6235_v47 }
 0xa33   : > { %v6237_v44 = vpop.xlane.xlu0 %6236 }
 0xa34   : > { %7564 = vrcp.f32 %v6237_v44 }
 0xa35   : > { %7566 = vtanh.f32 %v6226_v28 }
 0xa36   : > { %7568 = vlog2.f32 %v6237_v44 }
 0xa3e   : > { %v7565_v9 = vpop.eup %7564 }
 0xa3f   : > { %v6239_v14 = vmul.f32 %v7565_v9, %v7563_v7  ;;  %v7567_v45 = vpop.eup %7566 }
 0xa40   : > { %v7569_v22 = vpop.eup %7568 }
 0xa41   : > { %6258 = vrot.lane.b32.xlu1 %v6239_v14, %s7591_s30  ;;  %6250 = vrot.lane.b32.xlu0 %v6239_v14, %s7592_s16  ;;  %vm6245_vm1 = vcmp.lt.f32.partialorder %v6239_v14, %v6243_v38  ;;  %v6241_v3 = vmul.f32 0.6931472, %v7569_v22 }
 0xa42   : > { %v6547_v6 = vsel %vm6245_vm1, 1.0, %v9940_v2 }
 0xa43   : > { %v6242_v49 = vsub.f32 %v6232_v18, %v6241_v3 }
 0xa45   : > { %6266 = vrot.lane.b32.xlu1 %v6239_v14, %s7593_s17  ;;  %6274 = vrot.lane.b32.xlu0 %v6239_v14, %s7594_s20 }
 0xab3   : > { %v6259_v5 = vpop.permute.xlu1 %6258  ;;  %v6251_v59 = vpop.permute.xlu0 %6250 }
 0xab4   : > { %v6253_v42 = vadd.f32 %v6251_v59, %v6239_v14 }
 0xab6   : > { %vm6254_vm2 = vcmp.lt.f32.partialorder %v6253_v42, %v6243_v38  ;;  %v6261_v8 = vadd.f32 %v6259_v5, %v6253_v42 }
 0xab7   : > { %v6548_v33 = vsel %vm6254_vm2, 1.0, %v9940_v2  ;;  %v6267_v60 = vpop.permute.xlu1 %6266  ;;  %v6275_v53 = vpop.permute.xlu0 %6274 }
 0xab8   : > { %v6257_v19 = vadd.f32 %v6548_v33, %v6547_v6  ;;  %vm6262_vm3 = vcmp.lt.f32.partialorder %v6261_v8, %v6243_v38  ;;  %v6269_v11 = vadd.f32 %v6267_v60, %v6261_v8 }
 0xab9   : > { %v6549_v13 = vsel %vm6262_vm3, 1.0, %v9940_v2 }
 0xaba   : > { %v6265_v39 = vadd.f32 %v6549_v13, %v6257_v19  ;;  %vm6270_vm4 = vcmp.lt.f32.partialorder %v6269_v11, %v6243_v38  ;;  %v6277_v48 = vadd.f32 %v6275_v53, %v6269_v11 }
 0xabb   : > { %v6550_v36 = vsel %vm6270_vm4, 1.0, %v9940_v2 }
 0xabc   : > { %v6273_v46 = vadd.f32 %v6550_v36, %v6265_v39  ;;  %vm6278_vm5 = vcmp.lt.f32.partialorder %v6277_v48, %v6243_v38 }
 0xabd   : > { %v6551_v32 = vsel %vm6278_vm5, 1.0, %v9940_v2 }
 0xabe   : > { %v6281_v63 = vadd.f32 %v6551_v32, %v6273_v46 }
 0xac0   : > { %v7385_v29 = vtrunc.f32 %v6281_v63 }
 0xac2   : > { %v7386_v21 = vcvt.f32.s32 %v7385_v29 }
 0xac4   : > { %6284 = vperm.xlu1 %7444, %v7386_v21  }
 0xac8   : > { %7445 = vset.pattern.permute.xlu1 %v7595_v56 }
 0xac9   : > { %6294 = vperm.xlu1 %7445, %v7567_v45  }
 0xacd   : > { %7446 = vset.pattern.permute.xlu1 %v9942_v16 }
 0xace   : > { %6301 = vperm.xlu1 %7446, %v6281_v63  }
 0xb43   : > { %v6285_v10 = vpop.permute.xlu1 %6284 }
 0xb44   : > { %vm6286_vm6 = vcmp.eq.s32.totalorder %v9756_v27, %v6285_v10 }
 0xb45   : > { %v6287_v2 = vsel %vm6286_vm6, %v6242_v49, 0.0 }
 0xb46   : > { %v6288_v51 = vsel %vm6228_vm0, %v6287_v2, 0.0 }
 0xb47   : > { %6289 = vadd.xlane.f32.xlu0 %v6288_v51 }
 0xb48   : > { %v6295_v62 = vpop.permute.xlu1 %6294 }
 0xb49   : > { %v6297_v25 = vsel %vm6291_vm8, %v6295_v62, 0.0 }
 0xb4d   : > { %v6302_v23 = vpop.permute.xlu1 %6301 }
 0xb4e   : > { %v6304_v16 = vsel %vm6298_vm7, %v6302_v23, 0.0 }
 0xb4f   : > { %v6305_v41 = vadd.f32 %v6304_v16, %v6297_v25 }
 0xbd4   : > { %v6290_v17 = vpop.xlane.xlu0 %6289 }
 0xbd5   : > { %v6307_v30 = vsel %vm6306_vm9, %v6290_v17, 0.0 }
 0xbd6   : > { %v6308_v58 = vadd.f32 %v6307_v30, %v6305_v41 }
 0xbd8   : > { %6309 = vst [vmem:[%s504_s26] sm:$0x1] %v6308_v58 }
 0xbd9 PF: > { %s25_s18 = sadd.s32 1, %s7576_s18  }
 0xbda   : > { %p22_p4 = scmp.ge.s32.totalorder %s25_s18, 4  }
 0xbdc   :  { %24 = sbr.rel (!%p22_p4) target bundleno = 1 (0x1), region = 113 }

</bundles_post_ra>
